<compile_context>
chip_gen: v7x
topology: tpu7x:2x2x1
jax: 0.10.0
libtpu: 0.0.40
codegen_flags: <defaults>
</compile_context>

<pallas_src>
import functools

import numpy as np
import jax
import jax.numpy as jnp
from jax.experimental import pallas as pl
from jax.experimental.pallas import tpu as pltpu


CHANNELS = [64, 128, 320, 512]   # mit_b2 channel pyramid (default encoder_name)
PATCHES = [4, 2, 2, 2]           # overall strides 4, 8, 16, 32
EMBED_DIM = 512
N_CLASS = 3
HEAD_PAD = 128                   # pad the 3/6-class head lanes to a full 128-lane group
N_TAPS = 9                       # 3x3 voting conv taps
VMEM_LIMIT_BYTES = 32 * 1024 * 1024   # explicit, safe on v5e/v6e/v7x


def _ceil_to(n, m):
    return ((n + m - 1) // m) * m


# ----------------------------------------------------------------------------
# Kernel 1: batched fused matmul  out[g] = act(x[g] @ w[g] + b[g])
# (used for the two-branch patch-embed pyramid; bf16 operands, f32 accumulate)
# ----------------------------------------------------------------------------
def _bmm_kernel(x_ref, w_ref, b_ref, o_ref, *, activation):
    acc = jnp.dot(x_ref[0], w_ref[0], preferred_element_type=jnp.float32)
    acc = acc + b_ref[0]
    if activation == "gelu":
        acc = jax.nn.gelu(acc)
    elif activation == "relu":
        acc = jnp.maximum(acc, 0.0)
    o_ref[0] = acc.astype(o_ref.dtype)


def pallas_bmm_bias(x, w, b, activation="none", out_dtype=jnp.float32, tm_max=256):
    """x: [G, M, K], w: [G, K, N], b: [G, 1, N] -> [G, M, N] (out_dtype).

    Grid is (G, M/tm); both axes are 'parallel' so megacore / 2-TC chips can split
    the work and the BlockSpec pipeline overlaps DMA with MXU work when grid > 1.
    """
    G, M, K = x.shape
    _, K2, N = w.shape
    assert K == K2 and w.shape[0] == G and b.shape == (G, 1, N)
    if M <= tm_max:
        tm = _ceil_to(M, 8)          # sublane-aligned block; tiny pad only when needed
    else:
        tm = tm_max                  # 256: fine for v5e 128^2 and v6e/v7x 256^2 MXUs
    Mp = _ceil_to(M, tm)
    if Mp != M:
        x = jnp.pad(x, ((0, 0), (0, Mp - M), (0, 0)))
    out = pl.pallas_call(
        functools.partial(_bmm_kernel, activation=activation),
        out_shape=jax.ShapeDtypeStruct((G, Mp, N), out_dtype),
        grid=(G, Mp // tm),
        in_specs=[
            pl.BlockSpec((1, tm, K), lambda g, i: (g, i, 0)),
            pl.BlockSpec((1, K, N), lambda g, i: (g, 0, 0)),
            pl.BlockSpec((1, 1, N), lambda g, i: (g, 0, 0)),
        ],
        out_specs=pl.BlockSpec((1, tm, N), lambda g, i: (g, i, 0)),
        compiler_params=pltpu.CompilerParams(
            dimension_semantics=("parallel", "parallel"),
            vmem_limit_bytes=VMEM_LIMIT_BYTES),
    )(x, w, b)
    if Mp != M:
        out = out[:, :M]
    return out


# ----------------------------------------------------------------------------
# Kernel 2: fused SegFormer-style decoder + prediction heads (per branch, per batch)
#   acc  = sum_i  U_i @ (feat_i @ (proj_w_i @ fuse_w_i))        (U_i: bilinear-up to /4)
#   f    = relu(acc + folded_bias)                              (BN folds to identity)
#   out  = f @ head_w_padded + head_b_padded                    (lane-dense 128 output)
# ----------------------------------------------------------------------------
def _decoder_kernel(x0_ref, x1_ref, x2_ref, x3_ref,
                    w0_ref, w1_ref, w2_ref, w3_ref,
                    u1_ref, u2_ref, u3_ref,
                    bt_ref, hw_ref, hb_ref, o_ref):
    f32 = jnp.float32
    bf16 = jnp.bfloat16

    def m2(ref):
        v = ref[...]
        return v.reshape(v.shape[-2], v.shape[-1])

    acc = jnp.dot(m2(x0_ref), m2(w0_ref), preferred_element_type=f32)          # [n0, E]
    y1 = jnp.dot(m2(x1_ref), m2(w1_ref), preferred_element_type=f32).astype(bf16)
    acc = acc + jnp.dot(u1_ref[...], y1, preferred_element_type=f32)
    y2 = jnp.dot(m2(x2_ref), m2(w2_ref), preferred_element_type=f32).astype(bf16)
    acc = acc + jnp.dot(u2_ref[...], y2, preferred_element_type=f32)
    y3 = jnp.dot(m2(x3_ref), m2(w3_ref), preferred_element_type=f32).astype(bf16)
    acc = acc + jnp.dot(u3_ref[...], y3, preferred_element_type=f32)

    feat = jnp.maximum(acc + m2(bt_ref), 0.0).astype(bf16)                      # fuse+BN+ReLU
    out = jnp.dot(feat, m2(hw_ref), preferred_element_type=f32) + m2(hb_ref)    # heads
    o_ref[...] = out.reshape(o_ref.shape)


def decoder_fuse_heads(xs, ws, us, bt, hw, hb):
    """xs: per-scale token tensors [2, B, n_i, C_i] (bf16, n_i padded to mult of 8 for i>0)
       ws: folded [2, C_i, 512] weights (bf16); us: [n0, n_i] bilinear-up matrices (bf16)
       bt: [2, 1, 512] folded bias (f32); hw/hb: [2, 512, 128] bf16 / [2, 1, 128] f32."""
    G, B, n0, c0 = xs[0].shape
    n1, c1 = xs[1].shape[2], xs[1].shape[3]
    n2, c2 = xs[2].shape[2], xs[2].shape[3]
    n3, c3 = xs[3].shape[2], xs[3].shape[3]
    E = ws[0].shape[-1]
    HP = hw.shape[-1]
    # TODO(synk): for large images the /4 token axis (n0) would need its own grid axis;
    # at these sizes one block per (branch, batch) fits comfortably in VMEM.
    return pl.pallas_call(
        _decoder_kernel,
        out_shape=jax.ShapeDtypeStruct((G, B, n0, HP), jnp.float32),
        grid=(G, B),
        in_specs=[
            pl.BlockSpec((1, 1, n0, c0), lambda g, b: (g, b, 0, 0)),
            pl.BlockSpec((1, 1, n1, c1), lambda g, b: (g, b, 0, 0)),
            pl.BlockSpec((1, 1, n2, c2), lambda g, b: (g, b, 0, 0)),
            pl.BlockSpec((1, 1, n3, c3), lambda g, b: (g, b, 0, 0)),
            pl.BlockSpec((1, c0, E), lambda g, b: (g, 0, 0)),
            pl.BlockSpec((1, c1, E), lambda g, b: (g, 0, 0)),
            pl.BlockSpec((1, c2, E), lambda g, b: (g, 0, 0)),
            pl.BlockSpec((1, c3, E), lambda g, b: (g, 0, 0)),
            pl.BlockSpec((n0, n1), lambda g, b: (0, 0)),
            pl.BlockSpec((n0, n2), lambda g, b: (0, 0)),
            pl.BlockSpec((n0, n3), lambda g, b: (0, 0)),
            pl.BlockSpec((1, 1, E), lambda g, b: (g, 0, 0)),
            pl.BlockSpec((1, E, HP), lambda g, b: (g, 0, 0)),
            pl.BlockSpec((1, 1, HP), lambda g, b: (g, 0, 0)),
        ],
        out_specs=pl.BlockSpec((1, 1, n0, HP), lambda g, b: (g, b, 0, 0)),
        compiler_params=pltpu.CompilerParams(
            dimension_semantics=("parallel", "parallel"),
            vmem_limit_bytes=VMEM_LIMIT_BYTES),
    )(xs[0], xs[1], xs[2], xs[3], ws[0], ws[1], ws[2], ws[3],
      us[0], us[1], us[2], bt, hw, hb)


# ----------------------------------------------------------------------------
# Kernel 3: tail = fusion add + bilinear upsample to full res + 3x3 voting conv.
# The 9 conv taps use precomputed A_t = kron(shift_dy @ Uh, shift_dx @ Uw) so
#   final = sum_t A_t @ (fq @ vw_t) + vote_b
# This is restructured into TWO large MXU matmuls:
#   Z = fq @ [vw_0 | ... | vw_8]                 [n0, 9*128]   (contraction 128)
#   Y = stack_t Z[:, t]                          [9*n0, 128]   (sublane-aligned moves)
#   final = [A_0 | ... | A_8] @ Y + vote_b       (contraction 9*n0)
# a_up (center-tap kron) gives the plain bilinear upsample output.
# ----------------------------------------------------------------------------
def _tail_kernel(hr_ref, hd_ref, a_up_ref, a_cat_ref, vw_ref, vb_ref, up_ref, fin_ref):
    f32 = jnp.float32
    bf16 = jnp.bfloat16
    # lanes 0:3 = rgb_fusion (quarter res), lanes 3:6 = dep_fusion (quarter res)
    fq = (hr_ref[0] + hd_ref[0]).astype(bf16)                                  # [n0, 128]
    up_ref[0] = jnp.dot(a_up_ref[...], fq, preferred_element_type=f32)         # [HW, 128]
    z = jnp.dot(fq, vw_ref[...], preferred_element_type=f32).astype(bf16)      # [n0, 9*128]
    y = jnp.concatenate(
        [z[:, t * HEAD_PAD:(t + 1) * HEAD_PAD] for t in range(N_TAPS)], axis=0)  # [9*n0,128]
    fin_ref[0] = jnp.dot(a_cat_ref[...], y, preferred_element_type=f32) + vb_ref[...]


def tail_vote(hr, hd, a_up, a_cat, vw_cat, vb):
    B, n0, HP = hr.shape
    HW = a_up.shape[0]
    NC = a_cat.shape[1]            # 9 * n0
    return pl.pallas_call(
        _tail_kernel,
        out_shape=(jax.ShapeDtypeStruct((B, HW, HP), jnp.float32),
                   jax.ShapeDtypeStruct((B, HW, HP), jnp.float32)),
        grid=(B,),
        in_specs=[
            pl.BlockSpec((1, n0, HP), lambda b: (b, 0, 0)),
            pl.BlockSpec((1, n0, HP), lambda b: (b, 0, 0)),
            pl.BlockSpec((HW, n0), lambda b: (0, 0)),
            pl.BlockSpec((HW, NC), lambda b: (0, 0)),
            pl.BlockSpec((HP, N_TAPS * HP), lambda b: (0, 0)),
            pl.BlockSpec((1, HP), lambda b: (0, 0)),
        ],
        out_specs=(pl.BlockSpec((1, HW, HP), lambda b: (b, 0, 0)),
                   pl.BlockSpec((1, HW, HP), lambda b: (b, 0, 0))),
        compiler_params=pltpu.CompilerParams(
            dimension_semantics=("parallel",),
            vmem_limit_bytes=VMEM_LIMIT_BYTES),
    )(hr, hd, a_up, a_cat, vw_cat, vb)


# ----------------------------------------------------------------------------
# Static interpolation / shift matrices (numpy, built at trace time)
# ----------------------------------------------------------------------------
def _bilinear_matrix(in_size, out_size):
    """[out, in] matrix matching F.interpolate(mode='bilinear', align_corners=False)."""
    dst = np.arange(out_size, dtype=np.float64)
    src = np.clip((dst + 0.5) * (in_size / out_size) - 0.5, 0.0, in_size - 1)
    i0 = np.floor(src).astype(np.int64)
    i1 = np.minimum(i0 + 1, in_size - 1)
    frac = (src - i0).astype(np.float32)
    M = np.zeros((out_size, in_size), dtype=np.float32)
    M[np.arange(out_size), i0] += 1.0 - frac
    M[np.arange(out_size), i1] += frac
    return M


def _shift_matrix(n, d):
    """S @ x shifts rows: (S @ x)[i] = x[i + d] with zero fill (conv zero padding)."""
    S = np.zeros((n, n), dtype=np.float32)
    rows = np.arange(n)
    cols = rows + d
    ok = (cols >= 0) & (cols < n)
    S[rows[ok], cols[ok]] = 1.0
    return S


# ----------------------------------------------------------------------------
# Deterministic parameter construction (kaiming-normal, fan_in)
# ----------------------------------------------------------------------------
def make_params(key):
    keys = iter(jax.random.split(key, 64))
    nk = lambda: next(keys)

    def kaiming(shape, fan_in):
        return jax.random.normal(nk(), shape, jnp.float32) * np.sqrt(2.0 / fan_in)

    def backbone_branch():
        p, cin = {}, 3
        for i, (cout, patch) in enumerate(zip(CHANNELS, PATCHES)):
            fan_in = cin * patch * patch
            p[f"pe{i}_w"] = kaiming((fan_in, cout), fan_in)
            p[f"pe{i}_b"] = jnp.zeros((cout,), jnp.float32)
            cin = cout
        return p

    def decode_branch():
        p = {}
        for i, c in enumerate(CHANNELS):
            p[f"proj{i}_w"] = kaiming((c, EMBED_DIM), c)
            p[f"proj{i}_b"] = jnp.zeros((EMBED_DIM,), jnp.float32)
        p["fuse_w"] = kaiming((4 * EMBED_DIM, EMBED_DIM), 4 * EMBED_DIM)
        p["fuse_b"] = jnp.zeros((EMBED_DIM,), jnp.float32)
        return p

    heads = {}
    for name in ["rgb_pred", "rgb_comp", "dep_pred", "dep_comp"]:
        heads[name + "_w"] = kaiming((EMBED_DIM, N_CLASS), EMBED_DIM)
        heads[name + "_b"] = jnp.zeros((N_CLASS,), jnp.float32)

    return {
        "bb_rgb": backbone_branch(),
        "bb_dep": backbone_branch(),
        "dec_rgb": decode_branch(),
        "dec_dep": decode_branch(),
        "heads": heads,
        # voting conv weights stored as [tap(ky*3+kx), cin(=2*n_class), cout]
        # TODO(synk): real PyTorch Conv2d weights [Cout,Cin,kh,kw] must be permuted
        # to this layout before loading; only self-consistent with random params here.
        "vote_w": kaiming((N_TAPS, 2 * N_CLASS, N_CLASS), N_TAPS * 2 * N_CLASS),
        "vote_b": jnp.zeros((N_CLASS,), jnp.float32),
    }


# ----------------------------------------------------------------------------
# Forward pass (mirrors EncoderDecoder.forward / encode_decode)
# ----------------------------------------------------------------------------
def encoder_decoder_forward(params, x_nchw):
    x = jnp.transpose(x_nchw, (0, 2, 3, 1)).astype(jnp.float32)   # NCHW -> NHWC
    B, H, W, _ = x.shape

    # input split: rgb = input[:, :3]; modal_x = input[:, 3:] replicated to 3 channels
    rgb = x[..., :3]
    modal = x[..., 3:4]
    modal = jnp.concatenate([modal, modal, modal], axis=-1)

    # ---- backbone: dual-branch feature pyramid, both branches batched per stage ----
    # TODO(synk): exact dual_segformer mit_b2 (transformer blocks + cross-modal fuse)
    # source is not provided; this Pallas patch-embed pyramid only matches the
    # [64,128,320,512] feature shapes at /4../32.
    cur = jnp.stack([rgb, modal], axis=0).astype(jnp.bfloat16)    # [2, B, H, W, 3]
    feats, spat = [], []
    h, w = H, W
    for i, (cout, patch) in enumerate(zip(CHANNELS, PATCHES)):
        cin = cur.shape[-1]
        ho, wo = h // patch, w // patch
        cols = cur.reshape(2, B, ho, patch, wo, patch, cin)
        cols = jnp.transpose(cols, (0, 1, 2, 4, 3, 5, 6))
        cols = cols.reshape(2, B * ho * wo, patch * patch * cin)
        wst = jnp.stack([params["bb_rgb"][f"pe{i}_w"],
                         params["bb_dep"][f"pe{i}_w"]], axis=0).astype(jnp.bfloat16)
        bst = jnp.stack([params["bb_rgb"][f"pe{i}_b"],
                         params["bb_dep"][f"pe{i}_b"]], axis=0)[:, None, :]
        out = pallas_bmm_bias(cols, wst, bst, activation="gelu", out_dtype=jnp.bfloat16)
        feats.append(out.reshape(2, B, ho * wo, cout))
        cur = out.reshape(2, B, ho, wo, cout)
        spat.append((ho, wo))
        h, w = ho, wo

    h4, w4 = spat[0]
    n0 = h4 * w4

    # ---- decoder head (SegFormer-style all-MLP decoder, embed_dim=512), fully fused ----
    # proj_w_i @ fuse_w_i folded so the 2048-channel concat never exists; BN folds to
    # identity at init/eval running stats.
    def fold_branch(dec):
        ws_f, bt = [], dec["fuse_b"]
        for i in range(4):
            fw_i = dec["fuse_w"][i * EMBED_DIM:(i + 1) * EMBED_DIM]
            ws_f.append(jnp.dot(dec[f"proj{i}_w"], fw_i))
            bt = bt + jnp.dot(dec[f"proj{i}_b"], fw_i)
        return ws_f, bt

    ws_r, bt_r = fold_branch(params["dec_rgb"])
    ws_d, bt_d = fold_branch(params["dec_dep"])
    w_st = [jnp.stack([ws_r[i], ws_d[i]], axis=0).astype(jnp.bfloat16) for i in range(4)]
    bt_st = jnp.stack([bt_r, bt_d], axis=0)[:, None, :].astype(jnp.float32)   # [2,1,512]

    # per-scale bilinear-up-to-/4 matrices (kron of 1-D interps); token axes of the
    # smaller scales are zero-padded to a multiple of 8 sublanes.  bf16 is lossless for
    # these dyadic-fraction coefficients and keeps the MXU operands narrow.
    xs, us = [feats[0]], []
    for i in range(1, 4):
        hi, wi = spat[i]
        ni, nip = hi * wi, _ceil_to(hi * wi, 8)
        xi = feats[i]
        if nip != ni:
            xi = jnp.pad(xi, ((0, 0), (0, 0), (0, nip - ni), (0, 0)))
        xs.append(xi)
        Ui = np.kron(_bilinear_matrix(hi, h4), _bilinear_matrix(wi, w4))   # [n0, ni]
        if nip != ni:
            Ui = np.pad(Ui, ((0, 0), (0, nip - ni)))
        us.append(jnp.asarray(Ui, jnp.bfloat16))

    # per-branch heads packed into one lane-dense [512, 128] weight:
    #   rgb branch (f_rgb): lanes 0:3 = rgb_predict, 3:6 = depth_comple
    #   dep branch (f_dep): lanes 0:3 = rgb_comple,  3:6 = depth_predict
    # so (rgb_out + dep_out) lanes 0:3 / 3:6 are rgb_fusion / depth_fusion directly.
    hd = params["heads"]

    def head_pack(wa, ba, wb, bb):
        wp = jnp.zeros((EMBED_DIM, HEAD_PAD), jnp.float32)
        wp = wp.at[:, 0:N_CLASS].set(wa).at[:, N_CLASS:2 * N_CLASS].set(wb)
        bp = jnp.zeros((HEAD_PAD,), jnp.float32)
        bp = bp.at[0:N_CLASS].set(ba).at[N_CLASS:2 * N_CLASS].set(bb)
        return wp, bp

    hw_r, hb_r = head_pack(hd["rgb_pred_w"], hd["rgb_pred_b"],
                           hd["dep_comp_w"], hd["dep_comp_b"])
    hw_d, hb_d = head_pack(hd["rgb_comp_w"], hd["rgb_comp_b"],
                           hd["dep_pred_w"], hd["dep_pred_b"])
    hw_st = jnp.stack([hw_r, hw_d], axis=0).astype(jnp.bfloat16)   # [2, 512, 128]
    hb_st = jnp.stack([hb_r, hb_d], axis=0)[:, None, :]            # [2, 1, 128]

    heads_out = decoder_fuse_heads(xs, w_st, us, bt_st, hw_st, hb_st)  # [2,B,n0,128] f32

    # ---- encode_decode tail: upsample fusions to (H, W) + 3x3 voting conv ----
    Uh = _bilinear_matrix(h4, H)                              # [H, h4]
    Uw = _bilinear_matrix(w4, W)                              # [W, w4]
    a_list = [np.kron(_shift_matrix(H, ky - 1) @ Uh, _shift_matrix(W, kx - 1) @ Uw)
              for ky in range(3) for kx in range(3)]          # 9 x [H*W, n0]
    a_up = jnp.asarray(np.kron(Uh, Uw), jnp.bfloat16)         # plain bilinear upsample
    a_cat = jnp.asarray(np.concatenate(a_list, axis=1), jnp.bfloat16)   # [H*W, 9*n0]

    vw_cat = jnp.zeros((HEAD_PAD, N_TAPS * HEAD_PAD), jnp.float32)
    for t in range(N_TAPS):
        vw_cat = vw_cat.at[0:2 * N_CLASS,
                           t * HEAD_PAD:t * HEAD_PAD + N_CLASS].set(params["vote_w"][t])
    vw_cat = vw_cat.astype(jnp.bfloat16)
    vb = jnp.zeros((1, HEAD_PAD), jnp.float32).at[0, 0:N_CLASS].set(params["vote_b"])

    fusion_up, final = tail_vote(heads_out[0], heads_out[1], a_up, a_cat, vw_cat, vb)

    # ---- slice padded class lanes once, reshape to NCHW ----
    def nchw(t, hh, ww):
        return jnp.transpose(t.reshape(B, hh, ww, N_CLASS), (0, 3, 1, 2))

    rgb_predict = nchw(heads_out[0][..., 0:N_CLASS], h4, w4)
    dep_comple = nchw(heads_out[0][..., N_CLASS:2 * N_CLASS], h4, w4)
    rgb_comple = nchw(heads_out[1][..., 0:N_CLASS], h4, w4)
    dep_predict = nchw(heads_out[1][..., N_CLASS:2 * N_CLASS], h4, w4)
    rgb_fusion = nchw(fusion_up[..., 0:N_CLASS], H, W)
    dep_fusion = nchw(fusion_up[..., N_CLASS:2 * N_CLASS], H, W)
    final_o = nchw(final[..., 0:N_CLASS], H, W)

    return (rgb_predict, rgb_comple, rgb_fusion,
            dep_predict, dep_comple, dep_fusion, final_o)


# ----------------------------------------------------------------------------
if __name__ == "__main__":
    key = jax.random.PRNGKey(0)
    pkey, xkey = jax.random.split(key)

    B, C_IN, H, W = 2, 4, 32, 32          # NCHW input; H, W multiples of 32 (stride-32 pyramid)
    params = make_params(pkey)
    x = jax.random.normal(xkey, (B, C_IN, H, W), jnp.float32)

    fwd = jax.jit(encoder_decoder_forward)
    outs = fwd(params, x)
    outs = jax.block_until_ready(outs)

    # sanity: shapes match the reference semantics
    assert outs[0].shape == (B, N_CLASS, H // 4, W // 4)   # rgb_predict
    assert outs[2].shape == (B, N_CLASS, H, W)             # rgb_fusion (upsampled)
    assert outs[6].shape == (B, N_CLASS, H, W)             # final (voting conv)
    assert all(bool(jnp.all(jnp.isfinite(o))) for o in outs)

    print("KERNEL_OK")
</pallas_src>

<mosaic_0001>
module attributes {stable_mosaic.version = 11 : i64} {
  func.func @_bmm_kernel(%arg0: i32, %arg1: i32, %arg2: memref<1x128x48xbf16, #tpu.memory_space<vmem>>, %arg3: memref<1x48x64xbf16, #tpu.memory_space<vmem>>, %arg4: memref<1x1x64xf32, #tpu.memory_space<vmem>>, %arg5: memref<1x128x64xbf16, #tpu.memory_space<vmem>>) attributes {dimension_semantics = [#tpu.dimension_semantics<parallel>, #tpu.dimension_semantics<parallel>], iteration_bounds = array<i64: 2, 1>, scalar_prefetch = 0 : i64, scratch_operands = 0 : i64, tpu.core_type = #tpu.core_type<tc>, window_params = [{transform_indices = @transform_0, window_bounds = array<i64: 1, 128, 48>}, {transform_indices = @transform_1, window_bounds = array<i64: 1, 48, 64>}, {transform_indices = @transform_2, window_bounds = array<i64: 1, 1, 64>}, {transform_indices = @transform_3, window_bounds = array<i64: 1, 128, 64>}]} {
    %c0 = arith.constant 0 : index
    %c0_0 = arith.constant 0 : index
    %c0_1 = arith.constant 0 : index
    %0 = vector.load %arg2[%c0, %c0_0, %c0_1] : memref<1x128x48xbf16, #tpu.memory_space<vmem>>, vector<1x128x48xbf16>
    %1 = vector.shape_cast %0 : vector<1x128x48xbf16> to vector<128x48xbf16>
    %c0_2 = arith.constant 0 : index
    %c0_3 = arith.constant 0 : index
    %c0_4 = arith.constant 0 : index
    %2 = vector.load %arg3[%c0_2, %c0_3, %c0_4] : memref<1x48x64xbf16, #tpu.memory_space<vmem>>, vector<1x48x64xbf16>
    %3 = vector.shape_cast %2 : vector<1x48x64xbf16> to vector<48x64xbf16>
    %cst = arith.constant dense<0.000000e+00> : vector<128x64xf32>
    %4 = tpu.matmul %1, %3, %cst {dimension_numbers = #tpu.dot_dimension_numbers<[1], [0], [0], [1], [0, 0, 1, 1], [], []>} : vector<128x48xbf16>, vector<48x64xbf16>, vector<128x64xf32> -> vector<128x64xf32>
    %c0_5 = arith.constant 0 : index
    %c0_6 = arith.constant 0 : index
    %c0_7 = arith.constant 0 : index
    %5 = vector.load %arg4[%c0_5, %c0_6, %c0_7] : memref<1x1x64xf32, #tpu.memory_space<vmem>>, vector<1x1x64xf32>
    %6 = vector.shape_cast %5 : vector<1x1x64xf32> to vector<1x64xf32>
    %7 = vector.broadcast %6 : vector<1x64xf32> to vector<128x64xf32>
    %8 = arith.addf %4, %7 : vector<128x64xf32>
    %9 = arith.mulf %8, %8 : vector<128x64xf32>
    %10 = arith.mulf %8, %9 : vector<128x64xf32>
    %cst_8 = arith.constant 4.471500e-02 : f32
    %11 = vector.broadcast %cst_8 : f32 to vector<128x64xf32>
    %12 = arith.mulf %11, %10 : vector<128x64xf32>
    %13 = arith.addf %8, %12 : vector<128x64xf32>
    %cst_9 = arith.constant 0.797884583 : f32
    %14 = vector.broadcast %cst_9 : f32 to vector<128x64xf32>
    %15 = arith.mulf %14, %13 : vector<128x64xf32>
    %16 = math.tanh %15 : vector<128x64xf32>
    %cst_10 = arith.constant 1.000000e+00 : f32
    %17 = vector.broadcast %cst_10 : f32 to vector<128x64xf32>
    %18 = arith.addf %17, %16 : vector<128x64xf32>
    %cst_11 = arith.constant 5.000000e-01 : f32
    %19 = vector.broadcast %cst_11 : f32 to vector<128x64xf32>
    %20 = arith.mulf %19, %18 : vector<128x64xf32>
    %21 = arith.mulf %8, %20 : vector<128x64xf32>
    %22 = arith.truncf %21 : vector<128x64xf32> to vector<128x64xbf16>
    %c0_12 = arith.constant 0 : index
    %c0_13 = arith.constant 0 : index
    %c0_14 = arith.constant 0 : index
    %23 = vector.load %arg5[%c0_12, %c0_13, %c0_14] : memref<1x128x64xbf16, #tpu.memory_space<vmem>>, vector<1x128x64xbf16>
    %24 = vector.shape_cast %23 : vector<1x128x64xbf16> to vector<128x64xbf16>
    %25 = vector.shape_cast %22 : vector<128x64xbf16> to vector<1x128x64xbf16>
    tpu.vector_store %arg5[%c0_12, %c0_13, %c0_14], %25 {strides = array<i32>} : memref<1x128x64xbf16, #tpu.memory_space<vmem>>, vector<1x128x64xbf16>,
    return
  }
  func.func @transform_0(%arg0: i32, %arg1: i32) -> (i32, i32, i32) {
    %c0_i32 = arith.constant 0 : i32
    %c0_i32_0 = arith.constant 0 : i32
    return %arg0, %arg1, %c0_i32 : i32, i32, i32
  }
  func.func @transform_1(%arg0: i32, %arg1: i32) -> (i32, i32, i32) {
    %c0_i32 = arith.constant 0 : i32
    %c0_i32_0 = arith.constant 0 : i32
    %c0_i32_1 = arith.constant 0 : i32
    return %arg0, %c0_i32, %c0_i32_0 : i32, i32, i32
  }
  func.func @transform_2(%arg0: i32, %arg1: i32) -> (i32, i32, i32) {
    %c0_i32 = arith.constant 0 : i32
    %c0_i32_0 = arith.constant 0 : i32
    %c0_i32_1 = arith.constant 0 : i32
    return %arg0, %c0_i32, %c0_i32_0 : i32, i32, i32
  }
  func.func @transform_3(%arg0: i32, %arg1: i32) -> (i32, i32, i32) {
    %c0_i32 = arith.constant 0 : i32
    %c0_i32_0 = arith.constant 0 : i32
    return %arg0, %arg1, %c0_i32 : i32, i32, i32
  }
}

module attributes {stable_mosaic.version = 11 : i64} {
  func.func @_bmm_kernel(%arg0: i32, %arg1: i32, %arg2: memref<1x32x256xbf16, #tpu.memory_space<vmem>>, %arg3: memref<1x256x128xbf16, #tpu.memory_space<vmem>>, %arg4: memref<1x1x128xf32, #tpu.memory_space<vmem>>, %arg5: memref<1x32x128xbf16, #tpu.memory_space<vmem>>) attributes {dimension_semantics = [#tpu.dimension_semantics<parallel>, #tpu.dimension_semantics<parallel>], iteration_bounds = array<i64: 2, 1>, scalar_prefetch = 0 : i64, scratch_operands = 0 : i64, tpu.core_type = #tpu.core_type<tc>, window_params = [{transform_indices = @transform_0, window_bounds = array<i64: 1, 32, 256>}, {transform_indices = @transform_1, window_bounds = array<i64: 1, 256, 128>}, {transform_indices = @transform_2, window_bounds = array<i64: 1, 1, 128>}, {transform_indices = @transform_3, window_bounds = array<i64: 1, 32, 128>}]} {
    %c0 = arith.constant 0 : index
    %c0_0 = arith.constant 0 : index
    %c0_1 = arith.constant 0 : index
    %0 = vector.load %arg2[%c0, %c0_0, %c0_1] : memref<1x32x256xbf16, #tpu.memory_space<vmem>>, vector<1x32x256xbf16>
    %1 = vector.shape_cast %0 : vector<1x32x256xbf16> to vector<32x256xbf16>
    %c0_2 = arith.constant 0 : index
    %c0_3 = arith.constant 0 : index
    %c0_4 = arith.constant 0 : index
    %2 = vector.load %arg3[%c0_2, %c0_3, %c0_4] : memref<1x256x128xbf16, #tpu.memory_space<vmem>>, vector<1x256x128xbf16>
    %3 = vector.shape_cast %2 : vector<1x256x128xbf16> to vector<256x128xbf16>
    %cst = arith.constant dense<0.000000e+00> : vector<32x128xf32>
    %4 = tpu.matmul %1, %3, %cst {dimension_numbers = #tpu.dot_dimension_numbers<[1], [0], [0], [1], [0, 0, 1, 1], [], []>} : vector<32x256xbf16>, vector<256x128xbf16>, vector<32x128xf32> -> vector<32x128xf32>
    %c0_5 = arith.constant 0 : index
    %c0_6 = arith.constant 0 : index
    %c0_7 = arith.constant 0 : index
    %5 = vector.load %arg4[%c0_5, %c0_6, %c0_7] : memref<1x1x128xf32, #tpu.memory_space<vmem>>, vector<1x1x128xf32>
    %6 = vector.shape_cast %5 : vector<1x1x128xf32> to vector<1x128xf32>
    %7 = vector.broadcast %6 : vector<1x128xf32> to vector<32x128xf32>
    %8 = arith.addf %4, %7 : vector<32x128xf32>
    %9 = arith.mulf %8, %8 : vector<32x128xf32>
    %10 = arith.mulf %8, %9 : vector<32x128xf32>
    %cst_8 = arith.constant 4.471500e-02 : f32
    %11 = vector.broadcast %cst_8 : f32 to vector<32x128xf32>
    %12 = arith.mulf %11, %10 : vector<32x128xf32>
    %13 = arith.addf %8, %12 : vector<32x128xf32>
    %cst_9 = arith.constant 0.797884583 : f32
    %14 = vector.broadcast %cst_9 : f32 to vector<32x128xf32>
    %15 = arith.mulf %14, %13 : vector<32x128xf32>
    %16 = math.tanh %15 : vector<32x128xf32>
    %cst_10 = arith.constant 1.000000e+00 : f32
    %17 = vector.broadcast %cst_10 : f32 to vector<32x128xf32>
    %18 = arith.addf %17, %16 : vector<32x128xf32>
    %cst_11 = arith.constant 5.000000e-01 : f32
    %19 = vector.broadcast %cst_11 : f32 to vector<32x128xf32>
    %20 = arith.mulf %19, %18 : vector<32x128xf32>
    %21 = arith.mulf %8, %20 : vector<32x128xf32>
    %22 = arith.truncf %21 : vector<32x128xf32> to vector<32x128xbf16>
    %c0_12 = arith.constant 0 : index
    %c0_13 = arith.constant 0 : index
    %c0_14 = arith.constant 0 : index
    %23 = vector.load %arg5[%c0_12, %c0_13, %c0_14] : memref<1x32x128xbf16, #tpu.memory_space<vmem>>, vector<1x32x128xbf16>
    %24 = vector.shape_cast %23 : vector<1x32x128xbf16> to vector<32x128xbf16>
    %25 = vector.shape_cast %22 : vector<32x128xbf16> to vector<1x32x128xbf16>
    tpu.vector_store %arg5[%c0_12, %c0_13, %c0_14], %25 {strides = array<i32>} : memref<1x32x128xbf16, #tpu.memory_space<vmem>>, vector<1x32x128xbf16>,
    return
  }
  func.func @transform_0(%arg0: i32, %arg1: i32) -> (i32, i32, i32) {
    %c0_i32 = arith.constant 0 : i32
    %c0_i32_0 = arith.constant 0 : i32
    return %arg0, %arg1, %c0_i32 : i32, i32, i32
  }
  func.func @transform_1(%arg0: i32, %arg1: i32) -> (i32, i32, i32) {
    %c0_i32 = arith.constant 0 : i32
    %c0_i32_0 = arith.constant 0 : i32
    %c0_i32_1 = arith.constant 0 : i32
    return %arg0, %c0_i32, %c0_i32_0 : i32, i32, i32
  }
  func.func @transform_2(%arg0: i32, %arg1: i32) -> (i32, i32, i32) {
    %c0_i32 = arith.constant 0 : i32
    %c0_i32_0 = arith.constant 0 : i32
    %c0_i32_1 = arith.constant 0 : i32
    return %arg0, %c0_i32, %c0_i32_0 : i32, i32, i32
  }
  func.func @transform_3(%arg0: i32, %arg1: i32) -> (i32, i32, i32) {
    %c0_i32 = arith.constant 0 : i32
    %c0_i32_0 = arith.constant 0 : i32
    return %arg0, %arg1, %c0_i32 : i32, i32, i32
  }
}

module attributes {stable_mosaic.version = 11 : i64} {
  func.func @_bmm_kernel(%arg0: i32, %arg1: i32, %arg2: memref<1x8x512xbf16, #tpu.memory_space<vmem>>, %arg3: memref<1x512x320xbf16, #tpu.memory_space<vmem>>, %arg4: memref<1x1x320xf32, #tpu.memory_space<vmem>>, %arg5: memref<1x8x320xbf16, #tpu.memory_space<vmem>>) attributes {dimension_semantics = [#tpu.dimension_semantics<parallel>, #tpu.dimension_semantics<parallel>], iteration_bounds = array<i64: 2, 1>, scalar_prefetch = 0 : i64, scratch_operands = 0 : i64, tpu.core_type = #tpu.core_type<tc>, window_params = [{transform_indices = @transform_0, window_bounds = array<i64: 1, 8, 512>}, {transform_indices = @transform_1, window_bounds = array<i64: 1, 512, 320>}, {transform_indices = @transform_2, window_bounds = array<i64: 1, 1, 320>}, {transform_indices = @transform_3, window_bounds = array<i64: 1, 8, 320>}]} {
    %c0 = arith.constant 0 : index
    %c0_0 = arith.constant 0 : index
    %c0_1 = arith.constant 0 : index
    %0 = vector.load %arg2[%c0, %c0_0, %c0_1] : memref<1x8x512xbf16, #tpu.memory_space<vmem>>, vector<1x8x512xbf16>
    %1 = vector.shape_cast %0 : vector<1x8x512xbf16> to vector<8x512xbf16>
    %c0_2 = arith.constant 0 : index
    %c0_3 = arith.constant 0 : index
    %c0_4 = arith.constant 0 : index
    %2 = vector.load %arg3[%c0_2, %c0_3, %c0_4] : memref<1x512x320xbf16, #tpu.memory_space<vmem>>, vector<1x512x320xbf16>
    %3 = vector.shape_cast %2 : vector<1x512x320xbf16> to vector<512x320xbf16>
    %cst = arith.constant dense<0.000000e+00> : vector<8x320xf32>
    %4 = tpu.matmul %1, %3, %cst {dimension_numbers = #tpu.dot_dimension_numbers<[1], [0], [0], [1], [0, 0, 1, 1], [], []>} : vector<8x512xbf16>, vector<512x320xbf16>, vector<8x320xf32> -> vector<8x320xf32>
    %c0_5 = arith.constant 0 : index
    %c0_6 = arith.constant 0 : index
    %c0_7 = arith.constant 0 : index
    %5 = vector.load %arg4[%c0_5, %c0_6, %c0_7] : memref<1x1x320xf32, #tpu.memory_space<vmem>>, vector<1x1x320xf32>
    %6 = vector.shape_cast %5 : vector<1x1x320xf32> to vector<1x320xf32>
    %7 = vector.broadcast %6 : vector<1x320xf32> to vector<8x320xf32>
    %8 = arith.addf %4, %7 : vector<8x320xf32>
    %9 = arith.mulf %8, %8 : vector<8x320xf32>
    %10 = arith.mulf %8, %9 : vector<8x320xf32>
    %cst_8 = arith.constant 4.471500e-02 : f32
    %11 = vector.broadcast %cst_8 : f32 to vector<8x320xf32>
    %12 = arith.mulf %11, %10 : vector<8x320xf32>
    %13 = arith.addf %8, %12 : vector<8x320xf32>
    %cst_9 = arith.constant 0.797884583 : f32
    %14 = vector.broadcast %cst_9 : f32 to vector<8x320xf32>
    %15 = arith.mulf %14, %13 : vector<8x320xf32>
    %16 = math.tanh %15 : vector<8x320xf32>
    %cst_10 = arith.constant 1.000000e+00 : f32
    %17 = vector.broadcast %cst_10 : f32 to vector<8x320xf32>
    %18 = arith.addf %17, %16 : vector<8x320xf32>
    %cst_11 = arith.constant 5.000000e-01 : f32
    %19 = vector.broadcast %cst_11 : f32 to vector<8x320xf32>
    %20 = arith.mulf %19, %18 : vector<8x320xf32>
    %21 = arith.mulf %8, %20 : vector<8x320xf32>
    %22 = arith.truncf %21 : vector<8x320xf32> to vector<8x320xbf16>
    %c0_12 = arith.constant 0 : index
    %c0_13 = arith.constant 0 : index
    %c0_14 = arith.constant 0 : index
    %23 = vector.load %arg5[%c0_12, %c0_13, %c0_14] : memref<1x8x320xbf16, #tpu.memory_space<vmem>>, vector<1x8x320xbf16>
    %24 = vector.shape_cast %23 : vector<1x8x320xbf16> to vector<8x320xbf16>
    %25 = vector.shape_cast %22 : vector<8x320xbf16> to vector<1x8x320xbf16>
    tpu.vector_store %arg5[%c0_12, %c0_13, %c0_14], %25 {strides = array<i32>} : memref<1x8x320xbf16, #tpu.memory_space<vmem>>, vector<1x8x320xbf16>,
    return
  }
  func.func @transform_0(%arg0: i32, %arg1: i32) -> (i32, i32, i32) {
    %c0_i32 = arith.constant 0 : i32
    %c0_i32_0 = arith.constant 0 : i32
    return %arg0, %arg1, %c0_i32 : i32, i32, i32
  }
  func.func @transform_1(%arg0: i32, %arg1: i32) -> (i32, i32, i32) {
    %c0_i32 = arith.constant 0 : i32
    %c0_i32_0 = arith.constant 0 : i32
    %c0_i32_1 = arith.constant 0 : i32
    return %arg0, %c0_i32, %c0_i32_0 : i32, i32, i32
  }
  func.func @transform_2(%arg0: i32, %arg1: i32) -> (i32, i32, i32) {
    %c0_i32 = arith.constant 0 : i32
    %c0_i32_0 = arith.constant 0 : i32
    %c0_i32_1 = arith.constant 0 : i32
    return %arg0, %c0_i32, %c0_i32_0 : i32, i32, i32
  }
  func.func @transform_3(%arg0: i32, %arg1: i32) -> (i32, i32, i32) {
    %c0_i32 = arith.constant 0 : i32
    %c0_i32_0 = arith.constant 0 : i32
    return %arg0, %arg1, %c0_i32 : i32, i32, i32
  }
}

module attributes {stable_mosaic.version = 11 : i64} {
  func.func @_bmm_kernel(%arg0: i32, %arg1: i32, %arg2: memref<1x8x1280xbf16, #tpu.memory_space<vmem>>, %arg3: memref<1x1280x512xbf16, #tpu.memory_space<vmem>>, %arg4: memref<1x1x512xf32, #tpu.memory_space<vmem>>, %arg5: memref<1x8x512xbf16, #tpu.memory_space<vmem>>) attributes {dimension_semantics = [#tpu.dimension_semantics<parallel>, #tpu.dimension_semantics<parallel>], iteration_bounds = array<i64: 2, 1>, scalar_prefetch = 0 : i64, scratch_operands = 0 : i64, tpu.core_type = #tpu.core_type<tc>, window_params = [{transform_indices = @transform_0, window_bounds = array<i64: 1, 8, 1280>}, {transform_indices = @transform_1, window_bounds = array<i64: 1, 1280, 512>}, {transform_indices = @transform_2, window_bounds = array<i64: 1, 1, 512>}, {transform_indices = @transform_3, window_bounds = array<i64: 1, 8, 512>}]} {
    %c0 = arith.constant 0 : index
    %c0_0 = arith.constant 0 : index
    %c0_1 = arith.constant 0 : index
    %0 = vector.load %arg2[%c0, %c0_0, %c0_1] : memref<1x8x1280xbf16, #tpu.memory_space<vmem>>, vector<1x8x1280xbf16>
    %1 = vector.shape_cast %0 : vector<1x8x1280xbf16> to vector<8x1280xbf16>
    %c0_2 = arith.constant 0 : index
    %c0_3 = arith.constant 0 : index
    %c0_4 = arith.constant 0 : index
    %2 = vector.load %arg3[%c0_2, %c0_3, %c0_4] : memref<1x1280x512xbf16, #tpu.memory_space<vmem>>, vector<1x1280x512xbf16>
    %3 = vector.shape_cast %2 : vector<1x1280x512xbf16> to vector<1280x512xbf16>
    %cst = arith.constant dense<0.000000e+00> : vector<8x512xf32>
    %4 = tpu.matmul %1, %3, %cst {dimension_numbers = #tpu.dot_dimension_numbers<[1], [0], [0], [1], [0, 0, 1, 1], [], []>} : vector<8x1280xbf16>, vector<1280x512xbf16>, vector<8x512xf32> -> vector<8x512xf32>
    %c0_5 = arith.constant 0 : index
    %c0_6 = arith.constant 0 : index
    %c0_7 = arith.constant 0 : index
    %5 = vector.load %arg4[%c0_5, %c0_6, %c0_7] : memref<1x1x512xf32, #tpu.memory_space<vmem>>, vector<1x1x512xf32>
    %6 = vector.shape_cast %5 : vector<1x1x512xf32> to vector<1x512xf32>
    %7 = vector.broadcast %6 : vector<1x512xf32> to vector<8x512xf32>
    %8 = arith.addf %4, %7 : vector<8x512xf32>
    %9 = arith.mulf %8, %8 : vector<8x512xf32>
    %10 = arith.mulf %8, %9 : vector<8x512xf32>
    %cst_8 = arith.constant 4.471500e-02 : f32
    %11 = vector.broadcast %cst_8 : f32 to vector<8x512xf32>
    %12 = arith.mulf %11, %10 : vector<8x512xf32>
    %13 = arith.addf %8, %12 : vector<8x512xf32>
    %cst_9 = arith.constant 0.797884583 : f32
    %14 = vector.broadcast %cst_9 : f32 to vector<8x512xf32>
    %15 = arith.mulf %14, %13 : vector<8x512xf32>
    %16 = math.tanh %15 : vector<8x512xf32>
    %cst_10 = arith.constant 1.000000e+00 : f32
    %17 = vector.broadcast %cst_10 : f32 to vector<8x512xf32>
    %18 = arith.addf %17, %16 : vector<8x512xf32>
    %cst_11 = arith.constant 5.000000e-01 : f32
    %19 = vector.broadcast %cst_11 : f32 to vector<8x512xf32>
    %20 = arith.mulf %19, %18 : vector<8x512xf32>
    %21 = arith.mulf %8, %20 : vector<8x512xf32>
    %22 = arith.truncf %21 : vector<8x512xf32> to vector<8x512xbf16>
    %c0_12 = arith.constant 0 : index
    %c0_13 = arith.constant 0 : index
    %c0_14 = arith.constant 0 : index
    %23 = vector.load %arg5[%c0_12, %c0_13, %c0_14] : memref<1x8x512xbf16, #tpu.memory_space<vmem>>, vector<1x8x512xbf16>
    %24 = vector.shape_cast %23 : vector<1x8x512xbf16> to vector<8x512xbf16>
    %25 = vector.shape_cast %22 : vector<8x512xbf16> to vector<1x8x512xbf16>
    tpu.vector_store %arg5[%c0_12, %c0_13, %c0_14], %25 {strides = array<i32>} : memref<1x8x512xbf16, #tpu.memory_space<vmem>>, vector<1x8x512xbf16>,
    return
  }
  func.func @transform_0(%arg0: i32, %arg1: i32) -> (i32, i32, i32) {
    %c0_i32 = arith.constant 0 : i32
    %c0_i32_0 = arith.constant 0 : i32
    return %arg0, %arg1, %c0_i32 : i32, i32, i32
  }
  func.func @transform_1(%arg0: i32, %arg1: i32) -> (i32, i32, i32) {
    %c0_i32 = arith.constant 0 : i32
    %c0_i32_0 = arith.constant 0 : i32
    %c0_i32_1 = arith.constant 0 : i32
    return %arg0, %c0_i32, %c0_i32_0 : i32, i32, i32
  }
  func.func @transform_2(%arg0: i32, %arg1: i32) -> (i32, i32, i32) {
    %c0_i32 = arith.constant 0 : i32
    %c0_i32_0 = arith.constant 0 : i32
    %c0_i32_1 = arith.constant 0 : i32
    return %arg0, %c0_i32, %c0_i32_0 : i32, i32, i32
  }
  func.func @transform_3(%arg0: i32, %arg1: i32) -> (i32, i32, i32) {
    %c0_i32 = arith.constant 0 : i32
    %c0_i32_0 = arith.constant 0 : i32
    return %arg0, %arg1, %c0_i32 : i32, i32, i32
  }
}

module attributes {stable_mosaic.version = 11 : i64} {
  func.func @_decoder_kernel(%arg0: i32, %arg1: i32, %arg2: memref<1x1x64x64xbf16, #tpu.memory_space<vmem>>, %arg3: memref<1x1x16x128xbf16, #tpu.memory_space<vmem>>, %arg4: memref<1x1x8x320xbf16, #tpu.memory_space<vmem>>, %arg5: memref<1x1x8x512xbf16, #tpu.memory_space<vmem>>, %arg6: memref<1x64x512xbf16, #tpu.memory_space<vmem>>, %arg7: memref<1x128x512xbf16, #tpu.memory_space<vmem>>, %arg8: memref<1x320x512xbf16, #tpu.memory_space<vmem>>, %arg9: memref<1x512x512xbf16, #tpu.memory_space<vmem>>, %arg10: memref<64x16xbf16, #tpu.memory_space<vmem>>, %arg11: memref<64x8xbf16, #tpu.memory_space<vmem>>, %arg12: memref<64x8xbf16, #tpu.memory_space<vmem>>, %arg13: memref<1x1x512xf32, #tpu.memory_space<vmem>>, %arg14: memref<1x512x128xbf16, #tpu.memory_space<vmem>>, %arg15: memref<1x1x128xf32, #tpu.memory_space<vmem>>, %arg16: memref<1x1x64x128xf32, #tpu.memory_space<vmem>>) attributes {dimension_semantics = [#tpu.dimension_semantics<parallel>, #tpu.dimension_semantics<parallel>], iteration_bounds = array<i64: 2, 2>, scalar_prefetch = 0 : i64, scratch_operands = 0 : i64, tpu.core_type = #tpu.core_type<tc>, window_params = [{transform_indices = @transform_0, window_bounds = array<i64: 1, 1, 64, 64>}, {transform_indices = @transform_1, window_bounds = array<i64: 1, 1, 16, 128>}, {transform_indices = @transform_2, window_bounds = array<i64: 1, 1, 8, 320>}, {transform_indices = @transform_3, window_bounds = array<i64: 1, 1, 8, 512>}, {transform_indices = @transform_4, window_bounds = array<i64: 1, 64, 512>}, {transform_indices = @transform_5, window_bounds = array<i64: 1, 128, 512>}, {transform_indices = @transform_6, window_bounds = array<i64: 1, 320, 512>}, {transform_indices = @transform_7, window_bounds = array<i64: 1, 512, 512>}, {pipeline_mode = #tpu.pipeline_mode<synchronous>, transform_indices = @transform_8, window_bounds = array<i64: 64, 16>}, {pipeline_mode = #tpu.pipeline_mode<synchronous>, transform_indices = @transform_9, window_bounds = array<i64: 64, 8>}, {pipeline_mode = #tpu.pipeline_mode<synchronous>, transform_indices = @transform_10, window_bounds = array<i64: 64, 8>}, {transform_indices = @transform_11, window_bounds = array<i64: 1, 1, 512>}, {transform_indices = @transform_12, window_bounds = array<i64: 1, 512, 128>}, {transform_indices = @transform_13, window_bounds = array<i64: 1, 1, 128>}, {transform_indices = @transform_14, window_bounds = array<i64: 1, 1, 64, 128>}]} {
    %c0 = arith.constant 0 : index
    %c0_0 = arith.constant 0 : index
    %c0_1 = arith.constant 0 : index
    %c0_2 = arith.constant 0 : index
    %0 = vector.load %arg2[%c0, %c0_0, %c0_1, %c0_2] : memref<1x1x64x64xbf16, #tpu.memory_space<vmem>>, vector<1x1x64x64xbf16>
    %1 = vector.shape_cast %0 : vector<1x1x64x64xbf16> to vector<64x64xbf16>
    %c0_3 = arith.constant 0 : index
    %c0_4 = arith.constant 0 : index
    %c0_5 = arith.constant 0 : index
    %2 = vector.load %arg6[%c0_3, %c0_4, %c0_5] : memref<1x64x512xbf16, #tpu.memory_space<vmem>>, vector<1x64x512xbf16>
    %3 = vector.shape_cast %2 : vector<1x64x512xbf16> to vector<64x512xbf16>
    %cst = arith.constant dense<0.000000e+00> : vector<64x512xf32>
    %4 = tpu.matmul %1, %3, %cst {dimension_numbers = #tpu.dot_dimension_numbers<[1], [0], [0], [1], [0, 0, 1, 1], [], []>} : vector<64x64xbf16>, vector<64x512xbf16>, vector<64x512xf32> -> vector<64x512xf32>
    %c0_6 = arith.constant 0 : index
    %c0_7 = arith.constant 0 : index
    %c0_8 = arith.constant 0 : index
    %c0_9 = arith.constant 0 : index
    %5 = vector.load %arg3[%c0_6, %c0_7, %c0_8, %c0_9] : memref<1x1x16x128xbf16, #tpu.memory_space<vmem>>, vector<1x1x16x128xbf16>
    %6 = vector.shape_cast %5 : vector<1x1x16x128xbf16> to vector<16x128xbf16>
    %c0_10 = arith.constant 0 : index
    %c0_11 = arith.constant 0 : index
    %c0_12 = arith.constant 0 : index
    %7 = vector.load %arg7[%c0_10, %c0_11, %c0_12] : memref<1x128x512xbf16, #tpu.memory_space<vmem>>, vector<1x128x512xbf16>
    %8 = vector.shape_cast %7 : vector<1x128x512xbf16> to vector<128x512xbf16>
    %cst_13 = arith.constant dense<0.000000e+00> : vector<16x512xf32>
    %9 = tpu.matmul %6, %8, %cst_13 {dimension_numbers = #tpu.dot_dimension_numbers<[1], [0], [0], [1], [0, 0, 1, 1], [], []>} : vector<16x128xbf16>, vector<128x512xbf16>, vector<16x512xf32> -> vector<16x512xf32>
    %10 = arith.truncf %9 : vector<16x512xf32> to vector<16x512xbf16>
    %c0_14 = arith.constant 0 : index
    %c0_15 = arith.constant 0 : index
    %11 = vector.load %arg10[%c0_14, %c0_15] : memref<64x16xbf16, #tpu.memory_space<vmem>>, vector<64x16xbf16>
    %cst_16 = arith.constant dense<0.000000e+00> : vector<64x512xf32>
    %12 = tpu.matmul %11, %10, %cst_16 {dimension_numbers = #tpu.dot_dimension_numbers<[1], [0], [0], [1], [0, 0, 1, 1], [], []>} : vector<64x16xbf16>, vector<16x512xbf16>, vector<64x512xf32> -> vector<64x512xf32>
    %13 = arith.addf %4, %12 : vector<64x512xf32>
    %c0_17 = arith.constant 0 : index
    %c0_18 = arith.constant 0 : index
    %c0_19 = arith.constant 0 : index
    %c0_20 = arith.constant 0 : index
    %14 = vector.load %arg4[%c0_17, %c0_18, %c0_19, %c0_20] : memref<1x1x8x320xbf16, #tpu.memory_space<vmem>>, vector<1x1x8x320xbf16>
    %15 = vector.shape_cast %14 : vector<1x1x8x320xbf16> to vector<8x320xbf16>
    %c0_21 = arith.constant 0 : index
    %c0_22 = arith.constant 0 : index
    %c0_23 = arith.constant 0 : index
    %16 = vector.load %arg8[%c0_21, %c0_22, %c0_23] : memref<1x320x512xbf16, #tpu.memory_space<vmem>>, vector<1x320x512xbf16>
    %17 = vector.shape_cast %16 : vector<1x320x512xbf16> to vector<320x512xbf16>
    %cst_24 = arith.constant dense<0.000000e+00> : vector<8x512xf32>
    %18 = tpu.matmul %15, %17, %cst_24 {dimension_numbers = #tpu.dot_dimension_numbers<[1], [0], [0], [1], [0, 0, 1, 1], [], []>} : vector<8x320xbf16>, vector<320x512xbf16>, vector<8x512xf32> -> vector<8x512xf32>
    %19 = arith.truncf %18 : vector<8x512xf32> to vector<8x512xbf16>
    %c0_25 = arith.constant 0 : index
    %c0_26 = arith.constant 0 : index
    %20 = vector.load %arg11[%c0_25, %c0_26] : memref<64x8xbf16, #tpu.memory_space<vmem>>, vector<64x8xbf16>
    %cst_27 = arith.constant dense<0.000000e+00> : vector<64x512xf32>
    %21 = tpu.matmul %20, %19, %cst_27 {dimension_numbers = #tpu.dot_dimension_numbers<[1], [0], [0], [1], [0, 0, 1, 1], [], []>} : vector<64x8xbf16>, vector<8x512xbf16>, vector<64x512xf32> -> vector<64x512xf32>
    %22 = arith.addf %13, %21 : vector<64x512xf32>
    %c0_28 = arith.constant 0 : index
    %c0_29 = arith.constant 0 : index
    %c0_30 = arith.constant 0 : index
    %c0_31 = arith.constant 0 : index
    %23 = vector.load %arg5[%c0_28, %c0_29, %c0_30, %c0_31] : memref<1x1x8x512xbf16, #tpu.memory_space<vmem>>, vector<1x1x8x512xbf16>
    %24 = vector.shape_cast %23 : vector<1x1x8x512xbf16> to vector<8x512xbf16>
    %c0_32 = arith.constant 0 : index
    %c0_33 = arith.constant 0 : index
    %c0_34 = arith.constant 0 : index
    %25 = vector.load %arg9[%c0_32, %c0_33, %c0_34] : memref<1x512x512xbf16, #tpu.memory_space<vmem>>, vector<1x512x512xbf16>
    %26 = vector.shape_cast %25 : vector<1x512x512xbf16> to vector<512x512xbf16>
    %cst_35 = arith.constant dense<0.000000e+00> : vector<8x512xf32>
    %27 = tpu.matmul %24, %26, %cst_35 {dimension_numbers = #tpu.dot_dimension_numbers<[1], [0], [0], [1], [0, 0, 1, 1], [], []>} : vector<8x512xbf16>, vector<512x512xbf16>, vector<8x512xf32> -> vector<8x512xf32>
    %28 = arith.truncf %27 : vector<8x512xf32> to vector<8x512xbf16>
    %c0_36 = arith.constant 0 : index
    %c0_37 = arith.constant 0 : index
    %29 = vector.load %arg12[%c0_36, %c0_37] : memref<64x8xbf16, #tpu.memory_space<vmem>>, vector<64x8xbf16>
    %cst_38 = arith.constant dense<0.000000e+00> : vector<64x512xf32>
    %30 = tpu.matmul %29, %28, %cst_38 {dimension_numbers = #tpu.dot_dimension_numbers<[1], [0], [0], [1], [0, 0, 1, 1], [], []>} : vector<64x8xbf16>, vector<8x512xbf16>, vector<64x512xf32> -> vector<64x512xf32>
    %31 = arith.addf %22, %30 : vector<64x512xf32>
    %c0_39 = arith.constant 0 : index
    %c0_40 = arith.constant 0 : index
    %c0_41 = arith.constant 0 : index
    %32 = vector.load %arg13[%c0_39, %c0_40, %c0_41] : memref<1x1x512xf32, #tpu.memory_space<vmem>>, vector<1x1x512xf32>
    %33 = vector.shape_cast %32 : vector<1x1x512xf32> to vector<1x512xf32>
    %34 = vector.broadcast %33 : vector<1x512xf32> to vector<64x512xf32>
    %35 = arith.addf %31, %34 : vector<64x512xf32>
    %cst_42 = arith.constant 0.000000e+00 : f32
    %36 = vector.broadcast %cst_42 : f32 to vector<64x512xf32>
    %37 = arith.maximumf %35, %36 : vector<64x512xf32>
    %38 = arith.truncf %37 : vector<64x512xf32> to vector<64x512xbf16>
    %c0_43 = arith.constant 0 : index
    %c0_44 = arith.constant 0 : index
    %c0_45 = arith.constant 0 : index
    %39 = vector.load %arg14[%c0_43, %c0_44, %c0_45] : memref<1x512x128xbf16, #tpu.memory_space<vmem>>, vector<1x512x128xbf16>
    %40 = vector.shape_cast %39 : vector<1x512x128xbf16> to vector<512x128xbf16>
    %cst_46 = arith.constant dense<0.000000e+00> : vector<64x128xf32>
    %41 = tpu.matmul %38, %40, %cst_46 {dimension_numbers = #tpu.dot_dimension_numbers<[1], [0], [0], [1], [0, 0, 1, 1], [], []>} : vector<64x512xbf16>, vector<512x128xbf16>, vector<64x128xf32> -> vector<64x128xf32>
    %c0_47 = arith.constant 0 : index
    %c0_48 = arith.constant 0 : index
    %c0_49 = arith.constant 0 : index
    %42 = vector.load %arg15[%c0_47, %c0_48, %c0_49] : memref<1x1x128xf32, #tpu.memory_space<vmem>>, vector<1x1x128xf32>
    %43 = vector.shape_cast %42 : vector<1x1x128xf32> to vector<1x128xf32>
    %44 = vector.broadcast %43 : vector<1x128xf32> to vector<64x128xf32>
    %45 = arith.addf %41, %44 : vector<64x128xf32>
    %46 = vector.shape_cast %45 : vector<64x128xf32> to vector<1x1x64x128xf32>
    %c0_50 = arith.constant 0 : index
    %c0_51 = arith.constant 0 : index
    %c0_52 = arith.constant 0 : index
    %c0_53 = arith.constant 0 : index
    %47 = vector.load %arg16[%c0_50, %c0_51, %c0_52, %c0_53] : memref<1x1x64x128xf32, #tpu.memory_space<vmem>>, vector<1x1x64x128xf32>
    tpu.vector_store %arg16[%c0_50, %c0_51, %c0_52, %c0_53], %46 {strides = array<i32>} : memref<1x1x64x128xf32, #tpu.memory_space<vmem>>, vector<1x1x64x128xf32>,
    return
  }
  func.func @transform_0(%arg0: i32, %arg1: i32) -> (i32, i32, i32, i32) {
    %c0_i32 = arith.constant 0 : i32
    %c0_i32_0 = arith.constant 0 : i32
    %c0_i32_1 = arith.constant 0 : i32
    return %arg0, %arg1, %c0_i32, %c0_i32_0 : i32, i32, i32, i32
  }
  func.func @transform_1(%arg0: i32, %arg1: i32) -> (i32, i32, i32, i32) {
    %c0_i32 = arith.constant 0 : i32
    %c0_i32_0 = arith.constant 0 : i32
    %c0_i32_1 = arith.constant 0 : i32
    return %arg0, %arg1, %c0_i32, %c0_i32_0 : i32, i32, i32, i32
  }
  func.func @transform_2(%arg0: i32, %arg1: i32) -> (i32, i32, i32, i32) {
    %c0_i32 = arith.constant 0 : i32
    %c0_i32_0 = arith.constant 0 : i32
    %c0_i32_1 = arith.constant 0 : i32
    return %arg0, %arg1, %c0_i32, %c0_i32_0 : i32, i32, i32, i32
  }
  func.func @transform_3(%arg0: i32, %arg1: i32) -> (i32, i32, i32, i32) {
    %c0_i32 = arith.constant 0 : i32
    %c0_i32_0 = arith.constant 0 : i32
    %c0_i32_1 = arith.constant 0 : i32
    return %arg0, %arg1, %c0_i32, %c0_i32_0 : i32, i32, i32, i32
  }
  func.func @transform_4(%arg0: i32, %arg1: i32) -> (i32, i32, i32) {
    %c0_i32 = arith.constant 0 : i32
    %c0_i32_0 = arith.constant 0 : i32
    %c0_i32_1 = arith.constant 0 : i32
    return %arg0, %c0_i32, %c0_i32_0 : i32, i32, i32
  }
  func.func @transform_5(%arg0: i32, %arg1: i32) -> (i32, i32, i32) {
    %c0_i32 = arith.constant 0 : i32
    %c0_i32_0 = arith.constant 0 : i32
    %c0_i32_1 = arith.constant 0 : i32
    return %arg0, %c0_i32, %c0_i32_0 : i32, i32, i32
  }
  func.func @transform_6(%arg0: i32, %arg1: i32) -> (i32, i32, i32) {
    %c0_i32 = arith.constant 0 : i32
    %c0_i32_0 = arith.constant 0 : i32
    %c0_i32_1 = arith.constant 0 : i32
    return %arg0, %c0_i32, %c0_i32_0 : i32, i32, i32
  }
  func.func @transform_7(%arg0: i32, %arg1: i32) -> (i32, i32, i32) {
    %c0_i32 = arith.constant 0 : i32
    %c0_i32_0 = arith.constant 0 : i32
    %c0_i32_1 = arith.constant 0 : i32
    return %arg0, %c0_i32, %c0_i32_0 : i32, i32, i32
  }
  func.func @transform_8(%arg0: i32, %arg1: i32) -> (i32, i32) {
    %c0_i32 = arith.constant 0 : i32
    %c0_i32_0 = arith.constant 0 : i32
    %c0_i32_1 = arith.constant 0 : i32
    return %c0_i32, %c0_i32_0 : i32, i32
  }
  func.func @transform_9(%arg0: i32, %arg1: i32) -> (i32, i32) {
    %c0_i32 = arith.constant 0 : i32
    %c0_i32_0 = arith.constant 0 : i32
    %c0_i32_1 = arith.constant 0 : i32
    return %c0_i32, %c0_i32_0 : i32, i32
  }
  func.func @transform_10(%arg0: i32, %arg1: i32) -> (i32, i32) {
    %c0_i32 = arith.constant 0 : i32
    %c0_i32_0 = arith.constant 0 : i32
    %c0_i32_1 = arith.constant 0 : i32
    return %c0_i32, %c0_i32_0 : i32, i32
  }
  func.func @transform_11(%arg0: i32, %arg1: i32) -> (i32, i32, i32) {
    %c0_i32 = arith.constant 0 : i32
    %c0_i32_0 = arith.constant 0 : i32
    %c0_i32_1 = arith.constant 0 : i32
    return %arg0, %c0_i32, %c0_i32_0 : i32, i32, i32
  }
  func.func @transform_12(%arg0: i32, %arg1: i32) -> (i32, i32, i32) {
    %c0_i32 = arith.constant 0 : i32
    %c0_i32_0 = arith.constant 0 : i32
    %c0_i32_1 = arith.constant 0 : i32
    return %arg0, %c0_i32, %c0_i32_0 : i32, i32, i32
  }
  func.func @transform_13(%arg0: i32, %arg1: i32) -> (i32, i32, i32) {
    %c0_i32 = arith.constant 0 : i32
    %c0_i32_0 = arith.constant 0 : i32
    %c0_i32_1 = arith.constant 0 : i32
    return %arg0, %c0_i32, %c0_i32_0 : i32, i32, i32
  }
  func.func @transform_14(%arg0: i32, %arg1: i32) -> (i32, i32, i32, i32) {
    %c0_i32 = arith.constant 0 : i32
    %c0_i32_0 = arith.constant 0 : i32
    %c0_i32_1 = arith.constant 0 : i32
    return %arg0, %arg1, %c0_i32, %c0_i32_0 : i32, i32, i32, i32
  }
}

module attributes {stable_mosaic.version = 11 : i64} {
  func.func @_tail_kernel(%arg0: i32, %arg1: memref<1x64x128xf32, #tpu.memory_space<vmem>>, %arg2: memref<1x64x128xf32, #tpu.memory_space<vmem>>, %arg3: memref<1024x64xbf16, #tpu.memory_space<vmem>>, %arg4: memref<1024x576xbf16, #tpu.memory_space<vmem>>, %arg5: memref<128x1152xbf16, #tpu.memory_space<vmem>>, %arg6: memref<1x128xf32, #tpu.memory_space<vmem>>, %arg7: memref<1x1024x128xf32, #tpu.memory_space<vmem>>, %arg8: memref<1x1024x128xf32, #tpu.memory_space<vmem>>) attributes {dimension_semantics = [#tpu.dimension_semantics<parallel>], iteration_bounds = array<i64: 2>, scalar_prefetch = 0 : i64, scratch_operands = 0 : i64, tpu.core_type = #tpu.core_type<tc>, window_params = [{transform_indices = @transform_0, window_bounds = array<i64: 1, 64, 128>}, {transform_indices = @transform_1, window_bounds = array<i64: 1, 64, 128>}, {pipeline_mode = #tpu.pipeline_mode<synchronous>, transform_indices = @transform_2, window_bounds = array<i64: 1024, 64>}, {pipeline_mode = #tpu.pipeline_mode<synchronous>, transform_indices = @transform_3, window_bounds = array<i64: 1024, 576>}, {pipeline_mode = #tpu.pipeline_mode<synchronous>, transform_indices = @transform_4, window_bounds = array<i64: 128, 1152>}, {pipeline_mode = #tpu.pipeline_mode<synchronous>, transform_indices = @transform_5, window_bounds = array<i64: 1, 128>}, {transform_indices = @transform_6, window_bounds = array<i64: 1, 1024, 128>}, {transform_indices = @transform_7, window_bounds = array<i64: 1, 1024, 128>}]} {
    %c0 = arith.constant 0 : index
    %c0_0 = arith.constant 0 : index
    %c0_1 = arith.constant 0 : index
    %0 = vector.load %arg1[%c0, %c0_0, %c0_1] : memref<1x64x128xf32, #tpu.memory_space<vmem>>, vector<1x64x128xf32>
    %1 = vector.shape_cast %0 : vector<1x64x128xf32> to vector<64x128xf32>
    %c0_2 = arith.constant 0 : index
    %c0_3 = arith.constant 0 : index
    %c0_4 = arith.constant 0 : index
    %2 = vector.load %arg2[%c0_2, %c0_3, %c0_4] : memref<1x64x128xf32, #tpu.memory_space<vmem>>, vector<1x64x128xf32>
    %3 = vector.shape_cast %2 : vector<1x64x128xf32> to vector<64x128xf32>
    %4 = arith.addf %1, %3 : vector<64x128xf32>
    %5 = arith.truncf %4 : vector<64x128xf32> to vector<64x128xbf16>
    %c0_5 = arith.constant 0 : index
    %c0_6 = arith.constant 0 : index
    %6 = vector.load %arg3[%c0_5, %c0_6] : memref<1024x64xbf16, #tpu.memory_space<vmem>>, vector<1024x64xbf16>
    %cst = arith.constant dense<0.000000e+00> : vector<1024x128xf32>
    %7 = tpu.matmul %6, %5, %cst {dimension_numbers = #tpu.dot_dimension_numbers<[1], [0], [0], [1], [0, 0, 1, 1], [], []>} : vector<1024x64xbf16>, vector<64x128xbf16>, vector<1024x128xf32> -> vector<1024x128xf32>
    %c0_7 = arith.constant 0 : index
    %c0_8 = arith.constant 0 : index
    %c0_9 = arith.constant 0 : index
    %8 = vector.load %arg7[%c0_7, %c0_8, %c0_9] : memref<1x1024x128xf32, #tpu.memory_space<vmem>>, vector<1x1024x128xf32>
    %9 = vector.shape_cast %8 : vector<1x1024x128xf32> to vector<1024x128xf32>
    %10 = vector.shape_cast %7 : vector<1024x128xf32> to vector<1x1024x128xf32>
    tpu.vector_store %arg7[%c0_7, %c0_8, %c0_9], %10 {strides = array<i32>} : memref<1x1024x128xf32, #tpu.memory_space<vmem>>, vector<1x1024x128xf32>,
    %c0_10 = arith.constant 0 : index
    %c0_11 = arith.constant 0 : index
    %11 = vector.load %arg5[%c0_10, %c0_11] : memref<128x1152xbf16, #tpu.memory_space<vmem>>, vector<128x1152xbf16>
    %cst_12 = arith.constant dense<0.000000e+00> : vector<64x1152xf32>
    %12 = tpu.matmul %5, %11, %cst_12 {dimension_numbers = #tpu.dot_dimension_numbers<[1], [0], [0], [1], [0, 0, 1, 1], [], []>} : vector<64x128xbf16>, vector<128x1152xbf16>, vector<64x1152xf32> -> vector<64x1152xf32>
    %13 = arith.truncf %12 : vector<64x1152xf32> to vector<64x1152xbf16>
    %14 = vector.extract_strided_slice %13 {offsets = [0, 0], sizes = [64, 128], strides = [1, 1]} : vector<64x1152xbf16> to vector<64x128xbf16>
    %15 = vector.extract_strided_slice %13 {offsets = [0, 128], sizes = [64, 128], strides = [1, 1]} : vector<64x1152xbf16> to vector<64x128xbf16>
    %16 = vector.extract_strided_slice %13 {offsets = [0, 256], sizes = [64, 128], strides = [1, 1]} : vector<64x1152xbf16> to vector<64x128xbf16>
    %17 = vector.extract_strided_slice %13 {offsets = [0, 384], sizes = [64, 128], strides = [1, 1]} : vector<64x1152xbf16> to vector<64x128xbf16>
    %18 = vector.extract_strided_slice %13 {offsets = [0, 512], sizes = [64, 128], strides = [1, 1]} : vector<64x1152xbf16> to vector<64x128xbf16>
    %19 = vector.extract_strided_slice %13 {offsets = [0, 640], sizes = [64, 128], strides = [1, 1]} : vector<64x1152xbf16> to vector<64x128xbf16>
    %20 = vector.extract_strided_slice %13 {offsets = [0, 768], sizes = [64, 128], strides = [1, 1]} : vector<64x1152xbf16> to vector<64x128xbf16>
    %21 = vector.extract_strided_slice %13 {offsets = [0, 896], sizes = [64, 128], strides = [1, 1]} : vector<64x1152xbf16> to vector<64x128xbf16>
    %22 = vector.extract_strided_slice %13 {offsets = [0, 1024], sizes = [64, 128], strides = [1, 1]} : vector<64x1152xbf16> to vector<64x128xbf16>
    %23 = tpu.concatenate %14, %15, %16, %17, %18, %19, %20, %21, %22 in 0 : vector<64x128xbf16>, vector<64x128xbf16>, vector<64x128xbf16>, vector<64x128xbf16>, vector<64x128xbf16>, vector<64x128xbf16>, vector<64x128xbf16>, vector<64x128xbf16>, vector<64x128xbf16> -> vector<576x128xbf16>
    %c0_13 = arith.constant 0 : index
    %c0_14 = arith.constant 0 : index
    %24 = vector.load %arg4[%c0_13, %c0_14] : memref<1024x576xbf16, #tpu.memory_space<vmem>>, vector<1024x576xbf16>
    %cst_15 = arith.constant dense<0.000000e+00> : vector<1024x128xf32>
    %25 = tpu.matmul %24, %23, %cst_15 {dimension_numbers = #tpu.dot_dimension_numbers<[1], [0], [0], [1], [0, 0, 1, 1], [], []>} : vector<1024x576xbf16>, vector<576x128xbf16>, vector<1024x128xf32> -> vector<1024x128xf32>
    %c0_16 = arith.constant 0 : index
    %c0_17 = arith.constant 0 : index
    %26 = vector.load %arg6[%c0_16, %c0_17] : memref<1x128xf32, #tpu.memory_space<vmem>>, vector<1x128xf32>
    %27 = vector.broadcast %26 : vector<1x128xf32> to vector<1024x128xf32>
    %28 = arith.addf %25, %27 : vector<1024x128xf32>
    %c0_18 = arith.constant 0 : index
    %c0_19 = arith.constant 0 : index
    %c0_20 = arith.constant 0 : index
    %29 = vector.load %arg8[%c0_18, %c0_19, %c0_20] : memref<1x1024x128xf32, #tpu.memory_space<vmem>>, vector<1x1024x128xf32>
    %30 = vector.shape_cast %29 : vector<1x1024x128xf32> to vector<1024x128xf32>
    %31 = vector.shape_cast %28 : vector<1024x128xf32> to vector<1x1024x128xf32>
    tpu.vector_store %arg8[%c0_18, %c0_19, %c0_20], %31 {strides = array<i32>} : memref<1x1024x128xf32, #tpu.memory_space<vmem>>, vector<1x1024x128xf32>,
    return
  }
  func.func @transform_0(%arg0: i32) -> (i32, i32, i32) {
    %c0_i32 = arith.constant 0 : i32
    %c0_i32_0 = arith.constant 0 : i32
    %c0_i32_1 = arith.constant 0 : i32
    return %arg0, %c0_i32, %c0_i32_0 : i32, i32, i32
  }
  func.func @transform_1(%arg0: i32) -> (i32, i32, i32) {
    %c0_i32 = arith.constant 0 : i32
    %c0_i32_0 = arith.constant 0 : i32
    %c0_i32_1 = arith.constant 0 : i32
    return %arg0, %c0_i32, %c0_i32_0 : i32, i32, i32
  }
  func.func @transform_2(%arg0: i32) -> (i32, i32) {
    %c0_i32 = arith.constant 0 : i32
    %c0_i32_0 = arith.constant 0 : i32
    %c0_i32_1 = arith.constant 0 : i32
    return %c0_i32, %c0_i32_0 : i32, i32
  }
  func.func @transform_3(%arg0: i32) -> (i32, i32) {
    %c0_i32 = arith.constant 0 : i32
    %c0_i32_0 = arith.constant 0 : i32
    %c0_i32_1 = arith.constant 0 : i32
    return %c0_i32, %c0_i32_0 : i32, i32
  }
  func.func @transform_4(%arg0: i32) -> (i32, i32) {
    %c0_i32 = arith.constant 0 : i32
    %c0_i32_0 = arith.constant 0 : i32
    %c0_i32_1 = arith.constant 0 : i32
    return %c0_i32, %c0_i32_0 : i32, i32
  }
  func.func @transform_5(%arg0: i32) -> (i32, i32) {
    %c0_i32 = arith.constant 0 : i32
    %c0_i32_0 = arith.constant 0 : i32
    %c0_i32_1 = arith.constant 0 : i32
    return %c0_i32, %c0_i32_0 : i32, i32
  }
  func.func @transform_6(%arg0: i32) -> (i32, i32, i32) {
    %c0_i32 = arith.constant 0 : i32
    %c0_i32_0 = arith.constant 0 : i32
    %c0_i32_1 = arith.constant 0 : i32
    return %arg0, %c0_i32, %c0_i32_0 : i32, i32, i32
  }
  func.func @transform_7(%arg0: i32) -> (i32, i32, i32) {
    %c0_i32 = arith.constant 0 : i32
    %c0_i32_0 = arith.constant 0 : i32
    %c0_i32_1 = arith.constant 0 : i32
    return %arg0, %c0_i32, %c0_i32_0 : i32, i32, i32
  }
}

</mosaic_0001>

<bundles_post_ra>
// kernel: encoder_decoder_forward.6
= control target key start
LH: loop header
LB: loop body
LE: loop exit
PB: predicated region body
PF: predicated region fallthrough
CT: control target
= control target key end

     0   :  { %s1004_s12 = smov 0   ;;  %s1006_s13 = smov 0   ;;  %s1234_s0 = inlined_call_operand.vmem [shape: bf16[2,128,48], index: 0, kind: input, shape index: {}]   ;;  %s1235_s1 = inlined_call_operand.vmem [shape: bf16[2,48,64], index: 1, kind: input, shape index: {}]   ;;  %s1236_s2 = inlined_call_operand.vmem [shape: f32[2,1,64], index: 2, kind: input, shape index: {}]   ;;  %s1237_s3 = inlined_call_operand.vmem [shape: bf16[2,128,64], index: 3, kind: output, shape index: {}]  }
   0x1   :  { %s1008_s14 = smov 0  }
   0x2 LB: > { %s25_s15 = sadd.s32 1, %s978_s13  ;;  %p791_p0 = scmp.ge.s32.totalorder %s982_s14, 1  ;;  %s982_s14 = sphi %s1008_s14, %s13_s14   ;;  %s978_s13 = sphi %s1006_s13, %s1239_s13   ;;  %s974_s12 = sphi %s1004_s12, %s1238_s12  }
   0x3   : > { %p27_p1 = scmp.ge.s32.totalorder %s25_s15, 2  ;;  %p176_p2 = scmp.lt.s32.totalorder %s982_s14, 3 }
   0x5   : > { %s1241_s15 = smov (%p27_p1, %s25_s15), 0  ;;  %p177_p3 = pnand %p791_p0, %p176_p2 }
   0x6   : > { %p217_p4 = scmp.lt.s32.totalorder (!%p177_p3), %s974_s12, 1  ;;  %vm332_vm0 = vcmask (!%p177_p3), 392192   ;;  %vm662_vm1 = vcmask (!%p177_p3), 519168  }
   0x7   : > { %180 = sbr.rel (%p177_p3) target bundleno = 306 (0x132), region = 32 }
   0xe   : > { %s1243_s12 = smov (!%p217_p4, %s974_s12), 1 }
   0xf   : > { %s835_s16 = sshll.u32 %s1243_s12, 6  ;;  %s892_s17 = smul.u32 24, %s1243_s12 }
  0x10   : > { %s1031_s20 = scalar_lea.vmem %s1234_s0, %s835_s16  ;;  %s233_s26 = scalar_lea.vmem %s1236_s2, %s1243_s12 }
  0x11   : > { %s230_s23 = scalar_lea.vmem %s1235_s1, %s892_s17  ;;  %v920_v3 = vld [vmem:[%s1031_s20] sm:$0xff]   ;;  %v922_v5 = vld [vmem:[%s1031_s20 + $0x8] sm:$0xff]   ;;  %v924_v7 = vld [vmem:[%s1031_s20 + $0x10] sm:$0xff]   ;;  %s1170_s29 = scalar_lea.vmem %s1237_s3, %s835_s16 }
  0x12   : > { %v917_v0 = vld [vmem:[%s230_s23] sm:$0xff]   ;;  %v918_v1 = vld [vmem:[%s230_s23 + $0x8] sm:$0xff]   ;;  %v919_v2 = vld [vmem:[%s230_s23 + $0x10] sm:$0xff]   ;;  %870 = vmatprep.mubr.msk.bf16.mxu0 %vm332_vm0, %v920_v3 }
  0x13   : > { %864 = vmatprep.subr.bf16.mxu0 %v917_v0  ;;  %886 = vmatprep.subr.bf16.mxu1 %v917_v0  ;;  %v921_v4 = vld [vmem:[%s1031_s20 + $0x20] sm:$0xff]   ;;  %v923_v6 = vld [vmem:[%s1031_s20 + $0x28] sm:$0xff]   ;;  %v925_v8 = vld [vmem:[%s1031_s20 + $0x30] sm:$0xff]  }
  0x14   : > { %865 = vmatpush3.bf16.msra.mxu0 %v917_v0  ;;  %889 = vmatpush3.bf16.msra.mxu1 %v917_v0  ;;  %v926_v9 = vld [vmem:[%s1031_s20 + $0x18] sm:$0xff]   ;;  %v1056_v11 = vld [vmem:[%s233_s26] ss:$0 sm:$0xff] }
  0x15   : > { %866 = vmatprep.subr.bf16.mxu0 %v918_v1  ;;  %887 = vmatprep.subr.bf16.mxu1 %v918_v1  ;;  %v927_v10 = vld [vmem:[%s1031_s20 + $0x38] sm:$0xff]  }
  0x16   : > { %878 = vmatprep.mubr.msk.bf16.mxu1 %vm332_vm0, %v921_v4 }
  0x18   : > { %867 = vmatpush3.bf16.msra.mxu0 %v918_v1  ;;  %890 = vmatpush3.bf16.msra.mxu1 %v918_v1 }
  0x19   : > { %868 = vmatprep.subr.bf16.mxu0 %v919_v2  ;;  %888 = vmatprep.subr.bf16.mxu1 %v919_v2 }
  0x1c   : > { %869 = vmatpush3.bf16.msra.mxu0 %v919_v2  ;;  %891 = vmatpush3.bf16.msra.mxu1 %v919_v2 }
  0x1f   : > { %871 = vmatmul.mubr.msk.bf16.vlgmr.msra.gmra.mrb[0].mxu0 %vm332_vm0, %v922_v5  ;;  %879 = vmatmul.mubr.msk.bf16.vlgmr.msra.gmra.mrb[0].mxu1 %vm332_vm0, %v923_v6 }
  0x20   : > { %874 = vmatprep.mubr.msk.bf16.mxu0 %vm332_vm0, %v924_v7  ;;  %882 = vmatprep.mubr.msk.bf16.mxu1 %vm332_vm0, %v925_v8 }
  0x27   : > { %875 = vmatmul.mubr.msk.bf16.gmra.mrb[4].mxu0 %vm332_vm0, %v926_v9  ;;  %883 = vmatmul.mubr.msk.bf16.gmra.mrb[4].mxu1 %vm332_vm0, %v927_v10 }
  0xf2   : > { %v872_v12 = vpop.f32.mrb[0].mxu0  ;;  %v880_v13 = vpop.f32.mrb[0].mxu1 }
  0xf3   : > { %v1059_v14 = vadd.f32 %v872_v12, %v1056_v11  ;;  %v1062_v15 = vadd.f32 %v880_v13, %v1056_v11  ;;  %v391_v16 = vpop.f32.mrb[1].mxu0  ;;  %v423_v17 = vpop.f32.mrb[1].mxu1 }
  0xf4   : > { %v1065_v18 = vadd.f32 %v1056_v11, %v391_v16  ;;  %v1068_v19 = vadd.f32 %v1056_v11, %v423_v17  ;;  %v873_v20 = vpop.f32.mrb[2].mxu0  ;;  %v881_v21 = vpop.f32.mrb[2].mxu1 }
  0xf5   : > { %v456_v22 = vmul.f32 %v1059_v14, %v1059_v14  ;;  %v464_v23 = vmul.f32 %v1062_v15, %v1062_v15  ;;  %v1075_v24 = vadd.f32 %v873_v20, %v1056_v11  ;;  %v1078_v25 = vadd.f32 %v881_v21, %v1056_v11  ;;  %v394_v26 = vpop.f32.mrb[3].mxu0  ;;  %v426_v27 = vpop.f32.mrb[3].mxu1 }
  0xf6   : > { %v454_v28 = vmul.f32 %v1065_v18, %v1065_v18  ;;  %v462_v29 = vmul.f32 %v1068_v19, %v1068_v19  ;;  %v1085_v30 = vadd.f32 %v1056_v11, %v394_v26  ;;  %v1088_v31 = vadd.f32 %v1056_v11, %v426_v27 }
  0xf7   : > { %v472_v32 = vmul.f32 %v456_v22, %v1059_v14  ;;  %v480_v33 = vmul.f32 %v464_v23, %v1062_v15  ;;  %v457_v34 = vmul.f32 %v1075_v24, %v1075_v24  ;;  %v465_v35 = vmul.f32 %v1078_v25, %v1078_v25 }
  0xf8   : > { %v470_v36 = vmul.f32 %v454_v28, %v1065_v18  ;;  %v478_v37 = vmul.f32 %v462_v29, %v1068_v19  ;;  %v455_v38 = vmul.f32 %v1085_v30, %v1085_v30  ;;  %v463_v39 = vmul.f32 %v1088_v31, %v1088_v31 }
  0xf9   : > { %v488_v40 = vmul.f32 0.044715, %v472_v32  ;;  %v496_v41 = vmul.f32 0.044715, %v480_v33  ;;  %v473_v42 = vmul.f32 %v457_v34, %v1075_v24  ;;  %v481_v43 = vmul.f32 %v465_v35, %v1078_v25 }
  0xfa   : > { %v486_v44 = vmul.f32 0.044715, %v470_v36  ;;  %v494_v45 = vmul.f32 0.044715, %v478_v37  ;;  %v471_v46 = vmul.f32 %v455_v38, %v1085_v30  ;;  %v479_v47 = vmul.f32 %v463_v39, %v1088_v31  ;;  %v876_v48 = vpop.f32.mrb[4].mxu0  ;;  %v884_v49 = vpop.f32.mrb[4].mxu1 }
  0xfb   : > { %v504_v50 = vadd.f32 %v488_v40, %v1059_v14  ;;  %v512_v51 = vadd.f32 %v496_v41, %v1062_v15  ;;  %v489_v52 = vmul.f32 0.044715, %v473_v42  ;;  %v497_v53 = vmul.f32 0.044715, %v481_v43  ;;  %v407_v54 = vpop.f32.mrb[5].mxu0  ;;  %v439_v55 = vpop.f32.mrb[5].mxu1 }
  0xfc   : > { %v502_v56 = vadd.f32 %v486_v44, %v1065_v18  ;;  %v510_v57 = vadd.f32 %v494_v45, %v1068_v19  ;;  %v487_v58 = vmul.f32 0.044715, %v471_v46  ;;  %v495_v59 = vmul.f32 0.044715, %v479_v47  ;;  %v877_v60 = vpop.f32.mrb[6].mxu0  ;;  %v885_v61 = vpop.f32.mrb[6].mxu1 }
  0xfd   : > { %v520_v62 = vmul.f32 0.7978846, %v504_v50  ;;  %v528_v63 = vmul.f32 0.7978846, %v512_v51  ;;  %v505_v0 = vadd.f32 %v489_v52, %v1075_v24  ;;  %v513_v1 = vadd.f32 %v497_v53, %v1078_v25  ;;  %v410_v2 = vpop.f32.mrb[7].mxu0  ;;  %v442_v3 = vpop.f32.mrb[7].mxu1 }
  0xfe   : > { %v518_v4 = vmul.f32 0.7978846, %v502_v56  ;;  %v526_v5 = vmul.f32 0.7978846, %v510_v57  ;;  %v503_v6 = vadd.f32 %v487_v58, %v1085_v30  ;;  %v511_v7 = vadd.f32 %v495_v59, %v1088_v31 }
  0xff   : > { %928 = vtanh.f32 %v520_v62  ;;  %v521_v8 = vmul.f32 0.7978846, %v505_v0  ;;  %v529_v9 = vmul.f32 0.7978846, %v513_v1  ;;  %v1115_v10 = vadd.f32 %v876_v48, %v1056_v11 }
 0x100   : > { %930 = vtanh.f32 %v528_v63  ;;  %v519_v12 = vmul.f32 0.7978846, %v503_v6  ;;  %v527_v13 = vmul.f32 0.7978846, %v511_v7  ;;  %v1118_v16 = vadd.f32 %v884_v49, %v1056_v11 }
 0x101   : > { %932 = vtanh.f32 %v518_v4  ;;  %v460_v17 = vmul.f32 %v1115_v10, %v1115_v10  ;;  %v1123_v20 = vadd.f32 %v1056_v11, %v407_v54  ;;  %v1126_v21 = vadd.f32 %v1056_v11, %v439_v55 }
 0x102   : > { %934 = vtanh.f32 %v526_v5  ;;  %v468_v22 = vmul.f32 %v1118_v16, %v1118_v16  ;;  %v1131_v23 = vadd.f32 %v877_v60, %v1056_v11  ;;  %v1134_v26 = vadd.f32 %v885_v61, %v1056_v11 }
 0x103   : > { %936 = vtanh.f32 %v521_v8  ;;  %v476_v27 = vmul.f32 %v460_v17, %v1115_v10  ;;  %v458_v28 = vmul.f32 %v1123_v20, %v1123_v20  ;;  %v466_v29 = vmul.f32 %v1126_v21, %v1126_v21 }
 0x104   : > { %938 = vtanh.f32 %v529_v9  ;;  %v484_v32 = vmul.f32 %v468_v22, %v1118_v16  ;;  %v461_v33 = vmul.f32 %v1131_v23, %v1131_v23  ;;  %v469_v34 = vmul.f32 %v1134_v26, %v1134_v26 }
 0x105   : > { %940 = vtanh.f32 %v519_v12  ;;  %v492_v35 = vmul.f32 0.044715, %v476_v27  ;;  %v474_v36 = vmul.f32 %v458_v28, %v1123_v20  ;;  %v482_v37 = vmul.f32 %v466_v29, %v1126_v21 }
 0x106   : > { %942 = vtanh.f32 %v527_v13  ;;  %v500_v38 = vmul.f32 0.044715, %v484_v32  ;;  %v477_v39 = vmul.f32 %v461_v33, %v1131_v23  ;;  %v485_v40 = vmul.f32 %v469_v34, %v1134_v26 }
 0x107   : > { %v508_v41 = vadd.f32 %v492_v35, %v1115_v10  ;;  %v490_v42 = vmul.f32 0.044715, %v474_v36  ;;  %v498_v43 = vmul.f32 0.044715, %v482_v37  ;;  %v1152_v44 = vadd.f32 %v1056_v11, %v410_v2 }
 0x108   : > { %v516_v45 = vadd.f32 %v500_v38, %v1118_v16  ;;  %v493_v46 = vmul.f32 0.044715, %v477_v39  ;;  %v501_v47 = vmul.f32 0.044715, %v485_v40  ;;  %v1156_v48 = vadd.f32 %v1056_v11, %v442_v3 }
 0x109   : > { %v929_v49 = vpop.eup %928  ;;  %v524_v50 = vmul.f32 0.7978846, %v508_v41  ;;  %v506_v51 = vadd.f32 %v490_v42, %v1123_v20  ;;  %v514_v52 = vadd.f32 %v498_v43, %v1126_v21  ;;  %v459_v53 = vmul.f32 %v1152_v44, %v1152_v44 }
 0x10a   : > { %v931_v54 = vpop.eup %930  ;;  %v552_v55 = vadd.f32 1.0, %v929_v49  ;;  %v532_v56 = vmul.f32 0.7978846, %v516_v45  ;;  %v509_v57 = vadd.f32 %v493_v46, %v1131_v23  ;;  %v517_v58 = vadd.f32 %v501_v47, %v1134_v26 }
 0x10b   : > { %v933_v59 = vpop.eup %932  ;;  %v560_v60 = vadd.f32 1.0, %v931_v54  ;;  %944 = vtanh.f32 %v524_v50  ;;  %v522_v11 = vmul.f32 0.7978846, %v506_v51  ;;  %v530_v61 = vmul.f32 0.7978846, %v514_v52 }
 0x10c   : > { %v935_v62 = vpop.eup %934  ;;  %v568_v63 = vmul.f32 0.5, %v552_v55  ;;  %v550_v0 = vadd.f32 1.0, %v933_v59  ;;  %946 = vtanh.f32 %v532_v56  ;;  %v525_v1 = vmul.f32 0.7978846, %v509_v57 }
 0x10d   : > { %v937_v2 = vpop.eup %936  ;;  %v576_v3 = vmul.f32 0.5, %v560_v60  ;;  %v558_v4 = vadd.f32 1.0, %v935_v62  ;;  %948 = vtanh.f32 %v522_v11  ;;  %v533_v5 = vmul.f32 0.7978846, %v517_v58 }
 0x10e   : > { %v939_v6 = vpop.eup %938  ;;  %v584_v7 = vmul.f32 %v568_v63, %v1059_v14  ;;  %v566_v8 = vmul.f32 0.5, %v550_v0  ;;  %v553_v9 = vadd.f32 1.0, %v937_v2  ;;  %950 = vtanh.f32 %v530_v61 }
 0x10f   : > { %v941_v12 = vpop.eup %940  ;;  %v592_v13 = vmul.f32 %v576_v3, %v1062_v15  ;;  %v574_v17 = vmul.f32 0.5, %v558_v4  ;;  %v561_v22 = vadd.f32 1.0, %v939_v6  ;;  %952 = vtanh.f32 %v525_v1 }
 0x110   : > { %v943_v27 = vpop.eup %942  ;;  %v839_v28 = vpack.c.bf16 %v584_v7, %v584_v7  ;;  %v582_v14 = vmul.f32 %v566_v8, %v1065_v18  ;;  %v569_v29 = vmul.f32 0.5, %v553_v9  ;;  %v551_v32 = vadd.f32 1.0, %v941_v12 }
 0x111   : > { %v847_v33 = vpack.c.bf16 %v592_v13, %v592_v13  ;;  %v590_v34 = vmul.f32 %v574_v17, %v1068_v19  ;;  %v577_v35 = vmul.f32 0.5, %v561_v22  ;;  %v559_v36 = vadd.f32 1.0, %v943_v27 }
 0x112   : > { %665 = vst.msk [vmem:[%s1170_s29 + $0x8] sm:$0xf] %vm662_vm1, %v839_v28  ;;  %v837_v15 = vpack.c.bf16 %v582_v14, %v582_v14  ;;  %v585_v37 = vmul.f32 %v569_v29, %v1075_v24  ;;  %v567_v38 = vmul.f32 0.5, %v551_v32  ;;  %954 = vtanh.f32 %v533_v5 }
 0x113   : > { %673 = vst.msk [vmem:[%s1170_s29 + $0x28] sm:$0xf] %vm662_vm1, %v847_v33  ;;  %v845_v18 = vpack.c.bf16 %v590_v34, %v590_v34  ;;  %v593_v39 = vmul.f32 %v577_v35, %v1078_v25  ;;  %v575_v40 = vmul.f32 0.5, %v559_v36  ;;  %v475_v41 = vmul.f32 %v459_v53, %v1152_v44 }
 0x114   : > { %663 = vst.msk [vmem:[%s1170_s29] sm:$0xf] %vm662_vm1, %v837_v15  ;;  %v840_v19 = vpack.c.bf16 %v585_v37, %v585_v37  ;;  %v583_v42 = vmul.f32 %v567_v38, %v1085_v30  ;;  %v467_v24 = vmul.f32 %v1156_v48, %v1156_v48 }
 0x115   : > { %v945_v43 = vpop.eup %944  ;;  %671 = vst.msk [vmem:[%s1170_s29 + $0x20] sm:$0xf] %vm662_vm1, %v845_v18  ;;  %v848_v45 = vpack.c.bf16 %v593_v39, %v593_v39  ;;  %v591_v46 = vmul.f32 %v575_v40, %v1088_v31  ;;  %v491_v25 = vmul.f32 0.044715, %v475_v41 }
 0x116   : > { %v947_v47 = vpop.eup %946  ;;  %666 = vst.msk [vmem:[%s1170_s29 + $0xc] sm:$0xf] %vm662_vm1, %v840_v19  ;;  %v838_v49 = vpack.c.bf16 %v583_v42, %v583_v42  ;;  %v556_v50 = vadd.f32 1.0, %v945_v43  ;;  %v483_v51 = vmul.f32 %v467_v24, %v1156_v48 }
 0x117   : > { %v949_v30 = vpop.eup %948  ;;  %674 = vst.msk [vmem:[%s1170_s29 + $0x2c] sm:$0xf] %vm662_vm1, %v848_v45  ;;  %v846_v52 = vpack.c.bf16 %v591_v46, %v591_v46  ;;  %v564_v53 = vadd.f32 1.0, %v947_v47  ;;  %v507_v54 = vadd.f32 %v491_v25, %v1152_v44 }
 0x118   : > { %v951_v55 = vpop.eup %950  ;;  %664 = vst.msk [vmem:[%s1170_s29 + $0x4] sm:$0xf] %vm662_vm1, %v838_v49  ;;  %v572_v31 = vmul.f32 0.5, %v556_v50  ;;  %v554_v56 = vadd.f32 1.0, %v949_v30  ;;  %v499_v57 = vmul.f32 0.044715, %v483_v51 }
 0x119   : > { %v953_v58 = vpop.eup %952  ;;  %672 = vst.msk [vmem:[%s1170_s29 + $0x24] sm:$0xf] %vm662_vm1, %v846_v52  ;;  %v580_v59 = vmul.f32 0.5, %v564_v53  ;;  %v562_v60 = vadd.f32 1.0, %v951_v55  ;;  %v523_v11 = vmul.f32 0.7978846, %v507_v54 }
 0x11a   : > { %v588_v61 = vmul.f32 %v572_v31, %v1115_v10  ;;  %v570_v62 = vmul.f32 0.5, %v554_v56  ;;  %v557_v63 = vadd.f32 1.0, %v953_v58  ;;  %v515_v0 = vadd.f32 %v499_v57, %v1156_v48 }
 0x11b   : > { %v596_v1 = vmul.f32 %v580_v59, %v1118_v16  ;;  %v578_v2 = vmul.f32 0.5, %v562_v60  ;;  %956 = vtanh.f32 %v523_v11 }
 0x11c   : > { %v955_v3 = vpop.eup %954  ;;  %v843_v4 = vpack.c.bf16 %v588_v61, %v588_v61  ;;  %v586_v5 = vmul.f32 %v570_v62, %v1123_v20  ;;  %v573_v6 = vmul.f32 0.5, %v557_v63  ;;  %v531_v7 = vmul.f32 0.7978846, %v515_v0 }
 0x11d   : > { %v851_v8 = vpack.c.bf16 %v596_v1, %v596_v1  ;;  %v594_v10 = vmul.f32 %v578_v2, %v1126_v21  ;;  %v565_v9 = vadd.f32 1.0, %v955_v3 }
 0x11e   : > { %669 = vst.msk [vmem:[%s1170_s29 + $0x18] sm:$0xf] %vm662_vm1, %v843_v4  ;;  %v841_v12 = vpack.c.bf16 %v586_v5, %v586_v5  ;;  %v589_v16 = vmul.f32 %v573_v6, %v1131_v23  ;;  %958 = vtanh.f32 %v531_v7 }
 0x11f   : > { %677 = vst.msk [vmem:[%s1170_s29 + $0x38] sm:$0xf] %vm662_vm1, %v851_v8  ;;  %v849_v13 = vpack.c.bf16 %v594_v10, %v594_v10  ;;  %v581_v17 = vmul.f32 0.5, %v565_v9 }
 0x120   : > { %667 = vst.msk [vmem:[%s1170_s29 + $0x10] sm:$0xf] %vm662_vm1, %v841_v12  ;;  %v844_v20 = vpack.c.bf16 %v589_v16, %v589_v16 }
 0x121   : > { %675 = vst.msk [vmem:[%s1170_s29 + $0x30] sm:$0xf] %vm662_vm1, %v849_v13  ;;  %v597_v21 = vmul.f32 %v581_v17, %v1134_v26 }
 0x122   : > { %670 = vst.msk [vmem:[%s1170_s29 + $0x1c] sm:$0xf] %vm662_vm1, %v844_v20 }
 0x123   : > { %v852_v22 = vpack.c.bf16 %v597_v21, %v597_v21 }
 0x125   : > { %v957_v27 = vpop.eup %956  ;;  %678 = vst.msk [vmem:[%s1170_s29 + $0x3c] sm:$0xf] %vm662_vm1, %v852_v22 }
 0x126   : > { %v555_v23 = vadd.f32 1.0, %v957_v27 }
 0x128   : > { %v959_v28 = vpop.eup %958  ;;  %v571_v14 = vmul.f32 0.5, %v555_v23 }
 0x129   : > { %v563_v29 = vadd.f32 1.0, %v959_v28 }
 0x12a   : > { %v587_v32 = vmul.f32 %v571_v14, %v1152_v44 }
 0x12b   : > { %v579_v33 = vmul.f32 0.5, %v563_v29 }
 0x12c   : > { %v842_v34 = vpack.c.bf16 %v587_v32, %v587_v32 }
 0x12d   : > { %v595_v35 = vmul.f32 %v579_v33, %v1156_v48 }
 0x12e   : > { %668 = vst.msk [vmem:[%s1170_s29 + $0x14] sm:$0xf] %vm662_vm1, %v842_v34 }
 0x12f   : > { %v850_v36 = vpack.c.bf16 %v595_v35, %v595_v35 }
 0x131   : > { %676 = vst.msk [vmem:[%s1170_s29 + $0x34] sm:$0xf] %vm662_vm1, %v850_v36 }
 0x132 PF: > { %s13_s14 = sadd.s32 1, %s982_s14   ;;  %s1238_s12 = smov %s978_s13 }
 0x133   : > { %p10_p5 = scmp.ge.s32.totalorder %s13_s14, 4   ;;  %s1239_s13 = smov %s1241_s15 }
 0x135   :  { %12 = sbr.rel (!%p10_p5) target bundleno = 2 (0x2), region = 68 }

// kernel: encoder_decoder_forward.7
= control target key start
LH: loop header
LB: loop body
LE: loop exit
PB: predicated region body
PF: predicated region fallthrough
CT: control target
= control target key end

     0   :  { %s821_s12 = smov 0   ;;  %s823_s13 = smov 0   ;;  %s884_s0 = inlined_call_operand.vmem [shape: bf16[2,32,256], index: 0, kind: input, shape index: {}]   ;;  %s885_s1 = inlined_call_operand.vmem [shape: bf16[2,256,128], index: 1, kind: input, shape index: {}]   ;;  %s886_s2 = inlined_call_operand.vmem [shape: f32[2,1,128], index: 2, kind: input, shape index: {}]   ;;  %s887_s3 = inlined_call_operand.vmem [shape: bf16[2,32,128], index: 3, kind: output, shape index: {}]  }
   0x1   :  { %s825_s14 = smov 0  }
   0x2 LB: > { %s25_s15 = sadd.s32 1, %s795_s13  ;;  %p627_p0 = scmp.ge.s32.totalorder %s799_s14, 1  ;;  %s799_s14 = sphi %s825_s14, %s13_s14   ;;  %s795_s13 = sphi %s823_s13, %s889_s13   ;;  %s791_s12 = sphi %s821_s12, %s888_s12  }
   0x3   : > { %p27_p1 = scmp.ge.s32.totalorder %s25_s15, 2  ;;  %p177_p2 = scmp.lt.s32.totalorder %s799_s14, 3 }
   0x5   : > { %s891_s15 = smov (%p27_p1, %s25_s15), 0  ;;  %p178_p3 = pnand %p627_p0, %p177_p2 }
   0x6   : > { %p219_p4 = scmp.lt.s32.totalorder (!%p178_p3), %s791_s12, 1 }
   0x7   : > { %181 = sbr.rel (%p178_p3) target bundleno = 300 (0x12c), region = 32 }
   0xe   : > { %s893_s12 = smov (!%p219_p4, %s791_s12), 1 }
   0xf   : > { %s662_s16 = sshll.u32 %s893_s12, 7  ;;  %s661_s20 = sshll.u32 %s893_s12, 5 }
  0x10   : > { %s845_s19 = scalar_lea.vmem %s885_s1, %s662_s16  ;;  %s227_s23 = scalar_lea.vmem %s884_s0, %s661_s20 }
  0x11   : > { %v747_v0 = vld [vmem:[%s845_s19 + $0x40] sm:$0xff]   ;;  %v749_v2 = vld [vmem:[%s845_s19 + $0x48] sm:$0xff]   ;;  %v751_v4 = vld [vmem:[%s845_s19 + $0x50] sm:$0xff]   ;;  %s236_s26 = scalar_lea.vmem %s886_s2, %s893_s12  ;;  %s663_s27 = sshll.u32 %s893_s12, 4 }
  0x12   : > { %v748_v1 = vld [vmem:[%s845_s19] sm:$0xff]   ;;  %679 = vmatprep.subr.bf16.mxu0 %v747_v0  ;;  %707 = vmatprep.subr.bf16.mxu1 %v747_v0  ;;  %v750_v3 = vld [vmem:[%s845_s19 + $0x8] sm:$0xff]   ;;  %v752_v5 = vld [vmem:[%s845_s19 + $0x10] sm:$0xff]   ;;  %s245_s30 = scalar_lea.vmem %s887_s3, %s663_s27 }
  0x13   : > { %680 = vmatpush3.bf16.msra.mxu0 %v748_v1  ;;  %715 = vmatpush3.bf16.msra.mxu1 %v748_v1  ;;  %v753_v6 = vld [vmem:[%s845_s19 + $0x58] sm:$0xff]   ;;  %v755_v8 = vld [vmem:[%s845_s19 + $0x60] sm:$0xff]   ;;  %v757_v10 = vld [vmem:[%s845_s19 + $0x68] sm:$0xff]  }
  0x14   : > { %681 = vmatprep.subr.bf16.mxu0 %v749_v2  ;;  %708 = vmatprep.subr.bf16.mxu1 %v749_v2  ;;  %v754_v7 = vld [vmem:[%s845_s19 + $0x18] sm:$0xff]   ;;  %v756_v9 = vld [vmem:[%s845_s19 + $0x20] sm:$0xff]   ;;  %v758_v13 = vld [vmem:[%s845_s19 + $0x28] sm:$0xff]  }
  0x15   : > { %v765_v11 = vld [vmem:[%s227_s23 + $0x4] ss:$8 sps:$4 sm:$0xff]   ;;  %v768_v12 = vld [vmem:[%s227_s23 + $0x14] ss:$8 sps:$4 sm:$0xff]   ;;  %v763_v18 = vld [vmem:[%s227_s23] ss:$8 sps:$4 sm:$0xff]  }
  0x16   : > { %v759_v14 = vld [vmem:[%s845_s19 + $0x70] sm:$0xff]   ;;  %439 = vmatprep.mubr.bf16.mxu0 %v765_v11  ;;  %447 = vmatprep.mubr.bf16.mxu1 %v768_v12  ;;  %v761_v16 = vld [vmem:[%s845_s19 + $0x78] sm:$0xff]   ;;  %v634_v22 = vld [vmem:[%s236_s26] ss:$0 sm:$0xff] }
  0x17   : > { %682 = vmatpush3.bf16.msra.mxu0 %v750_v3  ;;  %716 = vmatpush3.bf16.msra.mxu1 %v750_v3  ;;  %v760_v15 = vld [vmem:[%s845_s19 + $0x30] sm:$0xff]   ;;  %v762_v17 = vld [vmem:[%s845_s19 + $0x38] sm:$0xff]  }
  0x18   : > { %683 = vmatprep.subr.bf16.mxu0 %v751_v4  ;;  %709 = vmatprep.subr.bf16.mxu1 %v751_v4  ;;  %v766_v19 = vld [vmem:[%s227_s23 + $0x10] ss:$8 sps:$4 sm:$0xff]  }
  0x1b   : > { %684 = vmatpush3.bf16.msra.mxu0 %v752_v5  ;;  %717 = vmatpush3.bf16.msra.mxu1 %v752_v5 }
  0x1c   : > { %685 = vmatprep.subr.bf16.mxu0 %v753_v6  ;;  %710 = vmatprep.subr.bf16.mxu1 %v753_v6 }
  0x1f   : > { %686 = vmatpush3.bf16.msra.mxu0 %v754_v7  ;;  %718 = vmatpush3.bf16.msra.mxu1 %v754_v7 }
  0x20   : > { %687 = vmatprep.subr.bf16.mxu0 %v755_v8  ;;  %711 = vmatprep.subr.bf16.mxu1 %v755_v8 }
  0x23   : > { %688 = vmatpush3.bf16.msra.mxu0 %v756_v9  ;;  %719 = vmatpush3.bf16.msra.mxu1 %v756_v9 }
  0x24   : > { %689 = vmatprep.subr.bf16.mxu0 %v757_v10  ;;  %712 = vmatprep.subr.bf16.mxu1 %v757_v10 }
  0x27   : > { %690 = vmatpush3.bf16.msra.mxu0 %v758_v13  ;;  %720 = vmatpush3.bf16.msra.mxu1 %v758_v13 }
  0x28   : > { %691 = vmatprep.subr.bf16.mxu0 %v759_v14  ;;  %713 = vmatprep.subr.bf16.mxu1 %v759_v14 }
  0x2b   : > { %692 = vmatpush3.bf16.msra.mxu0 %v760_v15  ;;  %721 = vmatpush3.bf16.msra.mxu1 %v760_v15 }
  0x2c   : > { %693 = vmatprep.subr.bf16.mxu0 %v761_v16  ;;  %714 = vmatprep.subr.bf16.mxu1 %v761_v16 }
  0x2f   : > { %694 = vmatpush3.bf16.msra.mxu0 %v762_v17  ;;  %722 = vmatpush3.bf16.msra.mxu1 %v762_v17 }
  0x32   : > { %440 = vmatmul.mubr.bf16.vlgmr.msra.gmra.mrb[0].mxu0 %v763_v18  ;;  %448 = vmatmul.mubr.bf16.vlgmr.msra.gmra.mrb[0].mxu1 %v766_v19 }
 0x105   : > { %v695_v20 = vpop.f32.mrb[0].mxu0  ;;  %v701_v21 = vpop.f32.mrb[0].mxu1 }
 0x106   : > { %v696_v23 = vpop.f32.mrb[1].mxu0  ;;  %v702_v24 = vpop.f32.mrb[1].mxu1 }
 0x107   : > { %v697_v25 = vadd.f32 %v696_v23, %v695_v20  ;;  %v703_v26 = vadd.f32 %v702_v24, %v701_v21  ;;  %v698_v27 = vpop.f32.mrb[2].mxu0  ;;  %v704_v28 = vpop.f32.mrb[2].mxu1 }
 0x108   : > { %v699_v29 = vpop.f32.mrb[3].mxu0  ;;  %v705_v30 = vpop.f32.mrb[3].mxu1 }
 0x109   : > { %v442_v31 = vadd.f32 %v697_v25, %v634_v22  ;;  %v450_v32 = vadd.f32 %v703_v26, %v634_v22  ;;  %v700_v33 = vadd.f32 %v699_v29, %v698_v27  ;;  %v706_v34 = vadd.f32 %v705_v30, %v704_v28 }
 0x10b   : > { %v456_v35 = vmul.f32 %v442_v31, %v442_v31  ;;  %v458_v36 = vmul.f32 %v450_v32, %v450_v32  ;;  %v445_v37 = vadd.f32 %v700_v33, %v634_v22  ;;  %v453_v38 = vadd.f32 %v706_v34, %v634_v22 }
 0x10d   : > { %v460_v39 = vmul.f32 %v456_v35, %v442_v31  ;;  %v462_v40 = vmul.f32 %v458_v36, %v450_v32  ;;  %v457_v41 = vmul.f32 %v445_v37, %v445_v37  ;;  %v459_v42 = vmul.f32 %v453_v38, %v453_v38 }
 0x10f   : > { %v464_v43 = vmul.f32 0.044715, %v460_v39  ;;  %v466_v44 = vmul.f32 0.044715, %v462_v40  ;;  %v461_v45 = vmul.f32 %v457_v41, %v445_v37  ;;  %v463_v46 = vmul.f32 %v459_v42, %v453_v38 }
 0x111   : > { %v468_v47 = vadd.f32 %v464_v43, %v442_v31  ;;  %v470_v48 = vadd.f32 %v466_v44, %v450_v32  ;;  %v465_v49 = vmul.f32 0.044715, %v461_v45  ;;  %v467_v50 = vmul.f32 0.044715, %v463_v46 }
 0x113   : > { %v472_v51 = vmul.f32 0.7978846, %v468_v47  ;;  %v474_v52 = vmul.f32 0.7978846, %v470_v48  ;;  %v469_v53 = vadd.f32 %v465_v49, %v445_v37  ;;  %v471_v54 = vadd.f32 %v467_v50, %v453_v38 }
 0x115   : > { %769 = vtanh.f32 %v472_v51  ;;  %v473_v55 = vmul.f32 0.7978846, %v469_v53  ;;  %v475_v56 = vmul.f32 0.7978846, %v471_v54 }
 0x116   : > { %771 = vtanh.f32 %v474_v52 }
 0x117   : > { %773 = vtanh.f32 %v473_v55 }
 0x118   : > { %775 = vtanh.f32 %v475_v56 }
 0x11f   : > { %v770_v57 = vpop.eup %769 }
 0x120   : > { %v772_v58 = vpop.eup %771  ;;  %v480_v59 = vadd.f32 1.0, %v770_v57 }
 0x121   : > { %v774_v60 = vpop.eup %773  ;;  %v482_v61 = vadd.f32 1.0, %v772_v58 }
 0x122   : > { %v776_v62 = vpop.eup %775  ;;  %v484_v63 = vmul.f32 0.5, %v480_v59  ;;  %v481_v0 = vadd.f32 1.0, %v774_v60 }
 0x123   : > { %v486_v1 = vmul.f32 0.5, %v482_v61  ;;  %v483_v2 = vadd.f32 1.0, %v776_v62 }
 0x124   : > { %v485_v3 = vmul.f32 0.5, %v481_v0  ;;  %v488_v5 = vmul.f32 %v484_v63, %v442_v31 }
 0x125   : > { %v487_v4 = vmul.f32 0.5, %v483_v2  ;;  %v490_v7 = vmul.f32 %v486_v1, %v450_v32 }
 0x126   : > { %v489_v6 = vmul.f32 %v485_v3, %v445_v37 }
 0x127   : > { %v491_v8 = vmul.f32 %v487_v4, %v453_v38 }
 0x128   : > { %v671_v9 = vpack.c.bf16 %v489_v6, %v488_v5 }
 0x129   : > { %v676_v10 = vpack.c.bf16 %v491_v8, %v490_v7 }
 0x12a   : > { %672 = vst [vmem:[%s245_s30] sm:$0xff] %v671_v9  }
 0x12b   : > { %678 = vst [vmem:[%s245_s30 + $0x8] sm:$0xff] %v676_v10  }
 0x12c PF: > { %s13_s14 = sadd.s32 1, %s799_s14   ;;  %s888_s12 = smov %s795_s13 }
 0x12d   : > { %p10_p5 = scmp.ge.s32.totalorder %s13_s14, 4   ;;  %s889_s13 = smov %s891_s15 }
 0x12f   :  { %12 = sbr.rel (!%p10_p5) target bundleno = 2 (0x2), region = 68 }

// kernel: encoder_decoder_forward.8
= control target key start
LH: loop header
LB: loop body
LE: loop exit
PB: predicated region body
PF: predicated region fallthrough
CT: control target
= control target key end

     0   :  { %s1614_s12 = smov 0   ;;  %s1616_s13 = smov 0   ;;  %s1789_s0 = inlined_call_operand.vmem [shape: bf16[2,8,512], index: 0, kind: input, shape index: {}]   ;;  %s1790_s1 = inlined_call_operand.vmem [shape: bf16[2,512,320], index: 1, kind: input, shape index: {}]   ;;  %s1791_s2 = inlined_call_operand.vmem [shape: f32[2,1,320], index: 2, kind: input, shape index: {}]   ;;  %s1792_s3 = inlined_call_operand.vmem [shape: bf16[2,8,320], index: 3, kind: output, shape index: {}]  }
   0x1   :  { %s1618_s14 = smov 0  }
   0x2 LB: > { %s25_s15 = sadd.s32 1, %s1588_s13  ;;  %p1243_p0 = scmp.ge.s32.totalorder %s1592_s14, 1  ;;  %s1592_s14 = sphi %s1618_s14, %s13_s14   ;;  %s1588_s13 = sphi %s1616_s13, %s1794_s13   ;;  %s1584_s12 = sphi %s1614_s12, %s1793_s12  }
   0x3   : > { %p27_p1 = scmp.ge.s32.totalorder %s25_s15, 2  ;;  %p176_p2 = scmp.lt.s32.totalorder %s1592_s14, 3 }
   0x5   : > { %s1796_s15 = smov (%p27_p1, %s25_s15), 0  ;;  %p177_p3 = pnand %p1243_p0, %p176_p2 }
   0x6   : > { %p217_p4 = scmp.lt.s32.totalorder (!%p177_p3), %s1584_s12, 1  ;;  %vm1121_vm0 = vcmask (!%p177_p3), 519168  }
   0x7   : > { %180 = sbr.rel (%p177_p3) target bundleno = 392 (0x188), region = 32 }
   0xe   : > { %s1798_s12 = smov (!%p217_p4, %s1584_s12), 1 }
   0xf   : > { %s1405_s16 = smul.u32 768, %s1798_s12  ;;  %s1352_s17 = sshll.u32 %s1798_s12, 4 }
  0x10   : > { %s1639_s20 = scalar_lea.vmem %s1789_s0, %s1352_s17  ;;  %s1406_s24 = smul.u32 3, %s1798_s12 }
  0x11   : > { %s1644_s23 = scalar_lea.vmem %s1790_s1, %s1405_s16  ;;  %v1647_v0 = vld [vmem:[%s1639_s20] sm:$0xff]  ;;  %v1688_v38 = vld [vmem:[%s1639_s20 + $0x8] sm:$0xff]  ;;  %s1407_s28 = smul.u32 12, %s1798_s12 }
  0x12   : > { %v1432_v1 = vld [vmem:[%s1644_s23 + $0x4] ss:$12 sps:$4 sm:$0xff]   ;;  %v1249_v2 = vcombine.high %v1647_v0, %v1647_v0  ;;  %v1434_v3 = vld [vmem:[%s1644_s23] ss:$12 sps:$4 sm:$0xff]   ;;  %v1435_v4 = vld [vmem:[%s1644_s23 + $0x1c] ss:$12 sps:$4 sm:$0xff]   ;;  %v1693_v40 = vcombine.low %v1647_v0, %v1647_v0  ;;  %v1701_v45 = vcombine.high %v1688_v38, %v1688_v38  ;;  %s234_s27 = scalar_lea.vmem %s1791_s2, %s1406_s24 }
  0x13   : > { %918 = vmatprep.subr.bf16.mxu0 %v1432_v1  ;;  %v1437_v5 = vld [vmem:[%s1644_s23 + $0x18] ss:$12 sps:$4 sm:$0xff]   ;;  %v1438_v6 = vld [vmem:[%s1644_s23 + $0xc8] ss:$12 sps:$4 sm:$0xff]   ;;  %v1442_v9 = vld [vmem:[%s1644_s23 + $0x30] ss:$12 sps:$4 sm:$0xff]   ;;  %s1776_s4 = scalar_lea.vmem %s1792_s3, %s1407_s28 }
  0x14   : > { %1032 = vmatprep.mubr.bf16.mxu1 %v1249_v2  ;;  %919 = vmatpush1.bf16.msra.mxu0 %v1434_v3  ;;  %v1439_v7 = vld [vmem:[%s1644_s23 + $0x34] ss:$12 sps:$4 sm:$0xff]   ;;  %v1444_v11 = vld [vmem:[%s1644_s23 + $0x4c] ss:$12 sps:$4 sm:$0xff]   ;;  %v1449_v15 = vld [vmem:[%s1644_s23 + $0x64] ss:$12 sps:$4 sm:$0xff]  }
  0x15   : > { %950 = vmatprep.mubr.bf16.mxu0 %v1249_v2  ;;  %920 = vmatprep.subr.bf16.mxu0 %v1435_v4  ;;  %v1441_v8 = vld [vmem:[%s1644_s23 + $0x8] ss:$12 sps:$4 sm:$0xff]   ;;  %v1443_v10 = vld [vmem:[%s1644_s23 + $0xe0] ss:$12 sps:$4 sm:$0xff]   ;;  %v1448_v13 = vld [vmem:[%s1644_s23 + $0xf8] ss:$12 sps:$4 sm:$0xff]  }
  0x16   : > { %1355 = vmatprep.subr.bf16.mxu1 %v1438_v6  ;;  %v1446_v12 = vld [vmem:[%s1644_s23 + $0x20] ss:$12 sps:$4 sm:$0xff]   ;;  %v1447_v14 = vld [vmem:[%s1644_s23 + $0x48] ss:$12 sps:$4 sm:$0xff]   ;;  %v1451_v16 = vld [vmem:[%s1644_s23 + $0x38] ss:$12 sps:$4 sm:$0xff]  }
  0x17   : > { %1356 = vmatpush3.bf16.msra.mxu1 %v1441_v8  ;;  %v1453_v17 = vld [vmem:[%s1644_s23 + $0x110] ss:$12 sps:$4 sm:$0xff]   ;;  %v1452_v18 = vld [vmem:[%s1644_s23 + $0x60] ss:$12 sps:$4 sm:$0xff]   ;;  %v1458_v21 = vld [vmem:[%s1644_s23 + $0x128] ss:$12 sps:$4 sm:$0xff]   ;;  %v1733_v8 = vcombine.low %v1688_v38, %v1688_v38 }
  0x18   : > { %921 = vmatpush1.bf16.msra.mxu0 %v1437_v5  ;;  %1357 = vmatprep.subr.bf16.mxu1 %v1443_v10  ;;  %v1454_v19 = vld [vmem:[%s1644_s23 + $0x7c] ss:$12 sps:$4 sm:$0xff]   ;;  %v1457_v22 = vld [vmem:[%s1644_s23 + $0x78] ss:$12 sps:$4 sm:$0xff]   ;;  %v1459_v23 = vld [vmem:[%s1644_s23 + $0x94] ss:$12 sps:$4 sm:$0xff]  }
  0x19   : > { %922 = vmatprep.subr.bf16.mxu0 %v1439_v7  ;;  %v1456_v20 = vld [vmem:[%s1644_s23 + $0x50] ss:$12 sps:$4 sm:$0xff]   ;;  %v1461_v24 = vld [vmem:[%s1644_s23 + $0x68] ss:$12 sps:$4 sm:$0xff]   ;;  %v1463_v25 = vld [vmem:[%s1644_s23 + $0x140] ss:$12 sps:$4 sm:$0xff]  }
  0x1a   : > { %v1462_v26 = vld [vmem:[%s1644_s23 + $0x90] ss:$12 sps:$4 sm:$0xff]   ;;  %v1464_v27 = vld [vmem:[%s1644_s23 + $0xac] ss:$12 sps:$4 sm:$0xff]   ;;  %v1467_v30 = vld [vmem:[%s1644_s23 + $0xa8] ss:$12 sps:$4 sm:$0xff]  }
  0x1b   : > { %1358 = vmatpush3.bf16.msra.mxu1 %v1446_v12  ;;  %v1466_v28 = vld [vmem:[%s1644_s23 + $0x80] ss:$12 sps:$4 sm:$0xff]   ;;  %v1468_v29 = vld [vmem:[%s1644_s23 + $0x158] ss:$12 sps:$4 sm:$0xff]   ;;  %v1473_v33 = vld [vmem:[%s1644_s23 + $0x170] ss:$12 sps:$4 sm:$0xff]  }
  0x1c   : > { %923 = vmatpush1.bf16.msra.mxu0 %v1442_v9  ;;  %1359 = vmatprep.subr.bf16.mxu1 %v1448_v13  ;;  %v1469_v31 = vld [vmem:[%s1644_s23 + $0xc4] ss:$12 sps:$4 sm:$0xff]   ;;  %v1472_v34 = vld [vmem:[%s1644_s23 + $0xc0] ss:$12 sps:$4 sm:$0xff]   ;;  %v1474_v36 = vld [vmem:[%s1644_s23 + $0xdc] ss:$12 sps:$4 sm:$0xff]  }
  0x1d   : > { %924 = vmatprep.subr.bf16.mxu0 %v1444_v11  ;;  %v1471_v32 = vld [vmem:[%s1644_s23 + $0x98] ss:$12 sps:$4 sm:$0xff]   ;;  %v1476_v35 = vld [vmem:[%s1644_s23 + $0xb0] ss:$12 sps:$4 sm:$0xff]   ;;  %v1481_v37 = vld [vmem:[%s1644_s23 + $0x248] ss:$12 sps:$4 sm:$0xff]  }
  0x1e   : > { %v1477_v39 = vld [vmem:[%s1644_s23 + $0xd8] ss:$12 sps:$4 sm:$0xff]   ;;  %v1482_v41 = vld [vmem:[%s1644_s23 + $0xf4] ss:$12 sps:$4 sm:$0xff]   ;;  %v1485_v44 = vld [vmem:[%s1644_s23 + $0xf0] ss:$12 sps:$4 sm:$0xff]  }
  0x1f   : > { %1360 = vmatpush3.bf16.msra.mxu1 %v1451_v16  ;;  %v1484_v42 = vld [vmem:[%s1644_s23 + $0x188] ss:$12 sps:$4 sm:$0xff]   ;;  %v1486_v43 = vld [vmem:[%s1644_s23 + $0x260] ss:$12 sps:$4 sm:$0xff]   ;;  %v1491_v48 = vld [vmem:[%s1644_s23 + $0x278] ss:$12 sps:$4 sm:$0xff]  }
  0x20   : > { %925 = vmatpush1.bf16.msra.mxu0 %v1447_v14  ;;  %1361 = vmatprep.subr.bf16.mxu1 %v1453_v17  ;;  %v1487_v46 = vld [vmem:[%s1644_s23 + $0x10c] ss:$12 sps:$4 sm:$0xff]   ;;  %v1490_v49 = vld [vmem:[%s1644_s23 + $0x108] ss:$12 sps:$4 sm:$0xff]   ;;  %v1492_v50 = vld [vmem:[%s1644_s23 + $0x124] ss:$12 sps:$4 sm:$0xff]  }
  0x21   : > { %926 = vmatprep.subr.bf16.mxu0 %v1449_v15  ;;  %v1489_v47 = vld [vmem:[%s1644_s23 + $0x1a0] ss:$12 sps:$4 sm:$0xff]   ;;  %v1494_v51 = vld [vmem:[%s1644_s23 + $0x1b8] ss:$12 sps:$4 sm:$0xff]   ;;  %v1496_v52 = vld [vmem:[%s1644_s23 + $0x290] ss:$12 sps:$4 sm:$0xff]  }
  0x22   : > { %v1495_v53 = vld [vmem:[%s1644_s23 + $0x120] ss:$12 sps:$4 sm:$0xff]   ;;  %v1497_v54 = vld [vmem:[%s1644_s23 + $0x13c] ss:$12 sps:$4 sm:$0xff]   ;;  %v1500_v57 = vld [vmem:[%s1644_s23 + $0x138] ss:$12 sps:$4 sm:$0xff]  }
  0x23   : > { %1362 = vmatpush3.bf16.msra.mxu1 %v1456_v20  ;;  %v1499_v55 = vld [vmem:[%s1644_s23 + $0x1d0] ss:$12 sps:$4 sm:$0xff]   ;;  %v1501_v56 = vld [vmem:[%s1644_s23 + $0x2a8] ss:$12 sps:$4 sm:$0xff]   ;;  %v1506_v60 = vld [vmem:[%s1644_s23 + $0x2c0] ss:$12 sps:$4 sm:$0xff]  }
  0x24   : > { %927 = vmatpush1.bf16.msra.mxu0 %v1452_v18  ;;  %1363 = vmatprep.subr.bf16.mxu1 %v1458_v21  ;;  %v1502_v58 = vld [vmem:[%s1644_s23 + $0x154] ss:$12 sps:$4 sm:$0xff]   ;;  %v1505_v61 = vld [vmem:[%s1644_s23 + $0x150] ss:$12 sps:$4 sm:$0xff]   ;;  %v1507_v62 = vld [vmem:[%s1644_s23 + $0x16c] ss:$12 sps:$4 sm:$0xff]  }
  0x25   : > { %928 = vmatprep.subr.bf16.mxu0 %v1454_v19  ;;  %v1504_v59 = vld [vmem:[%s1644_s23 + $0x1e8] ss:$12 sps:$4 sm:$0xff]   ;;  %v1509_v63 = vld [vmem:[%s1644_s23 + $0x200] ss:$12 sps:$4 sm:$0xff]   ;;  %v1511_v0 = vld [vmem:[%s1644_s23 + $0x2d8] ss:$12 sps:$4 sm:$0xff]  }
  0x26   : > { %v1510_v1 = vld [vmem:[%s1644_s23 + $0x168] ss:$12 sps:$4 sm:$0xff]   ;;  %v1514_v2 = vld [vmem:[%s1644_s23 + $0x184] ss:$12 sps:$4 sm:$0xff]   ;;  %v1512_v5 = vld [vmem:[%s1644_s23 + $0x180] ss:$12 sps:$4 sm:$0xff]  }
  0x27   : > { %1364 = vmatpush3.bf16.msra.mxu1 %v1461_v24  ;;  %v1515_v3 = vld [vmem:[%s1644_s23 + $0x218] ss:$12 sps:$4 sm:$0xff]   ;;  %v1516_v4 = vld [vmem:[%s1644_s23 + $0x2f0] ss:$12 sps:$4 sm:$0xff]   ;;  %v1524_v10 = vld [vmem:[%s1644_s23 + $0x1b4] ss:$12 sps:$4 sm:$0xff]  }
  0x28   : > { %929 = vmatpush1.bf16.msra.mxu0 %v1457_v22  ;;  %1365 = vmatprep.subr.bf16.mxu1 %v1463_v25  ;;  %v1520_v6 = vld [vmem:[%s1644_s23 + $0x230] ss:$12 sps:$4 sm:$0xff]   ;;  %v1517_v9 = vld [vmem:[%s1644_s23 + $0x198] ss:$12 sps:$4 sm:$0xff]   ;;  %v1525_v13 = vld [vmem:[%s1644_s23 + $0x1c8] ss:$12 sps:$4 sm:$0xff]  }
  0x29   : > { %930 = vmatprep.subr.bf16.mxu0 %v1459_v23  ;;  %v1519_v7 = vld [vmem:[%s1644_s23 + $0x19c] ss:$12 sps:$4 sm:$0xff]   ;;  %v1527_v12 = vld [vmem:[%s1644_s23 + $0x1cc] ss:$12 sps:$4 sm:$0xff]   ;;  %v1530_v14 = vld [vmem:[%s1644_s23 + $0x1e4] ss:$12 sps:$4 sm:$0xff]  }
  0x2a   : > { %v1522_v11 = vld [vmem:[%s1644_s23 + $0x1b0] ss:$12 sps:$4 sm:$0xff]   ;;  %v1528_v15 = vld [vmem:[%s1644_s23 + $0x1e0] ss:$12 sps:$4 sm:$0xff]   ;;  %v1531_v17 = vld [vmem:[%s1644_s23 + $0x1f8] ss:$12 sps:$4 sm:$0xff]  }
  0x2b   : > { %1366 = vmatpush3.bf16.msra.mxu1 %v1466_v28  ;;  %v1533_v16 = vld [vmem:[%s1644_s23 + $0x1fc] ss:$12 sps:$4 sm:$0xff]   ;;  %v1536_v18 = vld [vmem:[%s1644_s23 + $0x214] ss:$12 sps:$4 sm:$0xff]   ;;  %v1539_v20 = vld [vmem:[%s1644_s23 + $0x22c] ss:$12 sps:$4 sm:$0xff]  }
  0x2c   : > { %931 = vmatpush1.bf16.msra.mxu0 %v1462_v26  ;;  %1367 = vmatprep.subr.bf16.mxu1 %v1468_v29  ;;  %v1534_v19 = vld [vmem:[%s1644_s23 + $0x210] ss:$12 sps:$4 sm:$0xff]   ;;  %v1537_v21 = vld [vmem:[%s1644_s23 + $0x228] ss:$12 sps:$4 sm:$0xff]   ;;  %v1540_v23 = vld [vmem:[%s1644_s23 + $0x240] ss:$12 sps:$4 sm:$0xff]  }
  0x2d   : > { %932 = vmatprep.subr.bf16.mxu0 %v1464_v27  ;;  %v1542_v22 = vld [vmem:[%s1644_s23 + $0x244] ss:$12 sps:$4 sm:$0xff]   ;;  %v1545_v24 = vld [vmem:[%s1644_s23 + $0x25c] ss:$12 sps:$4 sm:$0xff]   ;;  %v1548_v26 = vld [vmem:[%s1644_s23 + $0x274] ss:$12 sps:$4 sm:$0xff]  }
  0x2e   : > { %v1543_v25 = vld [vmem:[%s1644_s23 + $0x258] ss:$12 sps:$4 sm:$0xff]   ;;  %v1546_v27 = vld [vmem:[%s1644_s23 + $0x270] ss:$12 sps:$4 sm:$0xff]   ;;  %v1549_v29 = vld [vmem:[%s1644_s23 + $0x288] ss:$12 sps:$4 sm:$0xff]  }
  0x2f   : > { %1368 = vmatpush3.bf16.msra.mxu1 %v1471_v32  ;;  %v1551_v28 = vld [vmem:[%s1644_s23 + $0x28c] ss:$12 sps:$4 sm:$0xff]   ;;  %v1557_v32 = vld [vmem:[%s1644_s23 + $0x2bc] ss:$12 sps:$4 sm:$0xff]  }
  0x30   : > { %933 = vmatpush1.bf16.msra.mxu0 %v1467_v30  ;;  %1369 = vmatprep.subr.bf16.mxu1 %v1473_v33  ;;  %v1554_v30 = vld [vmem:[%s1644_s23 + $0x2a4] ss:$12 sps:$4 sm:$0xff]  }
  0x31   : > { %934 = vmatprep.subr.bf16.mxu0 %v1469_v31  ;;  %v1552_v31 = vld [vmem:[%s1644_s23 + $0x2a0] ss:$12 sps:$4 sm:$0xff]   ;;  %v1555_v33 = vld [vmem:[%s1644_s23 + $0x2b8] ss:$12 sps:$4 sm:$0xff]  }
  0x33   : > { %1370 = vmatpush3.bf16.msra.mxu1 %v1476_v35  ;;  %v1558_v35 = vld [vmem:[%s1644_s23 + $0x2d0] ss:$12 sps:$4 sm:$0xff]  }
  0x34   : > { %935 = vmatpush1.bf16.msra.mxu0 %v1472_v34  ;;  %1377 = vmatprep.subr.bf16.mxu1 %v1481_v37  ;;  %v1560_v34 = vld [vmem:[%s1644_s23 + $0x2d4] ss:$12 sps:$4 sm:$0xff]  }
  0x35   : > { %936 = vmatprep.subr.bf16.mxu0 %v1474_v36  ;;  %v1563_v36 = vld [vmem:[%s1644_s23 + $0x2ec] ss:$12 sps:$4 sm:$0xff]   ;;  %v1561_v37 = vld [vmem:[%s1644_s23 + $0x2e8] ss:$12 sps:$4 sm:$0xff]  }
  0x36   : > { %1033 = vmatmul.mubr.bf16.vlgmr.msra.gmra.mrb[0].mxu1 %v1693_v40 }
  0x37   : > { %1378 = vmatpush3.bf16.msra.mxu1 %v1484_v42  ;;  %1072 = vmatprep.mubr.bf16.mxu1 %v1701_v45 }
  0x38   : > { %937 = vmatpush1.bf16.msra.mxu0 %v1477_v39  ;;  %1379 = vmatprep.subr.bf16.mxu1 %v1486_v43  ;;  %v377_v43 = vlaneseq }
  0x39   : > { %938 = vmatprep.subr.bf16.mxu0 %v1482_v41 }
  0x3b   : > { %1380 = vmatpush3.bf16.msra.mxu1 %v1489_v47 }
  0x3c   : > { %939 = vmatpush1.bf16.msra.mxu0 %v1485_v44  ;;  %1381 = vmatprep.subr.bf16.mxu1 %v1491_v48  ;;  %v378_v44 = vshrl.u32 %v377_v43, 7 }
  0x3d   : > { %940 = vmatprep.subr.bf16.mxu0 %v1487_v46  ;;  %v375_v46 = vld [vmem:[%s234_s27] sm:$0x7] }
  0x3f   : > { %1382 = vmatpush3.bf16.msra.mxu1 %v1494_v51 }
  0x40   : > { %941 = vmatpush1.bf16.msra.mxu0 %v1490_v49  ;;  %1383 = vmatprep.subr.bf16.mxu1 %v1496_v52 }
  0x41   : > { %942 = vmatprep.subr.bf16.mxu0 %v1492_v50 }
  0x43   : > { %1384 = vmatpush3.bf16.msra.mxu1 %v1499_v55 }
  0x44   : > { %943 = vmatpush1.bf16.msra.mxu0 %v1495_v53  ;;  %1385 = vmatprep.subr.bf16.mxu1 %v1501_v56 }
  0x45   : > { %944 = vmatprep.subr.bf16.mxu0 %v1497_v54 }
  0x47   : > { %1386 = vmatpush3.bf16.msra.mxu1 %v1504_v59 }
  0x48   : > { %945 = vmatpush1.bf16.msra.mxu0 %v1500_v57  ;;  %1387 = vmatprep.subr.bf16.mxu1 %v1506_v60 }
  0x49   : > { %946 = vmatprep.subr.bf16.mxu0 %v1502_v58 }
  0x4b   : > { %1388 = vmatpush3.bf16.msra.mxu1 %v1509_v63 }
  0x4c   : > { %947 = vmatpush1.bf16.msra.mxu0 %v1505_v61  ;;  %1389 = vmatprep.subr.bf16.mxu1 %v1511_v0 }
  0x4d   : > { %948 = vmatprep.subr.bf16.mxu0 %v1507_v62 }
  0x4f   : > { %1390 = vmatpush3.bf16.msra.mxu1 %v1515_v3 }
  0x50   : > { %949 = vmatpush1.bf16.msra.mxu0 %v1510_v1  ;;  %1391 = vmatprep.subr.bf16.mxu1 %v1516_v4  ;;  %v379_v1 = vsub.s32 0, %v378_v44 }
  0x51   : > { %959 = vmatprep.subr.bf16.mxu0 %v1514_v2  ;;  %v383_v2 = vsub.s32 1, %v378_v44 }
  0x52   : > { %v380_v3 = vrot.slane %v375_v46, %v379_v1 }
  0x53   : > { %951 = vmatmul.mubr.bf16.vlgmr.msra.gmra.mrb[0].mxu0 %v1693_v40  ;;  %1392 = vmatpush3.bf16.msra.mxu1 %v1520_v6  ;;  %v384_v4 = vrot.slane %v375_v46, %v383_v2 }
  0x54   : > { %960 = vmatpush1.bf16.msra.mxu0 %v1512_v5  ;;  %991 = vmatprep.mubr.bf16.mxu0 %v1701_v45  ;;  %v387_v45 = vsub.s32 2, %v378_v44 }
  0x55   : > { %961 = vmatprep.subr.bf16.mxu0 %v1519_v7 }
  0x56   : > { %1073 = vmatmul.mubr.bf16.vlgmr.msra.gmra.mrb[4].mxu1 %v1733_v8  ;;  %v388_v47 = vrot.slane %v375_v46, %v387_v45 }
  0x58   : > { %962 = vmatpush1.bf16.msra.mxu0 %v1517_v9 }
  0x59   : > { %963 = vmatprep.subr.bf16.mxu0 %v1524_v10 }
  0x5c   : > { %964 = vmatpush1.bf16.msra.mxu0 %v1522_v11 }
  0x5d   : > { %965 = vmatprep.subr.bf16.mxu0 %v1527_v12 }
  0x60   : > { %966 = vmatpush1.bf16.msra.mxu0 %v1525_v13 }
  0x61   : > { %967 = vmatprep.subr.bf16.mxu0 %v1530_v14 }
  0x64   : > { %968 = vmatpush1.bf16.msra.mxu0 %v1528_v15 }
  0x65   : > { %969 = vmatprep.subr.bf16.mxu0 %v1533_v16 }
  0x68   : > { %970 = vmatpush1.bf16.msra.mxu0 %v1531_v17 }
  0x69   : > { %971 = vmatprep.subr.bf16.mxu0 %v1536_v18 }
  0x6c   : > { %972 = vmatpush1.bf16.msra.mxu0 %v1534_v19 }
  0x6d   : > { %973 = vmatprep.subr.bf16.mxu0 %v1539_v20 }
  0x70   : > { %974 = vmatpush1.bf16.msra.mxu0 %v1537_v21 }
  0x71   : > { %975 = vmatprep.subr.bf16.mxu0 %v1542_v22 }
  0x74   : > { %976 = vmatpush1.bf16.msra.mxu0 %v1540_v23 }
  0x75   : > { %977 = vmatprep.subr.bf16.mxu0 %v1545_v24 }
  0x78   : > { %978 = vmatpush1.bf16.msra.mxu0 %v1543_v25 }
  0x79   : > { %979 = vmatprep.subr.bf16.mxu0 %v1548_v26 }
  0x7c   : > { %980 = vmatpush1.bf16.msra.mxu0 %v1546_v27 }
  0x7d   : > { %981 = vmatprep.subr.bf16.mxu0 %v1551_v28 }
  0x80   : > { %982 = vmatpush1.bf16.msra.mxu0 %v1549_v29 }
  0x81   : > { %983 = vmatprep.subr.bf16.mxu0 %v1554_v30 }
  0x84   : > { %984 = vmatpush1.bf16.msra.mxu0 %v1552_v31 }
  0x85   : > { %985 = vmatprep.subr.bf16.mxu0 %v1557_v32 }
  0x88   : > { %986 = vmatpush1.bf16.msra.mxu0 %v1555_v33 }
  0x89   : > { %987 = vmatprep.subr.bf16.mxu0 %v1560_v34 }
  0x8c   : > { %988 = vmatpush1.bf16.msra.mxu0 %v1558_v35 }
  0x8d   : > { %989 = vmatprep.subr.bf16.mxu0 %v1563_v36 }
  0x90   : > { %990 = vmatpush1.bf16.msra.mxu0 %v1561_v37 }
  0x93   : > { %992 = vmatmul.mubr.bf16.vlgmr.msra.gmra.mrb[0].mxu0 %v1733_v8 }
 0x109   : > { %v1371_v38 = vpop.f32.mrb[0].mxu1 }
 0x10a   : > { %v1372_v39 = vpop.f32.mrb[1].mxu1 }
 0x10b   : > { %v1373_v40 = vadd.f32 %v1372_v39, %v1371_v38  ;;  %v1374_v41 = vpop.f32.mrb[2].mxu1 }
 0x10c   : > { %v1375_v42 = vpop.f32.mrb[3].mxu1 }
 0x10d   : > { %v1035_v48 = vadd.f32 %v1373_v40, %v388_v47 }
 0x129   : > { %v1393_v49 = vpop.f32.mrb[4].mxu1 }
 0x12a   : > { %v1394_v50 = vpop.f32.mrb[5].mxu1 }
 0x12b   : > { %v1395_v51 = vadd.f32 %v1394_v50, %v1393_v49  ;;  %v1396_v52 = vpop.f32.mrb[6].mxu1 }
 0x12c   : > { %v1397_v53 = vpop.f32.mrb[7].mxu1 }
 0x12d   : > { %v1075_v54 = vadd.f32 %v1395_v51, %v1035_v48 }
 0x12f   : > { %v1082_v55 = vmul.f32 %v1075_v54, %v1075_v54 }
 0x131   : > { %v1085_v56 = vmul.f32 %v1082_v55, %v1075_v54 }
 0x133   : > { %v1088_v57 = vmul.f32 0.044715, %v1085_v56 }
 0x135   : > { %v1091_v58 = vadd.f32 %v1088_v57, %v1075_v54 }
 0x137   : > { %v1094_v59 = vmul.f32 0.7978846, %v1091_v58 }
 0x139   : > { %1564 = vtanh.f32 %v1094_v59 }
 0x143   : > { %v1565_v60 = vpop.eup %1564 }
 0x144   : > { %v1100_v61 = vadd.f32 1.0, %v1565_v60 }
 0x146   : > { %v1103_v62 = vmul.f32 0.5, %v1100_v61 }
 0x148   : > { %v1106_v63 = vmul.f32 %v1103_v62, %v1075_v54 }
 0x14a   : > { %v1354_v0 = vpack.c.bf16 %v1106_v63, %v1106_v63 }
 0x14c   : > { %1122 = vst.msk [vmem:[%s1776_s4 + $0x8] sm:$0xf] %vm1121_vm0, %v1354_v0 }
 0x166   : > { %v993_v5 = vpop.f32.mrb[0].mxu0 }
 0x167   : > { %v1399_v6 = vadd.f32 %v993_v5, %v380_v3  ;;  %v995_v7 = vpop.f32.mrb[1].mxu0 }
 0x168   : > { %v1400_v8 = vadd.f32 %v995_v7, %v384_v4  ;;  %v997_v9 = vpop.f32.mrb[2].mxu0 }
 0x169   : > { %v1080_v10 = vmul.f32 %v1399_v6, %v1399_v6  ;;  %v998_v11 = vpop.f32.mrb[3].mxu0 }
 0x16a   : > { %v1081_v12 = vmul.f32 %v1400_v8, %v1400_v8 }
 0x16b   : > { %v1083_v13 = vmul.f32 %v1399_v6, %v1080_v10 }
 0x16c   : > { %v1084_v14 = vmul.f32 %v1400_v8, %v1081_v12 }
 0x16d   : > { %v1086_v15 = vmul.f32 0.044715, %v1083_v13 }
 0x16e   : > { %v1087_v16 = vmul.f32 0.044715, %v1084_v14 }
 0x16f   : > { %v1089_v17 = vadd.f32 %v1399_v6, %v1086_v15 }
 0x170   : > { %v1090_v18 = vadd.f32 %v1400_v8, %v1087_v16 }
 0x171   : > { %v1092_v19 = vmul.f32 0.7978846, %v1089_v17 }
 0x172   : > { %v1093_v20 = vmul.f32 0.7978846, %v1090_v18 }
 0x173   : > { %1566 = vtanh.f32 %v1092_v19 }
 0x174   : > { %1568 = vtanh.f32 %v1093_v20 }
 0x17d   : > { %v1567_v21 = vpop.eup %1566 }
 0x17e   : > { %v1569_v22 = vpop.eup %1568  ;;  %v1098_v23 = vadd.f32 1.0, %v1567_v21 }
 0x17f   : > { %v1099_v24 = vadd.f32 1.0, %v1569_v22 }
 0x180   : > { %v1101_v25 = vmul.f32 0.5, %v1098_v23 }
 0x181   : > { %v1102_v26 = vmul.f32 0.5, %v1099_v24 }
 0x182   : > { %v1104_v27 = vmul.f32 %v1399_v6, %v1101_v25 }
 0x183   : > { %v1105_v28 = vmul.f32 %v1400_v8, %v1102_v26 }
 0x185   : > { %v1353_v29 = vpack.c.bf16 %v1105_v28, %v1104_v27 }
 0x187   : > { %1120 = vst [vmem:[%s1776_s4] sm:$0xff] %v1353_v29 }
 0x188 PF: > { %s13_s14 = sadd.s32 1, %s1592_s14   ;;  %s1793_s12 = smov %s1588_s13 }
 0x189   : > { %p10_p5 = scmp.ge.s32.totalorder %s13_s14, 4   ;;  %s1794_s13 = smov %s1796_s15 }
 0x18b   :  { %12 = sbr.rel (!%p10_p5) target bundleno = 2 (0x2), region = 68 }

// kernel: encoder_decoder_forward.9
= control target key start
LH: loop header
LB: loop body
LE: loop exit
PB: predicated region body
PF: predicated region fallthrough
CT: control target
= control target key end

     0   :  { %s3757_s12 = smov 0   ;;  %s3759_s13 = smov 0   ;;  %s4155_s0 = inlined_call_operand.vmem [shape: bf16[2,8,1280], index: 0, kind: input, shape index: {}]   ;;  %s4156_s1 = inlined_call_operand.vmem [shape: bf16[2,1280,512], index: 1, kind: input, shape index: {}]   ;;  %s4157_s2 = inlined_call_operand.vmem [shape: f32[2,1,512], index: 2, kind: input, shape index: {}]   ;;  %s4158_s3 = inlined_call_operand.vmem [shape: bf16[2,8,512], index: 3, kind: output, shape index: {}]  }
   0x1   :  { %s3761_s14 = smov 0  }
   0x2 LB: > { %s25_s15 = sadd.s32 1, %s3731_s13  ;;  %p2810_p0 = scmp.ge.s32.totalorder %s3735_s14, 1  ;;  %s3735_s14 = sphi %s3761_s14, %s13_s14   ;;  %s3731_s13 = sphi %s3759_s13, %s4160_s13   ;;  %s3727_s12 = sphi %s3757_s12, %s4159_s12  }
   0x3   : > { %p27_p1 = scmp.ge.s32.totalorder %s25_s15, 2  ;;  %p176_p2 = scmp.lt.s32.totalorder %s3735_s14, 3 }
   0x5   : > { %s4162_s15 = smov (%p27_p1, %s25_s15), 0  ;;  %p177_p3 = pnand %p2810_p0, %p176_p2 }
   0x6   : > { %p217_p4 = scmp.lt.s32.totalorder (!%p177_p3), %s3727_s12, 1 }
   0x7   : > { %180 = sbr.rel (%p177_p3) target bundleno = 586 (0x24a), region = 32 }
   0xe   : > { %s4164_s12 = smov (!%p217_p4, %s3727_s12), 1 }
   0xf   : > { %s3190_s16 = smul.u32 2560, %s4164_s12  ;;  %s2813_s24 = sshll.u32 %s4164_s12, 2 }
  0x10   : > { %s3189_s20 = smul.u32 40, %s4164_s12  ;;  %s234_s27 = scalar_lea.vmem %s4157_s2, %s2813_s24 }
  0x11   : > { %s3781_s19 = scalar_lea.vmem %s4156_s1, %s3190_s16  ;;  %s3150_s28 = sshll.u32 %s4164_s12, 4 }
  0x12   : > { %v3215_v0 = vld [vmem:[%s3781_s19 + $0x4] ss:$16 sps:$4 sm:$0xff]   ;;  %v3217_v1 = vld [vmem:[%s3781_s19 + $0xc] ss:$16 sps:$4 sm:$0xff]   ;;  %v3219_v2 = vld [vmem:[%s3781_s19] ss:$16 sps:$4 sm:$0xff]   ;;  %s3831_s23 = scalar_lea.vmem %s4155_s0, %s3189_s20  ;;  %s243_s4 = scalar_lea.vmem %s4158_s3, %s3150_s28 }
  0x13   : > { %2226 = vmatprep.subr.bf16.mxu0 %v3215_v0  ;;  %v3220_v3 = vld [vmem:[%s3781_s19 + $0x8] ss:$16 sps:$4 sm:$0xff]   ;;  %2431 = vmatprep.subr.bf16.mxu1 %v3217_v1  ;;  %v3221_v4 = vld [vmem:[%s3781_s19 + $0x24] ss:$16 sps:$4 sm:$0xff]   ;;  %v3223_v5 = vld [vmem:[%s3781_s19 + $0x2c] ss:$16 sps:$4 sm:$0xff]  }
  0x14   : > { %2227 = vmatpush1.bf16.msra.mxu0 %v3219_v2  ;;  %2432 = vmatpush1.bf16.msra.mxu1 %v3220_v3  ;;  %v3225_v6 = vld [vmem:[%s3781_s19 + $0x20] ss:$16 sps:$4 sm:$0xff]   ;;  %v3226_v7 = vld [vmem:[%s3781_s19 + $0x28] ss:$16 sps:$4 sm:$0xff]   ;;  %v3227_v8 = vld [vmem:[%s3781_s19 + $0x44] ss:$16 sps:$4 sm:$0xff]  }
  0x15   : > { %2228 = vmatprep.subr.bf16.mxu0 %v3221_v4  ;;  %2433 = vmatprep.subr.bf16.mxu1 %v3223_v5  ;;  %v3229_v9 = vld [vmem:[%s3781_s19 + $0x4c] ss:$16 sps:$4 sm:$0xff]   ;;  %v3231_v10 = vld [vmem:[%s3781_s19 + $0x40] ss:$16 sps:$4 sm:$0xff]   ;;  %v3232_v11 = vld [vmem:[%s3781_s19 + $0x48] ss:$16 sps:$4 sm:$0xff]  }
  0x16   : > { %v3233_v12 = vld [vmem:[%s3781_s19 + $0x64] ss:$16 sps:$4 sm:$0xff]   ;;  %v3235_v13 = vld [vmem:[%s3781_s19 + $0x6c] ss:$16 sps:$4 sm:$0xff]   ;;  %v3237_v14 = vld [vmem:[%s3781_s19 + $0x60] ss:$16 sps:$4 sm:$0xff]  }
  0x17   : > { %v3238_v15 = vld [vmem:[%s3781_s19 + $0x68] ss:$16 sps:$4 sm:$0xff]   ;;  %v3239_v16 = vld [vmem:[%s3781_s19 + $0x84] ss:$16 sps:$4 sm:$0xff]   ;;  %v3241_v17 = vld [vmem:[%s3781_s19 + $0x8c] ss:$16 sps:$4 sm:$0xff]  }
  0x18   : > { %2229 = vmatpush1.bf16.msra.mxu0 %v3225_v6  ;;  %2434 = vmatpush1.bf16.msra.mxu1 %v3226_v7  ;;  %v3243_v18 = vld [vmem:[%s3781_s19 + $0x80] ss:$16 sps:$4 sm:$0xff]   ;;  %v3244_v19 = vld [vmem:[%s3781_s19 + $0x88] ss:$16 sps:$4 sm:$0xff]   ;;  %v3245_v20 = vld [vmem:[%s3781_s19 + $0xa4] ss:$16 sps:$4 sm:$0xff]  }
  0x19   : > { %2230 = vmatprep.subr.bf16.mxu0 %v3227_v8  ;;  %2435 = vmatprep.subr.bf16.mxu1 %v3229_v9  ;;  %v3247_v21 = vld [vmem:[%s3781_s19 + $0xac] ss:$16 sps:$4 sm:$0xff]   ;;  %v3249_v22 = vld [vmem:[%s3781_s19 + $0xa0] ss:$16 sps:$4 sm:$0xff]   ;;  %v3250_v23 = vld [vmem:[%s3781_s19 + $0xa8] ss:$16 sps:$4 sm:$0xff]  }
  0x1a   : > { %v3251_v24 = vld [vmem:[%s3781_s19 + $0xc4] ss:$16 sps:$4 sm:$0xff]   ;;  %v3253_v25 = vld [vmem:[%s3781_s19 + $0xcc] ss:$16 sps:$4 sm:$0xff]   ;;  %v3255_v26 = vld [vmem:[%s3781_s19 + $0xc0] ss:$16 sps:$4 sm:$0xff]  }
  0x1b   : > { %v3256_v27 = vld [vmem:[%s3781_s19 + $0xc8] ss:$16 sps:$4 sm:$0xff]   ;;  %v3257_v28 = vld [vmem:[%s3781_s19 + $0xe4] ss:$16 sps:$4 sm:$0xff]   ;;  %v3259_v29 = vld [vmem:[%s3781_s19 + $0xec] ss:$16 sps:$4 sm:$0xff]  }
  0x1c   : > { %2231 = vmatpush1.bf16.msra.mxu0 %v3231_v10  ;;  %2436 = vmatpush1.bf16.msra.mxu1 %v3232_v11  ;;  %v3261_v30 = vld [vmem:[%s3781_s19 + $0xe0] ss:$16 sps:$4 sm:$0xff]   ;;  %v3262_v31 = vld [vmem:[%s3781_s19 + $0xe8] ss:$16 sps:$4 sm:$0xff]   ;;  %v3263_v32 = vld [vmem:[%s3781_s19 + $0x104] ss:$16 sps:$4 sm:$0xff]  }
  0x1d   : > { %2232 = vmatprep.subr.bf16.mxu0 %v3233_v12  ;;  %2437 = vmatprep.subr.bf16.mxu1 %v3235_v13  ;;  %v3265_v33 = vld [vmem:[%s3781_s19 + $0x10c] ss:$16 sps:$4 sm:$0xff]   ;;  %v3267_v34 = vld [vmem:[%s3781_s19 + $0x100] ss:$16 sps:$4 sm:$0xff]   ;;  %v3268_v35 = vld [vmem:[%s3781_s19 + $0x108] ss:$16 sps:$4 sm:$0xff]  }
  0x1e   : > { %v3269_v36 = vld [vmem:[%s3781_s19 + $0x124] ss:$16 sps:$4 sm:$0xff]   ;;  %v3271_v37 = vld [vmem:[%s3781_s19 + $0x12c] ss:$16 sps:$4 sm:$0xff]   ;;  %v3273_v38 = vld [vmem:[%s3781_s19 + $0x120] ss:$16 sps:$4 sm:$0xff]  }
  0x1f   : > { %v3274_v39 = vld [vmem:[%s3781_s19 + $0x128] ss:$16 sps:$4 sm:$0xff]   ;;  %v3275_v40 = vld [vmem:[%s3781_s19 + $0x144] ss:$16 sps:$4 sm:$0xff]   ;;  %v3277_v41 = vld [vmem:[%s3781_s19 + $0x14c] ss:$16 sps:$4 sm:$0xff]  }
  0x20   : > { %2233 = vmatpush1.bf16.msra.mxu0 %v3237_v14  ;;  %2438 = vmatpush1.bf16.msra.mxu1 %v3238_v15  ;;  %v3279_v42 = vld [vmem:[%s3781_s19 + $0x140] ss:$16 sps:$4 sm:$0xff]   ;;  %v3280_v43 = vld [vmem:[%s3781_s19 + $0x148] ss:$16 sps:$4 sm:$0xff]   ;;  %v3281_v44 = vld [vmem:[%s3781_s19 + $0x164] ss:$16 sps:$4 sm:$0xff]  }
  0x21   : > { %2234 = vmatprep.subr.bf16.mxu0 %v3239_v16  ;;  %2439 = vmatprep.subr.bf16.mxu1 %v3241_v17  ;;  %v3283_v45 = vld [vmem:[%s3781_s19 + $0x16c] ss:$16 sps:$4 sm:$0xff]   ;;  %v244_v46 = vld [vmem:[%s3831_s23] sm:$0xff]  ;;  %v3286_v49 = vld [vmem:[%s3781_s19 + $0x168] ss:$16 sps:$4 sm:$0xff]  }
  0x22   : > { %v3285_v47 = vld [vmem:[%s3781_s19 + $0x160] ss:$16 sps:$4 sm:$0xff]   ;;  %v2817_v48 = vcombine.high %v244_v46, %v244_v46  ;;  %v3287_v50 = vld [vmem:[%s3781_s19 + $0x184] ss:$16 sps:$4 sm:$0xff]   ;;  %v3289_v51 = vld [vmem:[%s3781_s19 + $0x18c] ss:$16 sps:$4 sm:$0xff]   ;;  %v2816_v4 = vcombine.low %v244_v46, %v244_v46 }
  0x23   : > { %v3291_v52 = vld [vmem:[%s3781_s19 + $0x180] ss:$16 sps:$4 sm:$0xff]   ;;  %v3292_v53 = vld [vmem:[%s3781_s19 + $0x188] ss:$16 sps:$4 sm:$0xff]   ;;  %v3293_v54 = vld [vmem:[%s3781_s19 + $0x1a4] ss:$16 sps:$4 sm:$0xff]  }
  0x24   : > { %2235 = vmatpush1.bf16.msra.mxu0 %v3243_v18  ;;  %2440 = vmatpush1.bf16.msra.mxu1 %v3244_v19  ;;  %v3295_v55 = vld [vmem:[%s3781_s19 + $0x1ac] ss:$16 sps:$4 sm:$0xff]   ;;  %v3297_v56 = vld [vmem:[%s3781_s19 + $0x1a0] ss:$16 sps:$4 sm:$0xff]   ;;  %v3298_v57 = vld [vmem:[%s3781_s19 + $0x1a8] ss:$16 sps:$4 sm:$0xff]  }
  0x25   : > { %2236 = vmatprep.subr.bf16.mxu0 %v3245_v20  ;;  %2441 = vmatprep.subr.bf16.mxu1 %v3247_v21  ;;  %v3299_v58 = vld [vmem:[%s3781_s19 + $0x1c4] ss:$16 sps:$4 sm:$0xff]   ;;  %v3301_v59 = vld [vmem:[%s3781_s19 + $0x1cc] ss:$16 sps:$4 sm:$0xff]   ;;  %v3303_v60 = vld [vmem:[%s3781_s19 + $0x1c0] ss:$16 sps:$4 sm:$0xff]  }
  0x26   : > { %2258 = vmatprep.mubr.bf16.mxu0 %v2817_v48  ;;  %2463 = vmatprep.mubr.bf16.mxu1 %v2817_v48  ;;  %v3304_v61 = vld [vmem:[%s3781_s19 + $0x1c8] ss:$16 sps:$4 sm:$0xff]   ;;  %v3305_v62 = vld [vmem:[%s3781_s19 + $0x1e4] ss:$16 sps:$4 sm:$0xff]   ;;  %v3307_v63 = vld [vmem:[%s3781_s19 + $0x1ec] ss:$16 sps:$4 sm:$0xff]  }
  0x27   : > { %v3309_v0 = vld [vmem:[%s3781_s19 + $0x1e0] ss:$16 sps:$4 sm:$0xff]   ;;  %v3310_v1 = vld [vmem:[%s3781_s19 + $0x1e8] ss:$16 sps:$4 sm:$0xff]   ;;  %v3315_v2 = vld [vmem:[%s3781_s19 + $0x204] ss:$16 sps:$4 sm:$0xff]  }
  0x28   : > { %2237 = vmatpush1.bf16.msra.mxu0 %v3249_v22  ;;  %2442 = vmatpush1.bf16.msra.mxu1 %v3250_v23  ;;  %v3318_v3 = vld [vmem:[%s3781_s19 + $0x20c] ss:$16 sps:$4 sm:$0xff]   ;;  %v3313_v5 = vld [vmem:[%s3781_s19 + $0x200] ss:$16 sps:$4 sm:$0xff]   ;;  %v3316_v6 = vld [vmem:[%s3781_s19 + $0x208] ss:$16 sps:$4 sm:$0xff]  }
  0x29   : > { %2238 = vmatprep.subr.bf16.mxu0 %v3251_v24  ;;  %2443 = vmatprep.subr.bf16.mxu1 %v3253_v25  ;;  %v3321_v7 = vld [vmem:[%s3781_s19 + $0x224] ss:$16 sps:$4 sm:$0xff]   ;;  %v3324_v8 = vld [vmem:[%s3781_s19 + $0x22c] ss:$16 sps:$4 sm:$0xff]   ;;  %v3319_v9 = vld [vmem:[%s3781_s19 + $0x220] ss:$16 sps:$4 sm:$0xff]  }
  0x2a   : > { %v3322_v10 = vld [vmem:[%s3781_s19 + $0x228] ss:$16 sps:$4 sm:$0xff]   ;;  %v3327_v11 = vld [vmem:[%s3781_s19 + $0x244] ss:$16 sps:$4 sm:$0xff]   ;;  %v3330_v12 = vld [vmem:[%s3781_s19 + $0x24c] ss:$16 sps:$4 sm:$0xff]  }
  0x2b   : > { %v3325_v13 = vld [vmem:[%s3781_s19 + $0x240] ss:$16 sps:$4 sm:$0xff]   ;;  %v3328_v14 = vld [vmem:[%s3781_s19 + $0x248] ss:$16 sps:$4 sm:$0xff]   ;;  %v3333_v15 = vld [vmem:[%s3781_s19 + $0x264] ss:$16 sps:$4 sm:$0xff]  }
  0x2c   : > { %2239 = vmatpush1.bf16.msra.mxu0 %v3255_v26  ;;  %2444 = vmatpush1.bf16.msra.mxu1 %v3256_v27  ;;  %v3336_v16 = vld [vmem:[%s3781_s19 + $0x26c] ss:$16 sps:$4 sm:$0xff]   ;;  %v3331_v17 = vld [vmem:[%s3781_s19 + $0x260] ss:$16 sps:$4 sm:$0xff]   ;;  %v3334_v18 = vld [vmem:[%s3781_s19 + $0x268] ss:$16 sps:$4 sm:$0xff]  }
  0x2d   : > { %2240 = vmatprep.subr.bf16.mxu0 %v3257_v28  ;;  %2445 = vmatprep.subr.bf16.mxu1 %v3259_v29  ;;  %v3339_v19 = vld [vmem:[%s3781_s19 + $0x284] ss:$16 sps:$4 sm:$0xff]   ;;  %v3342_v20 = vld [vmem:[%s3781_s19 + $0x28c] ss:$16 sps:$4 sm:$0xff]   ;;  %v3337_v21 = vld [vmem:[%s3781_s19 + $0x280] ss:$16 sps:$4 sm:$0xff]  }
  0x2e   : > { %v3340_v22 = vld [vmem:[%s3781_s19 + $0x288] ss:$16 sps:$4 sm:$0xff]   ;;  %v3345_v23 = vld [vmem:[%s3781_s19 + $0x2a4] ss:$16 sps:$4 sm:$0xff]   ;;  %v3348_v24 = vld [vmem:[%s3781_s19 + $0x2ac] ss:$16 sps:$4 sm:$0xff]  }
  0x2f   : > { %v3343_v25 = vld [vmem:[%s3781_s19 + $0x2a0] ss:$16 sps:$4 sm:$0xff]   ;;  %v3346_v26 = vld [vmem:[%s3781_s19 + $0x2a8] ss:$16 sps:$4 sm:$0xff]   ;;  %v3351_v27 = vld [vmem:[%s3781_s19 + $0x2c4] ss:$16 sps:$4 sm:$0xff]  }
  0x30   : > { %2241 = vmatpush1.bf16.msra.mxu0 %v3261_v30  ;;  %2446 = vmatpush1.bf16.msra.mxu1 %v3262_v31  ;;  %v3354_v28 = vld [vmem:[%s3781_s19 + $0x2cc] ss:$16 sps:$4 sm:$0xff]   ;;  %v3349_v31 = vld [vmem:[%s3781_s19 + $0x2c0] ss:$16 sps:$4 sm:$0xff]   ;;  %v3376_v48 = vld [vmem:[%s3781_s19 + $0x348] ss:$16 sps:$4 sm:$0xff]  }
  0x31   : > { %2242 = vmatprep.subr.bf16.mxu0 %v3263_v32  ;;  %2447 = vmatprep.subr.bf16.mxu1 %v3265_v33  ;;  %v3881_v29 = vld [vmem:[%s3831_s23 + $0x8] sm:$0xff]  ;;  %v3357_v33 = vld [vmem:[%s3781_s19 + $0x2e4] ss:$16 sps:$4 sm:$0xff]  }
  0x32   : > { %v2819_v30 = vcombine.high %v3881_v29, %v3881_v29  ;;  %v3352_v32 = vld [vmem:[%s3781_s19 + $0x2c8] ss:$16 sps:$4 sm:$0xff]   ;;  %v3378_v46 = vld [vmem:[%s3781_s19 + $0x34c] ss:$16 sps:$4 sm:$0xff]  }
  0x34   : > { %2243 = vmatpush1.bf16.msra.mxu0 %v3267_v34  ;;  %2448 = vmatpush1.bf16.msra.mxu1 %v3268_v35  ;;  %v3360_v34 = vld [vmem:[%s3781_s19 + $0x2ec] ss:$16 sps:$4 sm:$0xff]   ;;  %v3355_v35 = vld [vmem:[%s3781_s19 + $0x2e0] ss:$16 sps:$4 sm:$0xff]  }
  0x35   : > { %2244 = vmatprep.subr.bf16.mxu0 %v3269_v36  ;;  %2449 = vmatprep.subr.bf16.mxu1 %v3271_v37  ;;  %v3358_v36 = vld [vmem:[%s3781_s19 + $0x2e8] ss:$16 sps:$4 sm:$0xff]   ;;  %v3363_v37 = vld [vmem:[%s3781_s19 + $0x304] ss:$16 sps:$4 sm:$0xff]  }
  0x38   : > { %2245 = vmatpush1.bf16.msra.mxu0 %v3273_v38  ;;  %2450 = vmatpush1.bf16.msra.mxu1 %v3274_v39  ;;  %v3366_v38 = vld [vmem:[%s3781_s19 + $0x30c] ss:$16 sps:$4 sm:$0xff]   ;;  %v3361_v39 = vld [vmem:[%s3781_s19 + $0x300] ss:$16 sps:$4 sm:$0xff]  }
  0x39   : > { %2246 = vmatprep.subr.bf16.mxu0 %v3275_v40  ;;  %2451 = vmatprep.subr.bf16.mxu1 %v3277_v41  ;;  %v3364_v40 = vld [vmem:[%s3781_s19 + $0x308] ss:$16 sps:$4 sm:$0xff]   ;;  %v3369_v41 = vld [vmem:[%s3781_s19 + $0x324] ss:$16 sps:$4 sm:$0xff]  }
  0x3c   : > { %2247 = vmatpush1.bf16.msra.mxu0 %v3279_v42  ;;  %2452 = vmatpush1.bf16.msra.mxu1 %v3280_v43  ;;  %v3372_v42 = vld [vmem:[%s3781_s19 + $0x32c] ss:$16 sps:$4 sm:$0xff]   ;;  %v3367_v43 = vld [vmem:[%s3781_s19 + $0x320] ss:$16 sps:$4 sm:$0xff]  }
  0x3d   : > { %2248 = vmatprep.subr.bf16.mxu0 %v3281_v44  ;;  %2453 = vmatprep.subr.bf16.mxu1 %v3283_v45  ;;  %v3370_v44 = vld [vmem:[%s3781_s19 + $0x328] ss:$16 sps:$4 sm:$0xff]   ;;  %v3375_v45 = vld [vmem:[%s3781_s19 + $0x344] ss:$16 sps:$4 sm:$0xff]  }
  0x40   : > { %2249 = vmatpush1.bf16.msra.mxu0 %v3285_v47  ;;  %2454 = vmatpush1.bf16.msra.mxu1 %v3286_v49  ;;  %v3373_v47 = vld [vmem:[%s3781_s19 + $0x340] ss:$16 sps:$4 sm:$0xff]   ;;  %v3381_v49 = vld [vmem:[%s3781_s19 + $0x364] ss:$16 sps:$4 sm:$0xff]  }
  0x41   : > { %2250 = vmatprep.subr.bf16.mxu0 %v3287_v50  ;;  %2455 = vmatprep.subr.bf16.mxu1 %v3289_v51  ;;  %v3384_v50 = vld [vmem:[%s3781_s19 + $0x36c] ss:$16 sps:$4 sm:$0xff]   ;;  %v3379_v51 = vld [vmem:[%s3781_s19 + $0x360] ss:$16 sps:$4 sm:$0xff]  }
  0x44   : > { %2251 = vmatpush1.bf16.msra.mxu0 %v3291_v52  ;;  %2456 = vmatpush1.bf16.msra.mxu1 %v3292_v53  ;;  %v3382_v52 = vld [vmem:[%s3781_s19 + $0x368] ss:$16 sps:$4 sm:$0xff]   ;;  %v3387_v53 = vld [vmem:[%s3781_s19 + $0x384] ss:$16 sps:$4 sm:$0xff]  }
  0x45   : > { %2252 = vmatprep.subr.bf16.mxu0 %v3293_v54  ;;  %2457 = vmatprep.subr.bf16.mxu1 %v3295_v55  ;;  %v3390_v54 = vld [vmem:[%s3781_s19 + $0x38c] ss:$16 sps:$4 sm:$0xff]   ;;  %v3385_v55 = vld [vmem:[%s3781_s19 + $0x380] ss:$16 sps:$4 sm:$0xff]  }
  0x48   : > { %2253 = vmatpush1.bf16.msra.mxu0 %v3297_v56  ;;  %2458 = vmatpush1.bf16.msra.mxu1 %v3298_v57  ;;  %v3388_v56 = vld [vmem:[%s3781_s19 + $0x388] ss:$16 sps:$4 sm:$0xff]   ;;  %v3393_v57 = vld [vmem:[%s3781_s19 + $0x3a4] ss:$16 sps:$4 sm:$0xff]  }
  0x49   : > { %2254 = vmatprep.subr.bf16.mxu0 %v3299_v58  ;;  %2459 = vmatprep.subr.bf16.mxu1 %v3301_v59  ;;  %v3396_v58 = vld [vmem:[%s3781_s19 + $0x3ac] ss:$16 sps:$4 sm:$0xff]   ;;  %v3391_v59 = vld [vmem:[%s3781_s19 + $0x3a0] ss:$16 sps:$4 sm:$0xff]  }
  0x4c   : > { %2255 = vmatpush1.bf16.msra.mxu0 %v3303_v60  ;;  %2460 = vmatpush1.bf16.msra.mxu1 %v3304_v61  ;;  %v3394_v60 = vld [vmem:[%s3781_s19 + $0x3a8] ss:$16 sps:$4 sm:$0xff]   ;;  %v3399_v61 = vld [vmem:[%s3781_s19 + $0x3c4] ss:$16 sps:$4 sm:$0xff]  }
  0x4d   : > { %2256 = vmatprep.subr.bf16.mxu0 %v3305_v62  ;;  %2461 = vmatprep.subr.bf16.mxu1 %v3307_v63  ;;  %v3402_v62 = vld [vmem:[%s3781_s19 + $0x3cc] ss:$16 sps:$4 sm:$0xff]   ;;  %v3397_v63 = vld [vmem:[%s3781_s19 + $0x3c0] ss:$16 sps:$4 sm:$0xff]  }
  0x50   : > { %2257 = vmatpush1.bf16.msra.mxu0 %v3309_v0  ;;  %2462 = vmatpush1.bf16.msra.mxu1 %v3310_v1  ;;  %v3400_v0 = vld [vmem:[%s3781_s19 + $0x3c8] ss:$16 sps:$4 sm:$0xff]   ;;  %v3405_v1 = vld [vmem:[%s3781_s19 + $0x3e4] ss:$16 sps:$4 sm:$0xff]  }
  0x51   : > { %2267 = vmatprep.subr.bf16.mxu0 %v3315_v2  ;;  %2472 = vmatprep.subr.bf16.mxu1 %v3318_v3  ;;  %v3408_v2 = vld [vmem:[%s3781_s19 + $0x3ec] ss:$16 sps:$4 sm:$0xff]   ;;  %v3403_v3 = vld [vmem:[%s3781_s19 + $0x3e0] ss:$16 sps:$4 sm:$0xff]  }
  0x53   : > { %2259 = vmatmul.mubr.bf16.vlgmr.msra.gmra.mrb[0].mxu0 %v2816_v4  ;;  %2464 = vmatmul.mubr.bf16.vlgmr.msra.gmra.mrb[0].mxu1 %v2816_v4  ;;  %v3406_v4 = vld [vmem:[%s3781_s19 + $0x3e8] ss:$16 sps:$4 sm:$0xff]  }
  0x54   : > { %2268 = vmatpush1.bf16.msra.mxu0 %v3313_v5  ;;  %2473 = vmatpush1.bf16.msra.mxu1 %v3316_v6  ;;  %v3413_v5 = vld [vmem:[%s3781_s19 + $0x404] ss:$16 sps:$4 sm:$0xff]   ;;  %v3416_v6 = vld [vmem:[%s3781_s19 + $0x40c] ss:$16 sps:$4 sm:$0xff]  }
  0x55   : > { %2269 = vmatprep.subr.bf16.mxu0 %v3321_v7  ;;  %2474 = vmatprep.subr.bf16.mxu1 %v3324_v8  ;;  %v2818_v7 = vcombine.low %v3881_v29, %v3881_v29  ;;  %v3411_v8 = vld [vmem:[%s3781_s19 + $0x400] ss:$16 sps:$4 sm:$0xff]   ;;  %v3446_v29 = vld [vmem:[%s3781_s19 + $0x4ac] ss:$16 sps:$4 sm:$0xff]  }
  0x56   : > { %2299 = vmatprep.mubr.bf16.mxu0 %v2819_v30  ;;  %2504 = vmatprep.mubr.bf16.mxu1 %v2819_v30  ;;  %v3441_v30 = vld [vmem:[%s3781_s19 + $0x4a0] ss:$16 sps:$4 sm:$0xff]  }
  0x58   : > { %2270 = vmatpush1.bf16.msra.mxu0 %v3319_v9  ;;  %2475 = vmatpush1.bf16.msra.mxu1 %v3322_v10  ;;  %v3414_v9 = vld [vmem:[%s3781_s19 + $0x408] ss:$16 sps:$4 sm:$0xff]   ;;  %v3419_v10 = vld [vmem:[%s3781_s19 + $0x424] ss:$16 sps:$4 sm:$0xff]  }
  0x59   : > { %2271 = vmatprep.subr.bf16.mxu0 %v3327_v11  ;;  %2476 = vmatprep.subr.bf16.mxu1 %v3330_v12  ;;  %v3931_v11 = vld [vmem:[%s3831_s23 + $0x10] sm:$0xff]  ;;  %v3422_v12 = vld [vmem:[%s3781_s19 + $0x42c] ss:$16 sps:$4 sm:$0xff]  }
  0x5c   : > { %2272 = vmatpush1.bf16.msra.mxu0 %v3325_v13  ;;  %2477 = vmatpush1.bf16.msra.mxu1 %v3328_v14  ;;  %v2821_v13 = vcombine.high %v3931_v11, %v3931_v11  ;;  %v3417_v14 = vld [vmem:[%s3781_s19 + $0x420] ss:$16 sps:$4 sm:$0xff]  }
  0x5d   : > { %2273 = vmatprep.subr.bf16.mxu0 %v3333_v15  ;;  %2478 = vmatprep.subr.bf16.mxu1 %v3336_v16  ;;  %v3420_v15 = vld [vmem:[%s3781_s19 + $0x428] ss:$16 sps:$4 sm:$0xff]   ;;  %v3425_v16 = vld [vmem:[%s3781_s19 + $0x444] ss:$16 sps:$4 sm:$0xff]  }
  0x60   : > { %2274 = vmatpush1.bf16.msra.mxu0 %v3331_v17  ;;  %2479 = vmatpush1.bf16.msra.mxu1 %v3334_v18  ;;  %v3428_v17 = vld [vmem:[%s3781_s19 + $0x44c] ss:$16 sps:$4 sm:$0xff]   ;;  %v3423_v18 = vld [vmem:[%s3781_s19 + $0x440] ss:$16 sps:$4 sm:$0xff]  }
  0x61   : > { %2275 = vmatprep.subr.bf16.mxu0 %v3339_v19  ;;  %2480 = vmatprep.subr.bf16.mxu1 %v3342_v20  ;;  %v3426_v19 = vld [vmem:[%s3781_s19 + $0x448] ss:$16 sps:$4 sm:$0xff]   ;;  %v3431_v20 = vld [vmem:[%s3781_s19 + $0x464] ss:$16 sps:$4 sm:$0xff]  }
  0x64   : > { %2276 = vmatpush1.bf16.msra.mxu0 %v3337_v21  ;;  %2481 = vmatpush1.bf16.msra.mxu1 %v3340_v22  ;;  %v3434_v21 = vld [vmem:[%s3781_s19 + $0x46c] ss:$16 sps:$4 sm:$0xff]   ;;  %v3429_v22 = vld [vmem:[%s3781_s19 + $0x460] ss:$16 sps:$4 sm:$0xff]  }
  0x65   : > { %2277 = vmatprep.subr.bf16.mxu0 %v3345_v23  ;;  %2482 = vmatprep.subr.bf16.mxu1 %v3348_v24  ;;  %v3432_v23 = vld [vmem:[%s3781_s19 + $0x468] ss:$16 sps:$4 sm:$0xff]   ;;  %v3437_v24 = vld [vmem:[%s3781_s19 + $0x484] ss:$16 sps:$4 sm:$0xff]  }
  0x68   : > { %2278 = vmatpush1.bf16.msra.mxu0 %v3343_v25  ;;  %2483 = vmatpush1.bf16.msra.mxu1 %v3346_v26  ;;  %v3440_v25 = vld [vmem:[%s3781_s19 + $0x48c] ss:$16 sps:$4 sm:$0xff]   ;;  %v3435_v26 = vld [vmem:[%s3781_s19 + $0x480] ss:$16 sps:$4 sm:$0xff]  }
  0x69   : > { %2279 = vmatprep.subr.bf16.mxu0 %v3351_v27  ;;  %2484 = vmatprep.subr.bf16.mxu1 %v3354_v28  ;;  %v3438_v27 = vld [vmem:[%s3781_s19 + $0x488] ss:$16 sps:$4 sm:$0xff]   ;;  %v3443_v28 = vld [vmem:[%s3781_s19 + $0x4a4] ss:$16 sps:$4 sm:$0xff]  }
  0x6c   : > { %2280 = vmatpush1.bf16.msra.mxu0 %v3349_v31  ;;  %2485 = vmatpush1.bf16.msra.mxu1 %v3352_v32  ;;  %v3444_v31 = vld [vmem:[%s3781_s19 + $0x4a8] ss:$16 sps:$4 sm:$0xff]   ;;  %v3449_v32 = vld [vmem:[%s3781_s19 + $0x4c4] ss:$16 sps:$4 sm:$0xff]  }
  0x6d   : > { %2281 = vmatprep.subr.bf16.mxu0 %v3357_v33  ;;  %2486 = vmatprep.subr.bf16.mxu1 %v3360_v34  ;;  %v3452_v33 = vld [vmem:[%s3781_s19 + $0x4cc] ss:$16 sps:$4 sm:$0xff]   ;;  %v3447_v34 = vld [vmem:[%s3781_s19 + $0x4c0] ss:$16 sps:$4 sm:$0xff]  }
  0x70   : > { %2282 = vmatpush1.bf16.msra.mxu0 %v3355_v35  ;;  %2487 = vmatpush1.bf16.msra.mxu1 %v3358_v36  ;;  %v3450_v35 = vld [vmem:[%s3781_s19 + $0x4c8] ss:$16 sps:$4 sm:$0xff]   ;;  %v3455_v36 = vld [vmem:[%s3781_s19 + $0x4e4] ss:$16 sps:$4 sm:$0xff]  }
  0x71   : > { %2283 = vmatprep.subr.bf16.mxu0 %v3363_v37  ;;  %2488 = vmatprep.subr.bf16.mxu1 %v3366_v38  ;;  %v3458_v37 = vld [vmem:[%s3781_s19 + $0x4ec] ss:$16 sps:$4 sm:$0xff]   ;;  %v3453_v38 = vld [vmem:[%s3781_s19 + $0x4e0] ss:$16 sps:$4 sm:$0xff]  }
  0x74   : > { %2284 = vmatpush1.bf16.msra.mxu0 %v3361_v39  ;;  %2489 = vmatpush1.bf16.msra.mxu1 %v3364_v40  ;;  %v3456_v39 = vld [vmem:[%s3781_s19 + $0x4e8] ss:$16 sps:$4 sm:$0xff]   ;;  %v3461_v40 = vld [vmem:[%s3781_s19 + $0x504] ss:$16 sps:$4 sm:$0xff]  }
  0x75   : > { %2285 = vmatprep.subr.bf16.mxu0 %v3369_v41  ;;  %2490 = vmatprep.subr.bf16.mxu1 %v3372_v42  ;;  %v3464_v41 = vld [vmem:[%s3781_s19 + $0x50c] ss:$16 sps:$4 sm:$0xff]   ;;  %v3459_v42 = vld [vmem:[%s3781_s19 + $0x500] ss:$16 sps:$4 sm:$0xff]  }
  0x78   : > { %2286 = vmatpush1.bf16.msra.mxu0 %v3367_v43  ;;  %2491 = vmatpush1.bf16.msra.mxu1 %v3370_v44  ;;  %v3462_v43 = vld [vmem:[%s3781_s19 + $0x508] ss:$16 sps:$4 sm:$0xff]   ;;  %v3467_v44 = vld [vmem:[%s3781_s19 + $0x524] ss:$16 sps:$4 sm:$0xff]  }
  0x79   : > { %2287 = vmatprep.subr.bf16.mxu0 %v3375_v45  ;;  %2492 = vmatprep.subr.bf16.mxu1 %v3378_v46  ;;  %v3470_v45 = vld [vmem:[%s3781_s19 + $0x52c] ss:$16 sps:$4 sm:$0xff]   ;;  %v3465_v46 = vld [vmem:[%s3781_s19 + $0x520] ss:$16 sps:$4 sm:$0xff]  }
  0x7c   : > { %2288 = vmatpush1.bf16.msra.mxu0 %v3373_v47  ;;  %2493 = vmatpush1.bf16.msra.mxu1 %v3376_v48  ;;  %v3468_v47 = vld [vmem:[%s3781_s19 + $0x528] ss:$16 sps:$4 sm:$0xff]   ;;  %v3473_v48 = vld [vmem:[%s3781_s19 + $0x544] ss:$16 sps:$4 sm:$0xff]  }
  0x7d   : > { %2289 = vmatprep.subr.bf16.mxu0 %v3381_v49  ;;  %2494 = vmatprep.subr.bf16.mxu1 %v3384_v50  ;;  %v3476_v49 = vld [vmem:[%s3781_s19 + $0x54c] ss:$16 sps:$4 sm:$0xff]   ;;  %v3471_v50 = vld [vmem:[%s3781_s19 + $0x540] ss:$16 sps:$4 sm:$0xff]  }
  0x80   : > { %2290 = vmatpush1.bf16.msra.mxu0 %v3379_v51  ;;  %2495 = vmatpush1.bf16.msra.mxu1 %v3382_v52  ;;  %v3474_v51 = vld [vmem:[%s3781_s19 + $0x548] ss:$16 sps:$4 sm:$0xff]   ;;  %v3479_v52 = vld [vmem:[%s3781_s19 + $0x564] ss:$16 sps:$4 sm:$0xff]  }
  0x81   : > { %2291 = vmatprep.subr.bf16.mxu0 %v3387_v53  ;;  %2496 = vmatprep.subr.bf16.mxu1 %v3390_v54  ;;  %v3482_v53 = vld [vmem:[%s3781_s19 + $0x56c] ss:$16 sps:$4 sm:$0xff]   ;;  %v3477_v54 = vld [vmem:[%s3781_s19 + $0x560] ss:$16 sps:$4 sm:$0xff]  }
  0x84   : > { %2292 = vmatpush1.bf16.msra.mxu0 %v3385_v55  ;;  %2497 = vmatpush1.bf16.msra.mxu1 %v3388_v56  ;;  %v3480_v55 = vld [vmem:[%s3781_s19 + $0x568] ss:$16 sps:$4 sm:$0xff]   ;;  %v3485_v56 = vld [vmem:[%s3781_s19 + $0x584] ss:$16 sps:$4 sm:$0xff]  }
  0x85   : > { %2293 = vmatprep.subr.bf16.mxu0 %v3393_v57  ;;  %2498 = vmatprep.subr.bf16.mxu1 %v3396_v58  ;;  %v3488_v57 = vld [vmem:[%s3781_s19 + $0x58c] ss:$16 sps:$4 sm:$0xff]   ;;  %v3483_v58 = vld [vmem:[%s3781_s19 + $0x580] ss:$16 sps:$4 sm:$0xff]  }
  0x88   : > { %2294 = vmatpush1.bf16.msra.mxu0 %v3391_v59  ;;  %2499 = vmatpush1.bf16.msra.mxu1 %v3394_v60  ;;  %v3486_v59 = vld [vmem:[%s3781_s19 + $0x588] ss:$16 sps:$4 sm:$0xff]   ;;  %v3491_v60 = vld [vmem:[%s3781_s19 + $0x5a4] ss:$16 sps:$4 sm:$0xff]  }
  0x89   : > { %2295 = vmatprep.subr.bf16.mxu0 %v3399_v61  ;;  %2500 = vmatprep.subr.bf16.mxu1 %v3402_v62  ;;  %v3494_v61 = vld [vmem:[%s3781_s19 + $0x5ac] ss:$16 sps:$4 sm:$0xff]   ;;  %v3489_v62 = vld [vmem:[%s3781_s19 + $0x5a0] ss:$16 sps:$4 sm:$0xff]  }
  0x8c   : > { %2296 = vmatpush1.bf16.msra.mxu0 %v3397_v63  ;;  %2501 = vmatpush1.bf16.msra.mxu1 %v3400_v0  ;;  %v3492_v63 = vld [vmem:[%s3781_s19 + $0x5a8] ss:$16 sps:$4 sm:$0xff]   ;;  %v3497_v0 = vld [vmem:[%s3781_s19 + $0x5c4] ss:$16 sps:$4 sm:$0xff]  }
  0x8d   : > { %2297 = vmatprep.subr.bf16.mxu0 %v3405_v1  ;;  %2502 = vmatprep.subr.bf16.mxu1 %v3408_v2  ;;  %v3500_v1 = vld [vmem:[%s3781_s19 + $0x5cc] ss:$16 sps:$4 sm:$0xff]   ;;  %v3495_v2 = vld [vmem:[%s3781_s19 + $0x5c0] ss:$16 sps:$4 sm:$0xff]  }
  0x90   : > { %2298 = vmatpush1.bf16.msra.mxu0 %v3403_v3  ;;  %2503 = vmatpush1.bf16.msra.mxu1 %v3406_v4  ;;  %v3498_v3 = vld [vmem:[%s3781_s19 + $0x5c8] ss:$16 sps:$4 sm:$0xff]   ;;  %v3503_v4 = vld [vmem:[%s3781_s19 + $0x5e4] ss:$16 sps:$4 sm:$0xff]  }
  0x91   : > { %2308 = vmatprep.subr.bf16.mxu0 %v3413_v5  ;;  %2513 = vmatprep.subr.bf16.mxu1 %v3416_v6  ;;  %v3506_v5 = vld [vmem:[%s3781_s19 + $0x5ec] ss:$16 sps:$4 sm:$0xff]   ;;  %v3501_v6 = vld [vmem:[%s3781_s19 + $0x5e0] ss:$16 sps:$4 sm:$0xff]  }
  0x93   : > { %2300 = vmatmul.mubr.bf16.vlgmr.msra.gmra.mrb[0].mxu0 %v2818_v7  ;;  %2505 = vmatmul.mubr.bf16.vlgmr.msra.gmra.mrb[0].mxu1 %v2818_v7  ;;  %v3504_v7 = vld [vmem:[%s3781_s19 + $0x5e8] ss:$16 sps:$4 sm:$0xff]  }
  0x94   : > { %2309 = vmatpush1.bf16.msra.mxu0 %v3411_v8  ;;  %2514 = vmatpush1.bf16.msra.mxu1 %v3414_v9  ;;  %v3511_v8 = vld [vmem:[%s3781_s19 + $0x604] ss:$16 sps:$4 sm:$0xff]   ;;  %v3514_v9 = vld [vmem:[%s3781_s19 + $0x60c] ss:$16 sps:$4 sm:$0xff]  }
  0x95   : > { %2310 = vmatprep.subr.bf16.mxu0 %v3419_v10  ;;  %2515 = vmatprep.subr.bf16.mxu1 %v3422_v12  ;;  %v3509_v10 = vld [vmem:[%s3781_s19 + $0x600] ss:$16 sps:$4 sm:$0xff]   ;;  %v2820_v12 = vcombine.low %v3931_v11, %v3931_v11 }
  0x96   : > { %2340 = vmatprep.mubr.bf16.mxu0 %v2821_v13  ;;  %2545 = vmatprep.mubr.bf16.mxu1 %v2821_v13  ;;  %v3512_v13 = vld [vmem:[%s3781_s19 + $0x608] ss:$16 sps:$4 sm:$0xff]   ;;  %v3515_v11 = vld [vmem:[%s3781_s19 + $0x620] ss:$16 sps:$4 sm:$0xff]  }
  0x98   : > { %2311 = vmatpush1.bf16.msra.mxu0 %v3417_v14  ;;  %2516 = vmatpush1.bf16.msra.mxu1 %v3420_v15  ;;  %v4001_v14 = vld [vmem:[%s3831_s23 + $0x18] sm:$0xff]  ;;  %v3517_v15 = vld [vmem:[%s3781_s19 + $0x624] ss:$16 sps:$4 sm:$0xff]  }
  0x99   : > { %2312 = vmatprep.subr.bf16.mxu0 %v3425_v16  ;;  %2517 = vmatprep.subr.bf16.mxu1 %v3428_v17  ;;  %v3520_v16 = vld [vmem:[%s3781_s19 + $0x62c] ss:$16 sps:$4 sm:$0xff]   ;;  %v2823_v17 = vcombine.high %v4001_v14, %v4001_v14 }
  0x9c   : > { %2313 = vmatpush1.bf16.msra.mxu0 %v3423_v18  ;;  %2518 = vmatpush1.bf16.msra.mxu1 %v3426_v19  ;;  %v3518_v18 = vld [vmem:[%s3781_s19 + $0x628] ss:$16 sps:$4 sm:$0xff]   ;;  %v3523_v19 = vld [vmem:[%s3781_s19 + $0x644] ss:$16 sps:$4 sm:$0xff]  }
  0x9d   : > { %2314 = vmatprep.subr.bf16.mxu0 %v3431_v20  ;;  %2519 = vmatprep.subr.bf16.mxu1 %v3434_v21  ;;  %v3526_v20 = vld [vmem:[%s3781_s19 + $0x64c] ss:$16 sps:$4 sm:$0xff]   ;;  %v3521_v21 = vld [vmem:[%s3781_s19 + $0x640] ss:$16 sps:$4 sm:$0xff]  }
  0xa0   : > { %2315 = vmatpush1.bf16.msra.mxu0 %v3429_v22  ;;  %2520 = vmatpush1.bf16.msra.mxu1 %v3432_v23  ;;  %v3524_v22 = vld [vmem:[%s3781_s19 + $0x648] ss:$16 sps:$4 sm:$0xff]   ;;  %v3529_v23 = vld [vmem:[%s3781_s19 + $0x664] ss:$16 sps:$4 sm:$0xff]  }
  0xa1   : > { %2316 = vmatprep.subr.bf16.mxu0 %v3437_v24  ;;  %2521 = vmatprep.subr.bf16.mxu1 %v3440_v25  ;;  %v3532_v24 = vld [vmem:[%s3781_s19 + $0x66c] ss:$16 sps:$4 sm:$0xff]   ;;  %v3527_v25 = vld [vmem:[%s3781_s19 + $0x660] ss:$16 sps:$4 sm:$0xff]  }
  0xa4   : > { %2317 = vmatpush1.bf16.msra.mxu0 %v3435_v26  ;;  %2522 = vmatpush1.bf16.msra.mxu1 %v3438_v27  ;;  %v3530_v26 = vld [vmem:[%s3781_s19 + $0x668] ss:$16 sps:$4 sm:$0xff]   ;;  %v3535_v27 = vld [vmem:[%s3781_s19 + $0x684] ss:$16 sps:$4 sm:$0xff]  }
  0xa5   : > { %2318 = vmatprep.subr.bf16.mxu0 %v3443_v28  ;;  %2523 = vmatprep.subr.bf16.mxu1 %v3446_v29  ;;  %v3538_v28 = vld [vmem:[%s3781_s19 + $0x68c] ss:$16 sps:$4 sm:$0xff]   ;;  %v3533_v29 = vld [vmem:[%s3781_s19 + $0x680] ss:$16 sps:$4 sm:$0xff]  }
  0xa8   : > { %2319 = vmatpush1.bf16.msra.mxu0 %v3441_v30  ;;  %2524 = vmatpush1.bf16.msra.mxu1 %v3444_v31  ;;  %v3536_v30 = vld [vmem:[%s3781_s19 + $0x688] ss:$16 sps:$4 sm:$0xff]   ;;  %v3541_v31 = vld [vmem:[%s3781_s19 + $0x6a4] ss:$16 sps:$4 sm:$0xff]  }
  0xa9   : > { %2320 = vmatprep.subr.bf16.mxu0 %v3449_v32  ;;  %2525 = vmatprep.subr.bf16.mxu1 %v3452_v33  ;;  %v3544_v32 = vld [vmem:[%s3781_s19 + $0x6ac] ss:$16 sps:$4 sm:$0xff]   ;;  %v3539_v33 = vld [vmem:[%s3781_s19 + $0x6a0] ss:$16 sps:$4 sm:$0xff]  }
  0xac   : > { %2321 = vmatpush1.bf16.msra.mxu0 %v3447_v34  ;;  %2526 = vmatpush1.bf16.msra.mxu1 %v3450_v35  ;;  %v3542_v34 = vld [vmem:[%s3781_s19 + $0x6a8] ss:$16 sps:$4 sm:$0xff]   ;;  %v3547_v35 = vld [vmem:[%s3781_s19 + $0x6c4] ss:$16 sps:$4 sm:$0xff]  }
  0xad   : > { %2322 = vmatprep.subr.bf16.mxu0 %v3455_v36  ;;  %2527 = vmatprep.subr.bf16.mxu1 %v3458_v37  ;;  %v3550_v36 = vld [vmem:[%s3781_s19 + $0x6cc] ss:$16 sps:$4 sm:$0xff]   ;;  %v3545_v37 = vld [vmem:[%s3781_s19 + $0x6c0] ss:$16 sps:$4 sm:$0xff]  }
  0xb0   : > { %2323 = vmatpush1.bf16.msra.mxu0 %v3453_v38  ;;  %2528 = vmatpush1.bf16.msra.mxu1 %v3456_v39  ;;  %v3548_v38 = vld [vmem:[%s3781_s19 + $0x6c8] ss:$16 sps:$4 sm:$0xff]   ;;  %v3553_v39 = vld [vmem:[%s3781_s19 + $0x6e4] ss:$16 sps:$4 sm:$0xff]  }
  0xb1   : > { %2324 = vmatprep.subr.bf16.mxu0 %v3461_v40  ;;  %2529 = vmatprep.subr.bf16.mxu1 %v3464_v41  ;;  %v3556_v40 = vld [vmem:[%s3781_s19 + $0x6ec] ss:$16 sps:$4 sm:$0xff]   ;;  %v3551_v41 = vld [vmem:[%s3781_s19 + $0x6e0] ss:$16 sps:$4 sm:$0xff]  }
  0xb4   : > { %2325 = vmatpush1.bf16.msra.mxu0 %v3459_v42  ;;  %2530 = vmatpush1.bf16.msra.mxu1 %v3462_v43  ;;  %v3554_v42 = vld [vmem:[%s3781_s19 + $0x6e8] ss:$16 sps:$4 sm:$0xff]   ;;  %v3559_v43 = vld [vmem:[%s3781_s19 + $0x704] ss:$16 sps:$4 sm:$0xff]  }
  0xb5   : > { %2326 = vmatprep.subr.bf16.mxu0 %v3467_v44  ;;  %2531 = vmatprep.subr.bf16.mxu1 %v3470_v45  ;;  %v3562_v44 = vld [vmem:[%s3781_s19 + $0x70c] ss:$16 sps:$4 sm:$0xff]   ;;  %v3557_v45 = vld [vmem:[%s3781_s19 + $0x700] ss:$16 sps:$4 sm:$0xff]  }
  0xb8   : > { %2327 = vmatpush1.bf16.msra.mxu0 %v3465_v46  ;;  %2532 = vmatpush1.bf16.msra.mxu1 %v3468_v47  ;;  %v3560_v46 = vld [vmem:[%s3781_s19 + $0x708] ss:$16 sps:$4 sm:$0xff]   ;;  %v3565_v47 = vld [vmem:[%s3781_s19 + $0x724] ss:$16 sps:$4 sm:$0xff]  }
  0xb9   : > { %2328 = vmatprep.subr.bf16.mxu0 %v3473_v48  ;;  %2533 = vmatprep.subr.bf16.mxu1 %v3476_v49  ;;  %v3568_v48 = vld [vmem:[%s3781_s19 + $0x72c] ss:$16 sps:$4 sm:$0xff]   ;;  %v3563_v49 = vld [vmem:[%s3781_s19 + $0x720] ss:$16 sps:$4 sm:$0xff]  }
  0xbc   : > { %2329 = vmatpush1.bf16.msra.mxu0 %v3471_v50  ;;  %2534 = vmatpush1.bf16.msra.mxu1 %v3474_v51  ;;  %v3566_v50 = vld [vmem:[%s3781_s19 + $0x728] ss:$16 sps:$4 sm:$0xff]   ;;  %v3571_v51 = vld [vmem:[%s3781_s19 + $0x744] ss:$16 sps:$4 sm:$0xff]  }
  0xbd   : > { %2330 = vmatprep.subr.bf16.mxu0 %v3479_v52  ;;  %2535 = vmatprep.subr.bf16.mxu1 %v3482_v53  ;;  %v3574_v52 = vld [vmem:[%s3781_s19 + $0x74c] ss:$16 sps:$4 sm:$0xff]   ;;  %v3569_v53 = vld [vmem:[%s3781_s19 + $0x740] ss:$16 sps:$4 sm:$0xff]  }
  0xc0   : > { %2331 = vmatpush1.bf16.msra.mxu0 %v3477_v54  ;;  %2536 = vmatpush1.bf16.msra.mxu1 %v3480_v55  ;;  %v3572_v54 = vld [vmem:[%s3781_s19 + $0x748] ss:$16 sps:$4 sm:$0xff]   ;;  %v3577_v55 = vld [vmem:[%s3781_s19 + $0x764] ss:$16 sps:$4 sm:$0xff]  }
  0xc1   : > { %2332 = vmatprep.subr.bf16.mxu0 %v3485_v56  ;;  %2537 = vmatprep.subr.bf16.mxu1 %v3488_v57  ;;  %v3580_v56 = vld [vmem:[%s3781_s19 + $0x76c] ss:$16 sps:$4 sm:$0xff]   ;;  %v3575_v57 = vld [vmem:[%s3781_s19 + $0x760] ss:$16 sps:$4 sm:$0xff]  }
  0xc4   : > { %2333 = vmatpush1.bf16.msra.mxu0 %v3483_v58  ;;  %2538 = vmatpush1.bf16.msra.mxu1 %v3486_v59  ;;  %v3578_v58 = vld [vmem:[%s3781_s19 + $0x768] ss:$16 sps:$4 sm:$0xff]   ;;  %v3583_v59 = vld [vmem:[%s3781_s19 + $0x784] ss:$16 sps:$4 sm:$0xff]  }
  0xc5   : > { %2334 = vmatprep.subr.bf16.mxu0 %v3491_v60  ;;  %2539 = vmatprep.subr.bf16.mxu1 %v3494_v61  ;;  %v3586_v60 = vld [vmem:[%s3781_s19 + $0x78c] ss:$16 sps:$4 sm:$0xff]   ;;  %v3581_v61 = vld [vmem:[%s3781_s19 + $0x780] ss:$16 sps:$4 sm:$0xff]  }
  0xc8   : > { %2335 = vmatpush1.bf16.msra.mxu0 %v3489_v62  ;;  %2540 = vmatpush1.bf16.msra.mxu1 %v3492_v63  ;;  %v3584_v62 = vld [vmem:[%s3781_s19 + $0x788] ss:$16 sps:$4 sm:$0xff]   ;;  %v3589_v63 = vld [vmem:[%s3781_s19 + $0x7a4] ss:$16 sps:$4 sm:$0xff]  }
  0xc9   : > { %2336 = vmatprep.subr.bf16.mxu0 %v3497_v0  ;;  %2541 = vmatprep.subr.bf16.mxu1 %v3500_v1  ;;  %v3592_v0 = vld [vmem:[%s3781_s19 + $0x7ac] ss:$16 sps:$4 sm:$0xff]   ;;  %v3587_v1 = vld [vmem:[%s3781_s19 + $0x7a0] ss:$16 sps:$4 sm:$0xff]  }
  0xcc   : > { %2337 = vmatpush1.bf16.msra.mxu0 %v3495_v2  ;;  %2542 = vmatpush1.bf16.msra.mxu1 %v3498_v3  ;;  %v3590_v2 = vld [vmem:[%s3781_s19 + $0x7a8] ss:$16 sps:$4 sm:$0xff]   ;;  %v3595_v3 = vld [vmem:[%s3781_s19 + $0x7c4] ss:$16 sps:$4 sm:$0xff]  }
  0xcd   : > { %2338 = vmatprep.subr.bf16.mxu0 %v3503_v4  ;;  %2543 = vmatprep.subr.bf16.mxu1 %v3506_v5  ;;  %v3598_v4 = vld [vmem:[%s3781_s19 + $0x7cc] ss:$16 sps:$4 sm:$0xff]   ;;  %v3593_v5 = vld [vmem:[%s3781_s19 + $0x7c0] ss:$16 sps:$4 sm:$0xff]  }
  0xd0   : > { %2339 = vmatpush1.bf16.msra.mxu0 %v3501_v6  ;;  %2544 = vmatpush1.bf16.msra.mxu1 %v3504_v7  ;;  %v3596_v6 = vld [vmem:[%s3781_s19 + $0x7c8] ss:$16 sps:$4 sm:$0xff]   ;;  %v3601_v7 = vld [vmem:[%s3781_s19 + $0x7e4] ss:$16 sps:$4 sm:$0xff]  }
  0xd1   : > { %2349 = vmatprep.subr.bf16.mxu0 %v3511_v8  ;;  %2554 = vmatprep.subr.bf16.mxu1 %v3514_v9  ;;  %v3604_v8 = vld [vmem:[%s3781_s19 + $0x7ec] ss:$16 sps:$4 sm:$0xff]   ;;  %v3599_v9 = vld [vmem:[%s3781_s19 + $0x7e0] ss:$16 sps:$4 sm:$0xff]  }
  0xd3   : > { %2341 = vmatmul.mubr.bf16.vlgmr.msra.gmra.mrb[0].mxu0 %v2820_v12  ;;  %2546 = vmatmul.mubr.bf16.vlgmr.msra.gmra.mrb[0].mxu1 %v2820_v12  ;;  %v3609_v12 = vld [vmem:[%s3781_s19 + $0x804] ss:$16 sps:$4 sm:$0xff]  }
  0xd4   : > { %2350 = vmatpush1.bf16.msra.mxu0 %v3509_v10  ;;  %2555 = vmatpush1.bf16.msra.mxu1 %v3512_v13  ;;  %v3602_v10 = vld [vmem:[%s3781_s19 + $0x7e8] ss:$16 sps:$4 sm:$0xff]   ;;  %v3612_v13 = vld [vmem:[%s3781_s19 + $0x80c] ss:$16 sps:$4 sm:$0xff]  }
  0xd5   : > { %2351 = vmatprep.subr.bf16.mxu0 %v3517_v15  ;;  %2556 = vmatprep.subr.bf16.mxu1 %v3520_v16  ;;  %v2822_v15 = vcombine.low %v4001_v14, %v4001_v14  ;;  %v4070_v16 = vld [vmem:[%s3831_s23 + $0x20] sm:$0xff] }
  0xd6   : > { %2381 = vmatprep.mubr.bf16.mxu0 %v2823_v17  ;;  %2586 = vmatprep.mubr.bf16.mxu1 %v2823_v17  ;;  %v3607_v17 = vld [vmem:[%s3781_s19 + $0x800] ss:$16 sps:$4 sm:$0xff]  }
  0xd7   : > { %v3613_v14 = vld [vmem:[%s3781_s19 + $0x820] ss:$16 sps:$4 sm:$0xff]  }
  0xd8   : > { %2352 = vmatpush1.bf16.msra.mxu0 %v3515_v11  ;;  %2557 = vmatpush1.bf16.msra.mxu1 %v3518_v18  ;;  %v3610_v11 = vld [vmem:[%s3781_s19 + $0x808] ss:$16 sps:$4 sm:$0xff]   ;;  %v3615_v18 = vld [vmem:[%s3781_s19 + $0x824] ss:$16 sps:$4 sm:$0xff]  }
  0xd9   : > { %2353 = vmatprep.subr.bf16.mxu0 %v3523_v19  ;;  %2558 = vmatprep.subr.bf16.mxu1 %v3526_v20  ;;  %v3618_v19 = vld [vmem:[%s3781_s19 + $0x82c] ss:$16 sps:$4 sm:$0xff]   ;;  %v2825_v20 = vcombine.high %v4070_v16, %v4070_v16 }
  0xdc   : > { %2354 = vmatpush1.bf16.msra.mxu0 %v3521_v21  ;;  %2559 = vmatpush1.bf16.msra.mxu1 %v3524_v22  ;;  %v3616_v21 = vld [vmem:[%s3781_s19 + $0x828] ss:$16 sps:$4 sm:$0xff]   ;;  %v3621_v22 = vld [vmem:[%s3781_s19 + $0x844] ss:$16 sps:$4 sm:$0xff]  }
  0xdd   : > { %2355 = vmatprep.subr.bf16.mxu0 %v3529_v23  ;;  %2560 = vmatprep.subr.bf16.mxu1 %v3532_v24  ;;  %v3624_v23 = vld [vmem:[%s3781_s19 + $0x84c] ss:$16 sps:$4 sm:$0xff]   ;;  %v3619_v24 = vld [vmem:[%s3781_s19 + $0x840] ss:$16 sps:$4 sm:$0xff]  }
  0xe0   : > { %2356 = vmatpush1.bf16.msra.mxu0 %v3527_v25  ;;  %2561 = vmatpush1.bf16.msra.mxu1 %v3530_v26  ;;  %v3622_v25 = vld [vmem:[%s3781_s19 + $0x848] ss:$16 sps:$4 sm:$0xff]   ;;  %v3627_v26 = vld [vmem:[%s3781_s19 + $0x864] ss:$16 sps:$4 sm:$0xff]  }
  0xe1   : > { %2357 = vmatprep.subr.bf16.mxu0 %v3535_v27  ;;  %2562 = vmatprep.subr.bf16.mxu1 %v3538_v28  ;;  %v3630_v27 = vld [vmem:[%s3781_s19 + $0x86c] ss:$16 sps:$4 sm:$0xff]   ;;  %v3625_v28 = vld [vmem:[%s3781_s19 + $0x860] ss:$16 sps:$4 sm:$0xff]  }
  0xe4   : > { %2358 = vmatpush1.bf16.msra.mxu0 %v3533_v29  ;;  %2563 = vmatpush1.bf16.msra.mxu1 %v3536_v30  ;;  %v3628_v29 = vld [vmem:[%s3781_s19 + $0x868] ss:$16 sps:$4 sm:$0xff]   ;;  %v3633_v30 = vld [vmem:[%s3781_s19 + $0x884] ss:$16 sps:$4 sm:$0xff]  }
  0xe5   : > { %2359 = vmatprep.subr.bf16.mxu0 %v3541_v31  ;;  %2564 = vmatprep.subr.bf16.mxu1 %v3544_v32  ;;  %v3636_v31 = vld [vmem:[%s3781_s19 + $0x88c] ss:$16 sps:$4 sm:$0xff]   ;;  %v3631_v32 = vld [vmem:[%s3781_s19 + $0x880] ss:$16 sps:$4 sm:$0xff]  }
  0xe8   : > { %2360 = vmatpush1.bf16.msra.mxu0 %v3539_v33  ;;  %2565 = vmatpush1.bf16.msra.mxu1 %v3542_v34  ;;  %v3634_v33 = vld [vmem:[%s3781_s19 + $0x888] ss:$16 sps:$4 sm:$0xff]   ;;  %v3639_v34 = vld [vmem:[%s3781_s19 + $0x8a4] ss:$16 sps:$4 sm:$0xff]  }
  0xe9   : > { %2361 = vmatprep.subr.bf16.mxu0 %v3547_v35  ;;  %2566 = vmatprep.subr.bf16.mxu1 %v3550_v36  ;;  %v3642_v35 = vld [vmem:[%s3781_s19 + $0x8ac] ss:$16 sps:$4 sm:$0xff]   ;;  %v3637_v36 = vld [vmem:[%s3781_s19 + $0x8a0] ss:$16 sps:$4 sm:$0xff]  }
  0xec   : > { %2362 = vmatpush1.bf16.msra.mxu0 %v3545_v37  ;;  %2567 = vmatpush1.bf16.msra.mxu1 %v3548_v38  ;;  %v3640_v37 = vld [vmem:[%s3781_s19 + $0x8a8] ss:$16 sps:$4 sm:$0xff]   ;;  %v3645_v38 = vld [vmem:[%s3781_s19 + $0x8c4] ss:$16 sps:$4 sm:$0xff]  }
  0xed   : > { %2363 = vmatprep.subr.bf16.mxu0 %v3553_v39  ;;  %2568 = vmatprep.subr.bf16.mxu1 %v3556_v40  ;;  %v3648_v39 = vld [vmem:[%s3781_s19 + $0x8cc] ss:$16 sps:$4 sm:$0xff]   ;;  %v3643_v40 = vld [vmem:[%s3781_s19 + $0x8c0] ss:$16 sps:$4 sm:$0xff]  }
  0xf0   : > { %2364 = vmatpush1.bf16.msra.mxu0 %v3551_v41  ;;  %2569 = vmatpush1.bf16.msra.mxu1 %v3554_v42  ;;  %v3646_v41 = vld [vmem:[%s3781_s19 + $0x8c8] ss:$16 sps:$4 sm:$0xff]   ;;  %v3651_v42 = vld [vmem:[%s3781_s19 + $0x8e4] ss:$16 sps:$4 sm:$0xff]  }
  0xf1   : > { %2365 = vmatprep.subr.bf16.mxu0 %v3559_v43  ;;  %2570 = vmatprep.subr.bf16.mxu1 %v3562_v44  ;;  %v3654_v43 = vld [vmem:[%s3781_s19 + $0x8ec] ss:$16 sps:$4 sm:$0xff]   ;;  %v3649_v44 = vld [vmem:[%s3781_s19 + $0x8e0] ss:$16 sps:$4 sm:$0xff]  }
  0xf4   : > { %2366 = vmatpush1.bf16.msra.mxu0 %v3557_v45  ;;  %2571 = vmatpush1.bf16.msra.mxu1 %v3560_v46  ;;  %v3652_v45 = vld [vmem:[%s3781_s19 + $0x8e8] ss:$16 sps:$4 sm:$0xff]   ;;  %v3657_v46 = vld [vmem:[%s3781_s19 + $0x904] ss:$16 sps:$4 sm:$0xff]  }
  0xf5   : > { %2367 = vmatprep.subr.bf16.mxu0 %v3565_v47  ;;  %2572 = vmatprep.subr.bf16.mxu1 %v3568_v48  ;;  %v3660_v47 = vld [vmem:[%s3781_s19 + $0x90c] ss:$16 sps:$4 sm:$0xff]   ;;  %v3655_v48 = vld [vmem:[%s3781_s19 + $0x900] ss:$16 sps:$4 sm:$0xff]  }
  0xf8   : > { %2368 = vmatpush1.bf16.msra.mxu0 %v3563_v49  ;;  %2573 = vmatpush1.bf16.msra.mxu1 %v3566_v50  ;;  %v3658_v49 = vld [vmem:[%s3781_s19 + $0x908] ss:$16 sps:$4 sm:$0xff]   ;;  %v3663_v50 = vld [vmem:[%s3781_s19 + $0x924] ss:$16 sps:$4 sm:$0xff]  }
  0xf9   : > { %2369 = vmatprep.subr.bf16.mxu0 %v3571_v51  ;;  %2574 = vmatprep.subr.bf16.mxu1 %v3574_v52  ;;  %v3666_v51 = vld [vmem:[%s3781_s19 + $0x92c] ss:$16 sps:$4 sm:$0xff]   ;;  %v3661_v52 = vld [vmem:[%s3781_s19 + $0x920] ss:$16 sps:$4 sm:$0xff]  }
  0xfc   : > { %2370 = vmatpush1.bf16.msra.mxu0 %v3569_v53  ;;  %2575 = vmatpush1.bf16.msra.mxu1 %v3572_v54  ;;  %v3664_v53 = vld [vmem:[%s3781_s19 + $0x928] ss:$16 sps:$4 sm:$0xff]   ;;  %v3669_v54 = vld [vmem:[%s3781_s19 + $0x944] ss:$16 sps:$4 sm:$0xff]  }
  0xfd   : > { %2371 = vmatprep.subr.bf16.mxu0 %v3577_v55  ;;  %2576 = vmatprep.subr.bf16.mxu1 %v3580_v56  ;;  %v3672_v55 = vld [vmem:[%s3781_s19 + $0x94c] ss:$16 sps:$4 sm:$0xff]   ;;  %v3667_v56 = vld [vmem:[%s3781_s19 + $0x940] ss:$16 sps:$4 sm:$0xff]  }
 0x100   : > { %2372 = vmatpush1.bf16.msra.mxu0 %v3575_v57  ;;  %2577 = vmatpush1.bf16.msra.mxu1 %v3578_v58  ;;  %v3670_v57 = vld [vmem:[%s3781_s19 + $0x948] ss:$16 sps:$4 sm:$0xff]   ;;  %v3675_v58 = vld [vmem:[%s3781_s19 + $0x964] ss:$16 sps:$4 sm:$0xff]  }
 0x101   : > { %2373 = vmatprep.subr.bf16.mxu0 %v3583_v59  ;;  %2578 = vmatprep.subr.bf16.mxu1 %v3586_v60  ;;  %v3678_v59 = vld [vmem:[%s3781_s19 + $0x96c] ss:$16 sps:$4 sm:$0xff]   ;;  %v3673_v60 = vld [vmem:[%s3781_s19 + $0x960] ss:$16 sps:$4 sm:$0xff]  }
 0x104   : > { %2374 = vmatpush1.bf16.msra.mxu0 %v3581_v61  ;;  %2579 = vmatpush1.bf16.msra.mxu1 %v3584_v62  ;;  %v3676_v61 = vld [vmem:[%s3781_s19 + $0x968] ss:$16 sps:$4 sm:$0xff]   ;;  %v3681_v62 = vld [vmem:[%s3781_s19 + $0x984] ss:$16 sps:$4 sm:$0xff]  }
 0x105   : > { %2375 = vmatprep.subr.bf16.mxu0 %v3589_v63  ;;  %2580 = vmatprep.subr.bf16.mxu1 %v3592_v0  ;;  %v3684_v63 = vld [vmem:[%s3781_s19 + $0x98c] ss:$16 sps:$4 sm:$0xff]   ;;  %v3679_v0 = vld [vmem:[%s3781_s19 + $0x980] ss:$16 sps:$4 sm:$0xff]  }
 0x108   : > { %2376 = vmatpush1.bf16.msra.mxu0 %v3587_v1  ;;  %2581 = vmatpush1.bf16.msra.mxu1 %v3590_v2  ;;  %v3682_v1 = vld [vmem:[%s3781_s19 + $0x988] ss:$16 sps:$4 sm:$0xff]   ;;  %v3687_v2 = vld [vmem:[%s3781_s19 + $0x9a4] ss:$16 sps:$4 sm:$0xff]  }
 0x109   : > { %2377 = vmatprep.subr.bf16.mxu0 %v3595_v3  ;;  %2582 = vmatprep.subr.bf16.mxu1 %v3598_v4  ;;  %v3690_v3 = vld [vmem:[%s3781_s19 + $0x9ac] ss:$16 sps:$4 sm:$0xff]   ;;  %v3685_v4 = vld [vmem:[%s3781_s19 + $0x9a0] ss:$16 sps:$4 sm:$0xff]  }
 0x10c   : > { %2378 = vmatpush1.bf16.msra.mxu0 %v3593_v5  ;;  %2583 = vmatpush1.bf16.msra.mxu1 %v3596_v6  ;;  %v3688_v5 = vld [vmem:[%s3781_s19 + $0x9a8] ss:$16 sps:$4 sm:$0xff]   ;;  %v3693_v6 = vld [vmem:[%s3781_s19 + $0x9c4] ss:$16 sps:$4 sm:$0xff]  }
 0x10d   : > { %2379 = vmatprep.subr.bf16.mxu0 %v3601_v7  ;;  %2584 = vmatprep.subr.bf16.mxu1 %v3604_v8  ;;  %v3696_v7 = vld [vmem:[%s3781_s19 + $0x9cc] ss:$16 sps:$4 sm:$0xff]   ;;  %v3691_v8 = vld [vmem:[%s3781_s19 + $0x9c0] ss:$16 sps:$4 sm:$0xff]  }
 0x110   : > { %2380 = vmatpush1.bf16.msra.mxu0 %v3599_v9  ;;  %2585 = vmatpush1.bf16.msra.mxu1 %v3602_v10  ;;  %v3694_v9 = vld [vmem:[%s3781_s19 + $0x9c8] ss:$16 sps:$4 sm:$0xff]   ;;  %v3699_v10 = vld [vmem:[%s3781_s19 + $0x9e4] ss:$16 sps:$4 sm:$0xff]  }
 0x111   : > { %2390 = vmatprep.subr.bf16.mxu0 %v3609_v12  ;;  %2595 = vmatprep.subr.bf16.mxu1 %v3612_v13  ;;  %v3702_v12 = vld [vmem:[%s3781_s19 + $0x9ec] ss:$16 sps:$4 sm:$0xff]   ;;  %v3697_v13 = vld [vmem:[%s3781_s19 + $0x9e0] ss:$16 sps:$4 sm:$0xff]  }
 0x113   : > { %2382 = vmatmul.mubr.bf16.vlgmr.msra.gmra.mrb[0].mxu0 %v2822_v15  ;;  %2587 = vmatmul.mubr.bf16.vlgmr.msra.gmra.mrb[0].mxu1 %v2822_v15  ;;  %v3700_v15 = vld [vmem:[%s3781_s19 + $0x9e8] ss:$16 sps:$4 sm:$0xff]  }
 0x114   : > { %2391 = vmatpush1.bf16.msra.mxu0 %v3607_v17  ;;  %2596 = vmatpush1.bf16.msra.mxu1 %v3610_v11  ;;  %v2824_v17 = vcombine.low %v4070_v16, %v4070_v16  ;;  %v571_v11 = vlaneseq }
 0x115   : > { %2392 = vmatprep.subr.bf16.mxu0 %v3615_v18  ;;  %2597 = vmatprep.subr.bf16.mxu1 %v3618_v19 }
 0x116   : > { %2422 = vmatprep.mubr.bf16.mxu0 %v2825_v20  ;;  %2627 = vmatprep.mubr.bf16.mxu1 %v2825_v20  ;;  %v572_v18 = vshrl.u32 %v571_v11, 7 }
 0x118   : > { %2393 = vmatpush1.bf16.msra.mxu0 %v3613_v14  ;;  %2598 = vmatpush1.bf16.msra.mxu1 %v3616_v21  ;;  %v573_v19 = vsub.s32 0, %v572_v18  ;;  %v581_v20 = vsub.s32 2, %v572_v18  ;;  %v569_v14 = vld [vmem:[%s234_s27] sm:$0xf]  ;;  %v577_v21 = vsub.s32 1, %v572_v18 }
 0x119   : > { %2394 = vmatprep.subr.bf16.mxu0 %v3621_v22  ;;  %2599 = vmatprep.subr.bf16.mxu1 %v3624_v23  ;;  %v585_v22 = vsub.s32 3, %v572_v18 }
 0x11a   : > { %v574_v23 = vrot.slane %v569_v14, %v573_v19 }
 0x11b   : > { %v586_v16 = vrot.slane %v569_v14, %v585_v22 }
 0x11c   : > { %2395 = vmatpush1.bf16.msra.mxu0 %v3619_v24  ;;  %2600 = vmatpush1.bf16.msra.mxu1 %v3622_v25  ;;  %v582_v24 = vrot.slane %v569_v14, %v581_v20  ;;  %v578_v25 = vrot.slane %v569_v14, %v577_v21 }
 0x11d   : > { %2396 = vmatprep.subr.bf16.mxu0 %v3627_v26  ;;  %2601 = vmatprep.subr.bf16.mxu1 %v3630_v27 }
 0x120   : > { %2397 = vmatpush1.bf16.msra.mxu0 %v3625_v28  ;;  %2602 = vmatpush1.bf16.msra.mxu1 %v3628_v29 }
 0x121   : > { %2398 = vmatprep.subr.bf16.mxu0 %v3633_v30  ;;  %2603 = vmatprep.subr.bf16.mxu1 %v3636_v31 }
 0x124   : > { %2399 = vmatpush1.bf16.msra.mxu0 %v3631_v32  ;;  %2604 = vmatpush1.bf16.msra.mxu1 %v3634_v33 }
 0x125   : > { %2400 = vmatprep.subr.bf16.mxu0 %v3639_v34  ;;  %2605 = vmatprep.subr.bf16.mxu1 %v3642_v35 }
 0x128   : > { %2401 = vmatpush1.bf16.msra.mxu0 %v3637_v36  ;;  %2606 = vmatpush1.bf16.msra.mxu1 %v3640_v37 }
 0x129   : > { %2402 = vmatprep.subr.bf16.mxu0 %v3645_v38  ;;  %2607 = vmatprep.subr.bf16.mxu1 %v3648_v39 }
 0x12c   : > { %2403 = vmatpush1.bf16.msra.mxu0 %v3643_v40  ;;  %2608 = vmatpush1.bf16.msra.mxu1 %v3646_v41 }
 0x12d   : > { %2404 = vmatprep.subr.bf16.mxu0 %v3651_v42  ;;  %2609 = vmatprep.subr.bf16.mxu1 %v3654_v43 }
 0x130   : > { %2405 = vmatpush1.bf16.msra.mxu0 %v3649_v44  ;;  %2610 = vmatpush1.bf16.msra.mxu1 %v3652_v45 }
 0x131   : > { %2406 = vmatprep.subr.bf16.mxu0 %v3657_v46  ;;  %2611 = vmatprep.subr.bf16.mxu1 %v3660_v47 }
 0x134   : > { %2407 = vmatpush1.bf16.msra.mxu0 %v3655_v48  ;;  %2612 = vmatpush1.bf16.msra.mxu1 %v3658_v49 }
 0x135   : > { %2408 = vmatprep.subr.bf16.mxu0 %v3663_v50  ;;  %2613 = vmatprep.subr.bf16.mxu1 %v3666_v51 }
 0x138   : > { %2409 = vmatpush1.bf16.msra.mxu0 %v3661_v52  ;;  %2614 = vmatpush1.bf16.msra.mxu1 %v3664_v53 }
 0x139   : > { %2410 = vmatprep.subr.bf16.mxu0 %v3669_v54  ;;  %2615 = vmatprep.subr.bf16.mxu1 %v3672_v55 }
 0x13c   : > { %2411 = vmatpush1.bf16.msra.mxu0 %v3667_v56  ;;  %2616 = vmatpush1.bf16.msra.mxu1 %v3670_v57 }
 0x13d   : > { %2412 = vmatprep.subr.bf16.mxu0 %v3675_v58  ;;  %2617 = vmatprep.subr.bf16.mxu1 %v3678_v59 }
 0x140   : > { %2413 = vmatpush1.bf16.msra.mxu0 %v3673_v60  ;;  %2618 = vmatpush1.bf16.msra.mxu1 %v3676_v61 }
 0x141   : > { %2414 = vmatprep.subr.bf16.mxu0 %v3681_v62  ;;  %2619 = vmatprep.subr.bf16.mxu1 %v3684_v63 }
 0x144   : > { %2415 = vmatpush1.bf16.msra.mxu0 %v3679_v0  ;;  %2620 = vmatpush1.bf16.msra.mxu1 %v3682_v1 }
 0x145   : > { %2416 = vmatprep.subr.bf16.mxu0 %v3687_v2  ;;  %2621 = vmatprep.subr.bf16.mxu1 %v3690_v3 }
 0x148   : > { %2417 = vmatpush1.bf16.msra.mxu0 %v3685_v4  ;;  %2622 = vmatpush1.bf16.msra.mxu1 %v3688_v5 }
 0x149   : > { %2418 = vmatprep.subr.bf16.mxu0 %v3693_v6  ;;  %2623 = vmatprep.subr.bf16.mxu1 %v3696_v7 }
 0x14c   : > { %2419 = vmatpush1.bf16.msra.mxu0 %v3691_v8  ;;  %2624 = vmatpush1.bf16.msra.mxu1 %v3694_v9 }
 0x14d   : > { %2420 = vmatprep.subr.bf16.mxu0 %v3699_v10  ;;  %2625 = vmatprep.subr.bf16.mxu1 %v3702_v12 }
 0x150   : > { %2421 = vmatpush1.bf16.msra.mxu0 %v3697_v13  ;;  %2626 = vmatpush1.bf16.msra.mxu1 %v3700_v15 }
 0x153   : > { %2423 = vmatmul.mubr.bf16.vlgmr.msra.gmra.mrb[0].mxu0 %v2824_v17  ;;  %2628 = vmatmul.mubr.bf16.vlgmr.msra.gmra.mrb[0].mxu1 %v2824_v17 }
 0x226   : > { %v2424_v26 = vpop.f32.mrb[0].mxu0  ;;  %v2629_v27 = vpop.f32.mrb[0].mxu1 }
 0x227   : > { %v3153_v28 = vadd.f32 %v2424_v26, %v574_v23  ;;  %v3155_v29 = vadd.f32 %v2629_v27, %v582_v24  ;;  %v2426_v30 = vpop.f32.mrb[1].mxu0  ;;  %v2631_v31 = vpop.f32.mrb[1].mxu1 }
 0x228   : > { %v3154_v32 = vadd.f32 %v2426_v30, %v578_v25  ;;  %v3156_v33 = vadd.f32 %v2631_v31, %v586_v16  ;;  %v2428_v34 = vpop.f32.mrb[2].mxu0  ;;  %v2633_v35 = vpop.f32.mrb[2].mxu1 }
 0x229   : > { %v2636_v36 = vmul.f32 %v3153_v28, %v3153_v28  ;;  %v2638_v37 = vmul.f32 %v3155_v29, %v3155_v29  ;;  %v2429_v38 = vpop.f32.mrb[3].mxu0  ;;  %v2634_v39 = vpop.f32.mrb[3].mxu1 }
 0x22a   : > { %v2637_v40 = vmul.f32 %v3154_v32, %v3154_v32  ;;  %v2639_v41 = vmul.f32 %v3156_v33, %v3156_v33 }
 0x22b   : > { %v2640_v42 = vmul.f32 %v3153_v28, %v2636_v36  ;;  %v2642_v43 = vmul.f32 %v3155_v29, %v2638_v37 }
 0x22c   : > { %v2641_v44 = vmul.f32 %v3154_v32, %v2637_v40  ;;  %v2643_v45 = vmul.f32 %v3156_v33, %v2639_v41 }
 0x22d   : > { %v2644_v46 = vmul.f32 0.044715, %v2640_v42  ;;  %v2646_v47 = vmul.f32 0.044715, %v2642_v43 }
 0x22e   : > { %v2645_v48 = vmul.f32 0.044715, %v2641_v44  ;;  %v2647_v49 = vmul.f32 0.044715, %v2643_v45 }
 0x22f   : > { %v2648_v50 = vadd.f32 %v3153_v28, %v2644_v46  ;;  %v2650_v51 = vadd.f32 %v3155_v29, %v2646_v47 }
 0x230   : > { %v2649_v52 = vadd.f32 %v3154_v32, %v2645_v48  ;;  %v2651_v53 = vadd.f32 %v3156_v33, %v2647_v49 }
 0x231   : > { %v2652_v54 = vmul.f32 0.7978846, %v2648_v50  ;;  %v2654_v55 = vmul.f32 0.7978846, %v2650_v51 }
 0x232   : > { %v2653_v56 = vmul.f32 0.7978846, %v2649_v52  ;;  %v2655_v57 = vmul.f32 0.7978846, %v2651_v53 }
 0x233   : > { %3705 = vtanh.f32 %v2652_v54 }
 0x234   : > { %3707 = vtanh.f32 %v2654_v55 }
 0x235   : > { %3709 = vtanh.f32 %v2653_v56 }
 0x236   : > { %3711 = vtanh.f32 %v2655_v57 }
 0x23d   : > { %v3706_v58 = vpop.eup %3705 }
 0x23e   : > { %v3708_v59 = vpop.eup %3707  ;;  %v2660_v60 = vadd.f32 1.0, %v3706_v58 }
 0x23f   : > { %v3710_v61 = vpop.eup %3709  ;;  %v2662_v62 = vadd.f32 1.0, %v3708_v59 }
 0x240   : > { %v3712_v63 = vpop.eup %3711  ;;  %v2664_v0 = vmul.f32 0.5, %v2660_v60  ;;  %v2661_v1 = vadd.f32 1.0, %v3710_v61 }
 0x241   : > { %v2666_v2 = vmul.f32 0.5, %v2662_v62  ;;  %v2663_v3 = vadd.f32 1.0, %v3712_v63 }
 0x242   : > { %v2668_v4 = vmul.f32 %v3153_v28, %v2664_v0  ;;  %v2665_v5 = vmul.f32 0.5, %v2661_v1 }
 0x243   : > { %v2670_v6 = vmul.f32 %v3155_v29, %v2666_v2  ;;  %v2667_v7 = vmul.f32 0.5, %v2663_v3 }
 0x244   : > { %v2669_v8 = vmul.f32 %v3154_v32, %v2665_v5 }
 0x245   : > { %v2671_v9 = vmul.f32 %v3156_v33, %v2667_v7 }
 0x246   : > { %v3151_v10 = vpack.c.bf16 %v2669_v8, %v2668_v4 }
 0x247   : > { %v3152_v12 = vpack.c.bf16 %v2671_v9, %v2670_v6 }
 0x248   : > { %2688 = vst [vmem:[%s243_s4] sm:$0xff] %v3151_v10 }
 0x249   : > { %2689 = vst [vmem:[%s243_s4 + $0x8] sm:$0xff] %v3152_v12 }
 0x24a PF: > { %s13_s14 = sadd.s32 1, %s3735_s14   ;;  %s4159_s12 = smov %s3731_s13 }
 0x24b   : > { %p10_p5 = scmp.ge.s32.totalorder %s13_s14, 4   ;;  %s4160_s13 = smov %s4162_s15 }
 0x24d   :  { %12 = sbr.rel (!%p10_p5) target bundleno = 2 (0x2), region = 68 }

// kernel: encoder_decoder_forward.10
= control target key start
LH: loop header
LB: loop body
LE: loop exit
PB: predicated region body
PF: predicated region fallthrough
CT: control target
= control target key end

     0   :  { %s5494_s29 = smov 0   ;;  %s5496_s30 = smov 0   ;;  %s6112_s0 = inlined_call_operand.vmem [shape: bf16[2,2,64,64], index: 0, kind: input, shape index: {}]   ;;  %s6113_s1 = inlined_call_operand.vmem [shape: bf16[2,2,16,128], index: 1, kind: input, shape index: {}]   ;;  %s6114_s2 = inlined_call_operand.vmem [shape: bf16[2,2,8,320], index: 2, kind: input, shape index: {}]   ;;  %s6115_s3 = inlined_call_operand.vmem [shape: bf16[2,2,8,512], index: 3, kind: input, shape index: {}]   ;;  %s6116_s4 = inlined_call_operand.vmem [shape: bf16[2,64,512], index: 4, kind: input, shape index: {}]   ;;  %s6117_s5 = inlined_call_operand.vmem [shape: bf16[2,128,512], index: 5, kind: input, shape index: {}]   ;;  %s6118_s6 = inlined_call_operand.vmem [shape: bf16[2,320,512], index: 6, kind: input, shape index: {}]   ;;  %s6119_s7 = inlined_call_operand.vmem [shape: bf16[2,512,512], index: 7, kind: input, shape index: {}]   ;;  %s6120_s8 = inlined_call_operand.vmem [shape: bf16[64,16], index: 8, kind: input, shape index: {}]   ;;  %s6121_s9 = inlined_call_operand.vmem [shape: bf16[64,8], index: 9, kind: input, shape index: {}]   ;;  %s6122_s10 = inlined_call_operand.vmem [shape: bf16[64,8], index: 10, kind: input, shape index: {}]   ;;  %s6123_s11 = inlined_call_operand.vmem [shape: f32[2,1,512], index: 11, kind: input, shape index: {}]   ;;  %s6124_s12 = inlined_call_operand.vmem [shape: bf16[2,512,128], index: 12, kind: input, shape index: {}]   ;;  %s6125_s13 = inlined_call_operand.vmem [shape: f32[2,1,128], index: 13, kind: input, shape index: {}]   ;;  %s6126_s14 = inlined_call_operand.vmem [shape: f32[2,2,64,128], index: 14, kind: output, shape index: {}]  }
   0x1   :  { %6132 = sst [smem:[#allocation7_spill]] %s6112_s0  ;;  %s5498_s15 = smov 0  }
   0x2   :  { %6133 = sst [smem:[#allocation8_spill]] %s6113_s1  ;;  %s5500_s16 = smov 0  }
   0x3   :  { %6134 = sst [smem:[#allocation9_spill]] %s6117_s5  ;;  %s5502_s17 = smov 0  }
   0x4   :  { %6135 = sst [smem:[#allocation10_spill]] %s6118_s6 }
   0x5   :  { %6136 = sst [smem:[#allocation11_spill]] %s6119_s7 }
   0x6 LB: > { %6137 = sst [smem:[#allocation2_spill]] %s5408_s15  ;;  %s33_s18 = sadd.s32 1, %s5408_s15  ;;  %s5416_s17 = sphi %s5502_s17, %s24_s17   ;;  %s5412_s16 = sphi %s5500_s16, %s6153_s16   ;;  %s5408_s15 = sphi %s5498_s15, %s6152_s15   ;;  %s5404_s30 = sphi %s5496_s30, %s6151_s30   ;;  %s5400_s29 = sphi %s5494_s29, %s6150_s29  }
   0x7   : > { %6138 = sst [smem:[#allocation3_spill]] %s5412_s16  ;;  %s36_s19 = sadd.s32 1, %s5412_s16 }
   0x8   : > { %6139 = sst [smem:[#allocation4_spill]] %s5416_s17  ;;  %p34_p0 = scmp.ge.s32.totalorder %s33_s18, 2 }
   0x9   : > { %p4321_p1 = scmp.ge.s32.totalorder %s5416_s17, 1  ;;  %p547_p2 = scmp.lt.s32.totalorder %s5416_s17, 5 }
   0xa   : > { %s6155_s18 = smov (%p34_p0, %s33_s18), 0  ;;  %s6157_s19 = smov (!%p34_p0, %s36_s19), %s5412_s16 }
   0xb   : > { %6140 = sst [smem:[#allocation5_spill]] %s6155_s18  ;;  %p548_p3 = pnand %p4321_p1, %p547_p2 }
   0xc   : > { %p38_p4 = scmp.ge.s32.totalorder %s6157_s19, 2  ;;  %p660_p5 = scmp.lt.s32.totalorder (!%p548_p3), %s5404_s30, 1  ;;  %v5418_v0 = vmov (!%p548_p3), 0   ;;  %v4987_v48 = vld [vmem:[%s6120_s8] sm:$0xff] (!%p548_p3)   ;;  %vm1080_vm0 = vcmask (!%p548_p3), 130048   ;;  %v4994_v57 = vld [vmem:[%s6120_s8 + $0x8] sm:$0xff] (!%p548_p3)  }
   0xd   : > { %551 = sbr.rel (%p548_p3) target bundleno = 1423 (0x58f), region = 76  ;;  %994 = vmatprep.mubr.bf16.mxu0 (!%p548_p3), %v5418_v0  ;;  %1037 = vmatprep.mubr.bf16.mxu1 (!%p548_p3), %v5418_v0  ;;  %s6142_s5 = sld [smem:[#allocation9_spill]] (!%p548_p3)  ;;  %vm1339_vm1 = vcmask (!%p548_p3), 523264   ;;  %vm2202_vm2 = vcmask (!%p548_p3), 1043456   ;;  %vm2189_vm3 = vcmask (!%p548_p3), 64512  }
   0xe   : > { %s6159_s19 = smov (%p38_p4, %s6157_s19), 0  ;;  %p662_p6 = scmp.lt.s32.totalorder (!%p548_p3), %s5400_s29, 1 }
   0xf   : > { %6141 = sst [smem:[#allocation6_spill]] %s6159_s19  ;;  %s6143_s1 = sld [smem:[#allocation8_spill]] (!%p548_p3) }
  0x10   : > { %s6144_s6 = sld [smem:[#allocation10_spill]] (!%p548_p3)  ;;  %s6145_s0 = sld [smem:[#allocation7_spill]] (!%p548_p3) }
  0x11   : > { %s6146_s7 = sld [smem:[#allocation11_spill]] (!%p548_p3) }
  0x14   : > { %s6161_s30 = smov (!%p660_p5, %s5404_s30), 1  ;;  %s6163_s29 = smov (!%p662_p6, %s5400_s29), 1 }
  0x15   : > { %s6127_s20 = sshll.u32 %s6161_s30, 8  ;;  %s4325_s24 = sshll.u32 %s6163_s29, 1 }
  0x16   : > { %s5536_s23 = scalar_lea.vmem %s6142_s5, %s6127_s20  ;;  %s6128_s25 = sshll.u32 %s6161_s30, 2 }
  0x17   : > { %v4938_v1 = vld [vmem:[%s5536_s23 + $0x4] ss:$16 sps:$4 sm:$0xff]   ;;  %v4940_v2 = vld [vmem:[%s5536_s23 + $0xc] ss:$16 sps:$4 sm:$0xff]   ;;  %v4942_v3 = vld [vmem:[%s5536_s23] ss:$16 sps:$4 sm:$0xff]   ;;  %s675_s28 = sadd.s32 %s6128_s25, %s4325_s24 }
  0x18   : > { %962 = vmatprep.subr.bf16.mxu0 %v4938_v1  ;;  %v4943_v4 = vld [vmem:[%s5536_s23 + $0x8] ss:$16 sps:$4 sm:$0xff]   ;;  %1005 = vmatprep.subr.bf16.mxu1 %v4940_v2  ;;  %v4944_v5 = vld [vmem:[%s5536_s23 + $0x24] ss:$16 sps:$4 sm:$0xff]   ;;  %v4946_v6 = vld [vmem:[%s5536_s23 + $0x2c] ss:$16 sps:$4 sm:$0xff]  }
  0x19   : > { %963 = vmatpush1.bf16.msra.mxu0 %v4942_v3  ;;  %1006 = vmatpush1.bf16.msra.mxu1 %v4943_v4  ;;  %v4948_v7 = vld [vmem:[%s5536_s23 + $0x20] ss:$16 sps:$4 sm:$0xff]   ;;  %v4949_v8 = vld [vmem:[%s5536_s23 + $0x28] ss:$16 sps:$4 sm:$0xff]   ;;  %v4950_v9 = vld [vmem:[%s5536_s23 + $0x44] ss:$16 sps:$4 sm:$0xff]  }
  0x1a   : > { %964 = vmatprep.subr.bf16.mxu0 %v4944_v5  ;;  %1007 = vmatprep.subr.bf16.mxu1 %v4946_v6  ;;  %v4952_v10 = vld [vmem:[%s5536_s23 + $0x4c] ss:$16 sps:$4 sm:$0xff]   ;;  %v4954_v11 = vld [vmem:[%s5536_s23 + $0x40] ss:$16 sps:$4 sm:$0xff]   ;;  %v4955_v12 = vld [vmem:[%s5536_s23 + $0x48] ss:$16 sps:$4 sm:$0xff]  }
  0x1b   : > { %v4956_v13 = vld [vmem:[%s5536_s23 + $0x64] ss:$16 sps:$4 sm:$0xff]   ;;  %v4958_v14 = vld [vmem:[%s5536_s23 + $0x6c] ss:$16 sps:$4 sm:$0xff]   ;;  %v4960_v15 = vld [vmem:[%s5536_s23 + $0x60] ss:$16 sps:$4 sm:$0xff]  }
  0x1c   : > { %v4961_v16 = vld [vmem:[%s5536_s23 + $0x68] ss:$16 sps:$4 sm:$0xff]   ;;  %v4962_v17 = vld [vmem:[%s5536_s23 + $0x84] ss:$16 sps:$4 sm:$0xff]   ;;  %v4964_v18 = vld [vmem:[%s5536_s23 + $0x8c] ss:$16 sps:$4 sm:$0xff]  }
  0x1d   : > { %965 = vmatpush1.bf16.msra.mxu0 %v4948_v7  ;;  %1008 = vmatpush1.bf16.msra.mxu1 %v4949_v8  ;;  %s4322_s26 = sshll.u32 %s6163_s29, 3  ;;  %s4323_s27 = sshll.u32 %s6161_s30, 4  ;;  %v4966_v19 = vld [vmem:[%s5536_s23 + $0x80] ss:$16 sps:$4 sm:$0xff]   ;;  %v4967_v20 = vld [vmem:[%s5536_s23 + $0x88] ss:$16 sps:$4 sm:$0xff]  }
  0x1e   : > { %966 = vmatprep.subr.bf16.mxu0 %v4950_v9  ;;  %1009 = vmatprep.subr.bf16.mxu1 %v4952_v10  ;;  %s4896_s21 = smul.u32 640, %s6161_s30  ;;  %v4968_v21 = vld [vmem:[%s5536_s23 + $0xa4] ss:$16 sps:$4 sm:$0xff]   ;;  %v4970_v22 = vld [vmem:[%s5536_s23 + $0xac] ss:$16 sps:$4 sm:$0xff]   ;;  %s5571_s22 = sadd.s32 %s4323_s27, %s4322_s26 }
  0x1f   : > { %s4327_s20 = sshll.u32 %s675_s28, 2  ;;  %v4972_v23 = vld [vmem:[%s5536_s23 + $0xa0] ss:$16 sps:$4 sm:$0xff]   ;;  %v4973_v24 = vld [vmem:[%s5536_s23 + $0xa8] ss:$16 sps:$4 sm:$0xff]   ;;  %s4324_s24 = sshll.u32 %s5571_s22, 2 }
  0x20   : > { %v4974_v25 = vld [vmem:[%s5536_s23 + $0xc4] ss:$16 sps:$4 sm:$0xff]   ;;  %s677_s19 = scalar_lea.vmem %s6143_s1, %s4327_s20  ;;  %s5583_s26 = scalar_lea.vmem %s6144_s6, %s4896_s21  ;;  %v4976_v26 = vld [vmem:[%s5536_s23 + $0xcc] ss:$16 sps:$4 sm:$0xff]   ;;  %v4978_v27 = vld [vmem:[%s5536_s23 + $0xc0] ss:$16 sps:$4 sm:$0xff]  }
  0x21   : > { %967 = vmatpush1.bf16.msra.mxu0 %v4954_v11  ;;  %1010 = vmatpush1.bf16.msra.mxu1 %v4955_v12  ;;  %v4979_v28 = vld [vmem:[%s5536_s23 + $0xc8] ss:$16 sps:$4 sm:$0xff]   ;;  %v4980_v29 = vld [vmem:[%s5536_s23 + $0xe4] ss:$16 sps:$4 sm:$0xff]   ;;  %v4982_v30 = vld [vmem:[%s5536_s23 + $0xec] ss:$16 sps:$4 sm:$0xff]   ;;  %s5593_s15 = scalar_lea.vmem %s6145_s0, %s4324_s24 }
  0x22   : > { %968 = vmatprep.subr.bf16.mxu0 %v4956_v13  ;;  %1011 = vmatprep.subr.bf16.mxu1 %v4958_v14  ;;  %v4984_v31 = vld [vmem:[%s5536_s23 + $0xe0] ss:$16 sps:$4 sm:$0xff]   ;;  %v4985_v32 = vld [vmem:[%s5536_s23 + $0xe8] ss:$16 sps:$4 sm:$0xff]   ;;  %s4700_s5 = sshll.u32 %s6161_s30, 10  ;;  %s6147_s23 = sshll.u32 %s6161_s30, 8 }
  0x23   : > { %v4986_v33 = vld [vmem:[%s677_s19] sm:$0xff]   ;;  %s5603_s20 = scalar_lea.vmem %s6146_s7, %s4700_s5  ;;  %s5610_s24 = scalar_lea.vmem %s6124_s12, %s6147_s23  ;;  %v5020_v2 = vld [vmem:[%s5583_s26 + $0xc] ss:$16 sps:$4 sm:$0xff]   ;;  %v5001_v3 = vld [vmem:[%s6120_s8 + $0x10] sm:$0xff]  }
  0x24   : > { %s4698_s19 = sshll.u32 %s6161_s30, 7  ;;  %s4894_s1 = smul.u32 3, %s6163_s29  ;;  %v5017_v1 = vld [vmem:[%s5583_s26 + $0x4] ss:$16 sps:$4 sm:$0xff]   ;;  %v5008_v4 = vld [vmem:[%s6120_s8 + $0x18] sm:$0xff]   ;;  %v5082_v14 = vld [vmem:[%s5593_s15 + $0x8] sm:$0xff]  }
  0x25   : > { %969 = vmatpush1.bf16.msra.mxu0 %v4960_v15  ;;  %1012 = vmatpush1.bf16.msra.mxu1 %v4961_v16  ;;  %s5616_s0 = scalar_lea.vmem %s6116_s4, %s4698_s19  ;;  %s4895_s6 = smul.u32 6, %s6161_s30  ;;  %v5021_v5 = vld [vmem:[%s5593_s15] sm:$0xff]   ;;  %v5018_v7 = vld [vmem:[%s5583_s26 + $0x8] ss:$16 sps:$4 sm:$0xff]   ;;  %v5027_v9 = vld [vmem:[%s5583_s26 + $0x2c] ss:$16 sps:$4 sm:$0xff]  }
  0x26   : > { %970 = vmatprep.subr.bf16.mxu0 %v4962_v17  ;;  %1013 = vmatprep.subr.bf16.mxu1 %v4964_v18  ;;  %v4990_v46 = vld [vmem:[%s5616_s0 + $0x4] ss:$16 sps:$4 sm:$0xff]   ;;  %v4993_v47 = vld [vmem:[%s5616_s0 + $0xc] ss:$16 sps:$4 sm:$0xff]   ;;  %v4988_v49 = vld [vmem:[%s5616_s0] ss:$16 sps:$4 sm:$0xff]  }
  0x27   : > { %s684_s17 = sadd.s32 %s4895_s6, %s4894_s1  ;;  %v4991_v50 = vld [vmem:[%s5616_s0 + $0x8] ss:$16 sps:$4 sm:$0xff]   ;;  %v4997_v51 = vld [vmem:[%s5616_s0 + $0x24] ss:$16 sps:$4 sm:$0xff]   ;;  %v5000_v52 = vld [vmem:[%s5616_s0 + $0x2c] ss:$16 sps:$4 sm:$0xff]   ;;  %s727_s6 = scalar_lea.vmem %s6125_s13, %s6161_s30 }
  0x28   : > { %s4328_s16 = sshll.u32 %s684_s17, 2  ;;  %v4995_v53 = vld [vmem:[%s5616_s0 + $0x20] ss:$16 sps:$4 sm:$0xff]   ;;  %v4998_v54 = vld [vmem:[%s5616_s0 + $0x28] ss:$16 sps:$4 sm:$0xff]   ;;  %s4329_s28 = sshll.u32 %s6163_s29, 2 }
  0x29   : > { %971 = vmatpush1.bf16.msra.mxu0 %v4966_v19  ;;  %1014 = vmatpush1.bf16.msra.mxu1 %v4967_v20  ;;  %s5623_s7 = scalar_lea.vmem %s6114_s2, %s4328_s16  ;;  %v5004_v55 = vld [vmem:[%s5616_s0 + $0x44] ss:$16 sps:$4 sm:$0xff]   ;;  %v5007_v56 = vld [vmem:[%s5616_s0 + $0x4c] ss:$16 sps:$4 sm:$0xff]   ;;  %v5002_v58 = vld [vmem:[%s5616_s0 + $0x40] ss:$16 sps:$4 sm:$0xff]  }
  0x2a   : > { %972 = vmatprep.subr.bf16.mxu0 %v4968_v21  ;;  %1015 = vmatprep.subr.bf16.mxu1 %v4970_v22  ;;  %v5005_v59 = vld [vmem:[%s5616_s0 + $0x48] ss:$16 sps:$4 sm:$0xff]   ;;  %v5011_v60 = vld [vmem:[%s5616_s0 + $0x64] ss:$16 sps:$4 sm:$0xff]   ;;  %v5014_v61 = vld [vmem:[%s5616_s0 + $0x6c] ss:$16 sps:$4 sm:$0xff]  }
  0x2b   : > { %v5009_v62 = vld [vmem:[%s5616_s0 + $0x60] ss:$16 sps:$4 sm:$0xff]   ;;  %v5012_v63 = vld [vmem:[%s5616_s0 + $0x68] ss:$16 sps:$4 sm:$0xff]   ;;  %v5024_v8 = vld [vmem:[%s5583_s26 + $0x24] ss:$16 sps:$4 sm:$0xff]  }
  0x2c   : > { %v5015_v6 = vld [vmem:[%s5583_s26] ss:$16 sps:$4 sm:$0xff]   ;;  %v5025_v11 = vld [vmem:[%s5583_s26 + $0x28] ss:$16 sps:$4 sm:$0xff]   ;;  %v5030_v12 = vld [vmem:[%s5583_s26 + $0x44] ss:$16 sps:$4 sm:$0xff]  }
  0x2d   : > { %973 = vmatpush1.bf16.msra.mxu0 %v4972_v23  ;;  %1016 = vmatpush1.bf16.msra.mxu1 %v4973_v24  ;;  %v5022_v10 = vld [vmem:[%s5583_s26 + $0x20] ss:$16 sps:$4 sm:$0xff]   ;;  %v5033_v13 = vld [vmem:[%s5583_s26 + $0x4c] ss:$16 sps:$4 sm:$0xff]   ;;  %v5031_v16 = vld [vmem:[%s5583_s26 + $0x48] ss:$16 sps:$4 sm:$0xff]  }
  0x2e   : > { %974 = vmatprep.subr.bf16.mxu0 %v4974_v25  ;;  %1017 = vmatprep.subr.bf16.mxu1 %v4976_v26  ;;  %v5028_v15 = vld [vmem:[%s5583_s26 + $0x40] ss:$16 sps:$4 sm:$0xff]   ;;  %v5036_v17 = vld [vmem:[%s5583_s26 + $0x64] ss:$16 sps:$4 sm:$0xff]   ;;  %v5039_v18 = vld [vmem:[%s5583_s26 + $0x6c] ss:$16 sps:$4 sm:$0xff]  }
  0x2f   : > { %v5034_v19 = vld [vmem:[%s5583_s26 + $0x60] ss:$16 sps:$4 sm:$0xff]   ;;  %v5037_v20 = vld [vmem:[%s5583_s26 + $0x68] ss:$16 sps:$4 sm:$0xff]   ;;  %v5042_v21 = vld [vmem:[%s5583_s26 + $0x84] ss:$16 sps:$4 sm:$0xff]  }
  0x30   : > { %v5045_v22 = vld [vmem:[%s5583_s26 + $0x8c] ss:$16 sps:$4 sm:$0xff]   ;;  %v5095_v23 = vld [vmem:[%s5593_s15 + $0x10] sm:$0xff]   ;;  %v5043_v25 = vld [vmem:[%s5583_s26 + $0x88] ss:$16 sps:$4 sm:$0xff]   ;;  %s4330_s16 = sshll.u32 %s6161_s30, 3 }
  0x31   : > { %975 = vmatpush1.bf16.msra.mxu0 %v4978_v27  ;;  %1018 = vmatpush1.bf16.msra.mxu1 %v4979_v28  ;;  %v5040_v24 = vld [vmem:[%s5583_s26 + $0x80] ss:$16 sps:$4 sm:$0xff]   ;;  %v5048_v26 = vld [vmem:[%s5583_s26 + $0xa4] ss:$16 sps:$4 sm:$0xff]   ;;  %v5051_v27 = vld [vmem:[%s5583_s26 + $0xac] ss:$16 sps:$4 sm:$0xff]   ;;  %s693_s5 = sadd.s32 %s4330_s16, %s4329_s28 }
  0x32   : > { %976 = vmatprep.subr.bf16.mxu0 %v4980_v29  ;;  %1019 = vmatprep.subr.bf16.mxu1 %v4982_v30  ;;  %v5046_v28 = vld [vmem:[%s5583_s26 + $0xa0] ss:$16 sps:$4 sm:$0xff]   ;;  %v5049_v29 = vld [vmem:[%s5583_s26 + $0xa8] ss:$16 sps:$4 sm:$0xff]   ;;  %v5054_v30 = vld [vmem:[%s5583_s26 + $0xc4] ss:$16 sps:$4 sm:$0xff]  }
  0x33   : > { %s4331_s1 = sshll.u32 %s693_s5, 2  ;;  %s6148_s16 = sshll.u32 %s6161_s30, 2 }
  0x34   : > { %s5833_s23 = scalar_lea.vmem %s6115_s3, %s4331_s1  ;;  %s719_s18 = scalar_lea.vmem %s6123_s11, %s6148_s16 }
  0x35   : > { %977 = vmatpush1.bf16.msra.mxu0 %v4984_v31  ;;  %1020 = vmatpush1.bf16.msra.mxu1 %v4985_v32  ;;  %v5057_v31 = vld [vmem:[%s5583_s26 + $0xcc] ss:$16 sps:$4 sm:$0xff]   ;;  %s4344_s17 = sshll.u32 %s5571_s22, 3 }
  0x36   : > { %v5108_v32 = vld [vmem:[%s5593_s15 + $0x18] sm:$0xff]   ;;  %s6080_s30 = scalar_lea.vmem %s6126_s14, %s4344_s17 }
  0x38   : > { %995 = vmatmul.mubr.bf16.vlgmr.msra.gmra.mrb[0].mxu0 %v4986_v33  ;;  %1038 = vmatmul.mubr.bf16.vlgmr.msra.gmra.mrb[0].mxu1 %v4986_v33  ;;  %v5712_v33 = vld [vmem:[%s5623_s7] sm:$0xff] }
  0x39   : > { %1125 = vmatprep.mubr.bf16.mxu0 %v5418_v0  ;;  %1198 = vmatprep.mubr.bf16.mxu1 %v5418_v0 }
 0x10b   : > { %v996_v34 = vpop.f32.mrb[0].mxu0  ;;  %v1039_v35 = vpop.f32.mrb[0].mxu1 }
 0x10c   : > { %v998_v36 = vpop.f32.mrb[1].mxu0  ;;  %v1041_v37 = vpop.f32.mrb[1].mxu1 }
 0x10d   : > { %v1000_v38 = vpop.f32.mrb[2].mxu0  ;;  %v1043_v39 = vpop.f32.mrb[2].mxu1 }
 0x10e   : > { %v1048_v40 = vpack.c.bf16 %v1000_v38, %v996_v34  ;;  %v1050_v41 = vpack.c.bf16 %v1043_v39, %v1039_v35  ;;  %v1002_v42 = vpop.f32.mrb[3].mxu0  ;;  %v1045_v43 = vpop.f32.mrb[3].mxu1  ;;  %v5052_v34 = vld [vmem:[%s5583_s26 + $0xc0] ss:$16 sps:$4 sm:$0xff]   ;;  %v5055_v35 = vld [vmem:[%s5583_s26 + $0xc8] ss:$16 sps:$4 sm:$0xff]   ;;  %v4419_v38 = vcombine.high %v5712_v33, %v5712_v33 }
 0x10f   : > { %v1049_v44 = vpack.c.bf16 %v1002_v42, %v998_v36  ;;  %v1051_v45 = vpack.c.bf16 %v1045_v43, %v1041_v37  ;;  %v5060_v36 = vld [vmem:[%s5583_s26 + $0xe4] ss:$16 sps:$4 sm:$0xff]   ;;  %v5063_v37 = vld [vmem:[%s5583_s26 + $0xec] ss:$16 sps:$4 sm:$0xff]   ;;  %v5058_v39 = vld [vmem:[%s5583_s26 + $0xe0] ss:$16 sps:$4 sm:$0xff]  }
 0x110   : > { %v5069_v42 = vld [vmem:[%s5583_s26 + $0x10c] ss:$16 sps:$4 sm:$0xff]   ;;  %v5064_v43 = vld [vmem:[%s5583_s26 + $0x100] ss:$16 sps:$4 sm:$0xff]  }
 0x111   : > { %1093 = vmatprep.subr.bf16.mxu0 %v1049_v44  ;;  %1166 = vmatprep.subr.bf16.mxu1 %v1051_v45  ;;  %v5067_v44 = vld [vmem:[%s5583_s26 + $0x108] ss:$16 sps:$4 sm:$0xff]   ;;  %v5072_v45 = vld [vmem:[%s5583_s26 + $0x124] ss:$16 sps:$4 sm:$0xff]  }
 0x112   : > { %1094 = vmatpush1.bf16.msra.mxu0 %v1048_v40  ;;  %1167 = vmatpush1.bf16.msra.mxu1 %v1050_v41  ;;  %v5061_v40 = vld [vmem:[%s5583_s26 + $0xe8] ss:$16 sps:$4 sm:$0xff]   ;;  %v5066_v41 = vld [vmem:[%s5583_s26 + $0x104] ss:$16 sps:$4 sm:$0xff]  }
 0x113   : > { %1352 = vmatprep.subr.bf16.mxu0 %v4990_v46  ;;  %1425 = vmatprep.subr.bf16.mxu1 %v4993_v47  ;;  %v5075_v46 = vld [vmem:[%s5583_s26 + $0x12c] ss:$16 sps:$4 sm:$0xff]   ;;  %v5070_v47 = vld [vmem:[%s5583_s26 + $0x120] ss:$16 sps:$4 sm:$0xff]  }
 0x115   : > { %4382 = vmatmul.mubr.msk.bf16.vlgmr.msra.gmra.mrb[4].mxu0 %vm1080_vm0, %v4987_v48  ;;  %4386 = vmatmul.mubr.msk.bf16.vlgmr.msra.gmra.mrb[4].mxu1 %vm1080_vm0, %v4987_v48  ;;  %v5073_v48 = vld [vmem:[%s5583_s26 + $0x128] ss:$16 sps:$4 sm:$0xff]  }
 0x116   : > { %1353 = vmatpush1.bf16.msra.mxu0 %v4988_v49  ;;  %1135 = vmatprep.mubr.bf16.mxu0 %v5418_v0  ;;  %v5078_v49 = vld [vmem:[%s5583_s26 + $0x144] ss:$16 sps:$4 sm:$0xff]  }
 0x117   : > { %1208 = vmatprep.mubr.bf16.mxu1 %v5418_v0  ;;  %1426 = vmatpush1.bf16.msra.mxu1 %v4991_v50  ;;  %v5081_v50 = vld [vmem:[%s5583_s26 + $0x14c] ss:$16 sps:$4 sm:$0xff]  }
 0x118   : > { %1354 = vmatprep.subr.bf16.mxu0 %v4997_v51  ;;  %1427 = vmatprep.subr.bf16.mxu1 %v5000_v52  ;;  %v5076_v51 = vld [vmem:[%s5583_s26 + $0x140] ss:$16 sps:$4 sm:$0xff]   ;;  %v5079_v52 = vld [vmem:[%s5583_s26 + $0x148] ss:$16 sps:$4 sm:$0xff]  }
 0x11a   : > { %1355 = vmatpush1.bf16.msra.mxu0 %v4995_v53  ;;  %v5085_v53 = vld [vmem:[%s5583_s26 + $0x164] ss:$16 sps:$4 sm:$0xff]  }
 0x11b   : > { %1428 = vmatpush1.bf16.msra.mxu1 %v4998_v54  ;;  %1356 = vmatprep.subr.bf16.mxu0 %v5004_v55  ;;  %v5088_v54 = vld [vmem:[%s5583_s26 + $0x16c] ss:$16 sps:$4 sm:$0xff]   ;;  %v5083_v55 = vld [vmem:[%s5583_s26 + $0x160] ss:$16 sps:$4 sm:$0xff]  }
 0x11c   : > { %1429 = vmatprep.subr.bf16.mxu1 %v5007_v56  ;;  %v5086_v56 = vld [vmem:[%s5583_s26 + $0x168] ss:$16 sps:$4 sm:$0xff]  }
 0x11d   : > { %4383 = vmatmul.mubr.msk.bf16.gmra.mrb[8].mxu0 %vm1080_vm0, %v4994_v57  ;;  %4387 = vmatmul.mubr.msk.bf16.gmra.mrb[8].mxu1 %vm1080_vm0, %v4994_v57  ;;  %v5091_v57 = vld [vmem:[%s5583_s26 + $0x184] ss:$16 sps:$4 sm:$0xff]  }
 0x11e   : > { %1145 = vmatprep.mubr.bf16.mxu0 %v5418_v0  ;;  %1218 = vmatprep.mubr.bf16.mxu1 %v5418_v0 }
 0x11f   : > { %1357 = vmatpush1.bf16.msra.mxu0 %v5002_v58  ;;  %1430 = vmatpush1.bf16.msra.mxu1 %v5005_v59  ;;  %v5094_v58 = vld [vmem:[%s5583_s26 + $0x18c] ss:$16 sps:$4 sm:$0xff]   ;;  %v5089_v59 = vld [vmem:[%s5583_s26 + $0x180] ss:$16 sps:$4 sm:$0xff]  }
 0x120   : > { %1358 = vmatprep.subr.bf16.mxu0 %v5011_v60  ;;  %1431 = vmatprep.subr.bf16.mxu1 %v5014_v61  ;;  %v5092_v60 = vld [vmem:[%s5583_s26 + $0x188] ss:$16 sps:$4 sm:$0xff]   ;;  %v5098_v61 = vld [vmem:[%s5583_s26 + $0x1a4] ss:$16 sps:$4 sm:$0xff]  }
 0x123   : > { %1359 = vmatpush1.bf16.msra.mxu0 %v5009_v62  ;;  %1432 = vmatpush1.bf16.msra.mxu1 %v5012_v63  ;;  %v5101_v62 = vld [vmem:[%s5583_s26 + $0x1ac] ss:$16 sps:$4 sm:$0xff]   ;;  %v5096_v63 = vld [vmem:[%s5583_s26 + $0x1a0] ss:$16 sps:$4 sm:$0xff]  }
 0x124   : > { %1993 = vmatprep.subr.bf16.mxu0 %v5017_v1  ;;  %2075 = vmatprep.subr.bf16.mxu1 %v5020_v2  ;;  %v5099_v1 = vld [vmem:[%s5583_s26 + $0x1a8] ss:$16 sps:$4 sm:$0xff]   ;;  %v5104_v2 = vld [vmem:[%s5583_s26 + $0x1c4] ss:$16 sps:$4 sm:$0xff]  }
 0x125   : > { %4384 = vmatmul.mubr.msk.bf16.gmra.mrb[12].mxu0 %vm1080_vm0, %v5001_v3  ;;  %4388 = vmatmul.mubr.msk.bf16.gmra.mrb[12].mxu1 %vm1080_vm0, %v5001_v3  ;;  %v5107_v3 = vld [vmem:[%s5583_s26 + $0x1cc] ss:$16 sps:$4 sm:$0xff]  }
 0x126   : > { %1155 = vmatprep.mubr.bf16.mxu0 %v5418_v0  ;;  %1228 = vmatprep.mubr.bf16.mxu1 %v5418_v0 }
 0x12d   : > { %4385 = vmatmul.mubr.msk.bf16.gmra.mrb[16].mxu0 %vm1080_vm0, %v5008_v4  ;;  %4389 = vmatmul.mubr.msk.bf16.gmra.mrb[16].mxu1 %vm1080_vm0, %v5008_v4  ;;  %v5102_v4 = vld [vmem:[%s5583_s26 + $0x1c0] ss:$16 sps:$4 sm:$0xff]  }
 0x12e   : > { %1384 = vmatprep.mubr.bf16.mxu0 %v5418_v0  ;;  %1457 = vmatprep.mubr.bf16.mxu1 %v5418_v0 }
 0x135   : > { %4410 = vmatmul.mubr.msk.bf16.vlgmr.msra.gmra.mrb[4].mxu0 %vm1339_vm1, %v5021_v5  ;;  %4414 = vmatmul.mubr.msk.bf16.vlgmr.msra.gmra.mrb[4].mxu1 %vm1339_vm1, %v5021_v5  ;;  %v5105_v5 = vld [vmem:[%s5583_s26 + $0x1c8] ss:$16 sps:$4 sm:$0xff]  }
 0x136   : > { %1994 = vmatpush1.bf16.msra.mxu0 %v5015_v6  ;;  %2076 = vmatpush1.bf16.msra.mxu1 %v5018_v7  ;;  %v5111_v6 = vld [vmem:[%s5583_s26 + $0x1e4] ss:$16 sps:$4 sm:$0xff]   ;;  %v5114_v7 = vld [vmem:[%s5583_s26 + $0x1ec] ss:$16 sps:$4 sm:$0xff]  }
 0x137   : > { %1995 = vmatprep.subr.bf16.mxu0 %v5024_v8  ;;  %2077 = vmatprep.subr.bf16.mxu1 %v5027_v9  ;;  %v5109_v8 = vld [vmem:[%s5583_s26 + $0x1e0] ss:$16 sps:$4 sm:$0xff]   ;;  %v5112_v9 = vld [vmem:[%s5583_s26 + $0x1e8] ss:$16 sps:$4 sm:$0xff]  }
 0x138   : > { %1394 = vmatprep.mubr.bf16.mxu0 %v5418_v0  ;;  %1467 = vmatprep.mubr.bf16.mxu1 %v5418_v0 }
 0x13a   : > { %1996 = vmatpush1.bf16.msra.mxu0 %v5022_v10  ;;  %2078 = vmatpush1.bf16.msra.mxu1 %v5025_v11  ;;  %v5120_v10 = vld [vmem:[%s5583_s26 + $0x204] ss:$16 sps:$4 sm:$0xff]   ;;  %v5123_v11 = vld [vmem:[%s5583_s26 + $0x20c] ss:$16 sps:$4 sm:$0xff]  }
 0x13b   : > { %1997 = vmatprep.subr.bf16.mxu0 %v5030_v12  ;;  %2079 = vmatprep.subr.bf16.mxu1 %v5033_v13  ;;  %v4418_v12 = vcombine.low %v5712_v33, %v5712_v33  ;;  %v5118_v13 = vld [vmem:[%s5583_s26 + $0x200] ss:$16 sps:$4 sm:$0xff]  }
 0x13d   : > { %4411 = vmatmul.mubr.msk.bf16.gmra.mrb[8].mxu0 %vm1339_vm1, %v5082_v14  ;;  %4415 = vmatmul.mubr.msk.bf16.gmra.mrb[8].mxu1 %vm1339_vm1, %v5082_v14  ;;  %v5121_v14 = vld [vmem:[%s5583_s26 + $0x208] ss:$16 sps:$4 sm:$0xff]  }
 0x13e   : > { %1998 = vmatpush1.bf16.msra.mxu0 %v5028_v15  ;;  %2080 = vmatpush1.bf16.msra.mxu1 %v5031_v16  ;;  %v5126_v15 = vld [vmem:[%s5583_s26 + $0x224] ss:$16 sps:$4 sm:$0xff]   ;;  %v5129_v16 = vld [vmem:[%s5583_s26 + $0x22c] ss:$16 sps:$4 sm:$0xff]  }
 0x13f   : > { %1999 = vmatprep.subr.bf16.mxu0 %v5036_v17  ;;  %2081 = vmatprep.subr.bf16.mxu1 %v5039_v18  ;;  %v5124_v17 = vld [vmem:[%s5583_s26 + $0x220] ss:$16 sps:$4 sm:$0xff]   ;;  %v5127_v18 = vld [vmem:[%s5583_s26 + $0x228] ss:$16 sps:$4 sm:$0xff]  }
 0x140   : > { %1404 = vmatprep.mubr.bf16.mxu0 %v5418_v0  ;;  %1477 = vmatprep.mubr.bf16.mxu1 %v5418_v0 }
 0x142   : > { %2000 = vmatpush1.bf16.msra.mxu0 %v5034_v19  ;;  %2082 = vmatpush1.bf16.msra.mxu1 %v5037_v20  ;;  %v5132_v19 = vld [vmem:[%s5583_s26 + $0x244] ss:$16 sps:$4 sm:$0xff]   ;;  %v5135_v20 = vld [vmem:[%s5583_s26 + $0x24c] ss:$16 sps:$4 sm:$0xff]  }
 0x143   : > { %2001 = vmatprep.subr.bf16.mxu0 %v5042_v21  ;;  %2083 = vmatprep.subr.bf16.mxu1 %v5045_v22  ;;  %v5130_v21 = vld [vmem:[%s5583_s26 + $0x240] ss:$16 sps:$4 sm:$0xff]   ;;  %v5133_v22 = vld [vmem:[%s5583_s26 + $0x248] ss:$16 sps:$4 sm:$0xff]  }
 0x145   : > { %4412 = vmatmul.mubr.msk.bf16.gmra.mrb[12].mxu0 %vm1339_vm1, %v5095_v23  ;;  %4416 = vmatmul.mubr.msk.bf16.gmra.mrb[12].mxu1 %vm1339_vm1, %v5095_v23  ;;  %v5138_v23 = vld [vmem:[%s5583_s26 + $0x264] ss:$16 sps:$4 sm:$0xff]  }
 0x146   : > { %2002 = vmatpush1.bf16.msra.mxu0 %v5040_v24  ;;  %2084 = vmatpush1.bf16.msra.mxu1 %v5043_v25  ;;  %v5141_v24 = vld [vmem:[%s5583_s26 + $0x26c] ss:$16 sps:$4 sm:$0xff]   ;;  %v5136_v25 = vld [vmem:[%s5583_s26 + $0x260] ss:$16 sps:$4 sm:$0xff]  }
 0x147   : > { %2003 = vmatprep.subr.bf16.mxu0 %v5048_v26  ;;  %2085 = vmatprep.subr.bf16.mxu1 %v5051_v27  ;;  %v5139_v26 = vld [vmem:[%s5583_s26 + $0x268] ss:$16 sps:$4 sm:$0xff]  }
 0x148   : > { %1414 = vmatprep.mubr.bf16.mxu0 %v5418_v0  ;;  %1487 = vmatprep.mubr.bf16.mxu1 %v5418_v0  ;;  %v5117_v27 = vld [vmem:[%s5623_s7 + $0x8] ss:$0 sps:$4 sm:$0xff]  }
 0x14a   : > { %2004 = vmatpush1.bf16.msra.mxu0 %v5046_v28  ;;  %2086 = vmatpush1.bf16.msra.mxu1 %v5049_v29 }
 0x14b   : > { %2005 = vmatprep.subr.bf16.mxu0 %v5054_v30  ;;  %2087 = vmatprep.subr.bf16.mxu1 %v5057_v31 }
 0x14d   : > { %4413 = vmatmul.mubr.msk.bf16.gmra.mrb[16].mxu0 %vm1339_vm1, %v5108_v32  ;;  %4417 = vmatmul.mubr.msk.bf16.gmra.mrb[16].mxu1 %vm1339_vm1, %v5108_v32 }
 0x14e   : > { %2006 = vmatpush1.bf16.msra.mxu0 %v5052_v34  ;;  %2088 = vmatpush1.bf16.msra.mxu1 %v5055_v35 }
 0x14f   : > { %2007 = vmatprep.subr.bf16.mxu0 %v5060_v36  ;;  %2089 = vmatprep.subr.bf16.mxu1 %v5063_v37 }
 0x150   : > { %2025 = vmatprep.mubr.bf16.mxu0 %v4419_v38  ;;  %2107 = vmatprep.mubr.bf16.mxu1 %v4419_v38  ;;  %v5144_v38 = vld [vmem:[%s5603_s20 + $0x4] ss:$16 sps:$4 sm:$0xff]  }
 0x152   : > { %2008 = vmatpush1.bf16.msra.mxu0 %v5058_v39  ;;  %2090 = vmatpush1.bf16.msra.mxu1 %v5061_v40  ;;  %v5147_v39 = vld [vmem:[%s5603_s20 + $0xc] ss:$16 sps:$4 sm:$0xff]  }
 0x153   : > { %2009 = vmatprep.subr.bf16.mxu0 %v5066_v41  ;;  %2091 = vmatprep.subr.bf16.mxu1 %v5069_v42 }
 0x156   : > { %2010 = vmatpush1.bf16.msra.mxu0 %v5064_v43  ;;  %2092 = vmatpush1.bf16.msra.mxu1 %v5067_v44  ;;  %v5148_v44 = vld [vmem:[%s6121_s9] sm:$0xff]  }
 0x157   : > { %2011 = vmatprep.subr.bf16.mxu0 %v5072_v45  ;;  %2093 = vmatprep.subr.bf16.mxu1 %v5075_v46  ;;  %v5142_v45 = vld [vmem:[%s5603_s20] ss:$16 sps:$4 sm:$0xff]   ;;  %v5145_v46 = vld [vmem:[%s5603_s20 + $0x8] ss:$16 sps:$4 sm:$0xff]  }
 0x15a   : > { %2012 = vmatpush1.bf16.msra.mxu0 %v5070_v47  ;;  %2094 = vmatpush1.bf16.msra.mxu1 %v5073_v48  ;;  %v5151_v47 = vld [vmem:[%s5603_s20 + $0x24] ss:$16 sps:$4 sm:$0xff]   ;;  %v5154_v48 = vld [vmem:[%s5603_s20 + $0x2c] ss:$16 sps:$4 sm:$0xff]  }
 0x15b   : > { %2013 = vmatprep.subr.bf16.mxu0 %v5078_v49  ;;  %2095 = vmatprep.subr.bf16.mxu1 %v5081_v50  ;;  %v5149_v49 = vld [vmem:[%s5603_s20 + $0x20] ss:$16 sps:$4 sm:$0xff]   ;;  %v5152_v50 = vld [vmem:[%s5603_s20 + $0x28] ss:$16 sps:$4 sm:$0xff]  }
 0x15e   : > { %2014 = vmatpush1.bf16.msra.mxu0 %v5076_v51  ;;  %2096 = vmatpush1.bf16.msra.mxu1 %v5079_v52  ;;  %v5157_v51 = vld [vmem:[%s5603_s20 + $0x44] ss:$16 sps:$4 sm:$0xff]   ;;  %v5160_v52 = vld [vmem:[%s5603_s20 + $0x4c] ss:$16 sps:$4 sm:$0xff]  }
 0x15f   : > { %2015 = vmatprep.subr.bf16.mxu0 %v5085_v53  ;;  %2097 = vmatprep.subr.bf16.mxu1 %v5088_v54  ;;  %v5209_v53 = vld [vmem:[%s6121_s9 + $0x8] sm:$0xff]   ;;  %v5155_v54 = vld [vmem:[%s5603_s20 + $0x40] ss:$16 sps:$4 sm:$0xff]  }
 0x162   : > { %2016 = vmatpush1.bf16.msra.mxu0 %v5083_v55  ;;  %2098 = vmatpush1.bf16.msra.mxu1 %v5086_v56  ;;  %v5158_v55 = vld [vmem:[%s5603_s20 + $0x48] ss:$16 sps:$4 sm:$0xff]   ;;  %v5163_v56 = vld [vmem:[%s5603_s20 + $0x64] ss:$16 sps:$4 sm:$0xff]  }
 0x163   : > { %2017 = vmatprep.subr.bf16.mxu0 %v5091_v57  ;;  %2099 = vmatprep.subr.bf16.mxu1 %v5094_v58  ;;  %v5166_v57 = vld [vmem:[%s5603_s20 + $0x6c] ss:$16 sps:$4 sm:$0xff]   ;;  %v5161_v58 = vld [vmem:[%s5603_s20 + $0x60] ss:$16 sps:$4 sm:$0xff]  }
 0x166   : > { %2018 = vmatpush1.bf16.msra.mxu0 %v5089_v59  ;;  %2100 = vmatpush1.bf16.msra.mxu1 %v5092_v60  ;;  %v5164_v59 = vld [vmem:[%s5603_s20 + $0x68] ss:$16 sps:$4 sm:$0xff]   ;;  %v5169_v60 = vld [vmem:[%s5603_s20 + $0x84] ss:$16 sps:$4 sm:$0xff]  }
 0x167   : > { %2019 = vmatprep.subr.bf16.mxu0 %v5098_v61  ;;  %2101 = vmatprep.subr.bf16.mxu1 %v5101_v62  ;;  %v5172_v61 = vld [vmem:[%s5603_s20 + $0x8c] ss:$16 sps:$4 sm:$0xff]   ;;  %v5222_v62 = vld [vmem:[%s6121_s9 + $0x10] sm:$0xff]  }
 0x16a   : > { %2020 = vmatpush1.bf16.msra.mxu0 %v5096_v63  ;;  %2102 = vmatpush1.bf16.msra.mxu1 %v5099_v1  ;;  %v5167_v63 = vld [vmem:[%s5603_s20 + $0x80] ss:$16 sps:$4 sm:$0xff]   ;;  %v5170_v1 = vld [vmem:[%s5603_s20 + $0x88] ss:$16 sps:$4 sm:$0xff]  }
 0x16b   : > { %2021 = vmatprep.subr.bf16.mxu0 %v5104_v2  ;;  %2103 = vmatprep.subr.bf16.mxu1 %v5107_v3  ;;  %v5175_v2 = vld [vmem:[%s5603_s20 + $0xa4] ss:$16 sps:$4 sm:$0xff]   ;;  %v5178_v3 = vld [vmem:[%s5603_s20 + $0xac] ss:$16 sps:$4 sm:$0xff]  }
 0x16e   : > { %2022 = vmatpush1.bf16.msra.mxu0 %v5102_v4  ;;  %2104 = vmatpush1.bf16.msra.mxu1 %v5105_v5  ;;  %v5173_v4 = vld [vmem:[%s5603_s20 + $0xa0] ss:$16 sps:$4 sm:$0xff]   ;;  %v5176_v5 = vld [vmem:[%s5603_s20 + $0xa8] ss:$16 sps:$4 sm:$0xff]  }
 0x16f   : > { %2023 = vmatprep.subr.bf16.mxu0 %v5111_v6  ;;  %2105 = vmatprep.subr.bf16.mxu1 %v5114_v7  ;;  %v5181_v6 = vld [vmem:[%s5603_s20 + $0xc4] ss:$16 sps:$4 sm:$0xff]   ;;  %v5184_v7 = vld [vmem:[%s5603_s20 + $0xcc] ss:$16 sps:$4 sm:$0xff]  }
 0x172   : > { %2024 = vmatpush1.bf16.msra.mxu0 %v5109_v8  ;;  %2106 = vmatpush1.bf16.msra.mxu1 %v5112_v9  ;;  %v5235_v8 = vld [vmem:[%s6121_s9 + $0x18] sm:$0xff]   ;;  %v5843_v9 = vld [vmem:[%s5833_s23] sm:$0xff] }
 0x173   : > { %2034 = vmatprep.subr.bf16.mxu0 %v5120_v10  ;;  %2116 = vmatprep.subr.bf16.mxu1 %v5123_v11  ;;  %v5179_v10 = vld [vmem:[%s5603_s20 + $0xc0] ss:$16 sps:$4 sm:$0xff]   ;;  %v5182_v11 = vld [vmem:[%s5603_s20 + $0xc8] ss:$16 sps:$4 sm:$0xff]  }
 0x175   : > { %2026 = vmatmul.mubr.bf16.vlgmr.msra.gmra.mrb[20].mxu0 %v4418_v12  ;;  %2108 = vmatmul.mubr.bf16.vlgmr.msra.gmra.mrb[20].mxu1 %v4418_v12  ;;  %v5187_v12 = vld [vmem:[%s5603_s20 + $0xe4] ss:$16 sps:$4 sm:$0xff]  }
 0x176   : > { %2035 = vmatpush1.bf16.msra.mxu0 %v5118_v13  ;;  %2117 = vmatpush1.bf16.msra.mxu1 %v5121_v14  ;;  %v5190_v13 = vld [vmem:[%s5603_s20 + $0xec] ss:$16 sps:$4 sm:$0xff]   ;;  %v4518_v14 = vcombine.high %v5843_v9, %v5843_v9 }
 0x177   : > { %2036 = vmatprep.subr.bf16.mxu0 %v5126_v15  ;;  %2118 = vmatprep.subr.bf16.mxu1 %v5129_v16  ;;  %v5185_v15 = vld [vmem:[%s5603_s20 + $0xe0] ss:$16 sps:$4 sm:$0xff]   ;;  %v5188_v16 = vld [vmem:[%s5603_s20 + $0xe8] ss:$16 sps:$4 sm:$0xff]  }
 0x178   : > { %2066 = vmatprep.mubr.bf16.mxu0 %v5418_v0  ;;  %2148 = vmatprep.mubr.bf16.mxu1 %v5418_v0 }
 0x17a   : > { %2037 = vmatpush1.bf16.msra.mxu0 %v5124_v17  ;;  %2119 = vmatpush1.bf16.msra.mxu1 %v5127_v18  ;;  %v5193_v17 = vld [vmem:[%s5603_s20 + $0x104] ss:$16 sps:$4 sm:$0xff]   ;;  %v5196_v18 = vld [vmem:[%s5603_s20 + $0x10c] ss:$16 sps:$4 sm:$0xff]  }
 0x17b   : > { %2038 = vmatprep.subr.bf16.mxu0 %v5132_v19  ;;  %2120 = vmatprep.subr.bf16.mxu1 %v5135_v20  ;;  %v5191_v19 = vld [vmem:[%s5603_s20 + $0x100] ss:$16 sps:$4 sm:$0xff]   ;;  %v5194_v20 = vld [vmem:[%s5603_s20 + $0x108] ss:$16 sps:$4 sm:$0xff]  }
 0x17e   : > { %2039 = vmatpush1.bf16.msra.mxu0 %v5130_v21  ;;  %2121 = vmatpush1.bf16.msra.mxu1 %v5133_v22  ;;  %v5199_v21 = vld [vmem:[%s5603_s20 + $0x124] ss:$16 sps:$4 sm:$0xff]   ;;  %v5202_v22 = vld [vmem:[%s5603_s20 + $0x12c] ss:$16 sps:$4 sm:$0xff]  }
 0x17f   : > { %2040 = vmatprep.subr.bf16.mxu0 %v5138_v23  ;;  %2122 = vmatprep.subr.bf16.mxu1 %v5141_v24  ;;  %v5197_v23 = vld [vmem:[%s5603_s20 + $0x120] ss:$16 sps:$4 sm:$0xff]   ;;  %v5200_v24 = vld [vmem:[%s5603_s20 + $0x128] ss:$16 sps:$4 sm:$0xff]  }
 0x182   : > { %2041 = vmatpush1.bf16.msra.mxu0 %v5136_v25  ;;  %2123 = vmatpush1.bf16.msra.mxu1 %v5139_v26  ;;  %v5205_v25 = vld [vmem:[%s5603_s20 + $0x144] ss:$16 sps:$4 sm:$0xff]   ;;  %v5208_v26 = vld [vmem:[%s5603_s20 + $0x14c] ss:$16 sps:$4 sm:$0xff]  }
 0x185   : > { %4501 = vmatmul.mubr.msk.bf16.vlgmr.msra.gmra.mrb[20].mxu0 %vm1339_vm1, %v5117_v27  ;;  %4502 = vmatmul.mubr.msk.bf16.vlgmr.msra.gmra.mrb[20].mxu1 %vm1339_vm1, %v5117_v27  ;;  %v5203_v27 = vld [vmem:[%s5603_s20 + $0x140] ss:$16 sps:$4 sm:$0xff]  }
 0x186   : > { %2247 = vmatprep.mubr.bf16.mxu0 %v5418_v0  ;;  %2320 = vmatprep.mubr.bf16.mxu1 %v5418_v0 }
 0x258   : > { %v2068_v28 = vpop.f32.mrb[20].mxu0  ;;  %v2150_v29 = vpop.f32.mrb[20].mxu1 }
 0x259   : > { %v2157_v30 = vpack.c.bf16 %v2068_v28, %v2068_v28  ;;  %v2159_v31 = vpack.c.bf16 %v2150_v29, %v2150_v29  ;;  %v2070_v32 = vpop.f32.mrb[21].mxu0  ;;  %v2152_v33 = vpop.f32.mrb[21].mxu1  ;;  %v5206_v28 = vld [vmem:[%s5603_s20 + $0x148] ss:$16 sps:$4 sm:$0xff]   ;;  %v5212_v29 = vld [vmem:[%s5603_s20 + $0x164] ss:$16 sps:$4 sm:$0xff]  }
 0x25a   : > { %v2158_v34 = vpack.c.bf16 %v2070_v32, %v2070_v32  ;;  %v2160_v35 = vpack.c.bf16 %v2152_v33, %v2152_v33  ;;  %v2072_v36 = vpop.f32.mrb[22].mxu0  ;;  %v2154_v37 = vpop.f32.mrb[22].mxu1  ;;  %v5213_v32 = vld [vmem:[%s5603_s20 + $0x168] ss:$16 sps:$4 sm:$0xff]   ;;  %v5218_v33 = vld [vmem:[%s5603_s20 + $0x184] ss:$16 sps:$4 sm:$0xff]  }
 0x25b   : > { %v2204_v40 = vsel %vm2202_vm2, %v2157_v30, 0  ;;  %v2210_v41 = vsel %vm2202_vm2, %v2159_v31, 0  ;;  %v2073_v42 = vpop.f32.mrb[23].mxu0  ;;  %v2155_v43 = vpop.f32.mrb[23].mxu1  ;;  %v5215_v30 = vld [vmem:[%s5603_s20 + $0x16c] ss:$16 sps:$4 sm:$0xff]  }
 0x25c   : > { %4507 = vmatprep.subr.msk.bf16.mxu0 %vm2202_vm2, %v2158_v34  ;;  %4512 = vmatprep.subr.msk.bf16.mxu1 %vm2202_vm2, %v2160_v35  ;;  %v5210_v31 = vld [vmem:[%s5603_s20 + $0x160] ss:$16 sps:$4 sm:$0xff]   ;;  %v5221_v34 = vld [vmem:[%s5603_s20 + $0x18c] ss:$16 sps:$4 sm:$0xff]   ;;  %v5219_v36 = vld [vmem:[%s5603_s20 + $0x188] ss:$16 sps:$4 sm:$0xff]  }
 0x25d   : > { %2216 = vmatpush1.bf16.msra.mxu0 %v2204_v40  ;;  %2289 = vmatpush1.bf16.msra.mxu1 %v2210_v41  ;;  %v5216_v35 = vld [vmem:[%s5603_s20 + $0x180] ss:$16 sps:$4 sm:$0xff]   ;;  %v5225_v37 = vld [vmem:[%s5603_s20 + $0x1a4] ss:$16 sps:$4 sm:$0xff]   ;;  %v5226_v40 = vld [vmem:[%s5603_s20 + $0x1a8] ss:$16 sps:$4 sm:$0xff]  }
 0x25e   : > { %3177 = vmatprep.subr.bf16.mxu0 %v5144_v38  ;;  %3259 = vmatprep.subr.bf16.mxu1 %v5147_v39  ;;  %v5228_v38 = vld [vmem:[%s5603_s20 + $0x1ac] ss:$16 sps:$4 sm:$0xff]   ;;  %v5223_v39 = vld [vmem:[%s5603_s20 + $0x1a0] ss:$16 sps:$4 sm:$0xff]   ;;  %v5231_v41 = vld [vmem:[%s5603_s20 + $0x1c4] ss:$16 sps:$4 sm:$0xff]  }
 0x25f   : > { %v5234_v42 = vld [vmem:[%s5603_s20 + $0x1cc] ss:$16 sps:$4 sm:$0xff]   ;;  %v5229_v43 = vld [vmem:[%s5603_s20 + $0x1c0] ss:$16 sps:$4 sm:$0xff]  }
 0x260   : > { %4508 = vmatmul.mubr.msk.bf16.vlgmr.msra.gmra.mrb[4].mxu0 %vm2189_vm3, %v5148_v44  ;;  %4513 = vmatmul.mubr.msk.bf16.vlgmr.msra.gmra.mrb[4].mxu1 %vm2189_vm3, %v5148_v44  ;;  %v5232_v44 = vld [vmem:[%s5603_s20 + $0x1c8] ss:$16 sps:$4 sm:$0xff]  }
 0x261   : > { %3178 = vmatpush1.bf16.msra.mxu0 %v5142_v45  ;;  %3260 = vmatpush1.bf16.msra.mxu1 %v5145_v46  ;;  %v5238_v45 = vld [vmem:[%s5603_s20 + $0x1e4] ss:$16 sps:$4 sm:$0xff]   ;;  %v5241_v46 = vld [vmem:[%s5603_s20 + $0x1ec] ss:$16 sps:$4 sm:$0xff]  }
 0x262   : > { %3179 = vmatprep.subr.bf16.mxu0 %v5151_v47  ;;  %3261 = vmatprep.subr.bf16.mxu1 %v5154_v48  ;;  %v5236_v47 = vld [vmem:[%s5603_s20 + $0x1e0] ss:$16 sps:$4 sm:$0xff]   ;;  %v5239_v48 = vld [vmem:[%s5603_s20 + $0x1e8] ss:$16 sps:$4 sm:$0xff]  }
 0x263   : > { %2257 = vmatprep.mubr.bf16.mxu0 %v5418_v0  ;;  %2330 = vmatprep.mubr.bf16.mxu1 %v5418_v0 }
 0x265   : > { %3180 = vmatpush1.bf16.msra.mxu0 %v5149_v49  ;;  %3262 = vmatpush1.bf16.msra.mxu1 %v5152_v50  ;;  %v5246_v49 = vld [vmem:[%s5603_s20 + $0x204] ss:$16 sps:$4 sm:$0xff]   ;;  %v5249_v50 = vld [vmem:[%s5603_s20 + $0x20c] ss:$16 sps:$4 sm:$0xff]  }
 0x266   : > { %3181 = vmatprep.subr.bf16.mxu0 %v5157_v51  ;;  %3263 = vmatprep.subr.bf16.mxu1 %v5160_v52  ;;  %v4517_v51 = vcombine.low %v5843_v9, %v5843_v9  ;;  %v5892_v52 = vld [vmem:[%s5833_s23 + $0x8] sm:$0xff]  ;;  %v5276_v9 = vld [vmem:[%s5603_s20 + $0x2a4] ss:$16 sps:$4 sm:$0xff]  }
 0x268   : > { %4509 = vmatmul.mubr.msk.bf16.gmra.mrb[8].mxu0 %vm2189_vm3, %v5209_v53  ;;  %4514 = vmatmul.mubr.msk.bf16.gmra.mrb[8].mxu1 %vm2189_vm3, %v5209_v53  ;;  %v5244_v53 = vld [vmem:[%s5603_s20 + $0x200] ss:$16 sps:$4 sm:$0xff]  }
 0x269   : > { %3182 = vmatpush1.bf16.msra.mxu0 %v5155_v54  ;;  %3264 = vmatpush1.bf16.msra.mxu1 %v5158_v55  ;;  %v5247_v54 = vld [vmem:[%s5603_s20 + $0x208] ss:$16 sps:$4 sm:$0xff]   ;;  %v5252_v55 = vld [vmem:[%s5603_s20 + $0x224] ss:$16 sps:$4 sm:$0xff]  }
 0x26a   : > { %3183 = vmatprep.subr.bf16.mxu0 %v5163_v56  ;;  %3265 = vmatprep.subr.bf16.mxu1 %v5166_v57  ;;  %v5255_v56 = vld [vmem:[%s5603_s20 + $0x22c] ss:$16 sps:$4 sm:$0xff]   ;;  %v4520_v57 = vcombine.high %v5892_v52, %v5892_v52 }
 0x26b   : > { %2267 = vmatprep.mubr.bf16.mxu0 %v5418_v0  ;;  %2340 = vmatprep.mubr.bf16.mxu1 %v5418_v0 }
 0x26d   : > { %3184 = vmatpush1.bf16.msra.mxu0 %v5161_v58  ;;  %3266 = vmatpush1.bf16.msra.mxu1 %v5164_v59  ;;  %v5250_v58 = vld [vmem:[%s5603_s20 + $0x220] ss:$16 sps:$4 sm:$0xff]   ;;  %v5253_v59 = vld [vmem:[%s5603_s20 + $0x228] ss:$16 sps:$4 sm:$0xff]  }
 0x26e   : > { %3185 = vmatprep.subr.bf16.mxu0 %v5169_v60  ;;  %3267 = vmatprep.subr.bf16.mxu1 %v5172_v61  ;;  %v5258_v60 = vld [vmem:[%s5603_s20 + $0x244] ss:$16 sps:$4 sm:$0xff]   ;;  %v5261_v61 = vld [vmem:[%s5603_s20 + $0x24c] ss:$16 sps:$4 sm:$0xff]  }
 0x270   : > { %4510 = vmatmul.mubr.msk.bf16.gmra.mrb[12].mxu0 %vm2189_vm3, %v5222_v62  ;;  %4515 = vmatmul.mubr.msk.bf16.gmra.mrb[12].mxu1 %vm2189_vm3, %v5222_v62  ;;  %v5256_v62 = vld [vmem:[%s5603_s20 + $0x240] ss:$16 sps:$4 sm:$0xff]  }
 0x271   : > { %3186 = vmatpush1.bf16.msra.mxu0 %v5167_v63  ;;  %3268 = vmatpush1.bf16.msra.mxu1 %v5170_v1  ;;  %v5259_v63 = vld [vmem:[%s5603_s20 + $0x248] ss:$16 sps:$4 sm:$0xff]   ;;  %v5264_v1 = vld [vmem:[%s5603_s20 + $0x264] ss:$16 sps:$4 sm:$0xff]  }
 0x272   : > { %3187 = vmatprep.subr.bf16.mxu0 %v5175_v2  ;;  %3269 = vmatprep.subr.bf16.mxu1 %v5178_v3  ;;  %v5267_v2 = vld [vmem:[%s5603_s20 + $0x26c] ss:$16 sps:$4 sm:$0xff]   ;;  %v5262_v3 = vld [vmem:[%s5603_s20 + $0x260] ss:$16 sps:$4 sm:$0xff]  }
 0x273   : > { %2277 = vmatprep.mubr.bf16.mxu0 %v5418_v0  ;;  %2350 = vmatprep.mubr.bf16.mxu1 %v5418_v0 }
 0x275   : > { %3188 = vmatpush1.bf16.msra.mxu0 %v5173_v4  ;;  %3270 = vmatpush1.bf16.msra.mxu1 %v5176_v5  ;;  %v5265_v4 = vld [vmem:[%s5603_s20 + $0x268] ss:$16 sps:$4 sm:$0xff]   ;;  %v5270_v5 = vld [vmem:[%s5603_s20 + $0x284] ss:$16 sps:$4 sm:$0xff]  }
 0x276   : > { %3189 = vmatprep.subr.bf16.mxu0 %v5181_v6  ;;  %3271 = vmatprep.subr.bf16.mxu1 %v5184_v7  ;;  %v5273_v6 = vld [vmem:[%s5603_s20 + $0x28c] ss:$16 sps:$4 sm:$0xff]   ;;  %v5268_v7 = vld [vmem:[%s5603_s20 + $0x280] ss:$16 sps:$4 sm:$0xff]  }
 0x278   : > { %4511 = vmatmul.mubr.msk.bf16.gmra.mrb[16].mxu0 %vm2189_vm3, %v5235_v8  ;;  %4516 = vmatmul.mubr.msk.bf16.gmra.mrb[16].mxu1 %vm2189_vm3, %v5235_v8  ;;  %v5271_v8 = vld [vmem:[%s5603_s20 + $0x288] ss:$16 sps:$4 sm:$0xff]  }
 0x279   : > { %3190 = vmatpush1.bf16.msra.mxu0 %v5179_v10  ;;  %3272 = vmatpush1.bf16.msra.mxu1 %v5182_v11  ;;  %v5279_v10 = vld [vmem:[%s5603_s20 + $0x2ac] ss:$16 sps:$4 sm:$0xff]   ;;  %v5274_v11 = vld [vmem:[%s5603_s20 + $0x2a0] ss:$16 sps:$4 sm:$0xff]  }
 0x27a   : > { %3191 = vmatprep.subr.bf16.mxu0 %v5187_v12  ;;  %3273 = vmatprep.subr.bf16.mxu1 %v5190_v13  ;;  %v5277_v12 = vld [vmem:[%s5603_s20 + $0x2a8] ss:$16 sps:$4 sm:$0xff]   ;;  %v5282_v13 = vld [vmem:[%s5603_s20 + $0x2c4] ss:$16 sps:$4 sm:$0xff]  }
 0x27b   : > { %3209 = vmatprep.mubr.bf16.mxu0 %v4518_v14  ;;  %3291 = vmatprep.mubr.bf16.mxu1 %v4518_v14  ;;  %v5285_v14 = vld [vmem:[%s5603_s20 + $0x2cc] ss:$16 sps:$4 sm:$0xff]  }
 0x27d   : > { %3192 = vmatpush1.bf16.msra.mxu0 %v5185_v15  ;;  %3274 = vmatpush1.bf16.msra.mxu1 %v5188_v16  ;;  %v5280_v15 = vld [vmem:[%s5603_s20 + $0x2c0] ss:$16 sps:$4 sm:$0xff]   ;;  %v5283_v16 = vld [vmem:[%s5603_s20 + $0x2c8] ss:$16 sps:$4 sm:$0xff]  }
 0x27e   : > { %3193 = vmatprep.subr.bf16.mxu0 %v5193_v17  ;;  %3275 = vmatprep.subr.bf16.mxu1 %v5196_v18  ;;  %v5288_v17 = vld [vmem:[%s5603_s20 + $0x2e4] ss:$16 sps:$4 sm:$0xff]   ;;  %v5291_v18 = vld [vmem:[%s5603_s20 + $0x2ec] ss:$16 sps:$4 sm:$0xff]  }
 0x281   : > { %3194 = vmatpush1.bf16.msra.mxu0 %v5191_v19  ;;  %3276 = vmatpush1.bf16.msra.mxu1 %v5194_v20  ;;  %v5286_v19 = vld [vmem:[%s5603_s20 + $0x2e0] ss:$16 sps:$4 sm:$0xff]   ;;  %v5289_v20 = vld [vmem:[%s5603_s20 + $0x2e8] ss:$16 sps:$4 sm:$0xff]  }
 0x282   : > { %3195 = vmatprep.subr.bf16.mxu0 %v5199_v21  ;;  %3277 = vmatprep.subr.bf16.mxu1 %v5202_v22  ;;  %v5294_v21 = vld [vmem:[%s5603_s20 + $0x304] ss:$16 sps:$4 sm:$0xff]   ;;  %v5297_v22 = vld [vmem:[%s5603_s20 + $0x30c] ss:$16 sps:$4 sm:$0xff]  }
 0x285   : > { %3196 = vmatpush1.bf16.msra.mxu0 %v5197_v23  ;;  %3278 = vmatpush1.bf16.msra.mxu1 %v5200_v24  ;;  %v5292_v23 = vld [vmem:[%s5603_s20 + $0x300] ss:$16 sps:$4 sm:$0xff]   ;;  %v5295_v24 = vld [vmem:[%s5603_s20 + $0x308] ss:$16 sps:$4 sm:$0xff]  }
 0x286   : > { %3197 = vmatprep.subr.bf16.mxu0 %v5205_v25  ;;  %3279 = vmatprep.subr.bf16.mxu1 %v5208_v26  ;;  %v5300_v25 = vld [vmem:[%s5603_s20 + $0x324] ss:$16 sps:$4 sm:$0xff]   ;;  %v5303_v26 = vld [vmem:[%s5603_s20 + $0x32c] ss:$16 sps:$4 sm:$0xff]  }
 0x289   : > { %3198 = vmatpush1.bf16.msra.mxu0 %v5203_v27  ;;  %3280 = vmatpush1.bf16.msra.mxu1 %v5206_v28  ;;  %v5298_v27 = vld [vmem:[%s5603_s20 + $0x320] ss:$16 sps:$4 sm:$0xff]   ;;  %v5301_v28 = vld [vmem:[%s5603_s20 + $0x328] ss:$16 sps:$4 sm:$0xff]  }
 0x28a   : > { %3199 = vmatprep.subr.bf16.mxu0 %v5212_v29  ;;  %3281 = vmatprep.subr.bf16.mxu1 %v5215_v30  ;;  %v5306_v29 = vld [vmem:[%s5603_s20 + $0x344] ss:$16 sps:$4 sm:$0xff]   ;;  %v5309_v30 = vld [vmem:[%s5603_s20 + $0x34c] ss:$16 sps:$4 sm:$0xff]  }
 0x28d   : > { %3200 = vmatpush1.bf16.msra.mxu0 %v5210_v31  ;;  %3282 = vmatpush1.bf16.msra.mxu1 %v5213_v32  ;;  %v5304_v31 = vld [vmem:[%s5603_s20 + $0x340] ss:$16 sps:$4 sm:$0xff]   ;;  %v5307_v32 = vld [vmem:[%s5603_s20 + $0x348] ss:$16 sps:$4 sm:$0xff]  }
 0x28e   : > { %3201 = vmatprep.subr.bf16.mxu0 %v5218_v33  ;;  %3283 = vmatprep.subr.bf16.mxu1 %v5221_v34  ;;  %v5312_v33 = vld [vmem:[%s5603_s20 + $0x364] ss:$16 sps:$4 sm:$0xff]   ;;  %v5315_v34 = vld [vmem:[%s5603_s20 + $0x36c] ss:$16 sps:$4 sm:$0xff]  }
 0x291   : > { %3202 = vmatpush1.bf16.msra.mxu0 %v5216_v35  ;;  %3284 = vmatpush1.bf16.msra.mxu1 %v5219_v36  ;;  %v5310_v35 = vld [vmem:[%s5603_s20 + $0x360] ss:$16 sps:$4 sm:$0xff]   ;;  %v5313_v36 = vld [vmem:[%s5603_s20 + $0x368] ss:$16 sps:$4 sm:$0xff]  }
 0x292   : > { %3203 = vmatprep.subr.bf16.mxu0 %v5225_v37  ;;  %3285 = vmatprep.subr.bf16.mxu1 %v5228_v38  ;;  %v5318_v37 = vld [vmem:[%s5603_s20 + $0x384] ss:$16 sps:$4 sm:$0xff]   ;;  %v5321_v38 = vld [vmem:[%s5603_s20 + $0x38c] ss:$16 sps:$4 sm:$0xff]  }
 0x295   : > { %3204 = vmatpush1.bf16.msra.mxu0 %v5223_v39  ;;  %3286 = vmatpush1.bf16.msra.mxu1 %v5226_v40  ;;  %v5316_v39 = vld [vmem:[%s5603_s20 + $0x380] ss:$16 sps:$4 sm:$0xff]   ;;  %v5319_v40 = vld [vmem:[%s5603_s20 + $0x388] ss:$16 sps:$4 sm:$0xff]  }
 0x296   : > { %3205 = vmatprep.subr.bf16.mxu0 %v5231_v41  ;;  %3287 = vmatprep.subr.bf16.mxu1 %v5234_v42  ;;  %v5324_v41 = vld [vmem:[%s5603_s20 + $0x3a4] ss:$16 sps:$4 sm:$0xff]   ;;  %v5327_v42 = vld [vmem:[%s5603_s20 + $0x3ac] ss:$16 sps:$4 sm:$0xff]  }
 0x299   : > { %3206 = vmatpush1.bf16.msra.mxu0 %v5229_v43  ;;  %3288 = vmatpush1.bf16.msra.mxu1 %v5232_v44  ;;  %v5322_v43 = vld [vmem:[%s5603_s20 + $0x3a0] ss:$16 sps:$4 sm:$0xff]   ;;  %v5325_v44 = vld [vmem:[%s5603_s20 + $0x3a8] ss:$16 sps:$4 sm:$0xff]  }
 0x29a   : > { %3207 = vmatprep.subr.bf16.mxu0 %v5238_v45  ;;  %3289 = vmatprep.subr.bf16.mxu1 %v5241_v46  ;;  %v5330_v45 = vld [vmem:[%s5603_s20 + $0x3c4] ss:$16 sps:$4 sm:$0xff]   ;;  %v5333_v46 = vld [vmem:[%s5603_s20 + $0x3cc] ss:$16 sps:$4 sm:$0xff]  }
 0x29d   : > { %3208 = vmatpush1.bf16.msra.mxu0 %v5236_v47  ;;  %3290 = vmatpush1.bf16.msra.mxu1 %v5239_v48  ;;  %v5328_v47 = vld [vmem:[%s5603_s20 + $0x3c0] ss:$16 sps:$4 sm:$0xff]   ;;  %v5331_v48 = vld [vmem:[%s5603_s20 + $0x3c8] ss:$16 sps:$4 sm:$0xff]  }
 0x29e   : > { %3218 = vmatprep.subr.bf16.mxu0 %v5246_v49  ;;  %3300 = vmatprep.subr.bf16.mxu1 %v5249_v50  ;;  %v5336_v49 = vld [vmem:[%s5603_s20 + $0x3e4] ss:$16 sps:$4 sm:$0xff]   ;;  %v5339_v50 = vld [vmem:[%s5603_s20 + $0x3ec] ss:$16 sps:$4 sm:$0xff]  }
 0x2a0   : > { %3210 = vmatmul.mubr.bf16.vlgmr.msra.gmra.mrb[24].mxu0 %v4517_v51  ;;  %3292 = vmatmul.mubr.bf16.vlgmr.msra.gmra.mrb[24].mxu1 %v4517_v51  ;;  %v5334_v51 = vld [vmem:[%s5603_s20 + $0x3e0] ss:$16 sps:$4 sm:$0xff]  }
 0x2a1   : > { %3219 = vmatpush1.bf16.msra.mxu0 %v5244_v53  ;;  %3301 = vmatpush1.bf16.msra.mxu1 %v5247_v54  ;;  %v5337_v53 = vld [vmem:[%s5603_s20 + $0x3e8] ss:$16 sps:$4 sm:$0xff]   ;;  %v4519_v54 = vcombine.low %v5892_v52, %v5892_v52 }
 0x2a2   : > { %3220 = vmatprep.subr.bf16.mxu0 %v5252_v55  ;;  %3302 = vmatprep.subr.bf16.mxu1 %v5255_v56 }
 0x2a3   : > { %3250 = vmatprep.mubr.bf16.mxu0 %v4520_v57  ;;  %3332 = vmatprep.mubr.bf16.mxu1 %v4520_v57 }
 0x2a5   : > { %3221 = vmatpush1.bf16.msra.mxu0 %v5250_v58  ;;  %3303 = vmatpush1.bf16.msra.mxu1 %v5253_v59 }
 0x2a6   : > { %3222 = vmatprep.subr.bf16.mxu0 %v5258_v60  ;;  %3304 = vmatprep.subr.bf16.mxu1 %v5261_v61 }
 0x2a9   : > { %3223 = vmatpush1.bf16.msra.mxu0 %v5256_v62  ;;  %3305 = vmatpush1.bf16.msra.mxu1 %v5259_v63 }
 0x2aa   : > { %3224 = vmatprep.subr.bf16.mxu0 %v5264_v1  ;;  %3306 = vmatprep.subr.bf16.mxu1 %v5267_v2  ;;  %v5346_v1 = vld [vmem:[%s5610_s24 + $0x40] sm:$0xff]  }
 0x2ab   : > { %v5347_v2 = vld [vmem:[%s5610_s24 + $0xc0] sm:$0xff]  }
 0x2ad   : > { %3225 = vmatpush1.bf16.msra.mxu0 %v5262_v3  ;;  %3307 = vmatpush1.bf16.msra.mxu1 %v5265_v4 }
 0x2ae   : > { %3226 = vmatprep.subr.bf16.mxu0 %v5270_v5  ;;  %3308 = vmatprep.subr.bf16.mxu1 %v5273_v6 }
 0x2b1   : > { %3227 = vmatpush1.bf16.msra.mxu0 %v5268_v7  ;;  %3309 = vmatpush1.bf16.msra.mxu1 %v5271_v8  ;;  %v5342_v7 = vld [vmem:[%s6122_s10] sm:$0xff]  }
 0x2b2   : > { %3228 = vmatprep.subr.bf16.mxu0 %v5276_v9  ;;  %3310 = vmatprep.subr.bf16.mxu1 %v5279_v10  ;;  %v5348_v8 = vld [vmem:[%s5610_s24] sm:$0xff]   ;;  %v5350_v10 = vld [vmem:[%s5610_s24 + $0x48] sm:$0xff]  }
 0x2b3   : > { %v5349_v9 = vld [vmem:[%s5610_s24 + $0x80] sm:$0xff]  }
 0x2b5   : > { %3229 = vmatpush1.bf16.msra.mxu0 %v5274_v11  ;;  %3311 = vmatpush1.bf16.msra.mxu1 %v5277_v12  ;;  %v5351_v11 = vld [vmem:[%s5610_s24 + $0xc8] sm:$0xff]  }
 0x2b6   : > { %3230 = vmatprep.subr.bf16.mxu0 %v5282_v13  ;;  %3312 = vmatprep.subr.bf16.mxu1 %v5285_v14  ;;  %v5352_v12 = vld [vmem:[%s5610_s24 + $0x8] sm:$0xff]   ;;  %v5354_v14 = vld [vmem:[%s5610_s24 + $0x50] sm:$0xff]  }
 0x2b7   : > { %v5353_v13 = vld [vmem:[%s5610_s24 + $0x88] sm:$0xff]  }
 0x2b9   : > { %3231 = vmatpush1.bf16.msra.mxu0 %v5280_v15  ;;  %3313 = vmatpush1.bf16.msra.mxu1 %v5283_v16  ;;  %v5355_v15 = vld [vmem:[%s5610_s24 + $0xd0] sm:$0xff]   ;;  %v5343_v16 = vld [vmem:[%s6122_s10 + $0x8] sm:$0xff]  }
 0x2ba   : > { %3232 = vmatprep.subr.bf16.mxu0 %v5288_v17  ;;  %3314 = vmatprep.subr.bf16.mxu1 %v5291_v18  ;;  %v5356_v17 = vld [vmem:[%s5610_s24 + $0x10] sm:$0xff]  }
 0x2bb   : > { %v5357_v18 = vld [vmem:[%s5610_s24 + $0x90] sm:$0xff]  }
 0x2bd   : > { %3233 = vmatpush1.bf16.msra.mxu0 %v5286_v19  ;;  %3315 = vmatpush1.bf16.msra.mxu1 %v5289_v20  ;;  %v5358_v19 = vld [vmem:[%s5610_s24 + $0x58] sm:$0xff]  }
 0x2be   : > { %3234 = vmatprep.subr.bf16.mxu0 %v5294_v21  ;;  %3316 = vmatprep.subr.bf16.mxu1 %v5297_v22  ;;  %v5359_v20 = vld [vmem:[%s5610_s24 + $0xd8] sm:$0xff]  }
 0x2bf   : > { %v5360_v21 = vld [vmem:[%s5610_s24 + $0x18] sm:$0xff]  }
 0x2c0   : > { %v5361_v22 = vld [vmem:[%s5610_s24 + $0x98] sm:$0xff]  }
 0x2c1   : > { %3235 = vmatpush1.bf16.msra.mxu0 %v5292_v23  ;;  %3317 = vmatpush1.bf16.msra.mxu1 %v5295_v24  ;;  %v5362_v23 = vld [vmem:[%s5610_s24 + $0x60] sm:$0xff]  }
 0x2c2   : > { %3236 = vmatprep.subr.bf16.mxu0 %v5300_v25  ;;  %3318 = vmatprep.subr.bf16.mxu1 %v5303_v26  ;;  %v5363_v24 = vld [vmem:[%s5610_s24 + $0xe0] sm:$0xff]   ;;  %v5344_v25 = vld [vmem:[%s6122_s10 + $0x10] sm:$0xff]  }
 0x2c3   : > { %v5364_v26 = vld [vmem:[%s5610_s24 + $0x20] sm:$0xff]  }
 0x2c5   : > { %3237 = vmatpush1.bf16.msra.mxu0 %v5298_v27  ;;  %3319 = vmatpush1.bf16.msra.mxu1 %v5301_v28  ;;  %v5365_v27 = vld [vmem:[%s5610_s24 + $0xa0] sm:$0xff]   ;;  %v5366_v28 = vld [vmem:[%s5610_s24 + $0x68] sm:$0xff]  }
 0x2c6   : > { %3238 = vmatprep.subr.bf16.mxu0 %v5306_v29  ;;  %3320 = vmatprep.subr.bf16.mxu1 %v5309_v30  ;;  %v5367_v29 = vld [vmem:[%s5610_s24 + $0xe8] sm:$0xff]   ;;  %v5345_v30 = vld [vmem:[%s6122_s10 + $0x18] sm:$0xff]  }
 0x2c9   : > { %3239 = vmatpush1.bf16.msra.mxu0 %v5304_v31  ;;  %3321 = vmatpush1.bf16.msra.mxu1 %v5307_v32  ;;  %v5368_v31 = vld [vmem:[%s5610_s24 + $0x28] sm:$0xff]  }
 0x2ca   : > { %3240 = vmatprep.subr.bf16.mxu0 %v5312_v33  ;;  %3322 = vmatprep.subr.bf16.mxu1 %v5315_v34  ;;  %v5369_v32 = vld [vmem:[%s5610_s24 + $0xa8] sm:$0xff]   ;;  %v5371_v33 = vld [vmem:[%s5610_s24 + $0xf0] sm:$0xff]  }
 0x2cb   : > { %v5372_v34 = vld [vmem:[%s5610_s24 + $0x30] sm:$0xff]  }
 0x2cd   : > { %3241 = vmatpush1.bf16.msra.mxu0 %v5310_v35  ;;  %3323 = vmatpush1.bf16.msra.mxu1 %v5313_v36  ;;  %v5373_v35 = vld [vmem:[%s5610_s24 + $0xb0] sm:$0xff]   ;;  %v5374_v36 = vld [vmem:[%s5610_s24 + $0x78] sm:$0xff]  }
 0x2ce   : > { %3242 = vmatprep.subr.bf16.mxu0 %v5318_v37  ;;  %3324 = vmatprep.subr.bf16.mxu1 %v5321_v38  ;;  %v5375_v37 = vld [vmem:[%s5610_s24 + $0xf8] sm:$0xff]  }
 0x2cf   : > { %v5376_v38 = vld [vmem:[%s5610_s24 + $0x38] sm:$0xff]  }
 0x2d1   : > { %3243 = vmatpush1.bf16.msra.mxu0 %v5316_v39  ;;  %3325 = vmatpush1.bf16.msra.mxu1 %v5319_v40  ;;  %v5377_v39 = vld [vmem:[%s5610_s24 + $0xb8] sm:$0xff]   ;;  %v3577_v40 = vlaneseq }
 0x2d2   : > { %3244 = vmatprep.subr.bf16.mxu0 %v5324_v41  ;;  %3326 = vmatprep.subr.bf16.mxu1 %v5327_v42 }
 0x2d3   : > { %v3578_v41 = vshrl.u32 %v3577_v40, 7 }
 0x2d5   : > { %3245 = vmatpush1.bf16.msra.mxu0 %v5322_v43  ;;  %3327 = vmatpush1.bf16.msra.mxu1 %v5325_v44  ;;  %v3579_v42 = vsub.s32 0, %v3578_v41  ;;  %v3587_v43 = vsub.s32 2, %v3578_v41  ;;  %v3575_v44 = vld [vmem:[%s719_s18] sm:$0xf] }
 0x2d6   : > { %3246 = vmatprep.subr.bf16.mxu0 %v5330_v45  ;;  %3328 = vmatprep.subr.bf16.mxu1 %v5333_v46  ;;  %v3583_v45 = vsub.s32 1, %v3578_v41  ;;  %v3591_v46 = vsub.s32 3, %v3578_v41 }
 0x2d9   : > { %3247 = vmatpush1.bf16.msra.mxu0 %v5328_v47  ;;  %3329 = vmatpush1.bf16.msra.mxu1 %v5331_v48  ;;  %v6029_v47 = vrot.slane %v3575_v44, %v3579_v42  ;;  %v6031_v48 = vrot.slane %v3575_v44, %v3587_v43 }
 0x2da   : > { %3248 = vmatprep.subr.bf16.mxu0 %v5336_v49  ;;  %3330 = vmatprep.subr.bf16.mxu1 %v5339_v50  ;;  %v6033_v49 = vrot.slane %v3575_v44, %v3583_v45  ;;  %v6035_v50 = vrot.slane %v3575_v44, %v3591_v46 }
 0x2dd   : > { %3249 = vmatpush1.bf16.msra.mxu0 %v5334_v51  ;;  %3331 = vmatpush1.bf16.msra.mxu1 %v5337_v53 }
 0x2e0   : > { %3251 = vmatmul.mubr.bf16.vlgmr.msra.gmra.mrb[24].mxu0 %v4519_v54  ;;  %3333 = vmatmul.mubr.bf16.vlgmr.msra.gmra.mrb[24].mxu1 %v4519_v54 }
 0x2e1   : > { %3429 = vmatprep.mubr.bf16.mxu0 %v5418_v0  ;;  %3502 = vmatprep.mubr.bf16.mxu1 %v5418_v0 }
 0x3b3   : > { %v3252_v55 = vpop.f32.mrb[24].mxu0  ;;  %v3334_v56 = vpop.f32.mrb[24].mxu1 }
 0x3b4   : > { %v3341_v57 = vpack.c.bf16 %v3252_v55, %v3252_v55  ;;  %v3343_v58 = vpack.c.bf16 %v3334_v56, %v3334_v56  ;;  %v3254_v59 = vpop.f32.mrb[25].mxu0  ;;  %v3336_v60 = vpop.f32.mrb[25].mxu1 }
 0x3b5   : > { %v3342_v61 = vpack.c.bf16 %v3254_v59, %v3254_v59  ;;  %v3344_v62 = vpack.c.bf16 %v3336_v60, %v3336_v60  ;;  %v3256_v52 = vpop.f32.mrb[26].mxu0  ;;  %v3338_v63 = vpop.f32.mrb[26].mxu1 }
 0x3b6   : > { %v3386_v3 = vsel %vm2202_vm2, %v3341_v57, 0  ;;  %v3392_v4 = vsel %vm2202_vm2, %v3343_v58, 0  ;;  %v3257_v5 = vpop.f32.mrb[27].mxu0  ;;  %v3339_v6 = vpop.f32.mrb[27].mxu1 }
 0x3b7   : > { %4653 = vmatprep.subr.msk.bf16.mxu0 %vm2202_vm2, %v3342_v61  ;;  %4658 = vmatprep.subr.msk.bf16.mxu1 %vm2202_vm2, %v3344_v62 }
 0x3b8   : > { %3398 = vmatpush1.bf16.msra.mxu0 %v3386_v3  ;;  %3471 = vmatpush1.bf16.msra.mxu1 %v3392_v4 }
 0x3b9   : > { %4702 = vmatprep.subr.bf16.mxu0 %v5346_v1  ;;  %4742 = vmatprep.subr.bf16.mxu1 %v5347_v2 }
 0x3bb   : > { %4654 = vmatmul.mubr.msk.bf16.vlgmr.msra.gmra.mrb[4].mxu0 %vm2189_vm3, %v5342_v7  ;;  %4659 = vmatmul.mubr.msk.bf16.vlgmr.msra.gmra.mrb[4].mxu1 %vm2189_vm3, %v5342_v7 }
 0x3bc   : > { %3439 = vmatprep.mubr.bf16.mxu0 %v5418_v0  ;;  %3512 = vmatprep.mubr.bf16.mxu1 %v5418_v0 }
 0x3bd   : > { %4703 = vmatpush3.bf16.msra.mxu0 %v5348_v8  ;;  %4743 = vmatpush3.bf16.msra.mxu1 %v5349_v9 }
 0x3be   : > { %4704 = vmatprep.subr.bf16.mxu0 %v5350_v10  ;;  %4744 = vmatprep.subr.bf16.mxu1 %v5351_v11 }
 0x3c1   : > { %4705 = vmatpush3.bf16.msra.mxu0 %v5352_v12  ;;  %4745 = vmatpush3.bf16.msra.mxu1 %v5353_v13 }
 0x3c2   : > { %4706 = vmatprep.subr.bf16.mxu0 %v5354_v14  ;;  %4746 = vmatprep.subr.bf16.mxu1 %v5355_v15 }
 0x3c3   : > { %4655 = vmatmul.mubr.msk.bf16.gmra.mrb[8].mxu0 %vm2189_vm3, %v5343_v16  ;;  %4660 = vmatmul.mubr.msk.bf16.gmra.mrb[8].mxu1 %vm2189_vm3, %v5343_v16 }
 0x3c4   : > { %3449 = vmatprep.mubr.bf16.mxu0 %v5418_v0  ;;  %3522 = vmatprep.mubr.bf16.mxu1 %v5418_v0 }
 0x3c5   : > { %4707 = vmatpush3.bf16.msra.mxu0 %v5356_v17  ;;  %4747 = vmatpush3.bf16.msra.mxu1 %v5357_v18 }
 0x3c6   : > { %4708 = vmatprep.subr.bf16.mxu0 %v5358_v19  ;;  %4748 = vmatprep.subr.bf16.mxu1 %v5359_v20 }
 0x3c9   : > { %4709 = vmatpush3.bf16.msra.mxu0 %v5360_v21  ;;  %4749 = vmatpush3.bf16.msra.mxu1 %v5361_v22 }
 0x3ca   : > { %4710 = vmatprep.subr.bf16.mxu0 %v5362_v23  ;;  %4750 = vmatprep.subr.bf16.mxu1 %v5363_v24 }
 0x3cb   : > { %4656 = vmatmul.mubr.msk.bf16.gmra.mrb[12].mxu0 %vm2189_vm3, %v5344_v25  ;;  %4661 = vmatmul.mubr.msk.bf16.gmra.mrb[12].mxu1 %vm2189_vm3, %v5344_v25 }
 0x3cc   : > { %3459 = vmatprep.mubr.bf16.mxu0 %v5418_v0  ;;  %3532 = vmatprep.mubr.bf16.mxu1 %v5418_v0  ;;  %v5370_v0 = vld [vmem:[%s5610_s24 + $0x70] sm:$0xff]  }
 0x3cd   : > { %4711 = vmatpush3.bf16.msra.mxu0 %v5364_v26  ;;  %4751 = vmatpush3.bf16.msra.mxu1 %v5365_v27 }
 0x3ce   : > { %4712 = vmatprep.subr.bf16.mxu0 %v5366_v28  ;;  %4752 = vmatprep.subr.bf16.mxu1 %v5367_v29 }
 0x3d1   : > { %4713 = vmatpush3.bf16.msra.mxu0 %v5368_v31  ;;  %4753 = vmatpush3.bf16.msra.mxu1 %v5369_v32 }
 0x3d2   : > { %4714 = vmatprep.subr.bf16.mxu0 %v5370_v0  ;;  %4754 = vmatprep.subr.bf16.mxu1 %v5371_v33 }
 0x3d3   : > { %4657 = vmatmul.mubr.msk.bf16.gmra.mrb[16].mxu0 %vm2189_vm3, %v5345_v30  ;;  %4662 = vmatmul.mubr.msk.bf16.gmra.mrb[16].mxu1 %vm2189_vm3, %v5345_v30 }
 0x3d5   : > { %4715 = vmatpush3.bf16.msra.mxu0 %v5372_v34  ;;  %4755 = vmatpush3.bf16.msra.mxu1 %v5373_v35 }
 0x3d6   : > { %4716 = vmatprep.subr.bf16.mxu0 %v5374_v36  ;;  %4756 = vmatprep.subr.bf16.mxu1 %v5375_v37 }
 0x3d9   : > { %4717 = vmatpush3.bf16.msra.mxu0 %v5376_v38  ;;  %4757 = vmatpush3.bf16.msra.mxu1 %v5377_v39 }
 0x48e   : > { %v3431_v51 = vpop.f32.mrb[4].mxu0  ;;  %v3504_v53 = vpop.f32.mrb[4].mxu1 }
 0x48f   : > { %v3597_v54 = vadd.f32 %v6029_v47, %v3431_v51  ;;  %v3599_v55 = vadd.f32 %v6031_v48, %v3504_v53  ;;  %v3433_v56 = vpop.f32.mrb[5].mxu0  ;;  %v3506_v57 = vpop.f32.mrb[5].mxu1 }
 0x490   : > { %v3598_v58 = vadd.f32 %v6033_v49, %v3433_v56  ;;  %v3600_v59 = vadd.f32 %v6035_v50, %v3506_v57  ;;  %v3435_v60 = vpop.f32.mrb[6].mxu0  ;;  %v3508_v61 = vpop.f32.mrb[6].mxu1 }
 0x491   : > { %v3601_v62 = vadd.f32 %v6029_v47, %v3435_v60  ;;  %v3603_v52 = vadd.f32 %v6031_v48, %v3508_v61  ;;  %v3437_v63 = vpop.f32.mrb[7].mxu0  ;;  %v3510_v1 = vpop.f32.mrb[7].mxu1  ;;  %v3629_v4 = vmax.f32 %v3597_v54, 0.0  ;;  %v3631_v5 = vmax.f32 %v3599_v55, 0.0 }
 0x492   : > { %v3602_v2 = vadd.f32 %v6033_v49, %v3437_v63  ;;  %v3604_v3 = vadd.f32 %v6035_v50, %v3510_v1  ;;  %v3630_v8 = vmax.f32 %v3598_v58, 0.0  ;;  %v3632_v9 = vmax.f32 %v3600_v59, 0.0 }
 0x493   : > { %v3633_v6 = vmax.f32 %v3601_v62, 0.0  ;;  %v3635_v7 = vmax.f32 %v3603_v52, 0.0 }
 0x494   : > { %v3634_v10 = vmax.f32 %v3602_v2, 0.0  ;;  %v3636_v11 = vmax.f32 %v3604_v3, 0.0 }
 0x495   : > { %v3661_v12 = vpack.c.bf16 %v3633_v6, %v3629_v4  ;;  %v3663_v13 = vpack.c.bf16 %v3635_v7, %v3631_v5 }
 0x496   : > { %v3662_v14 = vpack.c.bf16 %v3634_v10, %v3630_v8  ;;  %v3664_v15 = vpack.c.bf16 %v3636_v11, %v3632_v9  ;;  %v3441_v16 = vpop.f32.mrb[8].mxu0  ;;  %v3514_v17 = vpop.f32.mrb[8].mxu1 }
 0x497   : > { %v3605_v18 = vadd.f32 %v6029_v47, %v3441_v16  ;;  %v3607_v19 = vadd.f32 %v6031_v48, %v3514_v17  ;;  %v3443_v20 = vpop.f32.mrb[9].mxu0  ;;  %v3516_v21 = vpop.f32.mrb[9].mxu1 }
 0x498   : > { %v3606_v22 = vadd.f32 %v6033_v49, %v3443_v20  ;;  %v3608_v23 = vadd.f32 %v6035_v50, %v3516_v21  ;;  %v3445_v24 = vpop.f32.mrb[10].mxu0  ;;  %v3518_v25 = vpop.f32.mrb[10].mxu1  ;;  %3972 = vmatprep.mubr.bf16.mxu0 %v3662_v14  ;;  %4037 = vmatprep.mubr.bf16.mxu1 %v3664_v15 }
 0x499   : > { %v3609_v26 = vadd.f32 %v6029_v47, %v3445_v24  ;;  %v3611_v27 = vadd.f32 %v6031_v48, %v3518_v25  ;;  %v3447_v28 = vpop.f32.mrb[11].mxu0  ;;  %v3520_v29 = vpop.f32.mrb[11].mxu1  ;;  %3973 = vmatmul.mubr.bf16.vlgmr.msra.gmra.mrb[28].mxu0 %v3661_v12  ;;  %4038 = vmatmul.mubr.bf16.vlgmr.msra.gmra.mrb[28].mxu1 %v3663_v13  ;;  %v3637_v32 = vmax.f32 %v3605_v18, 0.0  ;;  %v3639_v0 = vmax.f32 %v3607_v19, 0.0 }
 0x49a   : > { %v3610_v30 = vadd.f32 %v6033_v49, %v3447_v28  ;;  %v3612_v31 = vadd.f32 %v6035_v50, %v3520_v29  ;;  %v3638_v35 = vmax.f32 %v3606_v22, 0.0  ;;  %v3640_v36 = vmax.f32 %v3608_v23, 0.0 }
 0x49b   : > { %v3641_v33 = vmax.f32 %v3609_v26, 0.0  ;;  %v3643_v34 = vmax.f32 %v3611_v27, 0.0 }
 0x49c   : > { %v3642_v37 = vmax.f32 %v3610_v30, 0.0  ;;  %v3644_v38 = vmax.f32 %v3612_v31, 0.0 }
 0x49d   : > { %v3665_v39 = vpack.c.bf16 %v3641_v33, %v3637_v32  ;;  %v3667_v40 = vpack.c.bf16 %v3643_v34, %v3639_v0 }
 0x49e   : > { %v3666_v41 = vpack.c.bf16 %v3642_v37, %v3638_v35  ;;  %v3668_v42 = vpack.c.bf16 %v3644_v38, %v3640_v36  ;;  %v3451_v43 = vpop.f32.mrb[12].mxu0  ;;  %v3524_v44 = vpop.f32.mrb[12].mxu1  ;;  %v6073_v37 = vld [vmem:[%s727_s6] ss:$0 sm:$0xff] }
 0x49f   : > { %v3613_v45 = vadd.f32 %v6029_v47, %v3451_v43  ;;  %v3615_v46 = vadd.f32 %v6031_v48, %v3524_v44  ;;  %v3453_v51 = vpop.f32.mrb[13].mxu0  ;;  %v3526_v53 = vpop.f32.mrb[13].mxu1 }
 0x4a0   : > { %v3614_v54 = vadd.f32 %v6033_v49, %v3453_v51  ;;  %v3616_v55 = vadd.f32 %v6035_v50, %v3526_v53  ;;  %v3455_v56 = vpop.f32.mrb[14].mxu0  ;;  %v3528_v57 = vpop.f32.mrb[14].mxu1  ;;  %3980 = vmatprep.mubr.bf16.mxu0 %v3666_v41  ;;  %4045 = vmatprep.mubr.bf16.mxu1 %v3668_v42 }
 0x4a1   : > { %v3617_v58 = vadd.f32 %v6029_v47, %v3455_v56  ;;  %v3619_v59 = vadd.f32 %v6031_v48, %v3528_v57  ;;  %v3457_v60 = vpop.f32.mrb[15].mxu0  ;;  %v3530_v61 = vpop.f32.mrb[15].mxu1  ;;  %3981 = vmatmul.mubr.bf16.gmra.mrb[32].mxu0 %v3665_v39  ;;  %4046 = vmatmul.mubr.bf16.gmra.mrb[32].mxu1 %v3667_v40  ;;  %v3645_v63 = vmax.f32 %v3613_v45, 0.0  ;;  %v3647_v1 = vmax.f32 %v3615_v46, 0.0 }
 0x4a2   : > { %v3618_v62 = vadd.f32 %v6033_v49, %v3457_v60  ;;  %v3620_v52 = vadd.f32 %v6035_v50, %v3530_v61  ;;  %v3646_v4 = vmax.f32 %v3614_v54, 0.0  ;;  %v3648_v5 = vmax.f32 %v3616_v55, 0.0 }
 0x4a3   : > { %v3649_v2 = vmax.f32 %v3617_v58, 0.0  ;;  %v3651_v3 = vmax.f32 %v3619_v59, 0.0 }
 0x4a4   : > { %v3650_v6 = vmax.f32 %v3618_v62, 0.0  ;;  %v3652_v7 = vmax.f32 %v3620_v52, 0.0 }
 0x4a5   : > { %v3669_v8 = vpack.c.bf16 %v3649_v2, %v3645_v63  ;;  %v3671_v9 = vpack.c.bf16 %v3651_v3, %v3647_v1 }
 0x4a6   : > { %v3670_v10 = vpack.c.bf16 %v3650_v6, %v3646_v4  ;;  %v3672_v11 = vpack.c.bf16 %v3652_v7, %v3648_v5  ;;  %v3461_v12 = vpop.f32.mrb[16].mxu0  ;;  %v3534_v13 = vpop.f32.mrb[16].mxu1 }
 0x4a7   : > { %v3621_v14 = vadd.f32 %v6029_v47, %v3461_v12  ;;  %v3623_v15 = vadd.f32 %v6031_v48, %v3534_v13  ;;  %v3463_v16 = vpop.f32.mrb[17].mxu0  ;;  %v3536_v17 = vpop.f32.mrb[17].mxu1 }
 0x4a8   : > { %v3622_v18 = vadd.f32 %v6033_v49, %v3463_v16  ;;  %v3624_v19 = vadd.f32 %v6035_v50, %v3536_v17  ;;  %v3465_v20 = vpop.f32.mrb[18].mxu0  ;;  %v3538_v21 = vpop.f32.mrb[18].mxu1  ;;  %3988 = vmatprep.mubr.bf16.mxu0 %v3670_v10  ;;  %4053 = vmatprep.mubr.bf16.mxu1 %v3672_v11 }
 0x4a9   : > { %v3625_v22 = vadd.f32 %v6029_v47, %v3465_v20  ;;  %v3627_v23 = vadd.f32 %v6031_v48, %v3538_v21  ;;  %v3467_v24 = vpop.f32.mrb[19].mxu0  ;;  %v3540_v25 = vpop.f32.mrb[19].mxu1  ;;  %3989 = vmatmul.mubr.bf16.gmra.mrb[36].mxu0 %v3669_v8  ;;  %4054 = vmatmul.mubr.bf16.gmra.mrb[36].mxu1 %v3671_v9  ;;  %v3653_v28 = vmax.f32 %v3621_v14, 0.0  ;;  %v3655_v29 = vmax.f32 %v3623_v15, 0.0 }
 0x4aa   : > { %v3626_v26 = vadd.f32 %v6033_v49, %v3467_v24  ;;  %v3628_v27 = vadd.f32 %v6035_v50, %v3540_v25  ;;  %v3654_v32 = vmax.f32 %v3622_v18, 0.0  ;;  %v3656_v0 = vmax.f32 %v3624_v19, 0.0 }
 0x4ab   : > { %v3657_v30 = vmax.f32 %v3625_v22, 0.0  ;;  %v3659_v31 = vmax.f32 %v3627_v23, 0.0 }
 0x4ac   : > { %v3658_v33 = vmax.f32 %v3626_v26, 0.0  ;;  %v3660_v34 = vmax.f32 %v3628_v27, 0.0 }
 0x4ad   : > { %v3673_v47 = vpack.c.bf16 %v3657_v30, %v3653_v28  ;;  %v3675_v48 = vpack.c.bf16 %v3659_v31, %v3655_v29 }
 0x4ae   : > { %v3674_v35 = vpack.c.bf16 %v3658_v33, %v3654_v32  ;;  %v3676_v36 = vpack.c.bf16 %v3660_v34, %v3656_v0 }
 0x4b0   : > { %3996 = vmatprep.mubr.bf16.mxu0 %v3674_v35  ;;  %4061 = vmatprep.mubr.bf16.mxu1 %v3676_v36 }
 0x4b1   : > { %3997 = vmatmul.mubr.bf16.gmra.mrb[40].mxu0 %v3673_v47  ;;  %4062 = vmatmul.mubr.bf16.gmra.mrb[40].mxu1 %v3675_v48 }
 0x56c   : > { %v4718_v49 = vpop.f32.mrb[28].mxu0  ;;  %v4758_v50 = vpop.f32.mrb[28].mxu1 }
 0x56d   : > { %v4719_v38 = vpop.f32.mrb[29].mxu0  ;;  %v4759_v39 = vpop.f32.mrb[29].mxu1 }
 0x56e   : > { %v4720_v40 = vadd.f32 %v4719_v38, %v4718_v49  ;;  %v4760_v41 = vadd.f32 %v4759_v39, %v4758_v50  ;;  %v4721_v42 = vpop.f32.mrb[30].mxu0  ;;  %v4761_v43 = vpop.f32.mrb[30].mxu1 }
 0x56f   : > { %v4722_v44 = vpop.f32.mrb[31].mxu0  ;;  %v4762_v45 = vpop.f32.mrb[31].mxu1 }
 0x570   : > { %v3975_v46 = vadd.f32 %v4720_v40, %v6073_v37  ;;  %v4723_v51 = vadd.f32 %v4722_v44, %v4721_v42  ;;  %v4763_v53 = vadd.f32 %v4762_v45, %v4761_v43 }
 0x572   : > { %v4040_v54 = vadd.f32 %v4760_v41, %v3975_v46  ;;  %v3978_v55 = vadd.f32 %v4723_v51, %v6073_v37 }
 0x574   : > { %4070 = vst [vmem:[%s6080_s30] sm:$0xff] %v4040_v54  ;;  %v4043_v56 = vadd.f32 %v4763_v53, %v3978_v55  ;;  %v4724_v57 = vpop.f32.mrb[32].mxu0  ;;  %v4764_v58 = vpop.f32.mrb[32].mxu1 }
 0x575   : > { %v4725_v59 = vpop.f32.mrb[33].mxu0  ;;  %v4765_v60 = vpop.f32.mrb[33].mxu1 }
 0x576   : > { %4071 = vst [vmem:[%s6080_s30 + $0x8] sm:$0xff] %v4043_v56  ;;  %v4726_v61 = vadd.f32 %v4725_v59, %v4724_v57  ;;  %v4766_v62 = vadd.f32 %v4765_v60, %v4764_v58  ;;  %v4727_v52 = vpop.f32.mrb[34].mxu0  ;;  %v4767_v63 = vpop.f32.mrb[34].mxu1 }
 0x577   : > { %v4728_v1 = vpop.f32.mrb[35].mxu0  ;;  %v4768_v2 = vpop.f32.mrb[35].mxu1 }
 0x578   : > { %v3983_v3 = vadd.f32 %v4726_v61, %v6073_v37  ;;  %v4729_v4 = vadd.f32 %v4728_v1, %v4727_v52  ;;  %v4769_v5 = vadd.f32 %v4768_v2, %v4767_v63 }
 0x57a   : > { %v4048_v6 = vadd.f32 %v4766_v62, %v3983_v3  ;;  %v3986_v7 = vadd.f32 %v4729_v4, %v6073_v37 }
 0x57c   : > { %4072 = vst [vmem:[%s6080_s30 + $0x10] sm:$0xff] %v4048_v6  ;;  %v4051_v8 = vadd.f32 %v4769_v5, %v3986_v7  ;;  %v4730_v9 = vpop.f32.mrb[36].mxu0  ;;  %v4770_v10 = vpop.f32.mrb[36].mxu1 }
 0x57d   : > { %v4731_v11 = vpop.f32.mrb[37].mxu0  ;;  %v4771_v12 = vpop.f32.mrb[37].mxu1 }
 0x57e   : > { %4073 = vst [vmem:[%s6080_s30 + $0x18] sm:$0xff] %v4051_v8  ;;  %v4732_v13 = vadd.f32 %v4731_v11, %v4730_v9  ;;  %v4772_v14 = vadd.f32 %v4771_v12, %v4770_v10  ;;  %v4733_v15 = vpop.f32.mrb[38].mxu0  ;;  %v4773_v16 = vpop.f32.mrb[38].mxu1 }
 0x57f   : > { %v4734_v17 = vpop.f32.mrb[39].mxu0  ;;  %v4774_v18 = vpop.f32.mrb[39].mxu1 }
 0x580   : > { %v3991_v19 = vadd.f32 %v4732_v13, %v6073_v37  ;;  %v4735_v20 = vadd.f32 %v4734_v17, %v4733_v15  ;;  %v4775_v21 = vadd.f32 %v4774_v18, %v4773_v16 }
 0x582   : > { %v4056_v22 = vadd.f32 %v4772_v14, %v3991_v19  ;;  %v3994_v23 = vadd.f32 %v4735_v20, %v6073_v37 }
 0x584   : > { %4074 = vst [vmem:[%s6080_s30 + $0x20] sm:$0xff] %v4056_v22  ;;  %v4059_v24 = vadd.f32 %v4775_v21, %v3994_v23  ;;  %v4736_v25 = vpop.f32.mrb[40].mxu0  ;;  %v4776_v26 = vpop.f32.mrb[40].mxu1 }
 0x585   : > { %v4737_v27 = vpop.f32.mrb[41].mxu0  ;;  %v4777_v28 = vpop.f32.mrb[41].mxu1 }
 0x586   : > { %4075 = vst [vmem:[%s6080_s30 + $0x28] sm:$0xff] %v4059_v24  ;;  %v4738_v29 = vadd.f32 %v4737_v27, %v4736_v25  ;;  %v4778_v30 = vadd.f32 %v4777_v28, %v4776_v26  ;;  %v4739_v31 = vpop.f32.mrb[42].mxu0  ;;  %v4779_v32 = vpop.f32.mrb[42].mxu1 }
 0x587   : > { %v4740_v0 = vpop.f32.mrb[43].mxu0  ;;  %v4780_v33 = vpop.f32.mrb[43].mxu1 }
 0x588   : > { %v3999_v34 = vadd.f32 %v4738_v29, %v6073_v37  ;;  %v4741_v47 = vadd.f32 %v4740_v0, %v4739_v31  ;;  %v4781_v48 = vadd.f32 %v4780_v33, %v4779_v32 }
 0x58a   : > { %v4064_v35 = vadd.f32 %v4778_v30, %v3999_v34  ;;  %v4002_v36 = vadd.f32 %v4741_v47, %v6073_v37 }
 0x58c   : > { %4076 = vst [vmem:[%s6080_s30 + $0x30] sm:$0xff] %v4064_v35  ;;  %v4067_v49 = vadd.f32 %v4781_v48, %v4002_v36 }
 0x58e   : > { %4077 = vst [vmem:[%s6080_s30 + $0x38] sm:$0xff] %v4067_v49 }
 0x58f PF: > { %s6149_s22 = sld [smem:[#allocation4_spill]]  ;;  %s6150_s29 = sld [smem:[#allocation2_spill]] }
 0x590   : > { %s6151_s30 = sld [smem:[#allocation3_spill]]  ;;  %s6152_s15 = sld [smem:[#allocation5_spill]] }
 0x591   : > { %s6153_s16 = sld [smem:[#allocation6_spill]] }
 0x595   : > { %s24_s17 = sadd.s32 1, %s6149_s22  }
 0x596   : > { %p21_p7 = scmp.ge.s32.totalorder %s24_s17, 6  }
 0x598   :  { %23 = sbr.rel (!%p21_p7) target bundleno = 6 (0x6), region = 136 }

// kernel: encoder_decoder_forward.11
= control target key start
LH: loop header
LB: loop body
LE: loop exit
PB: predicated region body
PF: predicated region fallthrough
CT: control target
= control target key end

     0   :  { %s8592_s24 = smov 0   ;;  %s11264_s0 = inlined_call_operand.vmem [shape: f32[2,64,128], index: 0, kind: input, shape index: {}]   ;;  %s11265_s1 = inlined_call_operand.vmem [shape: f32[2,64,128], index: 1, kind: input, shape index: {}]   ;;  %s11266_s2 = inlined_call_operand.vmem [shape: bf16[1024,64], index: 2, kind: input, shape index: {}]   ;;  %s11267_s3 = inlined_call_operand.vmem [shape: bf16[1024,576], index: 3, kind: input, shape index: {}]   ;;  %s11268_s4 = inlined_call_operand.vmem [shape: bf16[128,1152], index: 4, kind: input, shape index: {}]   ;;  %s11269_s5 = inlined_call_operand.vmem [shape: f32[1,128], index: 5, kind: input, shape index: {}]   ;;  %s11270_s6 = inlined_call_operand.vmem [shape: f32[2,1024,128], index: 6, kind: output, shape index: {0}]   ;;  %s11271_s7 = inlined_call_operand.vmem [shape: f32[2,1024,128], index: 7, kind: output, shape index: {1}]  }
   0x1 LB: > { %s6542_s25 = sadd.s32 4294967295, %s8549_s24   ;;  %p6546_p0 = scmp.ge.s32.totalorder %s8549_s24, 1  ;;  %s8549_s24 = sphi %s8592_s24, %s18_s24  }
   0x2   : > { %p250_p1 = scmp.lt.s32.totalorder %s8549_s24, 3 }
   0x4   : > { %p251_p2 = pnand %p6546_p0, %p250_p1 }
   0x6   : > { %254 = sbr.rel (%p251_p2) target bundleno = 1212 (0x4bc), region = 44 }
   0xd   : > { %v7925_v0 = vld [vmem:[%s11268_s4 + $0x4] ss:$36 sps:$4 sm:$0xff]   ;;  %p292_p3 = scmp.lt.s32.totalorder %s6542_s25, 1  ;;  %v8551_v2 = vmov 0   ;;  %v7928_v3 = vld [vmem:[%s11268_s4 + $0x4c] ss:$36 sps:$4 sm:$0xff]  }
   0xe   : > { %v7927_v1 = vld [vmem:[%s11268_s4] ss:$36 sps:$4 sm:$0xff]   ;;  %2135 = vmatprep.mubr.bf16.mxu1 %v8551_v2  ;;  %2103 = vmatprep.subr.bf16.mxu1 %v7925_v0  ;;  %v7930_v4 = vld [vmem:[%s11268_s4 + $0x48] ss:$36 sps:$4 sm:$0xff]   ;;  %v7931_v5 = vld [vmem:[%s11268_s4 + $0x94] ss:$36 sps:$4 sm:$0xff]  }
   0xf   : > { %s11353_s25 = smov (!%p292_p3, %s6542_s25), 1  ;;  %2104 = vmatpush1.bf16.msra.mxu1 %v7927_v1  ;;  %v7933_v6 = vld [vmem:[%s11268_s4 + $0x90] ss:$36 sps:$4 sm:$0xff]   ;;  %v7934_v7 = vld [vmem:[%s11268_s4 + $0xdc] ss:$36 sps:$4 sm:$0xff]   ;;  %vm789_vm0 = vcmask 523264  }
  0x10   : > { %2105 = vmatprep.subr.bf16.mxu1 %v7928_v3  ;;  %s7142_s13 = sshll.u32 %s11353_s25, 6  ;;  %v7936_v8 = vld [vmem:[%s11268_s4 + $0xd8] ss:$36 sps:$4 sm:$0xff]   ;;  %v7937_v13 = vld [vmem:[%s11268_s4 + $0x124] ss:$36 sps:$4 sm:$0xff]   ;;  %v7975_v48 = vld [vmem:[%s11266_s2 + $0x10] sm:$0xff]  }
  0x11   : > { %s8625_s18 = scalar_lea.vmem %s11264_s0, %s7142_s13  ;;  %s8633_s23 = scalar_lea.vmem %s11265_s1, %s7142_s13  ;;  %v7939_v16 = vld [vmem:[%s11268_s4 + $0x120] ss:$36 sps:$4 sm:$0xff]   ;;  %v7940_v22 = vld [vmem:[%s11268_s4 + $0x16c] ss:$36 sps:$4 sm:$0xff]   ;;  %v7943_v31 = vld [vmem:[%s11268_s4 + $0x1b4] ss:$36 sps:$4 sm:$0xff]  }
  0x12   : > { %v313_v9 = vld [vmem:[%s8625_s18] sm:$0xff]  ;;  %v314_v10 = vld [vmem:[%s8625_s18 + $0x8] sm:$0xff]  ;;  %v315_v18 = vld [vmem:[%s8625_s18 + $0x10] sm:$0xff]  ;;  %s7144_s14 = sshll.u32 %s11353_s25, 10 }
  0x13   : > { %2106 = vmatpush1.bf16.msra.mxu1 %v7930_v4  ;;  %v321_v11 = vld [vmem:[%s8633_s23] sm:$0xff]  ;;  %v322_v12 = vld [vmem:[%s8633_s23 + $0x8] sm:$0xff]  ;;  %v316_v19 = vld [vmem:[%s8625_s18 + $0x18] sm:$0xff]  ;;  %s9128_s17 = scalar_lea.vmem %s11270_s6, %s7144_s14  ;;  %s10743_s9 = scalar_lea.vmem %s11271_s7, %s7144_s14 }
  0x14   : > { %2107 = vmatprep.subr.bf16.mxu1 %v7931_v5  ;;  %v329_v14 = vadd.f32 %v321_v11, %v313_v9  ;;  %v330_v15 = vadd.f32 %v322_v12, %v314_v10  ;;  %v323_v20 = vld [vmem:[%s8633_s23 + $0x10] sm:$0xff]  ;;  %v324_v21 = vld [vmem:[%s8633_s23 + $0x18] sm:$0xff]  ;;  %v7942_v25 = vld [vmem:[%s11268_s4 + $0x168] ss:$36 sps:$4 sm:$0xff]  }
  0x15   : > { %v331_v23 = vadd.f32 %v323_v20, %v315_v18  ;;  %v332_v24 = vadd.f32 %v324_v21, %v316_v19  ;;  %v317_v27 = vld [vmem:[%s8625_s18 + $0x20] sm:$0xff]  ;;  %v318_v28 = vld [vmem:[%s8625_s18 + $0x28] sm:$0xff]  ;;  %v7945_v34 = vld [vmem:[%s11268_s4 + $0x1b0] ss:$36 sps:$4 sm:$0xff]  }
  0x16   : > { %v8648_v17 = vpack.c.bf16 %v330_v15, %v329_v14  ;;  %v325_v29 = vld [vmem:[%s8633_s23 + $0x20] sm:$0xff]  ;;  %v326_v30 = vld [vmem:[%s8633_s23 + $0x28] sm:$0xff]  ;;  %v319_v36 = vld [vmem:[%s8625_s18 + $0x30] sm:$0xff] }
  0x17   : > { %2108 = vmatpush1.bf16.msra.mxu1 %v7933_v6  ;;  %v8662_v26 = vpack.c.bf16 %v332_v24, %v331_v23  ;;  %v333_v32 = vadd.f32 %v325_v29, %v317_v27  ;;  %v334_v33 = vadd.f32 %v326_v30, %v318_v28  ;;  %v320_v37 = vld [vmem:[%s8625_s18 + $0x38] sm:$0xff]  ;;  %v327_v38 = vld [vmem:[%s8633_s23 + $0x30] sm:$0xff]  ;;  %v7973_v46 = vld [vmem:[%s11266_s2] sm:$0xff]  }
  0x18   : > { %2109 = vmatprep.subr.bf16.mxu1 %v7934_v7  ;;  %7294 = vmatprep.subr.bf16.mxu0 %v8648_v17  ;;  %v328_v39 = vld [vmem:[%s8633_s23 + $0x38] sm:$0xff]  ;;  %v335_v41 = vadd.f32 %v327_v38, %v319_v36  ;;  %v7951_v44 = vld [vmem:[%s11268_s4 + $0xc] ss:$36 sps:$4 sm:$0xff]   ;;  %v7977_v54 = vld [vmem:[%s11266_s2 + $0x20] sm:$0xff]  }
  0x19   : > { %7295 = vmatpush3.bf16.msra.mxu0 %v8648_v17  ;;  %v8676_v35 = vpack.c.bf16 %v334_v33, %v333_v32  ;;  %v7946_v40 = vld [vmem:[%s11268_s4 + $0x1fc] ss:$36 sps:$4 sm:$0xff]   ;;  %v336_v42 = vadd.f32 %v328_v39, %v320_v37  ;;  %v7974_v47 = vld [vmem:[%s11266_s2 + $0x8] sm:$0xff]   ;;  %7302 = vmatprep.mubr.msk.bf16.mxu0 %vm789_vm0, %v7973_v46  ;;  %v7954_v50 = vld [vmem:[%s11268_s4 + $0x54] ss:$36 sps:$4 sm:$0xff]  }
  0x1a   : > { %7296 = vmatprep.subr.bf16.mxu0 %v8662_v26  ;;  %v7948_v43 = vld [vmem:[%s11268_s4 + $0x1f8] ss:$36 sps:$4 sm:$0xff]   ;;  %v7949_v49 = vld [vmem:[%s11268_s4 + $0x8] ss:$36 sps:$4 sm:$0xff]   ;;  %v7952_v51 = vld [vmem:[%s11268_s4 + $0x50] ss:$36 sps:$4 sm:$0xff]  }
  0x1b   : > { %2110 = vmatpush1.bf16.msra.mxu1 %v7936_v8  ;;  %v8693_v45 = vpack.c.bf16 %v336_v42, %v335_v41  ;;  %v7957_v52 = vld [vmem:[%s11268_s4 + $0x9c] ss:$36 sps:$4 sm:$0xff]   ;;  %v7960_v56 = vld [vmem:[%s11268_s4 + $0xe4] ss:$36 sps:$4 sm:$0xff]   ;;  %v7963_v58 = vld [vmem:[%s11268_s4 + $0x12c] ss:$36 sps:$4 sm:$0xff]  }
  0x1c   : > { %2111 = vmatprep.subr.bf16.mxu1 %v7937_v13  ;;  %v7976_v53 = vld [vmem:[%s11266_s2 + $0x18] sm:$0xff]   ;;  %v7958_v57 = vld [vmem:[%s11268_s4 + $0xe0] ss:$36 sps:$4 sm:$0xff]   ;;  %v7978_v59 = vld [vmem:[%s11266_s2 + $0x28] sm:$0xff]  }
  0x1d   : > { %7297 = vmatpush3.bf16.msra.mxu0 %v8662_v26  ;;  %v7955_v55 = vld [vmem:[%s11268_s4 + $0x98] ss:$36 sps:$4 sm:$0xff]   ;;  %v7979_v60 = vld [vmem:[%s11266_s2 + $0x30] sm:$0xff]   ;;  %v7961_v61 = vld [vmem:[%s11268_s4 + $0x128] ss:$36 sps:$4 sm:$0xff]  }
  0x1e   : > { %7298 = vmatprep.subr.bf16.mxu0 %v8676_v35  ;;  %v7966_v62 = vld [vmem:[%s11268_s4 + $0x174] ss:$36 sps:$4 sm:$0xff]   ;;  %v7969_v0 = vld [vmem:[%s11268_s4 + $0x1bc] ss:$36 sps:$4 sm:$0xff]   ;;  %v7972_v5 = vld [vmem:[%s11268_s4 + $0x204] ss:$36 sps:$4 sm:$0xff]  }
  0x1f   : > { %2112 = vmatpush1.bf16.msra.mxu1 %v7939_v16  ;;  %v7964_v63 = vld [vmem:[%s11268_s4 + $0x170] ss:$36 sps:$4 sm:$0xff]   ;;  %v7980_v1 = vld [vmem:[%s11266_s2 + $0x38] sm:$0xff]   ;;  %v7981_v3 = vld [vmem:[%s11266_s2 + $0x40] sm:$0xff]  }
  0x20   : > { %2113 = vmatprep.subr.bf16.mxu1 %v7940_v22  ;;  %v7967_v4 = vld [vmem:[%s11268_s4 + $0x1b8] ss:$36 sps:$4 sm:$0xff]   ;;  %v7970_v6 = vld [vmem:[%s11268_s4 + $0x200] ss:$36 sps:$4 sm:$0xff]   ;;  %v7982_v7 = vld [vmem:[%s11266_s2 + $0x48] sm:$0xff]  }
  0x21   : > { %7299 = vmatpush3.bf16.msra.mxu0 %v8676_v35  ;;  %v7997_v8 = vld [vmem:[%s11268_s4 + $0x14] ss:$36 sps:$4 sm:$0xff]   ;;  %v8002_v11 = vld [vmem:[%s11268_s4 + $0x5c] ss:$36 sps:$4 sm:$0xff]   ;;  %v8005_v14 = vld [vmem:[%s11268_s4 + $0xa4] ss:$36 sps:$4 sm:$0xff]  }
  0x22   : > { %7300 = vmatprep.subr.bf16.mxu0 %v8693_v45  ;;  %v7983_v9 = vld [vmem:[%s11266_s2 + $0x50] sm:$0xff]   ;;  %v8000_v12 = vld [vmem:[%s11268_s4 + $0x58] ss:$36 sps:$4 sm:$0xff]   ;;  %v7985_v15 = vld [vmem:[%s11266_s2 + $0x60] sm:$0xff]  }
  0x23   : > { %2114 = vmatpush1.bf16.msra.mxu1 %v7942_v25  ;;  %v7995_v10 = vld [vmem:[%s11268_s4 + $0x10] ss:$36 sps:$4 sm:$0xff]   ;;  %v7984_v13 = vld [vmem:[%s11266_s2 + $0x58] sm:$0xff]   ;;  %v8003_v16 = vld [vmem:[%s11268_s4 + $0xa0] ss:$36 sps:$4 sm:$0xff]  }
  0x24   : > { %2115 = vmatprep.subr.bf16.mxu1 %v7943_v31  ;;  %v8010_v18 = vld [vmem:[%s11268_s4 + $0xec] ss:$36 sps:$4 sm:$0xff]   ;;  %v8013_v21 = vld [vmem:[%s11268_s4 + $0x134] ss:$36 sps:$4 sm:$0xff]   ;;  %v8018_v24 = vld [vmem:[%s11268_s4 + $0x17c] ss:$36 sps:$4 sm:$0xff]  }
  0x25   : > { %7301 = vmatpush3.bf16.msra.mxu0 %v8693_v45  ;;  %v8008_v19 = vld [vmem:[%s11268_s4 + $0xe8] ss:$36 sps:$4 sm:$0xff]   ;;  %v7987_v22 = vld [vmem:[%s11266_s2 + $0x70] sm:$0xff]   ;;  %v7988_v25 = vld [vmem:[%s11266_s2 + $0x78] sm:$0xff]  }
  0x26   : > { %4679 = vmatprep.subr.bf16.mxu0 %v8551_v2  ;;  %v7986_v20 = vld [vmem:[%s11266_s2 + $0x68] sm:$0xff]   ;;  %v8011_v23 = vld [vmem:[%s11268_s4 + $0x130] ss:$36 sps:$4 sm:$0xff]   ;;  %v8016_v27 = vld [vmem:[%s11268_s4 + $0x178] ss:$36 sps:$4 sm:$0xff]  }
  0x27   : > { %2116 = vmatpush1.bf16.msra.mxu1 %v7945_v34  ;;  %v8021_v28 = vld [vmem:[%s11268_s4 + $0x1c4] ss:$36 sps:$4 sm:$0xff]   ;;  %v8026_v31 = vld [vmem:[%s11268_s4 + $0x20c] ss:$36 sps:$4 sm:$0xff]   ;;  %v8029_v34 = vld [vmem:[%s11268_s4 + $0x1c] ss:$36 sps:$4 sm:$0xff]  }
  0x28   : > { %2117 = vmatprep.subr.bf16.mxu1 %v7946_v40  ;;  %7303 = vmatmul.mubr.msk.bf16.vlgmr.msra.gmra.mrb[0].mxu0 %vm789_vm0, %v7974_v47  ;;  %v7989_v29 = vld [vmem:[%s11266_s2 + $0x80] sm:$0xff]   ;;  %v7990_v32 = vld [vmem:[%s11266_s2 + $0x88] sm:$0xff]   ;;  %v7991_v36 = vld [vmem:[%s11266_s2 + $0x90] sm:$0xff]  }
  0x29   : > { %7306 = vmatprep.mubr.msk.bf16.mxu0 %vm789_vm0, %v7975_v48  ;;  %v8019_v30 = vld [vmem:[%s11268_s4 + $0x1c0] ss:$36 sps:$4 sm:$0xff]   ;;  %v8024_v33 = vld [vmem:[%s11268_s4 + $0x208] ss:$36 sps:$4 sm:$0xff]   ;;  %v8027_v37 = vld [vmem:[%s11268_s4 + $0x18] ss:$36 sps:$4 sm:$0xff]  }
  0x2a   : > { %v8034_v38 = vld [vmem:[%s11268_s4 + $0x64] ss:$36 sps:$4 sm:$0xff]   ;;  %v7992_v39 = vld [vmem:[%s11266_s2 + $0x98] sm:$0xff]   ;;  %v8037_v42 = vld [vmem:[%s11268_s4 + $0xac] ss:$36 sps:$4 sm:$0xff]  }
  0x2b   : > { %2118 = vmatpush1.bf16.msra.mxu1 %v7948_v43  ;;  %v7993_v40 = vld [vmem:[%s11266_s2 + $0xa0] sm:$0xff]   ;;  %v8035_v43 = vld [vmem:[%s11268_s4 + $0xa8] ss:$36 sps:$4 sm:$0xff]   ;;  %v8040_v46 = vld [vmem:[%s11268_s4 + $0xf0] ss:$36 sps:$4 sm:$0xff]  }
  0x2c   : > { %2176 = vmatprep.subr.bf16.mxu1 %v7951_v44  ;;  %v8032_v41 = vld [vmem:[%s11268_s4 + $0x60] ss:$36 sps:$4 sm:$0xff]   ;;  %v8042_v44 = vld [vmem:[%s11268_s4 + $0xf4] ss:$36 sps:$4 sm:$0xff]   ;;  %v7994_v47 = vld [vmem:[%s11266_s2 + $0xa8] sm:$0xff]  }
  0x2d   : > { %v8045_v48 = vld [vmem:[%s11268_s4 + $0x13c] ss:$36 sps:$4 sm:$0xff]  }
  0x2e   : > { %2136 = vmatmul.mubr.bf16.vlgmr.msra.gmra.mrb[0].mxu1 %v8648_v17 }
  0x2f   : > { %2177 = vmatpush1.bf16.msra.mxu1 %v7949_v49  ;;  %2145 = vmatprep.mubr.bf16.mxu1 %v8551_v2  ;;  %v7998_v49 = vld [vmem:[%s11266_s2 + $0xb0] sm:$0xff]  }
  0x30   : > { %2178 = vmatprep.subr.bf16.mxu1 %v7954_v50  ;;  %7307 = vmatmul.mubr.msk.bf16.gmra.mrb[4].mxu0 %vm789_vm0, %v7976_v53  ;;  %v8043_v50 = vld [vmem:[%s11268_s4 + $0x138] ss:$36 sps:$4 sm:$0xff]  }
  0x31   : > { %7310 = vmatprep.mubr.msk.bf16.mxu0 %vm789_vm0, %v7977_v54  ;;  %v7999_v53 = vld [vmem:[%s11266_s2 + $0xb8] sm:$0xff]   ;;  %v8006_v54 = vld [vmem:[%s11266_s2 + $0xc0] sm:$0xff]  }
  0x33   : > { %2179 = vmatpush1.bf16.msra.mxu1 %v7952_v51  ;;  %v8050_v51 = vld [vmem:[%s11268_s4 + $0x184] ss:$36 sps:$4 sm:$0xff]  }
  0x34   : > { %2180 = vmatprep.subr.bf16.mxu1 %v7957_v52  ;;  %v8048_v52 = vld [vmem:[%s11268_s4 + $0x180] ss:$36 sps:$4 sm:$0xff]  }
  0x36   : > { %2146 = vmatmul.mubr.bf16.gmra.mrb[4].mxu1 %v8662_v26 }
  0x37   : > { %2181 = vmatpush1.bf16.msra.mxu1 %v7955_v55  ;;  %2155 = vmatprep.mubr.bf16.mxu1 %v8551_v2  ;;  %v8053_v55 = vld [vmem:[%s11268_s4 + $0x1cc] ss:$36 sps:$4 sm:$0xff]  }
  0x38   : > { %2182 = vmatprep.subr.bf16.mxu1 %v7960_v56  ;;  %7311 = vmatmul.mubr.msk.bf16.gmra.mrb[8].mxu0 %vm789_vm0, %v7978_v59  ;;  %v8051_v56 = vld [vmem:[%s11268_s4 + $0x1c8] ss:$36 sps:$4 sm:$0xff]   ;;  %v8056_v59 = vld [vmem:[%s11268_s4 + $0x210] ss:$36 sps:$4 sm:$0xff]  }
  0x39   : > { %7314 = vmatprep.mubr.msk.bf16.mxu0 %vm789_vm0, %v7979_v60  ;;  %v8059_v60 = vld [vmem:[%s11268_s4 + $0x20] ss:$36 sps:$4 sm:$0xff]  }
  0x3b   : > { %2183 = vmatpush1.bf16.msra.mxu1 %v7958_v57  ;;  %v8058_v57 = vld [vmem:[%s11268_s4 + $0x214] ss:$36 sps:$4 sm:$0xff]  }
  0x3c   : > { %2184 = vmatprep.subr.bf16.mxu1 %v7963_v58  ;;  %v8007_v58 = vld [vmem:[%s11266_s2 + $0xc8] sm:$0xff]  }
  0x3e   : > { %2156 = vmatmul.mubr.bf16.gmra.mrb[8].mxu1 %v8676_v35 }
  0x3f   : > { %2185 = vmatpush1.bf16.msra.mxu1 %v7961_v61  ;;  %2165 = vmatprep.mubr.bf16.mxu1 %v8551_v2  ;;  %v8014_v61 = vld [vmem:[%s11266_s2 + $0xd0] sm:$0xff]  }
  0x40   : > { %2186 = vmatprep.subr.bf16.mxu1 %v7966_v62  ;;  %7315 = vmatmul.mubr.msk.bf16.gmra.mrb[12].mxu0 %vm789_vm0, %v7980_v1  ;;  %v8062_v62 = vld [vmem:[%s11268_s4 + $0x68] ss:$36 sps:$4 sm:$0xff]   ;;  %v8022_v1 = vld [vmem:[%s11266_s2 + $0xe0] sm:$0xff]  }
  0x41   : > { %7318 = vmatprep.mubr.msk.bf16.mxu0 %vm789_vm0, %v7981_v3  ;;  %v8066_v3 = vld [vmem:[%s11268_s4 + $0xf8] ss:$36 sps:$4 sm:$0xff]  }
  0x43   : > { %2187 = vmatpush1.bf16.msra.mxu1 %v7964_v63  ;;  %v8015_v63 = vld [vmem:[%s11266_s2 + $0xd8] sm:$0xff]  }
  0x44   : > { %2188 = vmatprep.subr.bf16.mxu1 %v7969_v0  ;;  %v8063_v0 = vld [vmem:[%s11268_s4 + $0xb0] ss:$36 sps:$4 sm:$0xff]  }
  0x46   : > { %2166 = vmatmul.mubr.bf16.gmra.mrb[12].mxu1 %v8693_v45 }
  0x47   : > { %2189 = vmatpush1.bf16.msra.mxu1 %v7967_v4  ;;  %2208 = vmatprep.mubr.bf16.mxu1 %v8551_v2  ;;  %v8023_v4 = vld [vmem:[%s11266_s2 + $0xe8] sm:$0xff]  }
  0x48   : > { %2190 = vmatprep.subr.bf16.mxu1 %v7972_v5  ;;  %7319 = vmatmul.mubr.msk.bf16.gmra.mrb[16].mxu0 %vm789_vm0, %v7982_v7  ;;  %v8067_v5 = vld [vmem:[%s11268_s4 + $0x140] ss:$36 sps:$4 sm:$0xff]   ;;  %v8070_v7 = vld [vmem:[%s11268_s4 + $0x188] ss:$36 sps:$4 sm:$0xff]  }
  0x49   : > { %7322 = vmatprep.mubr.msk.bf16.mxu0 %vm789_vm0, %v7983_v9  ;;  %v8071_v9 = vld [vmem:[%s11268_s4 + $0x1d0] ss:$36 sps:$4 sm:$0xff]  }
  0x4b   : > { %2191 = vmatpush1.bf16.msra.mxu1 %v7970_v6  ;;  %v8030_v6 = vld [vmem:[%s11266_s2 + $0xf0] sm:$0xff]  }
  0x4c   : > { %2249 = vmatprep.subr.bf16.mxu1 %v7997_v8  ;;  %v8031_v8 = vld [vmem:[%s11266_s2 + $0xf8] sm:$0xff]  }
  0x4e   : > { %2209 = vmatmul.mubr.bf16.vlgmr.msra.gmra.mrb[16].mxu1 %v8648_v17 }
  0x4f   : > { %2218 = vmatprep.mubr.bf16.mxu1 %v8551_v2  ;;  %2250 = vmatpush1.bf16.msra.mxu1 %v7995_v10  ;;  %v8038_v10 = vld [vmem:[%s11266_s2 + $0x100] sm:$0xff]  }
  0x50   : > { %2251 = vmatprep.subr.bf16.mxu1 %v8002_v11  ;;  %7323 = vmatmul.mubr.msk.bf16.gmra.mrb[20].mxu0 %vm789_vm0, %v7984_v13  ;;  %v8074_v11 = vld [vmem:[%s11268_s4 + $0x218] ss:$36 sps:$4 sm:$0xff]   ;;  %v8046_v13 = vld [vmem:[%s11266_s2 + $0x110] sm:$0xff]  }
  0x51   : > { %7326 = vmatprep.mubr.msk.bf16.mxu0 %vm789_vm0, %v7985_v15  ;;  %v8054_v15 = vld [vmem:[%s11266_s2 + $0x120] sm:$0xff]  }
  0x53   : > { %2252 = vmatpush1.bf16.msra.mxu1 %v8000_v12  ;;  %v8039_v12 = vld [vmem:[%s11266_s2 + $0x108] sm:$0xff]  }
  0x54   : > { %2253 = vmatprep.subr.bf16.mxu1 %v8005_v14  ;;  %v8047_v14 = vld [vmem:[%s11266_s2 + $0x118] sm:$0xff]  }
  0x56   : > { %2219 = vmatmul.mubr.bf16.gmra.mrb[20].mxu1 %v8662_v26 }
  0x57   : > { %2228 = vmatprep.mubr.bf16.mxu1 %v8551_v2  ;;  %2254 = vmatpush1.bf16.msra.mxu1 %v8003_v16  ;;  %v8064_v16 = vld [vmem:[%s11266_s2 + $0x140] sm:$0xff]  }
  0x58   : > { %2255 = vmatprep.subr.bf16.mxu1 %v8010_v18  ;;  %7327 = vmatmul.mubr.msk.bf16.gmra.mrb[24].mxu0 %vm789_vm0, %v7986_v20  ;;  %v8068_v18 = vld [vmem:[%s11266_s2 + $0x150] sm:$0xff]   ;;  %v8098_v20 = vld [vmem:[%s11267_s3 + $0x70c] ss:$20 sps:$4 sm:$0xff]  }
  0x59   : > { %7330 = vmatprep.mubr.msk.bf16.mxu0 %vm789_vm0, %v7987_v22  ;;  %v8073_v22 = vld [vmem:[%s11266_s2 + $0x168] sm:$0xff]  }
  0x5b   : > { %2256 = vmatpush1.bf16.msra.mxu1 %v8008_v19  ;;  %v8069_v19 = vld [vmem:[%s11266_s2 + $0x158] sm:$0xff]  }
  0x5c   : > { %2257 = vmatprep.subr.bf16.mxu1 %v8013_v21  ;;  %v8072_v21 = vld [vmem:[%s11266_s2 + $0x160] sm:$0xff]  }
  0x5e   : > { %2229 = vmatmul.mubr.bf16.gmra.mrb[24].mxu1 %v8676_v35 }
  0x5f   : > { %2238 = vmatprep.mubr.bf16.mxu1 %v8551_v2  ;;  %2258 = vmatpush1.bf16.msra.mxu1 %v8011_v23  ;;  %v8075_v23 = vld [vmem:[%s11266_s2 + $0x170] sm:$0xff]  }
  0x60   : > { %2259 = vmatprep.subr.bf16.mxu1 %v8018_v24  ;;  %7331 = vmatmul.mubr.msk.bf16.gmra.mrb[28].mxu0 %vm789_vm0, %v7988_v25  ;;  %v8076_v24 = vld [vmem:[%s11266_s2 + $0x178] sm:$0xff]   ;;  %v8077_v25 = vld [vmem:[%s11266_s2 + $0x180] sm:$0xff]  }
  0x61   : > { %7334 = vmatprep.mubr.msk.bf16.mxu0 %vm789_vm0, %v7989_v29  ;;  %v8080_v29 = vld [vmem:[%s11266_s2 + $0x198] sm:$0xff]  }
  0x63   : > { %2260 = vmatpush1.bf16.msra.mxu1 %v8016_v27  ;;  %v8078_v27 = vld [vmem:[%s11266_s2 + $0x188] sm:$0xff]  }
  0x64   : > { %2261 = vmatprep.subr.bf16.mxu1 %v8021_v28  ;;  %v8079_v28 = vld [vmem:[%s11266_s2 + $0x190] sm:$0xff]  }
  0x66   : > { %2239 = vmatmul.mubr.bf16.gmra.mrb[28].mxu1 %v8693_v45 }
  0x67   : > { %2262 = vmatpush1.bf16.msra.mxu1 %v8019_v30  ;;  %2281 = vmatprep.mubr.bf16.mxu1 %v8551_v2  ;;  %v8081_v30 = vld [vmem:[%s11266_s2 + $0x1a0] sm:$0xff]  }
  0x68   : > { %2263 = vmatprep.subr.bf16.mxu1 %v8026_v31  ;;  %7335 = vmatmul.mubr.msk.bf16.gmra.mrb[32].mxu0 %vm789_vm0, %v7990_v32  ;;  %v8082_v31 = vld [vmem:[%s11266_s2 + $0x1a8] sm:$0xff]   ;;  %v8083_v32 = vld [vmem:[%s11266_s2 + $0x1b0] sm:$0xff]  }
  0x69   : > { %7338 = vmatprep.mubr.msk.bf16.mxu0 %vm789_vm0, %v7991_v36 }
  0x6b   : > { %2264 = vmatpush1.bf16.msra.mxu1 %v8024_v33  ;;  %v8084_v33 = vld [vmem:[%s11266_s2 + $0x1b8] sm:$0xff]  }
  0x6c   : > { %2322 = vmatprep.subr.bf16.mxu1 %v8029_v34 }
  0x6e   : > { %2282 = vmatmul.mubr.bf16.vlgmr.msra.gmra.mrb[32].mxu1 %v8648_v17 }
  0x6f   : > { %2323 = vmatpush1.bf16.msra.mxu1 %v8027_v37  ;;  %2291 = vmatprep.mubr.bf16.mxu1 %v8551_v2 }
  0x70   : > { %2324 = vmatprep.subr.bf16.mxu1 %v8034_v38  ;;  %7339 = vmatmul.mubr.msk.bf16.gmra.mrb[36].mxu0 %vm789_vm0, %v7992_v39  ;;  %v8085_v38 = vld [vmem:[%s11266_s2 + $0x1c0] sm:$0xff]  }
  0x71   : > { %7342 = vmatprep.mubr.msk.bf16.mxu0 %vm789_vm0, %v7993_v40 }
  0x73   : > { %2325 = vmatpush1.bf16.msra.mxu1 %v8032_v41 }
  0x74   : > { %2326 = vmatprep.subr.bf16.mxu1 %v8037_v42 }
  0x76   : > { %2292 = vmatmul.mubr.bf16.gmra.mrb[36].mxu1 %v8662_v26 }
  0x77   : > { %2327 = vmatpush1.bf16.msra.mxu1 %v8035_v43  ;;  %2301 = vmatprep.mubr.bf16.mxu1 %v8551_v2 }
  0x78   : > { %2328 = vmatprep.subr.bf16.mxu1 %v8042_v44  ;;  %7343 = vmatmul.mubr.msk.bf16.gmra.mrb[40].mxu0 %vm789_vm0, %v7994_v47  ;;  %v8086_v47 = vld [vmem:[%s11266_s2 + $0x1c8] sm:$0xff]  }
  0x79   : > { %7346 = vmatprep.mubr.msk.bf16.mxu0 %vm789_vm0, %v7998_v49 }
  0x7b   : > { %2329 = vmatpush1.bf16.msra.mxu1 %v8040_v46 }
  0x7c   : > { %2330 = vmatprep.subr.bf16.mxu1 %v8045_v48 }
  0x7e   : > { %2302 = vmatmul.mubr.bf16.gmra.mrb[40].mxu1 %v8676_v35 }
  0x7f   : > { %2331 = vmatpush1.bf16.msra.mxu1 %v8043_v50  ;;  %2311 = vmatprep.mubr.bf16.mxu1 %v8551_v2 }
  0x80   : > { %2332 = vmatprep.subr.bf16.mxu1 %v8050_v51  ;;  %7347 = vmatmul.mubr.msk.bf16.gmra.mrb[44].mxu0 %vm789_vm0, %v7999_v53  ;;  %v8087_v51 = vld [vmem:[%s11266_s2 + $0x1d0] sm:$0xff]  }
  0x81   : > { %7350 = vmatprep.mubr.msk.bf16.mxu0 %vm789_vm0, %v8006_v54 }
  0x83   : > { %2333 = vmatpush1.bf16.msra.mxu1 %v8048_v52 }
  0x84   : > { %2334 = vmatprep.subr.bf16.mxu1 %v8053_v55 }
  0x86   : > { %2312 = vmatmul.mubr.bf16.gmra.mrb[44].mxu1 %v8693_v45 }
  0x87   : > { %2335 = vmatpush1.bf16.msra.mxu1 %v8051_v56  ;;  %2354 = vmatprep.mubr.bf16.mxu1 %v8551_v2 }
  0x88   : > { %2336 = vmatprep.subr.bf16.mxu1 %v8058_v57  ;;  %7351 = vmatmul.mubr.msk.bf16.gmra.mrb[48].mxu0 %vm789_vm0, %v8007_v58 }
  0x89   : > { %7354 = vmatprep.mubr.msk.bf16.mxu0 %vm789_vm0, %v8014_v61 }
  0x8b   : > { %2337 = vmatpush1.bf16.msra.mxu1 %v8056_v59  ;;  %v8088_v59 = vld [vmem:[%s11266_s2 + $0x1d8] sm:$0xff]  }
  0x8c   : > { %7430 = vmatprep.subr.bf16.mxu1 %v8059_v60 }
  0x8e   : > { %2355 = vmatmul.mubr.bf16.vlgmr.msra.gmra.mrb[48].mxu1 %v8648_v17 }
  0x8f   : > { %7431 = vmatpush3.bf16.msra.mxu1 %v8059_v60  ;;  %2364 = vmatprep.mubr.bf16.mxu1 %v8551_v2 }
  0x90   : > { %7432 = vmatprep.subr.bf16.mxu1 %v8062_v62  ;;  %7355 = vmatmul.mubr.msk.bf16.gmra.mrb[52].mxu0 %vm789_vm0, %v8015_v63  ;;  %v8089_v63 = vld [vmem:[%s11266_s2 + $0x1e0] sm:$0xff]  }
  0x91   : > { %7358 = vmatprep.mubr.msk.bf16.mxu0 %vm789_vm0, %v8022_v1 }
  0x93   : > { %7433 = vmatpush3.bf16.msra.mxu1 %v8062_v62 }
  0x94   : > { %7434 = vmatprep.subr.bf16.mxu1 %v8063_v0 }
  0x96   : > { %2365 = vmatmul.mubr.bf16.gmra.mrb[52].mxu1 %v8662_v26 }
  0x97   : > { %7435 = vmatpush3.bf16.msra.mxu1 %v8063_v0  ;;  %2374 = vmatprep.mubr.bf16.mxu1 %v8551_v2 }
  0x98   : > { %7436 = vmatprep.subr.bf16.mxu1 %v8066_v3  ;;  %7359 = vmatmul.mubr.msk.bf16.gmra.mrb[56].mxu0 %vm789_vm0, %v8023_v4 }
  0x99   : > { %7362 = vmatprep.mubr.msk.bf16.mxu0 %vm789_vm0, %v8030_v6 }
  0x9b   : > { %7437 = vmatpush3.bf16.msra.mxu1 %v8066_v3 }
  0x9c   : > { %7438 = vmatprep.subr.bf16.mxu1 %v8067_v5 }
  0x9e   : > { %2375 = vmatmul.mubr.bf16.gmra.mrb[56].mxu1 %v8676_v35 }
  0x9f   : > { %7439 = vmatpush3.bf16.msra.mxu1 %v8067_v5  ;;  %2384 = vmatprep.mubr.bf16.mxu1 %v8551_v2 }
  0xa0   : > { %7440 = vmatprep.subr.bf16.mxu1 %v8070_v7  ;;  %7363 = vmatmul.mubr.msk.bf16.gmra.mrb[60].mxu0 %vm789_vm0, %v8031_v8 }
  0xa1   : > { %7366 = vmatprep.mubr.msk.bf16.mxu0 %vm789_vm0, %v8038_v10 }
  0xa3   : > { %7441 = vmatpush3.bf16.msra.mxu1 %v8070_v7 }
  0xa4   : > { %7442 = vmatprep.subr.bf16.mxu1 %v8071_v9 }
  0xa6   : > { %2385 = vmatmul.mubr.bf16.gmra.mrb[60].mxu1 %v8693_v45 }
  0xa7   : > { %7443 = vmatpush3.bf16.msra.mxu1 %v8071_v9  ;;  %7446 = vmatprep.mubr.bf16.mxu1 %v8648_v17  ;;  %v8055_v17 = vld [vmem:[%s11266_s2 + $0x128] sm:$0xff]  }
  0xa8   : > { %7444 = vmatprep.subr.bf16.mxu1 %v8074_v11  ;;  %7367 = vmatmul.mubr.msk.bf16.gmra.mrb[64].mxu0 %vm789_vm0, %v8039_v12  ;;  %v8090_v9 = vld [vmem:[%s11266_s2 + $0x1e8] sm:$0xff]   ;;  %v8091_v12 = vld [vmem:[%s11266_s2 + $0x1f0] sm:$0xff]  }
  0xa9   : > { %7370 = vmatprep.mubr.msk.bf16.mxu0 %vm789_vm0, %v8046_v13 }
  0xab   : > { %7445 = vmatpush3.bf16.msra.mxu1 %v8074_v11 }
  0xac   : > { %7590 = vmatprep.subr.bf16.mxu1 %v8551_v2 }
  0xae   : > { %7447 = vmatmul.mubr.bf16.vlgmr.msra.gmra.mrb[64].mxu1 %v8662_v26  ;;  %v8060_v26 = vld [vmem:[%s11266_s2 + $0x130] sm:$0xff]  }
  0xaf   : > { %7450 = vmatprep.mubr.bf16.mxu1 %v8676_v35  ;;  %v8061_v35 = vld [vmem:[%s11266_s2 + $0x138] sm:$0xff]  }
  0xb0   : > { %7371 = vmatmul.mubr.msk.bf16.gmra.mrb[68].mxu0 %vm789_vm0, %v8047_v14 }
  0xb1   : > { %7374 = vmatprep.mubr.msk.bf16.mxu0 %vm789_vm0, %v8054_v15 }
  0xb6   : > { %7451 = vmatmul.mubr.bf16.gmra.mrb[68].mxu1 %v8693_v45  ;;  %v8065_v45 = vld [vmem:[%s11266_s2 + $0x148] sm:$0xff]  }
  0xb7   : > { %5071 = vmatprep.mubr.bf16.mxu1 %v8098_v20 }
  0xb8   : > { %7375 = vmatmul.mubr.msk.bf16.gmra.mrb[72].mxu0 %vm789_vm0, %v8055_v17 }
  0xb9   : > { %7378 = vmatprep.mubr.msk.bf16.mxu0 %vm789_vm0, %v8060_v26 }
  0xc0   : > { %7379 = vmatmul.mubr.msk.bf16.gmra.mrb[76].mxu0 %vm789_vm0, %v8061_v35 }
  0xc1   : > { %7382 = vmatprep.mubr.msk.bf16.mxu0 %vm789_vm0, %v8064_v16 }
  0xc8   : > { %7383 = vmatmul.mubr.msk.bf16.gmra.mrb[80].mxu0 %vm789_vm0, %v8065_v45 }
  0xc9   : > { %7386 = vmatprep.mubr.msk.bf16.mxu0 %vm789_vm0, %v8068_v18  ;;  %v8092_v18 = vld [vmem:[%s11266_s2 + $0x1f8] sm:$0xff]  }
  0xd0   : > { %7387 = vmatmul.mubr.msk.bf16.gmra.mrb[84].mxu0 %vm789_vm0, %v8069_v19 }
  0xd1   : > { %7390 = vmatprep.mubr.msk.bf16.mxu0 %vm789_vm0, %v8072_v21  ;;  %v8095_v21 = vld [vmem:[%s11267_s3 + $0x4] ss:$20 sps:$4 sm:$0xff]  }
  0xd8   : > { %7391 = vmatmul.mubr.msk.bf16.gmra.mrb[88].mxu0 %vm789_vm0, %v8073_v22 }
  0xd9   : > { %7394 = vmatprep.mubr.msk.bf16.mxu0 %vm789_vm0, %v8075_v23 }
  0xe0   : > { %7395 = vmatmul.mubr.msk.bf16.gmra.mrb[92].mxu0 %vm789_vm0, %v8076_v24 }
  0xe1   : > { %7398 = vmatprep.mubr.msk.bf16.mxu0 %vm789_vm0, %v8077_v25 }
  0xe8   : > { %7399 = vmatmul.mubr.msk.bf16.gmra.mrb[96].mxu0 %vm789_vm0, %v8078_v27 }
  0xe9   : > { %7402 = vmatprep.mubr.msk.bf16.mxu0 %vm789_vm0, %v8079_v28 }
  0xf0   : > { %7403 = vmatmul.mubr.msk.bf16.gmra.mrb[100].mxu0 %vm789_vm0, %v8080_v29 }
  0xf1   : > { %7406 = vmatprep.mubr.msk.bf16.mxu0 %vm789_vm0, %v8081_v30 }
  0xf8   : > { %7407 = vmatmul.mubr.msk.bf16.gmra.mrb[104].mxu0 %vm789_vm0, %v8082_v31 }
  0xf9   : > { %7410 = vmatprep.mubr.msk.bf16.mxu0 %vm789_vm0, %v8083_v32 }
  0xfb   : > { %v7304_v34 = vpop.f32.mrb[0].mxu0 }
  0xfc   : > { %1529 = vst [vmem:[%s9128_s17 + $0x10] sm:$0xff] %v7304_v34  ;;  %v1016_v36 = vpop.f32.mrb[1].mxu0 }
  0xfd   : > { %1527 = vst [vmem:[%s9128_s17] sm:$0xff] %v1016_v36  ;;  %v7305_v39 = vpop.f32.mrb[2].mxu0 }
  0xfe   : > { %1530 = vst [vmem:[%s9128_s17 + $0x18] sm:$0xff] %v7305_v39  ;;  %v1019_v41 = vpop.f32.mrb[3].mxu0 }
  0xff   : > { %1528 = vst [vmem:[%s9128_s17 + $0x8] sm:$0xff] %v1019_v41 }
 0x100   : > { %7411 = vmatmul.mubr.msk.bf16.gmra.mrb[108].mxu0 %vm789_vm0, %v8084_v33 }
 0x101   : > { %v2137_v37 = vpop.f32.mrb[0].mxu1  ;;  %7414 = vmatprep.mubr.msk.bf16.mxu0 %vm789_vm0, %v8085_v38 }
 0x102   : > { %v2139_v40 = vpop.f32.mrb[1].mxu1 }
 0x103   : > { %v2141_v42 = vpop.f32.mrb[2].mxu1  ;;  %v7308_v48 = vpop.f32.mrb[4].mxu0 }
 0x104   : > { %v2460_v43 = vpack.c.bf16 %v2141_v42, %v2137_v37  ;;  %v2143_v44 = vpop.f32.mrb[3].mxu1  ;;  %1533 = vst [vmem:[%s9128_s17 + $0x30] sm:$0xff] %v7308_v48  ;;  %v1032_v49 = vpop.f32.mrb[5].mxu0 }
 0x105   : > { %v9141_v46 = vpack.c.bf16 %v2143_v44, %v2139_v40  ;;  %1531 = vst [vmem:[%s9128_s17 + $0x20] sm:$0xff] %v1032_v49  ;;  %v7309_v52 = vpop.f32.mrb[6].mxu0 }
 0x106   : > { %4680 = vmatpush1.bf16.msra.mxu0 %v2460_v43  ;;  %7606 = vmatpush1.bf16.msra.mxu1 %v2460_v43  ;;  %1534 = vst [vmem:[%s9128_s17 + $0x38] sm:$0xff] %v7309_v52  ;;  %v1035_v54 = vpop.f32.mrb[7].mxu0 }
 0x107   : > { %4681 = vmatprep.subr.bf16.mxu0 %v8551_v2  ;;  %7591 = vmatprep.subr.bf16.mxu1 %v8551_v2  ;;  %1532 = vst [vmem:[%s9128_s17 + $0x28] sm:$0xff] %v1035_v54 }
 0x108   : > { %7415 = vmatmul.mubr.msk.bf16.gmra.mrb[112].mxu0 %vm789_vm0, %v8086_v47 }
 0x109   : > { %v2147_v50 = vpop.f32.mrb[4].mxu1  ;;  %7418 = vmatprep.mubr.msk.bf16.mxu0 %vm789_vm0, %v8087_v51 }
 0x10a   : > { %v2149_v53 = vpop.f32.mrb[5].mxu1 }
 0x10b   : > { %v2151_v55 = vpop.f32.mrb[6].mxu1  ;;  %v7312_v60 = vpop.f32.mrb[8].mxu0 }
 0x10c   : > { %v2469_v56 = vpack.c.bf16 %v2151_v55, %v2147_v50  ;;  %v2153_v57 = vpop.f32.mrb[7].mxu1  ;;  %1537 = vst [vmem:[%s9128_s17 + $0x50] sm:$0xff] %v7312_v60  ;;  %v1048_v61 = vpop.f32.mrb[9].mxu0 }
 0x10d   : > { %v9157_v58 = vpack.c.bf16 %v2153_v57, %v2149_v53  ;;  %1535 = vst [vmem:[%s9128_s17 + $0x40] sm:$0xff] %v1048_v61  ;;  %v7313_v0 = vpop.f32.mrb[10].mxu0 }
 0x10e   : > { %4682 = vmatpush1.bf16.msra.mxu0 %v2469_v56  ;;  %7607 = vmatpush1.bf16.msra.mxu1 %v2469_v56  ;;  %1538 = vst [vmem:[%s9128_s17 + $0x58] sm:$0xff] %v7313_v0  ;;  %v1051_v3 = vpop.f32.mrb[11].mxu0 }
 0x10f   : > { %4683 = vmatprep.subr.bf16.mxu0 %v8551_v2  ;;  %7592 = vmatprep.subr.bf16.mxu1 %v8551_v2  ;;  %1536 = vst [vmem:[%s9128_s17 + $0x48] sm:$0xff] %v1051_v3 }
 0x110   : > { %7419 = vmatmul.mubr.msk.bf16.gmra.mrb[116].mxu0 %vm789_vm0, %v8088_v59 }
 0x111   : > { %v2157_v62 = vpop.f32.mrb[8].mxu1  ;;  %7422 = vmatprep.mubr.msk.bf16.mxu0 %vm789_vm0, %v8089_v63 }
 0x112   : > { %v2159_v1 = vpop.f32.mrb[9].mxu1 }
 0x113   : > { %v2161_v4 = vpop.f32.mrb[10].mxu1  ;;  %v7316_v8 = vpop.f32.mrb[12].mxu0 }
 0x114   : > { %v2478_v5 = vpack.c.bf16 %v2161_v4, %v2157_v62  ;;  %v2163_v6 = vpop.f32.mrb[11].mxu1  ;;  %1541 = vst [vmem:[%s9128_s17 + $0x70] sm:$0xff] %v7316_v8  ;;  %v1064_v10 = vpop.f32.mrb[13].mxu0 }
 0x115   : > { %v2479_v7 = vpack.c.bf16 %v2163_v6, %v2159_v1  ;;  %1539 = vst [vmem:[%s9128_s17 + $0x60] sm:$0xff] %v1064_v10  ;;  %v7317_v13 = vpop.f32.mrb[14].mxu0 }
 0x116   : > { %4684 = vmatpush1.bf16.msra.mxu0 %v2478_v5  ;;  %7608 = vmatpush1.bf16.msra.mxu1 %v2478_v5  ;;  %1542 = vst [vmem:[%s9128_s17 + $0x78] sm:$0xff] %v7317_v13  ;;  %v1067_v15 = vpop.f32.mrb[15].mxu0 }
 0x117   : > { %4685 = vmatprep.subr.bf16.mxu0 %v8551_v2  ;;  %7593 = vmatprep.subr.bf16.mxu1 %v8551_v2  ;;  %1540 = vst [vmem:[%s9128_s17 + $0x68] sm:$0xff] %v1067_v15 }
 0x118   : > { %7423 = vmatmul.mubr.msk.bf16.gmra.mrb[120].mxu0 %vm789_vm0, %v8090_v9 }
 0x119   : > { %v2167_v11 = vpop.f32.mrb[12].mxu1  ;;  %7426 = vmatprep.mubr.msk.bf16.mxu0 %vm789_vm0, %v8091_v12 }
 0x11a   : > { %v2169_v14 = vpop.f32.mrb[13].mxu1 }
 0x11b   : > { %v2171_v17 = vpop.f32.mrb[14].mxu1  ;;  %v7320_v45 = vpop.f32.mrb[16].mxu0 }
 0x11c   : > { %v2487_v26 = vpack.c.bf16 %v2171_v17, %v2167_v11  ;;  %v2173_v35 = vpop.f32.mrb[15].mxu1  ;;  %1545 = vst [vmem:[%s9128_s17 + $0x90] sm:$0xff] %v7320_v45  ;;  %v1080_v19 = vpop.f32.mrb[17].mxu0 }
 0x11d   : > { %v2488_v16 = vpack.c.bf16 %v2173_v35, %v2169_v14  ;;  %1543 = vst [vmem:[%s9128_s17 + $0x80] sm:$0xff] %v1080_v19  ;;  %v7321_v22 = vpop.f32.mrb[18].mxu0  ;;  %v8093_v35 = vld [vmem:[%s11267_s3] ss:$20 sps:$4 sm:$0xff]  }
 0x11e   : > { %4686 = vmatpush1.bf16.msra.mxu0 %v2487_v26  ;;  %7609 = vmatpush1.bf16.msra.mxu1 %v2487_v26  ;;  %1546 = vst [vmem:[%s9128_s17 + $0x98] sm:$0xff] %v7321_v22  ;;  %v1083_v24 = vpop.f32.mrb[19].mxu0  ;;  %v8101_v19 = vld [vmem:[%s11267_s3 + $0x734] ss:$20 sps:$4 sm:$0xff]  }
 0x11f   : > { %4687 = vmatprep.subr.bf16.mxu0 %v8551_v2  ;;  %7594 = vmatprep.subr.bf16.mxu1 %v8551_v2  ;;  %1544 = vst [vmem:[%s9128_s17 + $0x88] sm:$0xff] %v1083_v24 }
 0x120   : > { %7427 = vmatmul.mubr.msk.bf16.gmra.mrb[124].mxu0 %vm789_vm0, %v8092_v18  ;;  %v8099_v18 = vld [vmem:[%s11267_s3 + $0x2c] ss:$20 sps:$4 sm:$0xff]  }
 0x121   : > { %v2210_v20 = vpop.f32.mrb[16].mxu1  ;;  %4711 = vmatprep.mubr.bf16.mxu0 %v8095_v21 }
 0x122   : > { %4688 = vmatpush1.bf16.msra.mxu0 %v9141_v46  ;;  %7610 = vmatpush1.bf16.msra.mxu1 %v9141_v46  ;;  %v2212_v23 = vpop.f32.mrb[17].mxu1 }
 0x123   : > { %4689 = vmatprep.subr.bf16.mxu0 %v8551_v2  ;;  %7595 = vmatprep.subr.bf16.mxu1 %v8551_v2  ;;  %v2214_v25 = vpop.f32.mrb[18].mxu1  ;;  %v7324_v30 = vpop.f32.mrb[20].mxu0 }
 0x124   : > { %v2462_v27 = vpack.c.bf16 %v2214_v25, %v2210_v20  ;;  %v2216_v28 = vpop.f32.mrb[19].mxu1  ;;  %1549 = vst [vmem:[%s9128_s17 + $0xb0] sm:$0xff] %v7324_v30  ;;  %v1096_v31 = vpop.f32.mrb[21].mxu0  ;;  %v8103_v30 = vld [vmem:[%s11267_s3 + $0x28] ss:$20 sps:$4 sm:$0xff]  }
 0x125   : > { %v9205_v29 = vpack.c.bf16 %v2216_v28, %v2212_v23  ;;  %1547 = vst [vmem:[%s9128_s17 + $0xa0] sm:$0xff] %v1096_v31  ;;  %v7325_v33 = vpop.f32.mrb[22].mxu0  ;;  %v8104_v31 = vld [vmem:[%s11267_s3 + $0x730] ss:$20 sps:$4 sm:$0xff]  }
 0x126   : > { %4690 = vmatpush1.bf16.msra.mxu0 %v9157_v58  ;;  %7611 = vmatpush1.bf16.msra.mxu1 %v9157_v58  ;;  %1550 = vst [vmem:[%s9128_s17 + $0xb8] sm:$0xff] %v7325_v33  ;;  %v1099_v36 = vpop.f32.mrb[23].mxu0  ;;  %v8105_v33 = vld [vmem:[%s11267_s3 + $0x54] ss:$20 sps:$4 sm:$0xff]  }
 0x127   : > { %4691 = vmatprep.subr.bf16.mxu0 %v8551_v2  ;;  %7596 = vmatprep.subr.bf16.mxu1 %v8551_v2  ;;  %1548 = vst [vmem:[%s9128_s17 + $0xa8] sm:$0xff] %v1099_v36 }
 0x129   : > { %v2220_v32 = vpop.f32.mrb[20].mxu1 }
 0x12a   : > { %4692 = vmatpush1.bf16.msra.mxu0 %v2479_v7  ;;  %7612 = vmatpush1.bf16.msra.mxu1 %v2479_v7  ;;  %v2222_v34 = vpop.f32.mrb[21].mxu1 }
 0x12b   : > { %4693 = vmatprep.subr.bf16.mxu0 %v8551_v2  ;;  %7597 = vmatprep.subr.bf16.mxu1 %v8551_v2  ;;  %v2224_v37 = vpop.f32.mrb[22].mxu1  ;;  %v7328_v41 = vpop.f32.mrb[24].mxu0 }
 0x12c   : > { %v2471_v38 = vpack.c.bf16 %v2224_v37, %v2220_v32  ;;  %v2226_v39 = vpop.f32.mrb[23].mxu1  ;;  %1553 = vst [vmem:[%s9128_s17 + $0xd0] sm:$0xff] %v7328_v41  ;;  %v1112_v42 = vpop.f32.mrb[25].mxu0 }
 0x12d   : > { %v9217_v40 = vpack.c.bf16 %v2226_v39, %v2222_v34  ;;  %1551 = vst [vmem:[%s9128_s17 + $0xc0] sm:$0xff] %v1112_v42  ;;  %v7329_v44 = vpop.f32.mrb[26].mxu0  ;;  %v8107_v34 = vld [vmem:[%s11267_s3 + $0x75c] ss:$20 sps:$4 sm:$0xff]  }
 0x12e   : > { %4694 = vmatpush1.bf16.msra.mxu0 %v2488_v16  ;;  %7613 = vmatpush1.bf16.msra.mxu1 %v2488_v16  ;;  %1554 = vst [vmem:[%s9128_s17 + $0xd8] sm:$0xff] %v7329_v44  ;;  %v1115_v47 = vpop.f32.mrb[27].mxu0  ;;  %v8096_v16 = vld [vmem:[%s11267_s3 + $0x708] ss:$20 sps:$4 sm:$0xff]  }
 0x12f   : > { %4695 = vmatprep.subr.bf16.mxu0 %v8551_v2  ;;  %7598 = vmatprep.subr.bf16.mxu1 %v8551_v2  ;;  %1552 = vst [vmem:[%s9128_s17 + $0xc8] sm:$0xff] %v1115_v47  ;;  %v8110_v47 = vld [vmem:[%s11267_s3 + $0x758] ss:$20 sps:$4 sm:$0xff]  }
 0x131   : > { %v2230_v43 = vpop.f32.mrb[24].mxu1 }
 0x132   : > { %4696 = vmatpush1.bf16.msra.mxu0 %v2462_v27  ;;  %7614 = vmatpush1.bf16.msra.mxu1 %v2462_v27  ;;  %v2232_v46 = vpop.f32.mrb[25].mxu1 }
 0x133   : > { %4697 = vmatprep.subr.bf16.mxu0 %v8551_v2  ;;  %7599 = vmatprep.subr.bf16.mxu1 %v8551_v2  ;;  %v2234_v48 = vpop.f32.mrb[26].mxu1  ;;  %v7332_v52 = vpop.f32.mrb[28].mxu0 }
 0x134   : > { %v2480_v49 = vpack.c.bf16 %v2234_v48, %v2230_v43  ;;  %v2236_v50 = vpop.f32.mrb[27].mxu1  ;;  %1557 = vst [vmem:[%s9128_s17 + $0xf0] sm:$0xff] %v7332_v52  ;;  %v1128_v53 = vpop.f32.mrb[29].mxu0 }
 0x135   : > { %v2481_v51 = vpack.c.bf16 %v2236_v50, %v2232_v46  ;;  %1555 = vst [vmem:[%s9128_s17 + $0xe0] sm:$0xff] %v1128_v53  ;;  %v7333_v55 = vpop.f32.mrb[30].mxu0  ;;  %v8109_v46 = vld [vmem:[%s11267_s3 + $0x50] ss:$20 sps:$4 sm:$0xff]  }
 0x136   : > { %4698 = vmatpush1.bf16.msra.mxu0 %v2471_v38  ;;  %7615 = vmatpush1.bf16.msra.mxu1 %v2471_v38  ;;  %1558 = vst [vmem:[%s9128_s17 + $0xf8] sm:$0xff] %v7333_v55  ;;  %v1131_v57 = vpop.f32.mrb[31].mxu0  ;;  %v8113_v50 = vld [vmem:[%s11267_s3 + $0x784] ss:$20 sps:$4 sm:$0xff]  }
 0x137   : > { %4699 = vmatprep.subr.bf16.mxu0 %v8551_v2  ;;  %7600 = vmatprep.subr.bf16.mxu1 %v8551_v2  ;;  %1556 = vst [vmem:[%s9128_s17 + $0xe8] sm:$0xff] %v1131_v57 }
 0x139   : > { %v2240_v54 = vpop.f32.mrb[28].mxu1 }
 0x13a   : > { %v2242_v56 = vpop.f32.mrb[29].mxu1  ;;  %4700 = vmatpush1.bf16.msra.mxu0 %v2480_v49  ;;  %7616 = vmatpush1.bf16.msra.mxu1 %v2480_v49  ;;  %v8111_v49 = vld [vmem:[%s11267_s3 + $0x7c] ss:$20 sps:$4 sm:$0xff]  }
 0x13b   : > { %v2244_v58 = vpop.f32.mrb[30].mxu1  ;;  %4701 = vmatprep.subr.bf16.mxu0 %v8551_v2  ;;  %7601 = vmatprep.subr.bf16.mxu1 %v8551_v2  ;;  %v7336_v62 = vpop.f32.mrb[32].mxu0 }
 0x13c   : > { %v2489_v59 = vpack.c.bf16 %v2244_v58, %v2240_v54  ;;  %v2246_v60 = vpop.f32.mrb[31].mxu1  ;;  %1561 = vst [vmem:[%s9128_s17 + $0x110] sm:$0xff] %v7336_v62  ;;  %v1144_v63 = vpop.f32.mrb[33].mxu0 }
 0x13d   : > { %v2490_v61 = vpack.c.bf16 %v2246_v60, %v2242_v56  ;;  %1559 = vst [vmem:[%s9128_s17 + $0x100] sm:$0xff] %v1144_v63  ;;  %v7337_v1 = vpop.f32.mrb[34].mxu0  ;;  %v8115_v60 = vld [vmem:[%s11267_s3 + $0x78] ss:$20 sps:$4 sm:$0xff]  }
 0x13e   : > { %4702 = vmatpush1.bf16.msra.mxu0 %v2489_v59  ;;  %7617 = vmatpush1.bf16.msra.mxu1 %v2489_v59  ;;  %1562 = vst [vmem:[%s9128_s17 + $0x118] sm:$0xff] %v7337_v1  ;;  %v1147_v4 = vpop.f32.mrb[35].mxu0  ;;  %v8117_v63 = vld [vmem:[%s11267_s3 + $0xa4] ss:$20 sps:$4 sm:$0xff]  }
 0x13f   : > { %4703 = vmatprep.subr.bf16.mxu0 %v8551_v2  ;;  %7602 = vmatprep.subr.bf16.mxu1 %v8551_v2  ;;  %1560 = vst [vmem:[%s9128_s17 + $0x108] sm:$0xff] %v1147_v4 }
 0x141   : > { %v2283_v0 = vpop.f32.mrb[32].mxu1 }
 0x142   : > { %4704 = vmatpush1.bf16.msra.mxu0 %v9205_v29  ;;  %7618 = vmatpush1.bf16.msra.mxu1 %v9205_v29  ;;  %v9241_v3 = vpop.f32.mrb[33].mxu1 }
 0x143   : > { %4705 = vmatprep.subr.bf16.mxu0 %v8551_v2  ;;  %7603 = vmatprep.subr.bf16.mxu1 %v8551_v2  ;;  %v2287_v5 = vpop.f32.mrb[34].mxu1  ;;  %v7340_v9 = vpop.f32.mrb[36].mxu0 }
 0x144   : > { %v2464_v6 = vpack.c.bf16 %v2287_v5, %v2283_v0  ;;  %v9247_v7 = vpop.f32.mrb[35].mxu1  ;;  %1565 = vst [vmem:[%s9128_s17 + $0x130] sm:$0xff] %v7340_v9  ;;  %v1160_v10 = vpop.f32.mrb[37].mxu0  ;;  %v8119_v0 = vld [vmem:[%s11267_s3 + $0x7ac] ss:$20 sps:$4 sm:$0xff]  }
 0x145   : > { %v2465_v8 = vpack.c.bf16 %v9247_v7, %v9241_v3  ;;  %1563 = vst [vmem:[%s9128_s17 + $0x120] sm:$0xff] %v1160_v10  ;;  %v7341_v12 = vpop.f32.mrb[38].mxu0 }
 0x146   : > { %4706 = vmatpush1.bf16.msra.mxu0 %v9217_v40  ;;  %7619 = vmatpush1.bf16.msra.mxu1 %v9217_v40  ;;  %1566 = vst [vmem:[%s9128_s17 + $0x138] sm:$0xff] %v7341_v12  ;;  %v1163_v14 = vpop.f32.mrb[39].mxu0  ;;  %v8122_v12 = vld [vmem:[%s11267_s3 + $0x7a8] ss:$20 sps:$4 sm:$0xff]  }
 0x147   : > { %4707 = vmatprep.subr.bf16.mxu0 %v8551_v2  ;;  %7604 = vmatprep.subr.bf16.mxu1 %v8551_v2  ;;  %1564 = vst [vmem:[%s9128_s17 + $0x128] sm:$0xff] %v1163_v14  ;;  %v8123_v14 = vld [vmem:[%s11267_s3 + $0xcc] ss:$20 sps:$4 sm:$0xff]  }
 0x149   : > { %v2293_v11 = vpop.f32.mrb[36].mxu1 }
 0x14a   : > { %4708 = vmatpush1.bf16.msra.mxu0 %v2481_v51  ;;  %7620 = vmatpush1.bf16.msra.mxu1 %v2481_v51  ;;  %v9257_v13 = vpop.f32.mrb[37].mxu1 }
 0x14b   : > { %4709 = vmatprep.subr.bf16.mxu0 %v8551_v2  ;;  %7605 = vmatprep.subr.bf16.mxu1 %v8551_v2  ;;  %v2297_v15 = vpop.f32.mrb[38].mxu1  ;;  %v7344_v20 = vpop.f32.mrb[40].mxu0 }
 0x14c   : > { %v2473_v17 = vpack.c.bf16 %v2297_v15, %v2293_v11  ;;  %v9263_v26 = vpop.f32.mrb[39].mxu1  ;;  %1569 = vst [vmem:[%s9128_s17 + $0x150] sm:$0xff] %v7344_v20  ;;  %v1176_v21 = vpop.f32.mrb[41].mxu0  ;;  %v8121_v11 = vld [vmem:[%s11267_s3 + $0xa0] ss:$20 sps:$4 sm:$0xff]  }
 0x14d   : > { %v2474_v45 = vpack.c.bf16 %v9263_v26, %v9257_v13  ;;  %1567 = vst [vmem:[%s9128_s17 + $0x140] sm:$0xff] %v1176_v21  ;;  %v7345_v23 = vpop.f32.mrb[42].mxu0  ;;  %v8125_v15 = vld [vmem:[%s11267_s3 + $0x7d4] ss:$20 sps:$4 sm:$0xff]  }
 0x14e   : > { %4710 = vmatpush1.bf16.msra.mxu0 %v2490_v61  ;;  %7621 = vmatpush1.bf16.msra.mxu1 %v2490_v61  ;;  %1570 = vst [vmem:[%s9128_s17 + $0x158] sm:$0xff] %v7345_v23  ;;  %v1179_v25 = vpop.f32.mrb[43].mxu0  ;;  %v8116_v61 = vld [vmem:[%s11267_s3 + $0x780] ss:$20 sps:$4 sm:$0xff]   ;;  %v8128_v23 = vld [vmem:[%s11267_s3 + $0x7d0] ss:$20 sps:$4 sm:$0xff]  }
 0x14f   : > { %5224 = vmatprep.subr.bf16.mxu1 %v8551_v2  ;;  %1568 = vst [vmem:[%s9128_s17 + $0x148] sm:$0xff] %v1179_v25  ;;  %v8129_v25 = vld [vmem:[%s11267_s3 + $0xf4] ss:$20 sps:$4 sm:$0xff]  }
 0x151   : > { %4712 = vmatmul.mubr.bf16.vlgmr.msra.gmra.mrb[128].mxu0 %v8093_v35  ;;  %5072 = vmatmul.mubr.bf16.vlgmr.msra.gmra.mrb[72].mxu1 %v8096_v16  ;;  %v2303_v22 = vpop.f32.mrb[40].mxu1 }
 0x152   : > { %4719 = vmatprep.mubr.bf16.mxu0 %v8099_v18  ;;  %5079 = vmatprep.mubr.bf16.mxu1 %v8101_v19  ;;  %v9282_v24 = vpop.f32.mrb[41].mxu1 }
 0x153   : > { %5225 = vmatpush1.bf16.msra.mxu1 %v2464_v6  ;;  %v2307_v27 = vpop.f32.mrb[42].mxu1  ;;  %v7348_v36 = vpop.f32.mrb[44].mxu0 }
 0x154   : > { %5226 = vmatprep.subr.bf16.mxu1 %v8551_v2  ;;  %v2482_v28 = vpack.c.bf16 %v2307_v27, %v2303_v22  ;;  %v9287_v29 = vpop.f32.mrb[43].mxu1  ;;  %1573 = vst [vmem:[%s9128_s17 + $0x170] sm:$0xff] %v7348_v36  ;;  %v1192_v37 = vpop.f32.mrb[45].mxu0  ;;  %v8127_v22 = vld [vmem:[%s11267_s3 + $0xc8] ss:$20 sps:$4 sm:$0xff]  }
 0x155   : > { %v2483_v32 = vpack.c.bf16 %v9287_v29, %v9282_v24  ;;  %1571 = vst [vmem:[%s9128_s17 + $0x160] sm:$0xff] %v1192_v37  ;;  %v7349_v39 = vpop.f32.mrb[46].mxu0  ;;  %v8131_v27 = vld [vmem:[%s11267_s3 + $0x7fc] ss:$20 sps:$4 sm:$0xff]  }
 0x156   : > { %1574 = vst [vmem:[%s9128_s17 + $0x178] sm:$0xff] %v7349_v39  ;;  %v1195_v41 = vpop.f32.mrb[47].mxu0  ;;  %v8134_v39 = vld [vmem:[%s11267_s3 + $0x7f8] ss:$20 sps:$4 sm:$0xff]  }
 0x157   : > { %5227 = vmatpush1.bf16.msra.mxu1 %v2473_v17  ;;  %1572 = vst [vmem:[%s9128_s17 + $0x168] sm:$0xff] %v1195_v41  ;;  %v8135_v41 = vld [vmem:[%s11267_s3 + $0x11c] ss:$20 sps:$4 sm:$0xff]  }
 0x158   : > { %5228 = vmatprep.subr.bf16.mxu1 %v8551_v2 }
 0x159   : > { %4720 = vmatmul.mubr.bf16.gmra.mrb[132].mxu0 %v8103_v30  ;;  %5080 = vmatmul.mubr.bf16.gmra.mrb[76].mxu1 %v8104_v31  ;;  %v2313_v38 = vpop.f32.mrb[44].mxu1 }
 0x15a   : > { %4727 = vmatprep.mubr.bf16.mxu0 %v8105_v33  ;;  %5087 = vmatprep.mubr.bf16.mxu1 %v8107_v34  ;;  %v9306_v40 = vpop.f32.mrb[45].mxu1 }
 0x15b   : > { %5229 = vmatpush1.bf16.msra.mxu1 %v2482_v28  ;;  %v2317_v42 = vpop.f32.mrb[46].mxu1  ;;  %v7352_v51 = vpop.f32.mrb[48].mxu0 }
 0x15c   : > { %v2491_v43 = vpack.c.bf16 %v2317_v42, %v2313_v38  ;;  %5230 = vmatprep.subr.bf16.mxu1 %v8551_v2  ;;  %v2319_v44 = vpop.f32.mrb[47].mxu1  ;;  %1577 = vst [vmem:[%s9128_s17 + $0x190] sm:$0xff] %v7352_v51  ;;  %v1208_v52 = vpop.f32.mrb[49].mxu0  ;;  %v8133_v38 = vld [vmem:[%s11267_s3 + $0xf0] ss:$20 sps:$4 sm:$0xff]  }
 0x15d   : > { %v2492_v48 = vpack.c.bf16 %v2319_v44, %v9306_v40  ;;  %1575 = vst [vmem:[%s9128_s17 + $0x180] sm:$0xff] %v1208_v52  ;;  %v7353_v54 = vpop.f32.mrb[50].mxu0  ;;  %v8137_v42 = vld [vmem:[%s11267_s3 + $0x824] ss:$20 sps:$4 sm:$0xff]  }
 0x15e   : > { %1578 = vst [vmem:[%s9128_s17 + $0x198] sm:$0xff] %v7353_v54  ;;  %v1211_v56 = vpop.f32.mrb[51].mxu0  ;;  %v8140_v54 = vld [vmem:[%s11267_s3 + $0x820] ss:$20 sps:$4 sm:$0xff]  }
 0x15f   : > { %5231 = vmatpush1.bf16.msra.mxu1 %v2491_v43  ;;  %1576 = vst [vmem:[%s9128_s17 + $0x188] sm:$0xff] %v1211_v56 }
 0x160   : > { %5232 = vmatprep.subr.bf16.mxu1 %v8551_v2 }
 0x161   : > { %4728 = vmatmul.mubr.bf16.gmra.mrb[136].mxu0 %v8109_v46  ;;  %5088 = vmatmul.mubr.bf16.gmra.mrb[80].mxu1 %v8110_v47  ;;  %v2356_v53 = vpop.f32.mrb[48].mxu1 }
 0x162   : > { %4735 = vmatprep.mubr.bf16.mxu0 %v8111_v49  ;;  %5095 = vmatprep.mubr.bf16.mxu1 %v8113_v50  ;;  %v9327_v55 = vpop.f32.mrb[49].mxu1 }
 0x163   : > { %5233 = vmatpush1.bf16.msra.mxu1 %v2465_v8  ;;  %v2360_v57 = vpop.f32.mrb[50].mxu1  ;;  %v7356_v1 = vpop.f32.mrb[52].mxu0 }
 0x164   : > { %5234 = vmatprep.subr.bf16.mxu1 %v8551_v2  ;;  %v2466_v58 = vpack.c.bf16 %v2360_v57, %v2356_v53  ;;  %v9335_v59 = vpop.f32.mrb[51].mxu1  ;;  %1581 = vst [vmem:[%s9128_s17 + $0x1b0] sm:$0xff] %v7356_v1  ;;  %v1224_v3 = vpop.f32.mrb[53].mxu0  ;;  %v8139_v53 = vld [vmem:[%s11267_s3 + $0x118] ss:$20 sps:$4 sm:$0xff]  }
 0x165   : > { %v2467_v62 = vpack.c.bf16 %v9335_v59, %v9327_v55  ;;  %1579 = vst [vmem:[%s9128_s17 + $0x1a0] sm:$0xff] %v1224_v3  ;;  %v7357_v5 = vpop.f32.mrb[54].mxu0  ;;  %v8141_v55 = vld [vmem:[%s11267_s3 + $0x144] ss:$20 sps:$4 sm:$0xff]   ;;  %v8143_v57 = vld [vmem:[%s11267_s3 + $0x84c] ss:$20 sps:$4 sm:$0xff]  }
 0x166   : > { %1582 = vst [vmem:[%s9128_s17 + $0x1b8] sm:$0xff] %v7357_v5  ;;  %v1227_v7 = vpop.f32.mrb[55].mxu0  ;;  %v8149_v1 = vld [vmem:[%s11267_s3 + $0x874] ss:$20 sps:$4 sm:$0xff]  }
 0x167   : > { %5235 = vmatpush1.bf16.msra.mxu1 %v2474_v45  ;;  %1580 = vst [vmem:[%s9128_s17 + $0x1a8] sm:$0xff] %v1227_v7  ;;  %v8151_v7 = vld [vmem:[%s11267_s3 + $0x168] ss:$20 sps:$4 sm:$0xff]  }
 0x168   : > { %5236 = vmatprep.subr.bf16.mxu1 %v8551_v2 }
 0x169   : > { %4736 = vmatmul.mubr.bf16.gmra.mrb[140].mxu0 %v8115_v60  ;;  %5096 = vmatmul.mubr.bf16.gmra.mrb[84].mxu1 %v8116_v61  ;;  %v2366_v4 = vpop.f32.mrb[52].mxu1 }
 0x16a   : > { %4743 = vmatprep.mubr.bf16.mxu0 %v8117_v63  ;;  %5103 = vmatprep.mubr.bf16.mxu1 %v8119_v0  ;;  %v9357_v6 = vpop.f32.mrb[53].mxu1  ;;  %v8146_v63 = vld [vmem:[%s11267_s3 + $0x848] ss:$20 sps:$4 sm:$0xff]   ;;  %v8147_v0 = vld [vmem:[%s11267_s3 + $0x16c] ss:$20 sps:$4 sm:$0xff]  }
 0x16b   : > { %5237 = vmatpush1.bf16.msra.mxu1 %v2483_v32  ;;  %v2370_v8 = vpop.f32.mrb[54].mxu1  ;;  %v7360_v17 = vpop.f32.mrb[56].mxu0 }
 0x16c   : > { %5238 = vmatprep.subr.bf16.mxu1 %v8551_v2  ;;  %v2475_v9 = vpack.c.bf16 %v2370_v8, %v2366_v4  ;;  %v9365_v10 = vpop.f32.mrb[55].mxu1  ;;  %1585 = vst [vmem:[%s9128_s17 + $0x1d0] sm:$0xff] %v7360_v17  ;;  %v1240_v26 = vpop.f32.mrb[57].mxu0  ;;  %v8152_v8 = vld [vmem:[%s11267_s3 + $0x870] ss:$20 sps:$4 sm:$0xff]  }
 0x16d   : > { %v2476_v13 = vpack.c.bf16 %v9365_v10, %v9357_v6  ;;  %1583 = vst [vmem:[%s9128_s17 + $0x1c0] sm:$0xff] %v1240_v26  ;;  %v7361_v16 = vpop.f32.mrb[58].mxu0  ;;  %v8153_v10 = vld [vmem:[%s11267_s3 + $0x194] ss:$20 sps:$4 sm:$0xff]  }
 0x16e   : > { %1586 = vst [vmem:[%s9128_s17 + $0x1d8] sm:$0xff] %v7361_v16  ;;  %v1243_v18 = vpop.f32.mrb[59].mxu0 }
 0x16f   : > { %5239 = vmatpush1.bf16.msra.mxu1 %v2492_v48  ;;  %1584 = vst [vmem:[%s9128_s17 + $0x1c8] sm:$0xff] %v1243_v18  ;;  %v8158_v18 = vld [vmem:[%s11267_s3 + $0x898] ss:$20 sps:$4 sm:$0xff]  }
 0x170   : > { %5240 = vmatprep.subr.bf16.mxu1 %v8551_v2 }
 0x171   : > { %4744 = vmatmul.mubr.bf16.gmra.mrb[144].mxu0 %v8121_v11  ;;  %5104 = vmatmul.mubr.bf16.gmra.mrb[88].mxu1 %v8122_v12  ;;  %v2376_v35 = vpop.f32.mrb[56].mxu1  ;;  %v8155_v11 = vld [vmem:[%s11267_s3 + $0x89c] ss:$20 sps:$4 sm:$0xff]  }
 0x172   : > { %4751 = vmatprep.mubr.bf16.mxu0 %v8123_v14  ;;  %5111 = vmatprep.mubr.bf16.mxu1 %v8125_v15  ;;  %v9384_v45 = vpop.f32.mrb[57].mxu1 }
 0x173   : > { %5241 = vmatpush1.bf16.msra.mxu1 %v2466_v58  ;;  %v2380_v19 = vpop.f32.mrb[58].mxu1  ;;  %v7364_v28 = vpop.f32.mrb[60].mxu0 }
 0x174   : > { %5242 = vmatprep.subr.bf16.mxu1 %v8551_v2  ;;  %v2484_v20 = vpack.c.bf16 %v2380_v19, %v2376_v35  ;;  %v9389_v21 = vpop.f32.mrb[59].mxu1  ;;  %1589 = vst [vmem:[%s9128_s17 + $0x1f0] sm:$0xff] %v7364_v28  ;;  %v1256_v29 = vpop.f32.mrb[61].mxu0  ;;  %v8159_v19 = vld [vmem:[%s11267_s3 + $0x1bc] ss:$20 sps:$4 sm:$0xff]  }
 0x175   : > { %v2485_v24 = vpack.c.bf16 %v9389_v21, %v9384_v45  ;;  %1587 = vst [vmem:[%s9128_s17 + $0x1e0] sm:$0xff] %v1256_v29  ;;  %v7365_v31 = vpop.f32.mrb[62].mxu0  ;;  %v8157_v45 = vld [vmem:[%s11267_s3 + $0x190] ss:$20 sps:$4 sm:$0xff]   ;;  %v8167_v29 = vld [vmem:[%s11267_s3 + $0x8ec] ss:$20 sps:$4 sm:$0xff]  }
 0x176   : > { %1590 = vst [vmem:[%s9128_s17 + $0x1f8] sm:$0xff] %v7365_v31  ;;  %v1259_v33 = vpop.f32.mrb[63].mxu0  ;;  %v8165_v28 = vld [vmem:[%s11267_s3 + $0x1e4] ss:$20 sps:$4 sm:$0xff]  }
 0x177   : > { %5243 = vmatpush1.bf16.msra.mxu1 %v2475_v9  ;;  %1588 = vst [vmem:[%s9128_s17 + $0x1e8] sm:$0xff] %v1259_v33 }
 0x178   : > { %5244 = vmatprep.subr.bf16.mxu1 %v8551_v2 }
 0x179   : > { %4752 = vmatmul.mubr.bf16.gmra.mrb[148].mxu0 %v8127_v22  ;;  %5112 = vmatmul.mubr.bf16.gmra.mrb[92].mxu1 %v8128_v23  ;;  %v2386_v30 = vpop.f32.mrb[60].mxu1 }
 0x17a   : > { %4759 = vmatprep.mubr.bf16.mxu0 %v8129_v25  ;;  %5119 = vmatprep.mubr.bf16.mxu1 %v8131_v27  ;;  %v9408_v32 = vpop.f32.mrb[61].mxu1  ;;  %v8163_v25 = vld [vmem:[%s11267_s3 + $0x1b8] ss:$20 sps:$4 sm:$0xff]   ;;  %v8164_v27 = vld [vmem:[%s11267_s3 + $0x8c0] ss:$20 sps:$4 sm:$0xff]  }
 0x17b   : > { %5245 = vmatpush1.bf16.msra.mxu1 %v2484_v20  ;;  %v2390_v34 = vpop.f32.mrb[62].mxu1  ;;  %v7368_v43 = vpop.f32.mrb[64].mxu0  ;;  %v8161_v20 = vld [vmem:[%s11267_s3 + $0x8c4] ss:$20 sps:$4 sm:$0xff]  }
 0x17c   : > { %v2493_v36 = vpack.c.bf16 %v2390_v34, %v2386_v30  ;;  %5246 = vmatprep.subr.bf16.mxu1 %v8551_v2  ;;  %v2392_v37 = vpop.f32.mrb[63].mxu1  ;;  %1593 = vst [vmem:[%s9128_s17 + $0x210] sm:$0xff] %v7368_v43  ;;  %v1272_v44 = vpop.f32.mrb[65].mxu0  ;;  %v8169_v34 = vld [vmem:[%s11267_s3 + $0x1e0] ss:$20 sps:$4 sm:$0xff]  }
 0x17d   : > { %v2494_v40 = vpack.c.bf16 %v2392_v37, %v9408_v32  ;;  %1591 = vst [vmem:[%s9128_s17 + $0x200] sm:$0xff] %v1272_v44  ;;  %v7369_v47 = vpop.f32.mrb[66].mxu0  ;;  %v8171_v37 = vld [vmem:[%s11267_s3 + $0x20c] ss:$20 sps:$4 sm:$0xff]   ;;  %v8175_v43 = vld [vmem:[%s11267_s3 + $0x208] ss:$20 sps:$4 sm:$0xff]  }
 0x17e   : > { %1594 = vst [vmem:[%s9128_s17 + $0x218] sm:$0xff] %v7369_v47  ;;  %v1275_v49 = vpop.f32.mrb[67].mxu0  ;;  %v8176_v44 = vld [vmem:[%s11267_s3 + $0x910] ss:$20 sps:$4 sm:$0xff]  }
 0x17f   : > { %5247 = vmatpush1.bf16.msra.mxu1 %v2493_v36  ;;  %1592 = vst [vmem:[%s9128_s17 + $0x208] sm:$0xff] %v1275_v49  ;;  %v8170_v36 = vld [vmem:[%s11267_s3 + $0x8e8] ss:$20 sps:$4 sm:$0xff]  }
 0x180   : > { %5248 = vmatprep.subr.bf16.mxu1 %v8551_v2  ;;  %v8179_v47 = vld [vmem:[%s11267_s3 + $0x93c] ss:$20 sps:$4 sm:$0xff]  }
 0x181   : > { %4760 = vmatmul.mubr.bf16.gmra.mrb[152].mxu0 %v8133_v38  ;;  %5120 = vmatmul.mubr.bf16.gmra.mrb[96].mxu1 %v8134_v39  ;;  %v7448_v46 = vpop.f32.mrb[64].mxu1  ;;  %v8173_v38 = vld [vmem:[%s11267_s3 + $0x914] ss:$20 sps:$4 sm:$0xff]  }
 0x182   : > { %4767 = vmatprep.mubr.bf16.mxu0 %v8135_v41  ;;  %5127 = vmatprep.mubr.bf16.mxu1 %v8137_v42  ;;  %v2429_v48 = vpop.f32.mrb[65].mxu1 }
 0x183   : > { %5249 = vmatpush1.bf16.msra.mxu1 %v2467_v62  ;;  %v7449_v50 = vpop.f32.mrb[66].mxu1  ;;  %v7372_v58 = vpop.f32.mrb[68].mxu0  ;;  %v8145_v62 = vld [vmem:[%s11267_s3 + $0x140] ss:$20 sps:$4 sm:$0xff]  }
 0x184   : > { %5250 = vmatprep.subr.bf16.mxu1 %v8551_v2  ;;  %v2477_v51 = vpack.c.bf16 %v7449_v50, %v7448_v46  ;;  %v2432_v52 = vpop.f32.mrb[67].mxu1  ;;  %1597 = vst [vmem:[%s9128_s17 + $0x230] sm:$0xff] %v7372_v58  ;;  %v1288_v59 = vpop.f32.mrb[69].mxu0  ;;  %v8177_v46 = vld [vmem:[%s11267_s3 + $0x234] ss:$20 sps:$4 sm:$0xff]  }
 0x185   : > { %v2468_v56 = vpack.c.bf16 %v2432_v52, %v2429_v48  ;;  %1595 = vst [vmem:[%s9128_s17 + $0x220] sm:$0xff] %v1288_v59  ;;  %v7373_v60 = vpop.f32.mrb[70].mxu0  ;;  %v8181_v52 = vld [vmem:[%s11267_s3 + $0x230] ss:$20 sps:$4 sm:$0xff]  }
 0x186   : > { %1598 = vst [vmem:[%s9128_s17 + $0x238] sm:$0xff] %v7373_v60  ;;  %v1291_v61 = vpop.f32.mrb[71].mxu0  ;;  %v8187_v60 = vld [vmem:[%s11267_s3 + $0x258] ss:$20 sps:$4 sm:$0xff]  }
 0x187   : > { %5251 = vmatpush1.bf16.msra.mxu1 %v2476_v13  ;;  %7454 = vmatprep.subr.bf16.mxu0 %v2468_v56  ;;  %1596 = vst [vmem:[%s9128_s17 + $0x228] sm:$0xff] %v1291_v61  ;;  %v8188_v61 = vld [vmem:[%s11267_s3 + $0x960] ss:$20 sps:$4 sm:$0xff]  }
 0x188   : > { %5252 = vmatprep.subr.bf16.mxu1 %v8551_v2  ;;  %7455 = vmatpush3.bf16.msra.mxu0 %v2468_v56  ;;  %v8185_v56 = vld [vmem:[%s11267_s3 + $0x964] ss:$20 sps:$4 sm:$0xff]  }
 0x189   : > { %4768 = vmatmul.mubr.bf16.gmra.mrb[156].mxu0 %v8139_v53  ;;  %5128 = vmatmul.mubr.bf16.gmra.mrb[100].mxu1 %v8140_v54  ;;  %v7452_v6 = vpop.f32.mrb[68].mxu1  ;;  %v8182_v53 = vld [vmem:[%s11267_s3 + $0x938] ss:$20 sps:$4 sm:$0xff]   ;;  %v8183_v54 = vld [vmem:[%s11267_s3 + $0x25c] ss:$20 sps:$4 sm:$0xff]  }
 0x18a   : > { %4775 = vmatprep.mubr.bf16.mxu0 %v8141_v55  ;;  %5135 = vmatprep.mubr.bf16.mxu1 %v8143_v57  ;;  %v2445_v9 = vpop.f32.mrb[69].mxu1 }
 0x18b   : > { %5253 = vmatpush1.bf16.msra.mxu1 %v2485_v24  ;;  %7456 = vmatprep.subr.bf16.mxu0 %v2477_v51  ;;  %v7453_v12 = vpop.f32.mrb[70].mxu1 }
 0x18c   : > { %5254 = vmatprep.subr.bf16.mxu1 %v8551_v2  ;;  %7457 = vmatpush3.bf16.msra.mxu0 %v2477_v51  ;;  %v7376_v2 = vpop.f32.mrb[72].mxu0  ;;  %v2448_v14 = vpop.f32.mrb[71].mxu1  ;;  %v2495_v16 = vpack.c.bf16 %v7453_v12, %v7452_v6  ;;  %v8195_v6 = vld [vmem:[%s11267_s3 + $0x2ac] ss:$20 sps:$4 sm:$0xff]   ;;  %v8199_v12 = vld [vmem:[%s11267_s3 + $0x2a8] ss:$20 sps:$4 sm:$0xff]  }
 0x18d   : > { %1601 = vst [vmem:[%s9128_s17 + $0x250] sm:$0xff] %v7376_v2  ;;  %v1304_v3 = vpop.f32.mrb[73].mxu0  ;;  %v2486_v17 = vpack.c.bf16 %v2448_v14, %v2445_v9  ;;  %v8201_v14 = vld [vmem:[%s11267_s3 + $0x2d4] ss:$20 sps:$4 sm:$0xff]  }
 0x18e   : > { %1599 = vst [vmem:[%s9128_s17 + $0x240] sm:$0xff] %v1304_v3  ;;  %v7377_v4 = vpop.f32.mrb[74].mxu0 }
 0x18f   : > { %5255 = vmatpush1.bf16.msra.mxu1 %v2494_v40  ;;  %1602 = vst [vmem:[%s9128_s17 + $0x258] sm:$0xff] %v7377_v4  ;;  %v1307_v5 = vpop.f32.mrb[75].mxu0  ;;  %7458 = vmatprep.subr.bf16.mxu0 %v2486_v17  ;;  %v8193_v4 = vld [vmem:[%s11267_s3 + $0x280] ss:$20 sps:$4 sm:$0xff]  }
 0x190   : > { %1600 = vst [vmem:[%s9128_s17 + $0x248] sm:$0xff] %v1307_v5  ;;  %7459 = vmatpush3.bf16.msra.mxu0 %v2486_v17  ;;  %v8194_v5 = vld [vmem:[%s11267_s3 + $0x988] ss:$20 sps:$4 sm:$0xff]  }
 0x191   : > { %4776 = vmatmul.mubr.bf16.gmra.mrb[160].mxu0 %v8145_v62  ;;  %5136 = vmatmul.mubr.bf16.gmra.mrb[104].mxu1 %v8146_v63  ;;  %v8189_v62 = vld [vmem:[%s11267_s3 + $0x284] ss:$20 sps:$4 sm:$0xff]   ;;  %v8191_v63 = vld [vmem:[%s11267_s3 + $0x98c] ss:$20 sps:$4 sm:$0xff]  }
 0x192   : > { %4783 = vmatprep.mubr.bf16.mxu0 %v8147_v0  ;;  %5143 = vmatprep.mubr.bf16.mxu1 %v8149_v1 }
 0x193   : > { %v7380_v13 = vpop.f32.mrb[76].mxu0  ;;  %7460 = vmatprep.subr.bf16.mxu0 %v2495_v16 }
 0x194   : > { %1605 = vst [vmem:[%s9128_s17 + $0x270] sm:$0xff] %v7380_v13  ;;  %v1320_v15 = vpop.f32.mrb[77].mxu0  ;;  %7461 = vmatpush3.bf16.msra.mxu0 %v2495_v16  ;;  %v8200_v13 = vld [vmem:[%s11267_s3 + $0x9b0] ss:$20 sps:$4 sm:$0xff]  }
 0x195   : > { %1603 = vst [vmem:[%s9128_s17 + $0x260] sm:$0xff] %v1320_v15  ;;  %v7381_v26 = vpop.f32.mrb[78].mxu0  ;;  %v8203_v15 = vld [vmem:[%s11267_s3 + $0x9dc] ss:$20 sps:$4 sm:$0xff]  }
 0x196   : > { %1606 = vst [vmem:[%s9128_s17 + $0x278] sm:$0xff] %v7381_v26  ;;  %v1323_v35 = vpop.f32.mrb[79].mxu0 }
 0x197   : > { %1604 = vst [vmem:[%s9128_s17 + $0x268] sm:$0xff] %v1323_v35 }
 0x199   : > { %4784 = vmatmul.mubr.bf16.gmra.mrb[164].mxu0 %v8151_v7  ;;  %5144 = vmatmul.mubr.bf16.gmra.mrb[108].mxu1 %v8152_v8  ;;  %v8197_v7 = vld [vmem:[%s11267_s3 + $0x9b4] ss:$20 sps:$4 sm:$0xff]  }
 0x19a   : > { %4791 = vmatprep.mubr.bf16.mxu0 %v8153_v10  ;;  %5151 = vmatprep.mubr.bf16.mxu1 %v8155_v11 }
 0x19b   : > { %v7384_v21 = vpop.f32.mrb[80].mxu0 }
 0x19c   : > { %1609 = vst [vmem:[%s9128_s17 + $0x290] sm:$0xff] %v7384_v21  ;;  %v1336_v22 = vpop.f32.mrb[81].mxu0 }
 0x19d   : > { %1607 = vst [vmem:[%s9128_s17 + $0x280] sm:$0xff] %v1336_v22  ;;  %v7385_v23 = vpop.f32.mrb[82].mxu0 }
 0x19e   : > { %1610 = vst [vmem:[%s9128_s17 + $0x298] sm:$0xff] %v7385_v23  ;;  %v1339_v24 = vpop.f32.mrb[83].mxu0 }
 0x19f   : > { %1608 = vst [vmem:[%s9128_s17 + $0x288] sm:$0xff] %v1339_v24 }
 0x1a1   : > { %4792 = vmatmul.mubr.bf16.gmra.mrb[168].mxu0 %v8157_v45  ;;  %5152 = vmatmul.mubr.bf16.gmra.mrb[112].mxu1 %v8158_v18  ;;  %v8205_v45 = vld [vmem:[%s11267_s3 + $0x2d0] ss:$20 sps:$4 sm:$0xff]   ;;  %v8206_v18 = vld [vmem:[%s11267_s3 + $0x9d8] ss:$20 sps:$4 sm:$0xff]  }
 0x1a2   : > { %4799 = vmatprep.mubr.bf16.mxu0 %v8159_v19  ;;  %5159 = vmatprep.mubr.bf16.mxu1 %v8161_v20  ;;  %v8207_v19 = vld [vmem:[%s11267_s3 + $0x2fc] ss:$20 sps:$4 sm:$0xff]   ;;  %v8211_v20 = vld [vmem:[%s11267_s3 + $0xc] ss:$20 sps:$4 sm:$0xff]  }
 0x1a3   : > { %v7388_v30 = vpop.f32.mrb[84].mxu0 }
 0x1a4   : > { %1613 = vst [vmem:[%s9128_s17 + $0x2b0] sm:$0xff] %v7388_v30  ;;  %v1352_v31 = vpop.f32.mrb[85].mxu0 }
 0x1a5   : > { %1611 = vst [vmem:[%s9128_s17 + $0x2a0] sm:$0xff] %v1352_v31  ;;  %v7389_v32 = vpop.f32.mrb[86].mxu0 }
 0x1a6   : > { %1614 = vst [vmem:[%s9128_s17 + $0x2b8] sm:$0xff] %v7389_v32  ;;  %v1355_v33 = vpop.f32.mrb[87].mxu0 }
 0x1a7   : > { %1612 = vst [vmem:[%s9128_s17 + $0x2a8] sm:$0xff] %v1355_v33 }
 0x1a9   : > { %4800 = vmatmul.mubr.bf16.gmra.mrb[172].mxu0 %v8163_v25  ;;  %5160 = vmatmul.mubr.bf16.gmra.mrb[116].mxu1 %v8164_v27  ;;  %v8209_v25 = vld [vmem:[%s11267_s3 + $0x8] ss:$20 sps:$4 sm:$0xff]   ;;  %v8212_v27 = vld [vmem:[%s11267_s3 + $0x2f8] ss:$20 sps:$4 sm:$0xff]  }
 0x1aa   : > { %4807 = vmatprep.mubr.bf16.mxu0 %v8165_v28  ;;  %5167 = vmatprep.mubr.bf16.mxu1 %v8167_v29  ;;  %v8213_v28 = vld [vmem:[%s11267_s3 + $0x324] ss:$20 sps:$4 sm:$0xff]   ;;  %v8215_v29 = vld [vmem:[%s11267_s3 + $0x34] ss:$20 sps:$4 sm:$0xff]  }
 0x1ab   : > { %v7392_v39 = vpop.f32.mrb[88].mxu0 }
 0x1ac   : > { %1617 = vst [vmem:[%s9128_s17 + $0x2d0] sm:$0xff] %v7392_v39  ;;  %v1368_v40 = vpop.f32.mrb[89].mxu0 }
 0x1ad   : > { %1615 = vst [vmem:[%s9128_s17 + $0x2c0] sm:$0xff] %v1368_v40  ;;  %v7393_v41 = vpop.f32.mrb[90].mxu0 }
 0x1ae   : > { %1618 = vst [vmem:[%s9128_s17 + $0x2d8] sm:$0xff] %v7393_v41  ;;  %v1371_v42 = vpop.f32.mrb[91].mxu0 }
 0x1af   : > { %1616 = vst [vmem:[%s9128_s17 + $0x2c8] sm:$0xff] %v1371_v42 }
 0x1b1   : > { %4808 = vmatmul.mubr.bf16.gmra.mrb[176].mxu0 %v8169_v34  ;;  %5168 = vmatmul.mubr.bf16.gmra.mrb[120].mxu1 %v8170_v36  ;;  %v8217_v34 = vld [vmem:[%s11267_s3 + $0x320] ss:$20 sps:$4 sm:$0xff]   ;;  %v8218_v36 = vld [vmem:[%s11267_s3 + $0x30] ss:$20 sps:$4 sm:$0xff]  }
 0x1b2   : > { %4815 = vmatprep.mubr.bf16.mxu0 %v8171_v37  ;;  %5175 = vmatprep.mubr.bf16.mxu1 %v8173_v38  ;;  %v8219_v37 = vld [vmem:[%s11267_s3 + $0x34c] ss:$20 sps:$4 sm:$0xff]   ;;  %v8221_v38 = vld [vmem:[%s11267_s3 + $0x5c] ss:$20 sps:$4 sm:$0xff]  }
 0x1b3   : > { %v7396_v48 = vpop.f32.mrb[92].mxu0 }
 0x1b4   : > { %1621 = vst [vmem:[%s9128_s17 + $0x2f0] sm:$0xff] %v7396_v48  ;;  %v1384_v49 = vpop.f32.mrb[93].mxu0 }
 0x1b5   : > { %1619 = vst [vmem:[%s9128_s17 + $0x2e0] sm:$0xff] %v1384_v49  ;;  %v7397_v50 = vpop.f32.mrb[94].mxu0 }
 0x1b6   : > { %1622 = vst [vmem:[%s9128_s17 + $0x2f8] sm:$0xff] %v7397_v50  ;;  %v1387_v51 = vpop.f32.mrb[95].mxu0 }
 0x1b7   : > { %1620 = vst [vmem:[%s9128_s17 + $0x2e8] sm:$0xff] %v1387_v51 }
 0x1b9   : > { %4816 = vmatmul.mubr.bf16.gmra.mrb[180].mxu0 %v8175_v43  ;;  %5176 = vmatmul.mubr.bf16.gmra.mrb[124].mxu1 %v8176_v44  ;;  %v8223_v43 = vld [vmem:[%s11267_s3 + $0x348] ss:$20 sps:$4 sm:$0xff]   ;;  %v8224_v44 = vld [vmem:[%s11267_s3 + $0x58] ss:$20 sps:$4 sm:$0xff]  }
 0x1ba   : > { %4823 = vmatprep.mubr.bf16.mxu0 %v8177_v46  ;;  %5183 = vmatprep.mubr.bf16.mxu1 %v8179_v47  ;;  %v8225_v46 = vld [vmem:[%s11267_s3 + $0x374] ss:$20 sps:$4 sm:$0xff]   ;;  %v8227_v47 = vld [vmem:[%s11267_s3 + $0x84] ss:$20 sps:$4 sm:$0xff]  }
 0x1bb   : > { %v7400_v55 = vpop.f32.mrb[96].mxu0 }
 0x1bc   : > { %1625 = vst [vmem:[%s9128_s17 + $0x310] sm:$0xff] %v7400_v55  ;;  %v1400_v57 = vpop.f32.mrb[97].mxu0  ;;  %v8235_v55 = vld [vmem:[%s11267_s3 + $0x398] ss:$20 sps:$4 sm:$0xff]  }
 0x1bd   : > { %1623 = vst [vmem:[%s9128_s17 + $0x300] sm:$0xff] %v1400_v57  ;;  %v7401_v58 = vpop.f32.mrb[98].mxu0  ;;  %v8236_v57 = vld [vmem:[%s11267_s3 + $0xa8] ss:$20 sps:$4 sm:$0xff]  }
 0x1be   : > { %1626 = vst [vmem:[%s9128_s17 + $0x318] sm:$0xff] %v7401_v58  ;;  %v1403_v59 = vpop.f32.mrb[99].mxu0  ;;  %v8237_v58 = vld [vmem:[%s11267_s3 + $0x3c4] ss:$20 sps:$4 sm:$0xff]  }
 0x1bf   : > { %1624 = vst [vmem:[%s9128_s17 + $0x308] sm:$0xff] %v1403_v59  ;;  %v8239_v59 = vld [vmem:[%s11267_s3 + $0xd4] ss:$20 sps:$4 sm:$0xff]  }
 0x1c1   : > { %4824 = vmatmul.mubr.bf16.gmra.mrb[184].mxu0 %v8181_v52  ;;  %5184 = vmatmul.mubr.bf16.gmra.mrb[128].mxu1 %v8182_v53  ;;  %v8229_v52 = vld [vmem:[%s11267_s3 + $0x370] ss:$20 sps:$4 sm:$0xff]   ;;  %v8230_v53 = vld [vmem:[%s11267_s3 + $0x80] ss:$20 sps:$4 sm:$0xff]  }
 0x1c2   : > { %4831 = vmatprep.mubr.bf16.mxu0 %v8183_v54  ;;  %5191 = vmatprep.mubr.bf16.mxu1 %v8185_v56  ;;  %v8231_v54 = vld [vmem:[%s11267_s3 + $0x39c] ss:$20 sps:$4 sm:$0xff]   ;;  %v8233_v56 = vld [vmem:[%s11267_s3 + $0xac] ss:$20 sps:$4 sm:$0xff]  }
 0x1c3   : > { %v7404_v0 = vpop.f32.mrb[100].mxu0 }
 0x1c4   : > { %1629 = vst [vmem:[%s9128_s17 + $0x330] sm:$0xff] %v7404_v0  ;;  %v1416_v1 = vpop.f32.mrb[101].mxu0  ;;  %v8247_v0 = vld [vmem:[%s11267_s3 + $0x3e8] ss:$20 sps:$4 sm:$0xff]  }
 0x1c5   : > { %1627 = vst [vmem:[%s9128_s17 + $0x320] sm:$0xff] %v1416_v1  ;;  %v7405_v2 = vpop.f32.mrb[102].mxu0  ;;  %v8248_v1 = vld [vmem:[%s11267_s3 + $0xf8] ss:$20 sps:$4 sm:$0xff]  }
 0x1c6   : > { %1630 = vst [vmem:[%s9128_s17 + $0x338] sm:$0xff] %v7405_v2  ;;  %v1419_v3 = vpop.f32.mrb[103].mxu0  ;;  %v8249_v2 = vld [vmem:[%s11267_s3 + $0x414] ss:$20 sps:$4 sm:$0xff]  }
 0x1c7   : > { %1628 = vst [vmem:[%s9128_s17 + $0x328] sm:$0xff] %v1419_v3  ;;  %v8251_v3 = vld [vmem:[%s11267_s3 + $0x124] ss:$20 sps:$4 sm:$0xff]  }
 0x1c9   : > { %4832 = vmatmul.mubr.bf16.gmra.mrb[188].mxu0 %v8187_v60  ;;  %5192 = vmatmul.mubr.bf16.gmra.mrb[132].mxu1 %v8188_v61  ;;  %v8241_v60 = vld [vmem:[%s11267_s3 + $0x3c0] ss:$20 sps:$4 sm:$0xff]   ;;  %v8242_v61 = vld [vmem:[%s11267_s3 + $0xd0] ss:$20 sps:$4 sm:$0xff]  }
 0x1ca   : > { %4839 = vmatprep.mubr.bf16.mxu0 %v8189_v62  ;;  %5199 = vmatprep.mubr.bf16.mxu1 %v8191_v63  ;;  %v8243_v62 = vld [vmem:[%s11267_s3 + $0x3ec] ss:$20 sps:$4 sm:$0xff]   ;;  %v8245_v63 = vld [vmem:[%s11267_s3 + $0xfc] ss:$20 sps:$4 sm:$0xff]  }
 0x1cb   : > { %v7408_v8 = vpop.f32.mrb[104].mxu0 }
 0x1cc   : > { %1633 = vst [vmem:[%s9128_s17 + $0x350] sm:$0xff] %v7408_v8  ;;  %v1432_v9 = vpop.f32.mrb[105].mxu0 }
 0x1cd   : > { %1631 = vst [vmem:[%s9128_s17 + $0x340] sm:$0xff] %v1432_v9  ;;  %v7409_v10 = vpop.f32.mrb[106].mxu0  ;;  %v8259_v9 = vld [vmem:[%s11267_s3 + $0x438] ss:$20 sps:$4 sm:$0xff]  }
 0x1ce   : > { %1634 = vst [vmem:[%s9128_s17 + $0x358] sm:$0xff] %v7409_v10  ;;  %v1435_v11 = vpop.f32.mrb[107].mxu0  ;;  %v8260_v10 = vld [vmem:[%s11267_s3 + $0x148] ss:$20 sps:$4 sm:$0xff]  }
 0x1cf   : > { %1632 = vst [vmem:[%s9128_s17 + $0x348] sm:$0xff] %v1435_v11 }
 0x1d1   : > { %4840 = vmatmul.mubr.bf16.gmra.mrb[192].mxu0 %v8193_v4  ;;  %5200 = vmatmul.mubr.bf16.gmra.mrb[136].mxu1 %v8194_v5  ;;  %v8253_v4 = vld [vmem:[%s11267_s3 + $0x410] ss:$20 sps:$4 sm:$0xff]   ;;  %v8254_v5 = vld [vmem:[%s11267_s3 + $0x120] ss:$20 sps:$4 sm:$0xff]  }
 0x1d2   : > { %4847 = vmatprep.mubr.bf16.mxu0 %v8195_v6  ;;  %5207 = vmatprep.mubr.bf16.mxu1 %v8197_v7  ;;  %v8255_v6 = vld [vmem:[%s11267_s3 + $0x43c] ss:$20 sps:$4 sm:$0xff]   ;;  %v8257_v7 = vld [vmem:[%s11267_s3 + $0x14c] ss:$20 sps:$4 sm:$0xff]  }
 0x1d3   : > { %v7412_v17 = vpop.f32.mrb[108].mxu0 }
 0x1d4   : > { %1637 = vst [vmem:[%s9128_s17 + $0x370] sm:$0xff] %v7412_v17  ;;  %v1448_v26 = vpop.f32.mrb[109].mxu0 }
 0x1d5   : > { %1635 = vst [vmem:[%s9128_s17 + $0x360] sm:$0xff] %v1448_v26  ;;  %v7413_v35 = vpop.f32.mrb[110].mxu0  ;;  %v8265_v26 = vld [vmem:[%s11267_s3 + $0x460] ss:$20 sps:$4 sm:$0xff]  }
 0x1d6   : > { %1638 = vst [vmem:[%s9128_s17 + $0x378] sm:$0xff] %v7413_v35  ;;  %v1451_v16 = vpop.f32.mrb[111].mxu0  ;;  %v8266_v35 = vld [vmem:[%s11267_s3 + $0x170] ss:$20 sps:$4 sm:$0xff]  }
 0x1d7   : > { %1636 = vst [vmem:[%s9128_s17 + $0x368] sm:$0xff] %v1451_v16 }
 0x1d9   : > { %4848 = vmatmul.mubr.bf16.gmra.mrb[196].mxu0 %v8199_v12  ;;  %5208 = vmatmul.mubr.bf16.gmra.mrb[140].mxu1 %v8200_v13  ;;  %v8261_v12 = vld [vmem:[%s11267_s3 + $0x464] ss:$20 sps:$4 sm:$0xff]   ;;  %v8263_v13 = vld [vmem:[%s11267_s3 + $0x174] ss:$20 sps:$4 sm:$0xff]  }
 0x1da   : > { %4855 = vmatprep.mubr.bf16.mxu0 %v8201_v14  ;;  %5215 = vmatprep.mubr.bf16.mxu1 %v8203_v15 }
 0x1db   : > { %v7416_v21 = vpop.f32.mrb[112].mxu0 }
 0x1dc   : > { %1641 = vst [vmem:[%s9128_s17 + $0x390] sm:$0xff] %v7416_v21  ;;  %v1464_v22 = vpop.f32.mrb[113].mxu0 }
 0x1dd   : > { %1639 = vst [vmem:[%s9128_s17 + $0x380] sm:$0xff] %v1464_v22  ;;  %v7417_v23 = vpop.f32.mrb[114].mxu0  ;;  %v8271_v22 = vld [vmem:[%s11267_s3 + $0x488] ss:$20 sps:$4 sm:$0xff]  }
 0x1de   : > { %1642 = vst [vmem:[%s9128_s17 + $0x398] sm:$0xff] %v7417_v23  ;;  %v1467_v24 = vpop.f32.mrb[115].mxu0  ;;  %v8272_v23 = vld [vmem:[%s11267_s3 + $0x198] ss:$20 sps:$4 sm:$0xff]  }
 0x1df   : > { %1640 = vst [vmem:[%s9128_s17 + $0x388] sm:$0xff] %v1467_v24 }
 0x1e1   : > { %4856 = vmatmul.mubr.bf16.gmra.mrb[200].mxu0 %v8205_v45  ;;  %5216 = vmatmul.mubr.bf16.gmra.mrb[144].mxu1 %v8206_v18  ;;  %v8267_v45 = vld [vmem:[%s11267_s3 + $0x48c] ss:$20 sps:$4 sm:$0xff]   ;;  %v8269_v18 = vld [vmem:[%s11267_s3 + $0x19c] ss:$20 sps:$4 sm:$0xff]  }
 0x1e2   : > { %4863 = vmatprep.mubr.bf16.mxu0 %v8207_v19  ;;  %5256 = vmatprep.mubr.bf16.mxu1 %v8211_v20 }
 0x1e3   : > { %v7420_v30 = vpop.f32.mrb[116].mxu0 }
 0x1e4   : > { %1645 = vst [vmem:[%s9128_s17 + $0x3b0] sm:$0xff] %v7420_v30  ;;  %v1480_v31 = vpop.f32.mrb[117].mxu0 }
 0x1e5   : > { %1643 = vst [vmem:[%s9128_s17 + $0x3a0] sm:$0xff] %v1480_v31  ;;  %v7421_v32 = vpop.f32.mrb[118].mxu0  ;;  %v8277_v31 = vld [vmem:[%s11267_s3 + $0x4b0] ss:$20 sps:$4 sm:$0xff]  }
 0x1e6   : > { %1646 = vst [vmem:[%s9128_s17 + $0x3b8] sm:$0xff] %v7421_v32  ;;  %v1483_v33 = vpop.f32.mrb[119].mxu0  ;;  %v8278_v32 = vld [vmem:[%s11267_s3 + $0x1c0] ss:$20 sps:$4 sm:$0xff]  }
 0x1e7   : > { %1644 = vst [vmem:[%s9128_s17 + $0x3a8] sm:$0xff] %v1483_v33 }
 0x1e9   : > { %4864 = vmatmul.mubr.bf16.gmra.mrb[204].mxu0 %v8212_v27  ;;  %5257 = vmatmul.mubr.bf16.vlgmr.msra.gmra.mrb[148].mxu1 %v8209_v25  ;;  %v8273_v25 = vld [vmem:[%s11267_s3 + $0x4b4] ss:$20 sps:$4 sm:$0xff]   ;;  %v8275_v27 = vld [vmem:[%s11267_s3 + $0x1c4] ss:$20 sps:$4 sm:$0xff]  }
 0x1ea   : > { %4871 = vmatprep.mubr.bf16.mxu0 %v8213_v28  ;;  %5264 = vmatprep.mubr.bf16.mxu1 %v8215_v29 }
 0x1eb   : > { %v7424_v39 = vpop.f32.mrb[120].mxu0 }
 0x1ec   : > { %1649 = vst [vmem:[%s9128_s17 + $0x3d0] sm:$0xff] %v7424_v39  ;;  %v1496_v40 = vpop.f32.mrb[121].mxu0 }
 0x1ed   : > { %1647 = vst [vmem:[%s9128_s17 + $0x3c0] sm:$0xff] %v1496_v40  ;;  %v7425_v41 = vpop.f32.mrb[122].mxu0  ;;  %v8283_v40 = vld [vmem:[%s11267_s3 + $0x4d8] ss:$20 sps:$4 sm:$0xff]  }
 0x1ee   : > { %1650 = vst [vmem:[%s9128_s17 + $0x3d8] sm:$0xff] %v7425_v41  ;;  %v1499_v42 = vpop.f32.mrb[123].mxu0  ;;  %v8284_v41 = vld [vmem:[%s11267_s3 + $0x1e8] ss:$20 sps:$4 sm:$0xff]  }
 0x1ef   : > { %1648 = vst [vmem:[%s9128_s17 + $0x3c8] sm:$0xff] %v1499_v42 }
 0x1f1   : > { %4872 = vmatmul.mubr.bf16.gmra.mrb[208].mxu0 %v8217_v34  ;;  %5265 = vmatmul.mubr.bf16.gmra.mrb[152].mxu1 %v8218_v36  ;;  %v8279_v34 = vld [vmem:[%s11267_s3 + $0x4dc] ss:$20 sps:$4 sm:$0xff]   ;;  %v8281_v36 = vld [vmem:[%s11267_s3 + $0x1ec] ss:$20 sps:$4 sm:$0xff]  }
 0x1f2   : > { %4879 = vmatprep.mubr.bf16.mxu0 %v8219_v37  ;;  %5272 = vmatprep.mubr.bf16.mxu1 %v8221_v38 }
 0x1f3   : > { %v7428_v48 = vpop.f32.mrb[124].mxu0 }
 0x1f4   : > { %1653 = vst [vmem:[%s9128_s17 + $0x3f0] sm:$0xff] %v7428_v48  ;;  %v1512_v49 = vpop.f32.mrb[125].mxu0 }
 0x1f5   : > { %1651 = vst [vmem:[%s9128_s17 + $0x3e0] sm:$0xff] %v1512_v49  ;;  %v7429_v50 = vpop.f32.mrb[126].mxu0  ;;  %v8285_v49 = vld [vmem:[%s11267_s3 + $0x500] ss:$20 sps:$4 sm:$0xff]  }
 0x1f6   : > { %1654 = vst [vmem:[%s9128_s17 + $0x3f8] sm:$0xff] %v7429_v50  ;;  %v1515_v51 = vpop.f32.mrb[127].mxu0  ;;  %v8290_v50 = vld [vmem:[%s11267_s3 + $0x210] ss:$20 sps:$4 sm:$0xff]  }
 0x1f7   : > { %1652 = vst [vmem:[%s9128_s17 + $0x3e8] sm:$0xff] %v1515_v51 }
 0x1f9   : > { %4880 = vmatmul.mubr.bf16.gmra.mrb[212].mxu0 %v8223_v43  ;;  %5273 = vmatmul.mubr.bf16.gmra.mrb[156].mxu1 %v8224_v44  ;;  %v8287_v43 = vld [vmem:[%s11267_s3 + $0x504] ss:$20 sps:$4 sm:$0xff]   ;;  %v8288_v44 = vld [vmem:[%s11267_s3 + $0x214] ss:$20 sps:$4 sm:$0xff]  }
 0x1fa   : > { %4887 = vmatprep.mubr.bf16.mxu0 %v8225_v46  ;;  %5280 = vmatprep.mubr.bf16.mxu1 %v8227_v47 }
 0x201   : > { %4888 = vmatmul.mubr.bf16.gmra.mrb[216].mxu0 %v8229_v52  ;;  %5281 = vmatmul.mubr.bf16.gmra.mrb[160].mxu1 %v8230_v53  ;;  %v8293_v52 = vld [vmem:[%s11267_s3 + $0x52c] ss:$20 sps:$4 sm:$0xff]   ;;  %v8294_v53 = vld [vmem:[%s11267_s3 + $0x23c] ss:$20 sps:$4 sm:$0xff]  }
 0x202   : > { %4895 = vmatprep.mubr.bf16.mxu0 %v8231_v54  ;;  %5288 = vmatprep.mubr.bf16.mxu1 %v8233_v56 }
 0x209   : > { %4896 = vmatmul.mubr.bf16.gmra.mrb[220].mxu0 %v8235_v55  ;;  %5289 = vmatmul.mubr.bf16.gmra.mrb[164].mxu1 %v8236_v57  ;;  %v8291_v57 = vld [vmem:[%s11267_s3 + $0x528] ss:$20 sps:$4 sm:$0xff]  }
 0x20a   : > { %4903 = vmatprep.mubr.bf16.mxu0 %v8237_v58  ;;  %5296 = vmatprep.mubr.bf16.mxu1 %v8239_v59  ;;  %v8296_v58 = vld [vmem:[%s11267_s3 + $0x238] ss:$20 sps:$4 sm:$0xff]  }
 0x211   : > { %4904 = vmatmul.mubr.bf16.gmra.mrb[224].mxu0 %v8241_v60  ;;  %5297 = vmatmul.mubr.bf16.gmra.mrb[168].mxu1 %v8242_v61  ;;  %v8299_v60 = vld [vmem:[%s11267_s3 + $0x554] ss:$20 sps:$4 sm:$0xff]   ;;  %v8300_v61 = vld [vmem:[%s11267_s3 + $0x264] ss:$20 sps:$4 sm:$0xff]  }
 0x212   : > { %4911 = vmatprep.mubr.bf16.mxu0 %v8243_v62  ;;  %5304 = vmatprep.mubr.bf16.mxu1 %v8245_v63 }
 0x219   : > { %4912 = vmatmul.mubr.bf16.gmra.mrb[228].mxu0 %v8247_v0  ;;  %5305 = vmatmul.mubr.bf16.gmra.mrb[172].mxu1 %v8248_v1  ;;  %v8297_v1 = vld [vmem:[%s11267_s3 + $0x550] ss:$20 sps:$4 sm:$0xff]  }
 0x21a   : > { %4919 = vmatprep.mubr.bf16.mxu0 %v8249_v2  ;;  %5312 = vmatprep.mubr.bf16.mxu1 %v8251_v3  ;;  %v8302_v2 = vld [vmem:[%s11267_s3 + $0x260] ss:$20 sps:$4 sm:$0xff]  }
 0x221   : > { %4920 = vmatmul.mubr.bf16.gmra.mrb[232].mxu0 %v8253_v4  ;;  %5313 = vmatmul.mubr.bf16.gmra.mrb[176].mxu1 %v8254_v5  ;;  %v8305_v4 = vld [vmem:[%s11267_s3 + $0x57c] ss:$20 sps:$4 sm:$0xff]   ;;  %v8306_v5 = vld [vmem:[%s11267_s3 + $0x28c] ss:$20 sps:$4 sm:$0xff]  }
 0x222   : > { %4927 = vmatprep.mubr.bf16.mxu0 %v8255_v6  ;;  %5320 = vmatprep.mubr.bf16.mxu1 %v8257_v7 }
 0x224   : > { %v9743_v8 = vpop.f32.mrb[128].mxu0 }
 0x225   : > { %v4715_v11 = vpop.f32.mrb[129].mxu0 }
 0x226   : > { %v9757_v14 = vpop.f32.mrb[130].mxu0  ;;  %v8308_v11 = vld [vmem:[%s11267_s3 + $0x288] ss:$20 sps:$4 sm:$0xff]  }
 0x227   : > { %v4718_v15 = vpop.f32.mrb[131].mxu0 }
 0x228   : > { %v8312_v15 = vld [vmem:[%s11267_s3 + $0x2b4] ss:$20 sps:$4 sm:$0xff]  }
 0x229   : > { %4928 = vmatmul.mubr.bf16.gmra.mrb[236].mxu0 %v8259_v9  ;;  %5321 = vmatmul.mubr.bf16.gmra.mrb[180].mxu1 %v8260_v10  ;;  %v8303_v10 = vld [vmem:[%s11267_s3 + $0x578] ss:$20 sps:$4 sm:$0xff]  }
 0x22a   : > { %4935 = vmatprep.mubr.bf16.mxu0 %v8261_v12  ;;  %5328 = vmatprep.mubr.bf16.mxu1 %v8263_v13  ;;  %v8311_v13 = vld [vmem:[%s11267_s3 + $0x5a4] ss:$20 sps:$4 sm:$0xff]  }
 0x22c   : > { %v9759_v17 = vpop.f32.mrb[132].mxu0 }
 0x22d   : > { %v4723_v16 = vpop.f32.mrb[133].mxu0 }
 0x22e   : > { %v9773_v19 = vpop.f32.mrb[134].mxu0 }
 0x22f   : > { %v4726_v20 = vpop.f32.mrb[135].mxu0 }
 0x231   : > { %4936 = vmatmul.mubr.bf16.gmra.mrb[240].mxu0 %v8265_v26  ;;  %5329 = vmatmul.mubr.bf16.gmra.mrb[184].mxu1 %v8266_v35 }
 0x232   : > { %4943 = vmatprep.mubr.bf16.mxu0 %v8267_v45  ;;  %5336 = vmatprep.mubr.bf16.mxu1 %v8269_v18  ;;  %v8309_v45 = vld [vmem:[%s11267_s3 + $0x5a0] ss:$20 sps:$4 sm:$0xff]   ;;  %v8314_v18 = vld [vmem:[%s11267_s3 + $0x2b0] ss:$20 sps:$4 sm:$0xff]  }
 0x234   : > { %v9775_v21 = vpop.f32.mrb[136].mxu0 }
 0x235   : > { %v4731_v24 = vpop.f32.mrb[137].mxu0 }
 0x236   : > { %v9789_v28 = vpop.f32.mrb[138].mxu0 }
 0x237   : > { %v4734_v29 = vpop.f32.mrb[139].mxu0 }
 0x238   : > { %v8315_v29 = vld [vmem:[%s11267_s3 + $0x5c8] ss:$20 sps:$4 sm:$0xff]  }
 0x239   : > { %4944 = vmatmul.mubr.bf16.gmra.mrb[244].mxu0 %v8271_v22  ;;  %5337 = vmatmul.mubr.bf16.gmra.mrb[188].mxu1 %v8272_v23  ;;  %v8317_v22 = vld [vmem:[%s11267_s3 + $0x5cc] ss:$20 sps:$4 sm:$0xff]   ;;  %v8318_v23 = vld [vmem:[%s11267_s3 + $0x2dc] ss:$20 sps:$4 sm:$0xff]  }
 0x23a   : > { %4951 = vmatprep.mubr.bf16.mxu0 %v8273_v25  ;;  %5344 = vmatprep.mubr.bf16.mxu1 %v8275_v27 }
 0x23c   : > { %v9791_v30 = vpop.f32.mrb[140].mxu0 }
 0x23d   : > { %v4739_v33 = vpop.f32.mrb[141].mxu0 }
 0x23e   : > { %v9805_v37 = vpop.f32.mrb[142].mxu0  ;;  %v8323_v33 = vld [vmem:[%s11267_s3 + $0x5f4] ss:$20 sps:$4 sm:$0xff]  }
 0x23f   : > { %v4742_v38 = vpop.f32.mrb[143].mxu0 }
 0x241   : > { %4952 = vmatmul.mubr.bf16.gmra.mrb[248].mxu0 %v8277_v31  ;;  %5345 = vmatmul.mubr.bf16.gmra.mrb[192].mxu1 %v8278_v32  ;;  %v8320_v31 = vld [vmem:[%s11267_s3 + $0x2d8] ss:$20 sps:$4 sm:$0xff]  }
 0x242   : > { %4959 = vmatprep.mubr.bf16.mxu0 %v8279_v34  ;;  %5352 = vmatprep.mubr.bf16.mxu1 %v8281_v36  ;;  %v8324_v34 = vld [vmem:[%s11267_s3 + $0x304] ss:$20 sps:$4 sm:$0xff]  }
 0x244   : > { %v9807_v39 = vpop.f32.mrb[144].mxu0 }
 0x245   : > { %v4747_v42 = vpop.f32.mrb[145].mxu0 }
 0x246   : > { %v9821_v46 = vpop.f32.mrb[146].mxu0  ;;  %v8326_v42 = vld [vmem:[%s11267_s3 + $0x300] ss:$20 sps:$4 sm:$0xff]  }
 0x247   : > { %v4750_v47 = vpop.f32.mrb[147].mxu0 }
 0x248   : > { %v8330_v47 = vld [vmem:[%s11267_s3 + $0x32c] ss:$20 sps:$4 sm:$0xff]  }
 0x249   : > { %4960 = vmatmul.mubr.bf16.gmra.mrb[252].mxu0 %v8283_v40  ;;  %5353 = vmatmul.mubr.bf16.gmra.mrb[196].mxu1 %v8284_v41  ;;  %v8321_v41 = vld [vmem:[%s11267_s3 + $0x5f0] ss:$20 sps:$4 sm:$0xff]  }
 0x24a   : > { %4967 = vmatprep.mubr.bf16.mxu0 %v8287_v43  ;;  %5360 = vmatprep.mubr.bf16.mxu1 %v8288_v44  ;;  %v8329_v44 = vld [vmem:[%s11267_s3 + $0x61c] ss:$20 sps:$4 sm:$0xff]  }
 0x24c   : > { %v9823_v48 = vpop.f32.mrb[148].mxu0 }
 0x24d   : > { %v4755_v51 = vpop.f32.mrb[149].mxu0 }
 0x24e   : > { %v9837_v54 = vpop.f32.mrb[150].mxu0 }
 0x24f   : > { %v4758_v56 = vpop.f32.mrb[151].mxu0 }
 0x251   : > { %4968 = vmatmul.mubr.bf16.gmra.mrb[0].mxu0 %v8285_v49  ;;  %5361 = vmatmul.mubr.bf16.gmra.mrb[200].mxu1 %v8290_v50 }
 0x252   : > { %4975 = vmatprep.mubr.bf16.mxu0 %v8293_v52  ;;  %5368 = vmatprep.mubr.bf16.mxu1 %v8294_v53  ;;  %v8327_v52 = vld [vmem:[%s11267_s3 + $0x618] ss:$20 sps:$4 sm:$0xff]   ;;  %v8332_v53 = vld [vmem:[%s11267_s3 + $0x328] ss:$20 sps:$4 sm:$0xff]  }
 0x254   : > { %v9839_v55 = vpop.f32.mrb[152].mxu0 }
 0x255   : > { %v4763_v59 = vpop.f32.mrb[153].mxu0 }
 0x256   : > { %v9853_v62 = vpop.f32.mrb[154].mxu0 }
 0x257   : > { %v4766_v63 = vpop.f32.mrb[155].mxu0 }
 0x258   : > { %v8333_v63 = vld [vmem:[%s11267_s3 + $0x640] ss:$20 sps:$4 sm:$0xff]  }
 0x259   : > { %4976 = vmatmul.mubr.bf16.gmra.mrb[4].mxu0 %v8291_v57  ;;  %5369 = vmatmul.mubr.bf16.gmra.mrb[204].mxu1 %v8296_v58  ;;  %v8335_v57 = vld [vmem:[%s11267_s3 + $0x644] ss:$20 sps:$4 sm:$0xff]   ;;  %v8336_v58 = vld [vmem:[%s11267_s3 + $0x354] ss:$20 sps:$4 sm:$0xff]  }
 0x25a   : > { %4983 = vmatprep.mubr.bf16.mxu0 %v8299_v60  ;;  %5376 = vmatprep.mubr.bf16.mxu1 %v8300_v61 }
 0x25c   : > { %v9855_v0 = vpop.f32.mrb[156].mxu0 }
 0x25d   : > { %v4771_v3 = vpop.f32.mrb[157].mxu0 }
 0x25e   : > { %v9869_v6 = vpop.f32.mrb[158].mxu0  ;;  %v8341_v3 = vld [vmem:[%s11267_s3 + $0x66c] ss:$20 sps:$4 sm:$0xff]  }
 0x25f   : > { %v4774_v7 = vpop.f32.mrb[159].mxu0 }
 0x261   : > { %4984 = vmatmul.mubr.bf16.gmra.mrb[8].mxu0 %v8297_v1  ;;  %5377 = vmatmul.mubr.bf16.gmra.mrb[208].mxu1 %v8302_v2  ;;  %v8338_v1 = vld [vmem:[%s11267_s3 + $0x350] ss:$20 sps:$4 sm:$0xff]  }
 0x262   : > { %4991 = vmatprep.mubr.bf16.mxu0 %v8305_v4  ;;  %5384 = vmatprep.mubr.bf16.mxu1 %v8306_v5  ;;  %v8342_v4 = vld [vmem:[%s11267_s3 + $0x37c] ss:$20 sps:$4 sm:$0xff]  }
 0x264   : > { %v9871_v9 = vpop.f32.mrb[160].mxu0 }
 0x265   : > { %v4779_v12 = vpop.f32.mrb[161].mxu0 }
 0x266   : > { %v9885_v26 = vpop.f32.mrb[162].mxu0  ;;  %v8344_v12 = vld [vmem:[%s11267_s3 + $0x378] ss:$20 sps:$4 sm:$0xff]  }
 0x267   : > { %v4782_v35 = vpop.f32.mrb[163].mxu0 }
 0x268   : > { %v8348_v35 = vld [vmem:[%s11267_s3 + $0x3a4] ss:$20 sps:$4 sm:$0xff]  }
 0x269   : > { %4992 = vmatmul.mubr.bf16.gmra.mrb[12].mxu0 %v8303_v10  ;;  %5385 = vmatmul.mubr.bf16.gmra.mrb[212].mxu1 %v8308_v11  ;;  %v8339_v11 = vld [vmem:[%s11267_s3 + $0x668] ss:$20 sps:$4 sm:$0xff]  }
 0x26a   : > { %4999 = vmatprep.mubr.bf16.mxu0 %v8311_v13  ;;  %5392 = vmatprep.mubr.bf16.mxu1 %v8312_v15  ;;  %v8347_v15 = vld [vmem:[%s11267_s3 + $0x694] ss:$20 sps:$4 sm:$0xff]  }
 0x26c   : > { %v9887_v16 = vpop.f32.mrb[164].mxu0 }
 0x26d   : > { %v4787_v20 = vpop.f32.mrb[165].mxu0 }
 0x26e   : > { %v9901_v24 = vpop.f32.mrb[166].mxu0 }
 0x26f   : > { %v4790_v25 = vpop.f32.mrb[167].mxu0 }
 0x271   : > { %5000 = vmatmul.mubr.bf16.gmra.mrb[16].mxu0 %v8309_v45  ;;  %5393 = vmatmul.mubr.bf16.gmra.mrb[216].mxu1 %v8314_v18 }
 0x272   : > { %5007 = vmatprep.mubr.bf16.mxu0 %v8317_v22  ;;  %5400 = vmatprep.mubr.bf16.mxu1 %v8318_v23  ;;  %v8345_v22 = vld [vmem:[%s11267_s3 + $0x690] ss:$20 sps:$4 sm:$0xff]   ;;  %v8350_v23 = vld [vmem:[%s11267_s3 + $0x3a0] ss:$20 sps:$4 sm:$0xff]  }
 0x274   : > { %v9903_v27 = vpop.f32.mrb[168].mxu0 }
 0x275   : > { %v4795_v32 = vpop.f32.mrb[169].mxu0 }
 0x276   : > { %v9917_v36 = vpop.f32.mrb[170].mxu0 }
 0x277   : > { %v4798_v38 = vpop.f32.mrb[171].mxu0 }
 0x278   : > { %v8351_v38 = vld [vmem:[%s11267_s3 + $0x6b8] ss:$20 sps:$4 sm:$0xff]  }
 0x279   : > { %5008 = vmatmul.mubr.bf16.gmra.mrb[20].mxu0 %v8315_v29  ;;  %5401 = vmatmul.mubr.bf16.gmra.mrb[220].mxu1 %v8320_v31  ;;  %v8353_v29 = vld [vmem:[%s11267_s3 + $0x6bc] ss:$20 sps:$4 sm:$0xff]   ;;  %v8354_v31 = vld [vmem:[%s11267_s3 + $0x3cc] ss:$20 sps:$4 sm:$0xff]  }
 0x27a   : > { %5015 = vmatprep.mubr.bf16.mxu0 %v8323_v33  ;;  %5408 = vmatprep.mubr.bf16.mxu1 %v8324_v34 }
 0x27c   : > { %v9919_v40 = vpop.f32.mrb[172].mxu0 }
 0x27d   : > { %v4803_v43 = vpop.f32.mrb[173].mxu0 }
 0x27e   : > { %v9933_v49 = vpop.f32.mrb[174].mxu0  ;;  %v8359_v43 = vld [vmem:[%s11267_s3 + $0x6e4] ss:$20 sps:$4 sm:$0xff]  }
 0x27f   : > { %v4806_v50 = vpop.f32.mrb[175].mxu0 }
 0x281   : > { %5016 = vmatmul.mubr.bf16.gmra.mrb[24].mxu0 %v8321_v41  ;;  %5409 = vmatmul.mubr.bf16.gmra.mrb[224].mxu1 %v8326_v42  ;;  %v8356_v41 = vld [vmem:[%s11267_s3 + $0x3c8] ss:$20 sps:$4 sm:$0xff]  }
 0x282   : > { %5023 = vmatprep.mubr.bf16.mxu0 %v8329_v44  ;;  %5416 = vmatprep.mubr.bf16.mxu1 %v8330_v47  ;;  %v8360_v44 = vld [vmem:[%s11267_s3 + $0x3f4] ss:$20 sps:$4 sm:$0xff]  }
 0x284   : > { %v9935_v51 = vpop.f32.mrb[176].mxu0 }
 0x285   : > { %v4811_v56 = vpop.f32.mrb[177].mxu0 }
 0x286   : > { %v9949_v59 = vpop.f32.mrb[178].mxu0  ;;  %v8362_v56 = vld [vmem:[%s11267_s3 + $0x3f0] ss:$20 sps:$4 sm:$0xff]  }
 0x287   : > { %v4814_v60 = vpop.f32.mrb[179].mxu0 }
 0x288   : > { %v8365_v60 = vld [vmem:[%s11267_s3 + $0x10] ss:$20 sps:$4 sm:$0xff]  }
 0x289   : > { %5024 = vmatmul.mubr.bf16.gmra.mrb[28].mxu0 %v8327_v52  ;;  %5417 = vmatmul.mubr.bf16.gmra.mrb[228].mxu1 %v8332_v53  ;;  %v8357_v53 = vld [vmem:[%s11267_s3 + $0x6e0] ss:$20 sps:$4 sm:$0xff]  }
 0x28a   : > { %5031 = vmatprep.mubr.bf16.mxu0 %v8335_v57  ;;  %5424 = vmatprep.mubr.bf16.mxu1 %v8336_v58  ;;  %v8363_v58 = vld [vmem:[%s11267_s3 + $0x41c] ss:$20 sps:$4 sm:$0xff]  }
 0x28c   : > { %v9951_v61 = vpop.f32.mrb[180].mxu0 }
 0x28d   : > { %v4819_v2 = vpop.f32.mrb[181].mxu0 }
 0x28e   : > { %v9965_v5 = vpop.f32.mrb[182].mxu0 }
 0x28f   : > { %v4822_v7 = vpop.f32.mrb[183].mxu0 }
 0x291   : > { %5032 = vmatmul.mubr.bf16.gmra.mrb[32].mxu0 %v8333_v63  ;;  %5425 = vmatmul.mubr.bf16.gmra.mrb[232].mxu1 %v8338_v1 }
 0x292   : > { %5039 = vmatprep.mubr.bf16.mxu0 %v8341_v3  ;;  %5432 = vmatprep.mubr.bf16.mxu1 %v8342_v4  ;;  %v8366_v3 = vld [vmem:[%s11267_s3 + $0x418] ss:$20 sps:$4 sm:$0xff]  }
 0x293   : > { %v8367_v4 = vld [vmem:[%s11267_s3 + $0x38] ss:$20 sps:$4 sm:$0xff]  }
 0x294   : > { %v9967_v10 = vpop.f32.mrb[184].mxu0 }
 0x295   : > { %v4827_v13 = vpop.f32.mrb[185].mxu0 }
 0x296   : > { %v9981_v45 = vpop.f32.mrb[186].mxu0 }
 0x297   : > { %v4830_v18 = vpop.f32.mrb[187].mxu0 }
 0x299   : > { %5040 = vmatmul.mubr.bf16.gmra.mrb[36].mxu0 %v8339_v11  ;;  %5433 = vmatmul.mubr.bf16.gmra.mrb[236].mxu1 %v8344_v12  ;;  %v8370_v11 = vld [vmem:[%s11267_s3 + $0x444] ss:$20 sps:$4 sm:$0xff]   ;;  %v8371_v12 = vld [vmem:[%s11267_s3 + $0x60] ss:$20 sps:$4 sm:$0xff]  }
 0x29a   : > { %5047 = vmatprep.mubr.bf16.mxu0 %v8347_v15  ;;  %5440 = vmatprep.mubr.bf16.mxu1 %v8348_v35  ;;  %v10051_v35 = vld [vmem:[%s11269_s5] ss:$0 sm:$0xff] }
 0x29b   : > { %v4714_v18 = vadd.f32 %v10051_v35, %v9743_v8  ;;  %v8375_v8 = vld [vmem:[%s11267_s3 + $0x46c] ss:$20 sps:$4 sm:$0xff]  }
 0x29c   : > { %v9983_v20 = vpop.f32.mrb[188].mxu0 }
 0x29d   : > { %v4835_v25 = vpop.f32.mrb[189].mxu0 }
 0x29e   : > { %v9997_v32 = vpop.f32.mrb[190].mxu0  ;;  %v8368_v25 = vld [vmem:[%s11267_s3 + $0x440] ss:$20 sps:$4 sm:$0xff]  }
 0x29f   : > { %v4838_v33 = vpop.f32.mrb[191].mxu0 }
 0x2a1   : > { %5048 = vmatmul.mubr.bf16.gmra.mrb[40].mxu0 %v8345_v22  ;;  %5441 = vmatmul.mubr.bf16.gmra.mrb[240].mxu1 %v8350_v23 }
 0x2a2   : > { %5055 = vmatprep.mubr.bf16.mxu0 %v8353_v29  ;;  %5448 = vmatprep.mubr.bf16.mxu1 %v8354_v31  ;;  %v8372_v29 = vld [vmem:[%s11267_s3 + $0x88] ss:$20 sps:$4 sm:$0xff]  }
 0x2a4   : > { %v9999_v34 = vpop.f32.mrb[192].mxu0 }
 0x2a5   : > { %v4843_v42 = vpop.f32.mrb[193].mxu0 }
 0x2a6   : > { %v10013_v47 = vpop.f32.mrb[194].mxu0  ;;  %v8376_v42 = vld [vmem:[%s11267_s3 + $0xb0] ss:$20 sps:$4 sm:$0xff]  }
 0x2a7   : > { %v4846_v50 = vpop.f32.mrb[195].mxu0 }
 0x2a9   : > { %5056 = vmatmul.mubr.bf16.gmra.mrb[44].mxu0 %v8351_v38  ;;  %5449 = vmatmul.mubr.bf16.gmra.mrb[244].mxu1 %v8356_v41  ;;  %v4717_v38 = vadd.f32 %v10051_v35, %v9757_v14  ;;  %v4722_v14 = vadd.f32 %v10051_v35, %v9759_v17  ;;  %v8380_v17 = vld [vmem:[%s11267_s3 + $0x494] ss:$20 sps:$4 sm:$0xff]  }
 0x2aa   : > { %5063 = vmatprep.mubr.bf16.mxu0 %v8359_v43  ;;  %5456 = vmatprep.mubr.bf16.mxu1 %v8360_v44 }
 0x2ac   : > { %v10015_v52 = vpop.f32.mrb[196].mxu0 }
 0x2ad   : > { %v4851_v57 = vpop.f32.mrb[197].mxu0 }
 0x2ae   : > { %v10029_v63 = vpop.f32.mrb[198].mxu0 }
 0x2af   : > { %v4854_v1 = vpop.f32.mrb[199].mxu0 }
 0x2b0   : > { %v8377_v1 = vld [vmem:[%s11267_s3 + $0xd8] ss:$20 sps:$4 sm:$0xff]  }
 0x2b1   : > { %5064 = vmatmul.mubr.bf16.gmra.mrb[48].mxu0 %v8357_v53  ;;  %5457 = vmatmul.mubr.bf16.gmra.mrb[248].mxu1 %v8362_v56 }
 0x2b2   : > { %5464 = vmatprep.mubr.bf16.mxu1 %v8363_v58  ;;  %7462 = vmatprep.mubr.msk.bf16.mxu0 %vm789_vm0, %v8365_v60  ;;  %v8373_v60 = vld [vmem:[%s11267_s3 + $0x468] ss:$20 sps:$4 sm:$0xff]  }
 0x2b4   : > { %v10032_v2 = vpop.f32.mrb[200].mxu0 }
 0x2b5   : > { %v4859_v7 = vpop.f32.mrb[201].mxu0 }
 0x2b6   : > { %v10046_v13 = vpop.f32.mrb[202].mxu0  ;;  %v4725_v7 = vadd.f32 %v10051_v35, %v9773_v19  ;;  %v4730_v19 = vadd.f32 %v10051_v35, %v9775_v21  ;;  %v8385_v21 = vld [vmem:[%s11267_s3 + $0x4bc] ss:$20 sps:$4 sm:$0xff]  }
 0x2b7   : > { %v4862_v15 = vpop.f32.mrb[203].mxu0 }
 0x2b9   : > { %5465 = vmatmul.mubr.bf16.gmra.mrb[252].mxu1 %v8366_v3  ;;  %7463 = vmatmul.mubr.msk.bf16.vlgmr.msra.gmra.mrb[52].mxu0 %vm789_vm0, %v8367_v4 }
 0x2ba   : > { %5472 = vmatprep.mubr.bf16.mxu1 %v8370_v11  ;;  %7466 = vmatprep.mubr.msk.bf16.mxu0 %vm789_vm0, %v8371_v12  ;;  %v8381_v12 = vld [vmem:[%s11267_s3 + $0x100] ss:$20 sps:$4 sm:$0xff]  }
 0x2bc   : > { %v5258_v22 = vpop.f32.mrb[148].mxu1  ;;  %v10057_v23 = vpop.f32.mrb[204].mxu0 }
 0x2bd   : > { %v10065_v31 = vadd.f32 %v5258_v22, %v4714_v18  ;;  %v5260_v33 = vpop.f32.mrb[149].mxu1  ;;  %v4867_v41 = vpop.f32.mrb[205].mxu0 }
 0x2be   : > { %v5261_v43 = vpop.f32.mrb[150].mxu1  ;;  %v10075_v44 = vpop.f32.mrb[206].mxu0  ;;  %v8378_v41 = vld [vmem:[%s11267_s3 + $0x490] ss:$20 sps:$4 sm:$0xff]  }
 0x2bf   : > { %v10077_v50 = vadd.f32 %v5261_v43, %v4717_v38  ;;  %v5263_v53 = vpop.f32.mrb[151].mxu1  ;;  %v4870_v56 = vpop.f32.mrb[207].mxu0 }
 0x2c0   : > { %v4733_v53 = vadd.f32 %v10051_v35, %v9789_v28  ;;  %v4738_v28 = vadd.f32 %v10051_v35, %v9791_v30  ;;  %v8390_v30 = vld [vmem:[%s11267_s3 + $0x4e4] ss:$20 sps:$4 sm:$0xff]  }
 0x2c1   : > { %5473 = vmatmul.mubr.bf16.gmra.mrb[0].mxu1 %v8368_v25  ;;  %7467 = vmatmul.mubr.msk.bf16.gmra.mrb[56].mxu0 %vm789_vm0, %v8372_v29 }
 0x2c2   : > { %5480 = vmatprep.mubr.bf16.mxu1 %v8375_v8  ;;  %7470 = vmatprep.mubr.msk.bf16.mxu0 %vm789_vm0, %v8376_v42  ;;  %v8382_v8 = vld [vmem:[%s11267_s3 + $0x128] ss:$20 sps:$4 sm:$0xff]  }
 0x2c4   : > { %v5266_v57 = vpop.f32.mrb[152].mxu1  ;;  %v10083_v58 = vpop.f32.mrb[208].mxu0 }
 0x2c5   : > { %v10091_v3 = vadd.f32 %v5266_v57, %v4722_v14  ;;  %v5268_v4 = vpop.f32.mrb[153].mxu1  ;;  %v4875_v11 = vpop.f32.mrb[209].mxu0  ;;  %v8386_v14 = vld [vmem:[%s11267_s3 + $0x150] ss:$20 sps:$4 sm:$0xff]  }
 0x2c6   : > { %v5269_v15 = vpop.f32.mrb[154].mxu1  ;;  %v10101_v18 = vpop.f32.mrb[210].mxu0 }
 0x2c7   : > { %v10103_v22 = vadd.f32 %v5269_v15, %v4725_v7  ;;  %v5271_v25 = vpop.f32.mrb[155].mxu1  ;;  %v4878_v29 = vpop.f32.mrb[211].mxu0  ;;  %v8387_v15 = vld [vmem:[%s11267_s3 + $0x178] ss:$20 sps:$4 sm:$0xff]  }
 0x2c9   : > { %5481 = vmatmul.mubr.bf16.gmra.mrb[4].mxu1 %v8373_v60  ;;  %7471 = vmatmul.mubr.msk.bf16.gmra.mrb[60].mxu0 %vm789_vm0, %v8377_v1 }
 0x2ca   : > { %5488 = vmatprep.mubr.bf16.mxu1 %v8380_v17  ;;  %7474 = vmatprep.mubr.msk.bf16.mxu0 %vm789_vm0, %v8381_v12  ;;  %v8383_v12 = vld [vmem:[%s11267_s3 + $0x4b8] ss:$20 sps:$4 sm:$0xff]  }
 0x2cc   : > { %v5274_v33 = vpop.f32.mrb[156].mxu1  ;;  %v10109_v38 = vpop.f32.mrb[212].mxu0 }
 0x2cd   : > { %v10117_v42 = vadd.f32 %v5274_v33, %v4730_v19  ;;  %v5276_v43 = vpop.f32.mrb[157].mxu1  ;;  %v4883_v56 = vpop.f32.mrb[213].mxu0  ;;  %v4741_v19 = vadd.f32 %v10051_v35, %v9805_v37  ;;  %v4746_v37 = vadd.f32 %v10051_v35, %v9807_v39  ;;  %v8395_v39 = vld [vmem:[%s11267_s3 + $0x50c] ss:$20 sps:$4 sm:$0xff]  }
 0x2ce   : > { %v5277_v57 = vpop.f32.mrb[158].mxu1  ;;  %v10127_v60 = vpop.f32.mrb[214].mxu0 }
 0x2cf   : > { %v10129_v1 = vadd.f32 %v5277_v57, %v4733_v53  ;;  %v5279_v4 = vpop.f32.mrb[159].mxu1  ;;  %v4886_v7 = vpop.f32.mrb[215].mxu0 }
 0x2d0   : > { %v8388_v4 = vld [vmem:[%s11267_s3 + $0x4e0] ss:$20 sps:$4 sm:$0xff]   ;;  %v8392_v7 = vld [vmem:[%s11267_s3 + $0x1c8] ss:$20 sps:$4 sm:$0xff]  }
 0x2d1   : > { %5489 = vmatmul.mubr.bf16.gmra.mrb[8].mxu1 %v8378_v41  ;;  %7475 = vmatmul.mubr.msk.bf16.gmra.mrb[64].mxu0 %vm789_vm0, %v8382_v8  ;;  %v8391_v41 = vld [vmem:[%s11267_s3 + $0x1a0] ss:$20 sps:$4 sm:$0xff]  }
 0x2d2   : > { %5496 = vmatprep.mubr.bf16.mxu1 %v8385_v21  ;;  %7478 = vmatprep.mubr.msk.bf16.mxu0 %vm789_vm0, %v8386_v14 }
 0x2d4   : > { %v5282_v11 = vpop.f32.mrb[160].mxu1  ;;  %v10135_v17 = vpop.f32.mrb[216].mxu0 }
 0x2d5   : > { %v10143_v25 = vadd.f32 %v5282_v11, %v4738_v28  ;;  %v5284_v29 = vpop.f32.mrb[161].mxu1  ;;  %v4891_v33 = vpop.f32.mrb[217].mxu0 }
 0x2d6   : > { %v5285_v8 = vpop.f32.mrb[162].mxu1  ;;  %v10153_v43 = vpop.f32.mrb[218].mxu0  ;;  %v8396_v29 = vld [vmem:[%s11267_s3 + $0x1f0] ss:$20 sps:$4 sm:$0xff]  }
 0x2d7   : > { %v10155_v53 = vadd.f32 %v5285_v8, %v4741_v19  ;;  %v5287_v56 = vpop.f32.mrb[163].mxu1  ;;  %v4894_v21 = vpop.f32.mrb[219].mxu0 }
 0x2d9   : > { %5497 = vmatmul.mubr.bf16.gmra.mrb[12].mxu1 %v8383_v12  ;;  %7479 = vmatmul.mubr.msk.bf16.gmra.mrb[68].mxu0 %vm789_vm0, %v8387_v15  ;;  %v4749_v12 = vadd.f32 %v10051_v35, %v9821_v46  ;;  %v4754_v46 = vadd.f32 %v10051_v35, %v9823_v48  ;;  %v8400_v48 = vld [vmem:[%s11267_s3 + $0x534] ss:$20 sps:$4 sm:$0xff]  }
 0x2da   : > { %5504 = vmatprep.mubr.bf16.mxu1 %v8390_v30  ;;  %7482 = vmatprep.mubr.msk.bf16.mxu0 %vm789_vm0, %v8391_v41 }
 0x2dc   : > { %v5290_v14 = vpop.f32.mrb[164].mxu1  ;;  %v10161_v57 = vpop.f32.mrb[220].mxu0 }
 0x2dd   : > { %v10169_v28 = vadd.f32 %v5290_v14, %v4746_v37  ;;  %v5292_v11 = vpop.f32.mrb[165].mxu1  ;;  %v4899_v15 = vpop.f32.mrb[221].mxu0  ;;  %v8393_v37 = vld [vmem:[%s11267_s3 + $0x508] ss:$20 sps:$4 sm:$0xff]   ;;  %v8397_v14 = vld [vmem:[%s11267_s3 + $0x218] ss:$20 sps:$4 sm:$0xff]  }
 0x2de   : > { %v5293_v19 = vpop.f32.mrb[166].mxu1  ;;  %v10179_v33 = vpop.f32.mrb[222].mxu0  ;;  %v4757_v11 = vadd.f32 %v10051_v35, %v9837_v54  ;;  %v8401_v15 = vld [vmem:[%s11267_s3 + $0x240] ss:$20 sps:$4 sm:$0xff]   ;;  %v4762_v54 = vadd.f32 %v10051_v35, %v9839_v55  ;;  %v8405_v55 = vld [vmem:[%s11267_s3 + $0x55c] ss:$20 sps:$4 sm:$0xff]  }
 0x2df   : > { %v10181_v30 = vadd.f32 %v5293_v19, %v4749_v12  ;;  %v5295_v41 = vpop.f32.mrb[167].mxu1  ;;  %v4902_v8 = vpop.f32.mrb[223].mxu0 }
 0x2e1   : > { %5505 = vmatmul.mubr.bf16.gmra.mrb[16].mxu1 %v8388_v4  ;;  %7483 = vmatmul.mubr.msk.bf16.gmra.mrb[72].mxu0 %vm789_vm0, %v8392_v7 }
 0x2e2   : > { %5512 = vmatprep.mubr.bf16.mxu1 %v8395_v39  ;;  %7486 = vmatprep.mubr.msk.bf16.mxu0 %vm789_vm0, %v8396_v29 }
 0x2e4   : > { %v5298_v56 = vpop.f32.mrb[168].mxu1  ;;  %v10187_v21 = vpop.f32.mrb[224].mxu0 }
 0x2e5   : > { %v10195_v4 = vadd.f32 %v5298_v56, %v4754_v46  ;;  %v5300_v7 = vpop.f32.mrb[169].mxu1  ;;  %v4907_v12 = vpop.f32.mrb[225].mxu0 }
 0x2e6   : > { %v5301_v39 = vpop.f32.mrb[170].mxu1  ;;  %v10205_v29 = vpop.f32.mrb[226].mxu0  ;;  %v8398_v7 = vld [vmem:[%s11267_s3 + $0x530] ss:$20 sps:$4 sm:$0xff]   ;;  %v4765_v12 = vadd.f32 %v10051_v35, %v9853_v62  ;;  %v4770_v62 = vadd.f32 %v10051_v35, %v9855_v0 }
 0x2e7   : > { %v10207_v19 = vadd.f32 %v5301_v39, %v4757_v11  ;;  %v5303_v41 = vpop.f32.mrb[171].mxu1  ;;  %v4910_v8 = vpop.f32.mrb[227].mxu0  ;;  %v8402_v11 = vld [vmem:[%s11267_s3 + $0x268] ss:$20 sps:$4 sm:$0xff]   ;;  %v8410_v0 = vld [vmem:[%s11267_s3 + $0x584] ss:$20 sps:$4 sm:$0xff]  }
 0x2e9   : > { %5513 = vmatmul.mubr.bf16.gmra.mrb[20].mxu1 %v8393_v37  ;;  %7487 = vmatmul.mubr.msk.bf16.gmra.mrb[76].mxu0 %vm789_vm0, %v8397_v14 }
 0x2ea   : > { %5520 = vmatprep.mubr.bf16.mxu1 %v8400_v48  ;;  %7490 = vmatprep.mubr.msk.bf16.mxu0 %vm789_vm0, %v8401_v15  ;;  %v8406_v15 = vld [vmem:[%s11267_s3 + $0x290] ss:$20 sps:$4 sm:$0xff]  }
 0x2ec   : > { %v5306_v46 = vpop.f32.mrb[172].mxu1  ;;  %v10213_v56 = vpop.f32.mrb[228].mxu0 }
 0x2ed   : > { %v10221_v37 = vadd.f32 %v5306_v46, %v4762_v54  ;;  %v5308_v14 = vpop.f32.mrb[173].mxu1  ;;  %v4915_v48 = vpop.f32.mrb[229].mxu0 }
 0x2ee   : > { %v5309_v39 = vpop.f32.mrb[174].mxu1  ;;  %v10231_v41 = vpop.f32.mrb[230].mxu0 }
 0x2ef   : > { %11272 = vst [vmem:[#allocation2_spill] sm:$0xff] %v10221_v37  ;;  %v10233_v8 = vadd.f32 %v5309_v39, %v4765_v12  ;;  %v5311_v54 = vpop.f32.mrb[175].mxu1  ;;  %v4918_v46 = vpop.f32.mrb[231].mxu0  ;;  %v8403_v37 = vld [vmem:[%s11267_s3 + $0x558] ss:$20 sps:$4 sm:$0xff]  }
 0x2f0   : > { %v8407_v12 = vld [vmem:[%s11267_s3 + $0x2b8] ss:$20 sps:$4 sm:$0xff]   ;;  %v8411_v39 = vld [vmem:[%s11267_s3 + $0x2e0] ss:$20 sps:$4 sm:$0xff]  }
 0x2f1   : > { %11273 = vst [vmem:[#allocation3_spill] sm:$0xff] %v10233_v8  ;;  %5521 = vmatmul.mubr.bf16.gmra.mrb[24].mxu1 %v8398_v7  ;;  %7491 = vmatmul.mubr.msk.bf16.gmra.mrb[80].mxu0 %vm789_vm0, %v8402_v11 }
 0x2f2   : > { %5528 = vmatprep.mubr.bf16.mxu1 %v8405_v55  ;;  %7494 = vmatprep.mubr.msk.bf16.mxu0 %vm789_vm0, %v8406_v15  ;;  %v4773_v55 = vadd.f32 %v10051_v35, %v9869_v6  ;;  %v4778_v6 = vadd.f32 %v10051_v35, %v9871_v9  ;;  %v8415_v9 = vld [vmem:[%s11267_s3 + $0x5ac] ss:$20 sps:$4 sm:$0xff]  }
 0x2f4   : > { %v5314_v14 = vpop.f32.mrb[176].mxu1  ;;  %v10239_v48 = vpop.f32.mrb[232].mxu0 }
 0x2f5   : > { %v10247_v7 = vadd.f32 %v5314_v14, %v4770_v62  ;;  %v5316_v11 = vpop.f32.mrb[177].mxu1  ;;  %v4923_v15 = vpop.f32.mrb[233].mxu0 }
 0x2f6   : > { %v5317_v54 = vpop.f32.mrb[178].mxu1  ;;  %v10257_v46 = vpop.f32.mrb[234].mxu0 }
 0x2f7   : > { %11274 = vst [vmem:[#allocation4_spill] sm:$0xff] %v10247_v7  ;;  %v10259_v8 = vadd.f32 %v5317_v54, %v4773_v55  ;;  %v5319_v62 = vpop.f32.mrb[179].mxu1  ;;  %v4926_v14 = vpop.f32.mrb[235].mxu0  ;;  %v8408_v7 = vld [vmem:[%s11267_s3 + $0x580] ss:$20 sps:$4 sm:$0xff]  }
 0x2f8   : > { %v8412_v55 = vld [vmem:[%s11267_s3 + $0x308] ss:$20 sps:$4 sm:$0xff]   ;;  %v8416_v54 = vld [vmem:[%s11267_s3 + $0x330] ss:$20 sps:$4 sm:$0xff]  }
 0x2f9   : > { %11275 = vst [vmem:[#allocation5_spill] sm:$0xff] %v10259_v8  ;;  %5529 = vmatmul.mubr.bf16.gmra.mrb[28].mxu1 %v8403_v37  ;;  %7495 = vmatmul.mubr.msk.bf16.gmra.mrb[84].mxu0 %vm789_vm0, %v8407_v12 }
 0x2fa   : > { %5536 = vmatprep.mubr.bf16.mxu1 %v8410_v0  ;;  %7498 = vmatprep.mubr.msk.bf16.mxu0 %vm789_vm0, %v8411_v39  ;;  %v4781_v0 = vadd.f32 %v10051_v35, %v9885_v26  ;;  %v4786_v26 = vadd.f32 %v10051_v35, %v9887_v16  ;;  %v8420_v16 = vld [vmem:[%s11267_s3 + $0x5d4] ss:$20 sps:$4 sm:$0xff]  }
 0x2fc   : > { %v5322_v11 = vpop.f32.mrb[180].mxu1  ;;  %v10265_v15 = vpop.f32.mrb[236].mxu0 }
 0x2fd   : > { %v10273_v37 = vadd.f32 %v5322_v11, %v4778_v6  ;;  %v5324_v12 = vpop.f32.mrb[181].mxu1  ;;  %v4931_v39 = vpop.f32.mrb[237].mxu0 }
 0x2fe   : > { %v5325_v62 = vpop.f32.mrb[182].mxu1  ;;  %v10283_v14 = vpop.f32.mrb[238].mxu0 }
 0x2ff   : > { %11276 = vst [vmem:[#allocation6_spill] sm:$0xff] %v10273_v37  ;;  %v10285_v8 = vadd.f32 %v5325_v62, %v4781_v0  ;;  %v5327_v6 = vpop.f32.mrb[183].mxu1  ;;  %v4934_v11 = vpop.f32.mrb[239].mxu0  ;;  %v8413_v37 = vld [vmem:[%s11267_s3 + $0x5a8] ss:$20 sps:$4 sm:$0xff]  }
 0x300   : > { %v8417_v0 = vld [vmem:[%s11267_s3 + $0x358] ss:$20 sps:$4 sm:$0xff]   ;;  %v8421_v62 = vld [vmem:[%s11267_s3 + $0x380] ss:$20 sps:$4 sm:$0xff]  }
 0x301   : > { %11277 = vst [vmem:[#allocation7_spill] sm:$0xff] %v10285_v8  ;;  %5537 = vmatmul.mubr.bf16.gmra.mrb[32].mxu1 %v8408_v7  ;;  %7499 = vmatmul.mubr.msk.bf16.gmra.mrb[88].mxu0 %vm789_vm0, %v8412_v55 }
 0x302   : > { %5544 = vmatprep.mubr.bf16.mxu1 %v8415_v9  ;;  %7502 = vmatprep.mubr.msk.bf16.mxu0 %vm789_vm0, %v8416_v54  ;;  %v4789_v9 = vadd.f32 %v10051_v35, %v9901_v24  ;;  %v4794_v24 = vadd.f32 %v10051_v35, %v9903_v27  ;;  %v8425_v27 = vld [vmem:[%s11267_s3 + $0x5fc] ss:$20 sps:$4 sm:$0xff]  }
 0x304   : > { %v5330_v12 = vpop.f32.mrb[184].mxu1  ;;  %v10291_v39 = vpop.f32.mrb[240].mxu0 }
 0x305   : > { %v10299_v7 = vadd.f32 %v5330_v12, %v4786_v26  ;;  %v5332_v55 = vpop.f32.mrb[185].mxu1  ;;  %v4939_v54 = vpop.f32.mrb[241].mxu0 }
 0x306   : > { %v5333_v6 = vpop.f32.mrb[186].mxu1  ;;  %v10309_v11 = vpop.f32.mrb[242].mxu0 }
 0x307   : > { %11278 = vst [vmem:[#allocation8_spill] sm:$0xff] %v10299_v7  ;;  %v10311_v8 = vadd.f32 %v5333_v6, %v4789_v9  ;;  %v5335_v26 = vpop.f32.mrb[187].mxu1  ;;  %v4942_v12 = vpop.f32.mrb[243].mxu0  ;;  %v8418_v7 = vld [vmem:[%s11267_s3 + $0x5d0] ss:$20 sps:$4 sm:$0xff]  }
 0x308   : > { %v8422_v9 = vld [vmem:[%s11267_s3 + $0x3a8] ss:$20 sps:$4 sm:$0xff]   ;;  %v8426_v6 = vld [vmem:[%s11267_s3 + $0x3d0] ss:$20 sps:$4 sm:$0xff]  }
 0x309   : > { %11279 = vst [vmem:[#allocation9_spill] sm:$0xff] %v10311_v8  ;;  %5545 = vmatmul.mubr.bf16.gmra.mrb[36].mxu1 %v8413_v37  ;;  %7503 = vmatmul.mubr.msk.bf16.gmra.mrb[92].mxu0 %vm789_vm0, %v8417_v0 }
 0x30a   : > { %5552 = vmatprep.mubr.bf16.mxu1 %v8420_v16  ;;  %7506 = vmatprep.mubr.msk.bf16.mxu0 %vm789_vm0, %v8421_v62  ;;  %v4797_v16 = vadd.f32 %v10051_v35, %v9917_v36  ;;  %v4802_v36 = vadd.f32 %v10051_v35, %v9919_v40  ;;  %v8430_v40 = vld [vmem:[%s11267_s3 + $0x624] ss:$20 sps:$4 sm:$0xff]  }
 0x30c   : > { %v5338_v55 = vpop.f32.mrb[188].mxu1  ;;  %v10317_v54 = vpop.f32.mrb[244].mxu0 }
 0x30d   : > { %v10325_v37 = vadd.f32 %v5338_v55, %v4794_v24  ;;  %v5340_v0 = vpop.f32.mrb[189].mxu1  ;;  %v4947_v62 = vpop.f32.mrb[245].mxu0 }
 0x30e   : > { %v5341_v26 = vpop.f32.mrb[190].mxu1  ;;  %v10335_v12 = vpop.f32.mrb[246].mxu0 }
 0x30f   : > { %11280 = vst [vmem:[#allocation10_spill] sm:$0xff] %v10325_v37  ;;  %v10337_v8 = vadd.f32 %v5341_v26, %v4797_v16  ;;  %v5343_v24 = vpop.f32.mrb[191].mxu1  ;;  %v4950_v55 = vpop.f32.mrb[247].mxu0  ;;  %v8423_v37 = vld [vmem:[%s11267_s3 + $0x5f8] ss:$20 sps:$4 sm:$0xff]  }
 0x310   : > { %v8427_v16 = vld [vmem:[%s11267_s3 + $0x3f8] ss:$20 sps:$4 sm:$0xff]   ;;  %v8431_v26 = vld [vmem:[%s11267_s3 + $0x420] ss:$20 sps:$4 sm:$0xff]  }
 0x311   : > { %11281 = vst [vmem:[#allocation11_spill] sm:$0xff] %v10337_v8  ;;  %5553 = vmatmul.mubr.bf16.gmra.mrb[40].mxu1 %v8418_v7  ;;  %7507 = vmatmul.mubr.msk.bf16.gmra.mrb[96].mxu0 %vm789_vm0, %v8422_v9 }
 0x312   : > { %5560 = vmatprep.mubr.bf16.mxu1 %v8425_v27  ;;  %7510 = vmatprep.mubr.msk.bf16.mxu0 %vm789_vm0, %v8426_v6  ;;  %v4805_v27 = vadd.f32 %v10051_v35, %v9933_v49  ;;  %v4810_v49 = vadd.f32 %v10051_v35, %v9935_v51  ;;  %v8435_v51 = vld [vmem:[%s11267_s3 + $0x64c] ss:$20 sps:$4 sm:$0xff]  }
 0x314   : > { %v5346_v0 = vpop.f32.mrb[192].mxu1  ;;  %v10343_v62 = vpop.f32.mrb[248].mxu0 }
 0x315   : > { %v10351_v7 = vadd.f32 %v5346_v0, %v4802_v36  ;;  %v5348_v9 = vpop.f32.mrb[193].mxu1  ;;  %v4955_v6 = vpop.f32.mrb[249].mxu0 }
 0x316   : > { %v5349_v24 = vpop.f32.mrb[194].mxu1  ;;  %v10361_v55 = vpop.f32.mrb[250].mxu0 }
 0x317   : > { %11282 = vst [vmem:[#allocation12_spill] sm:$0xff] %v10351_v7  ;;  %v10363_v8 = vadd.f32 %v5349_v24, %v4805_v27  ;;  %v5351_v36 = vpop.f32.mrb[195].mxu1  ;;  %v4958_v0 = vpop.f32.mrb[251].mxu0  ;;  %v8428_v7 = vld [vmem:[%s11267_s3 + $0x620] ss:$20 sps:$4 sm:$0xff]  }
 0x318   : > { %v8432_v27 = vld [vmem:[%s11267_s3 + $0x448] ss:$20 sps:$4 sm:$0xff]   ;;  %v8436_v24 = vld [vmem:[%s11267_s3 + $0x470] ss:$20 sps:$4 sm:$0xff]  }
 0x319   : > { %11283 = vst [vmem:[#allocation13_spill] sm:$0xff] %v10363_v8  ;;  %5561 = vmatmul.mubr.bf16.gmra.mrb[44].mxu1 %v8423_v37  ;;  %7511 = vmatmul.mubr.msk.bf16.gmra.mrb[100].mxu0 %vm789_vm0, %v8427_v16 }
 0x31a   : > { %5568 = vmatprep.mubr.bf16.mxu1 %v8430_v40  ;;  %7514 = vmatprep.mubr.msk.bf16.mxu0 %vm789_vm0, %v8431_v26  ;;  %v4813_v40 = vadd.f32 %v10051_v35, %v9949_v59  ;;  %v4818_v59 = vadd.f32 %v10051_v35, %v9951_v61  ;;  %v8440_v61 = vld [vmem:[%s11267_s3 + $0x674] ss:$20 sps:$4 sm:$0xff]  }
 0x31c   : > { %v5354_v9 = vpop.f32.mrb[196].mxu1  ;;  %v10369_v6 = vpop.f32.mrb[252].mxu0 }
 0x31d   : > { %v10377_v37 = vadd.f32 %v5354_v9, %v4810_v49  ;;  %v5356_v16 = vpop.f32.mrb[197].mxu1  ;;  %v4963_v26 = vpop.f32.mrb[253].mxu0 }
 0x31e   : > { %v5357_v36 = vpop.f32.mrb[198].mxu1  ;;  %v10387_v0 = vpop.f32.mrb[254].mxu0 }
 0x31f   : > { %11284 = vst [vmem:[#allocation14_spill] sm:$0xff] %v10377_v37  ;;  %v10389_v8 = vadd.f32 %v5357_v36, %v4813_v40  ;;  %v5359_v49 = vpop.f32.mrb[199].mxu1  ;;  %v4966_v9 = vpop.f32.mrb[255].mxu0  ;;  %v4821_v37 = vadd.f32 %v10051_v35, %v9965_v5  ;;  %v8433_v40 = vld [vmem:[%s11267_s3 + $0x648] ss:$20 sps:$4 sm:$0xff]  }
 0x320   : > { %v8441_v5 = vld [vmem:[%s11267_s3 + $0x4c0] ss:$20 sps:$4 sm:$0xff]  }
 0x321   : > { %11285 = vst [vmem:[#allocation15_spill] sm:$0xff] %v10389_v8  ;;  %5569 = vmatmul.mubr.bf16.gmra.mrb[48].mxu1 %v8428_v7  ;;  %7515 = vmatmul.mubr.msk.bf16.gmra.mrb[104].mxu0 %vm789_vm0, %v8432_v27  ;;  %v8437_v7 = vld [vmem:[%s11267_s3 + $0x498] ss:$20 sps:$4 sm:$0xff]  }
 0x322   : > { %5576 = vmatprep.mubr.bf16.mxu1 %v8435_v51  ;;  %7518 = vmatprep.mubr.msk.bf16.mxu0 %vm789_vm0, %v8436_v24 }
 0x324   : > { %v5362_v16 = vpop.f32.mrb[200].mxu1  ;;  %v10395_v26 = vpop.f32.mrb[0].mxu0 }
 0x325   : > { %11286 = vst [vmem:[#allocation16_spill] sm:$0xff] %v10395_v26  ;;  %v10405_v27 = vadd.f32 %v5362_v16, %v4818_v59  ;;  %v5364_v51 = vpop.f32.mrb[201].mxu1  ;;  %v4971_v24 = vpop.f32.mrb[1].mxu0  ;;  %v4826_v59 = vadd.f32 %v10051_v35, %v9967_v10  ;;  %v8445_v10 = vld [vmem:[%s11267_s3 + $0x69c] ss:$20 sps:$4 sm:$0xff]  }
 0x326   : > { %v5365_v36 = vpop.f32.mrb[202].mxu1  ;;  %v10413_v49 = vpop.f32.mrb[2].mxu0  ;;  %v4829_v24 = vadd.f32 %v10051_v35, %v9981_v45  ;;  %v8446_v45 = vld [vmem:[%s11267_s3 + $0x510] ss:$20 sps:$4 sm:$0xff]  }
 0x327   : > { %v10415_v9 = vadd.f32 %v5365_v36, %v4821_v37  ;;  %v5367_v8 = vpop.f32.mrb[203].mxu1  ;;  %v4974_v26 = vpop.f32.mrb[3].mxu0  ;;  %v8442_v37 = vld [vmem:[%s11267_s3 + $0x4e8] ss:$20 sps:$4 sm:$0xff]  }
 0x328   : > { %v8438_v8 = vld [vmem:[%s11267_s3 + $0x670] ss:$20 sps:$4 sm:$0xff]  }
 0x329   : > { %11287 = vst [vmem:[#allocation17_spill] sm:$0xff] %v10415_v9  ;;  %5577 = vmatmul.mubr.bf16.gmra.mrb[52].mxu1 %v8433_v40  ;;  %7519 = vmatmul.mubr.msk.bf16.gmra.mrb[108].mxu0 %vm789_vm0, %v8437_v7 }
 0x32a   : > { %5584 = vmatprep.mubr.bf16.mxu1 %v8440_v61  ;;  %7522 = vmatprep.mubr.msk.bf16.mxu0 %vm789_vm0, %v8441_v5 }
 0x32c   : > { %v5370_v16 = vpop.f32.mrb[204].mxu1  ;;  %v10421_v51 = vpop.f32.mrb[4].mxu0 }
 0x32d   : > { %11288 = vst [vmem:[#allocation18_spill] sm:$0xff] %v10421_v51  ;;  %v10431_v26 = vadd.f32 %v5370_v16, %v4826_v59  ;;  %v5372_v40 = vpop.f32.mrb[205].mxu1  ;;  %v4979_v7 = vpop.f32.mrb[5].mxu0  ;;  %v4834_v59 = vadd.f32 %v10051_v35, %v9983_v20  ;;  %v8450_v20 = vld [vmem:[%s11267_s3 + $0x6c4] ss:$20 sps:$4 sm:$0xff]  }
 0x32e   : > { %v5373_v61 = vpop.f32.mrb[206].mxu1  ;;  %v10439_v5 = vpop.f32.mrb[6].mxu0  ;;  %v4837_v7 = vadd.f32 %v10051_v35, %v9997_v32  ;;  %v8451_v32 = vld [vmem:[%s11267_s3 + $0x560] ss:$20 sps:$4 sm:$0xff]  }
 0x32f   : > { %v10441_v36 = vadd.f32 %v5373_v61, %v4829_v24  ;;  %v5375_v51 = vpop.f32.mrb[207].mxu1  ;;  %v4982_v9 = vpop.f32.mrb[7].mxu0 }
 0x330   : > { %v8443_v51 = vld [vmem:[%s11267_s3 + $0x698] ss:$20 sps:$4 sm:$0xff]  }
 0x331   : > { %11289 = vst [vmem:[#allocation19_spill] sm:$0xff] %v10441_v36  ;;  %5585 = vmatmul.mubr.bf16.gmra.mrb[56].mxu1 %v8438_v8  ;;  %7523 = vmatmul.mubr.msk.bf16.gmra.mrb[112].mxu0 %vm789_vm0, %v8442_v37  ;;  %v8447_v9 = vld [vmem:[%s11267_s3 + $0x538] ss:$20 sps:$4 sm:$0xff]  }
 0x332   : > { %5592 = vmatprep.mubr.bf16.mxu1 %v8445_v10  ;;  %7526 = vmatprep.mubr.msk.bf16.mxu0 %vm789_vm0, %v8446_v45 }
 0x334   : > { %v5378_v16 = vpop.f32.mrb[208].mxu1  ;;  %v10447_v40 = vpop.f32.mrb[8].mxu0 }
 0x335   : > { %11290 = vst [vmem:[#allocation20_spill] sm:$0xff] %v10447_v40  ;;  %v10457_v24 = vadd.f32 %v5378_v16, %v4834_v59  ;;  %v5380_v8 = vpop.f32.mrb[209].mxu1  ;;  %v4987_v37 = vpop.f32.mrb[9].mxu0  ;;  %v4842_v59 = vadd.f32 %v10051_v35, %v9999_v34  ;;  %v8455_v34 = vld [vmem:[%s11267_s3 + $0x6ec] ss:$20 sps:$4 sm:$0xff]  }
 0x336   : > { %v5381_v10 = vpop.f32.mrb[210].mxu1  ;;  %v10465_v45 = vpop.f32.mrb[10].mxu0  ;;  %v4845_v37 = vadd.f32 %v10051_v35, %v10013_v47  ;;  %v8456_v47 = vld [vmem:[%s11267_s3 + $0x5b0] ss:$20 sps:$4 sm:$0xff]  }
 0x337   : > { %11291 = vst [vmem:[#allocation21_spill] sm:$0xff] %v10465_v45  ;;  %v10467_v61 = vadd.f32 %v5381_v10, %v4837_v7  ;;  %v5383_v40 = vpop.f32.mrb[211].mxu1  ;;  %v4990_v36 = vpop.f32.mrb[11].mxu0 }
 0x338   : > { %v8448_v40 = vld [vmem:[%s11267_s3 + $0x6c0] ss:$20 sps:$4 sm:$0xff]   ;;  %v8452_v36 = vld [vmem:[%s11267_s3 + $0x588] ss:$20 sps:$4 sm:$0xff]  }
 0x339   : > { %5593 = vmatmul.mubr.bf16.gmra.mrb[60].mxu1 %v8443_v51  ;;  %7527 = vmatmul.mubr.msk.bf16.gmra.mrb[116].mxu0 %vm789_vm0, %v8447_v9 }
 0x33a   : > { %5600 = vmatprep.mubr.bf16.mxu1 %v8450_v20  ;;  %7530 = vmatprep.mubr.msk.bf16.mxu0 %vm789_vm0, %v8451_v32 }
 0x33c   : > { %v5386_v16 = vpop.f32.mrb[212].mxu1  ;;  %v10473_v8 = vpop.f32.mrb[12].mxu0 }
 0x33d   : > { %11292 = vst [vmem:[#allocation22_spill] sm:$0xff] %v10473_v8  ;;  %v10483_v7 = vadd.f32 %v5386_v16, %v4842_v59  ;;  %v5388_v51 = vpop.f32.mrb[213].mxu1  ;;  %v4995_v9 = vpop.f32.mrb[13].mxu0  ;;  %v4850_v59 = vadd.f32 %v10051_v35, %v10015_v52  ;;  %v8458_v52 = vld [vmem:[%s11267_s3 + $0x714] ss:$20 sps:$4 sm:$0xff]  }
 0x33e   : > { %v5389_v20 = vpop.f32.mrb[214].mxu1  ;;  %v10491_v32 = vpop.f32.mrb[14].mxu0  ;;  %v4853_v9 = vadd.f32 %v10051_v35, %v10029_v63  ;;  %v8460_v63 = vld [vmem:[%s11267_s3 + $0x600] ss:$20 sps:$4 sm:$0xff]  }
 0x33f   : > { %11293 = vst [vmem:[#allocation23_spill] sm:$0xff] %v10491_v32  ;;  %v10493_v10 = vadd.f32 %v5389_v20, %v4845_v37  ;;  %v5391_v8 = vpop.f32.mrb[215].mxu1  ;;  %v4998_v45 = vpop.f32.mrb[15].mxu0 }
 0x340   : > { %v8453_v8 = vld [vmem:[%s11267_s3 + $0x6e8] ss:$20 sps:$4 sm:$0xff]   ;;  %v8457_v45 = vld [vmem:[%s11267_s3 + $0x5d8] ss:$20 sps:$4 sm:$0xff]  }
 0x341   : > { %5601 = vmatmul.mubr.bf16.gmra.mrb[64].mxu1 %v8448_v40  ;;  %7531 = vmatmul.mubr.msk.bf16.gmra.mrb[120].mxu0 %vm789_vm0, %v8452_v36 }
 0x342   : > { %5608 = vmatprep.mubr.bf16.mxu1 %v8455_v34  ;;  %7534 = vmatprep.mubr.msk.bf16.mxu0 %vm789_vm0, %v8456_v47 }
 0x344   : > { %v5394_v16 = vpop.f32.mrb[216].mxu1  ;;  %v10499_v51 = vpop.f32.mrb[16].mxu0 }
 0x345   : > { %11294 = vst [vmem:[#allocation24_spill] sm:$0xff] %v10499_v51  ;;  %v10509_v37 = vadd.f32 %v5394_v16, %v4850_v59  ;;  %v5396_v40 = vpop.f32.mrb[217].mxu1  ;;  %v5003_v36 = vpop.f32.mrb[17].mxu0  ;;  %v4858_v59 = vadd.f32 %v10051_v35, %v10032_v2  ;;  %v8463_v2 = vld [vmem:[%s11267_s3 + $0x73c] ss:$20 sps:$4 sm:$0xff]  }
 0x346   : > { %v5397_v34 = vpop.f32.mrb[218].mxu1  ;;  %v10517_v47 = vpop.f32.mrb[18].mxu0  ;;  %v4861_v36 = vadd.f32 %v10051_v35, %v10046_v13  ;;  %v8465_v13 = vld [vmem:[%s11267_s3 + $0x650] ss:$20 sps:$4 sm:$0xff]  }
 0x347   : > { %11295 = vst [vmem:[#allocation25_spill] sm:$0xff] %v10517_v47  ;;  %v10519_v20 = vadd.f32 %v5397_v34, %v4853_v9  ;;  %v5399_v51 = vpop.f32.mrb[219].mxu1  ;;  %v5006_v32 = vpop.f32.mrb[19].mxu0 }
 0x348   : > { %v8461_v51 = vld [vmem:[%s11267_s3 + $0x710] ss:$20 sps:$4 sm:$0xff]   ;;  %v8462_v32 = vld [vmem:[%s11267_s3 + $0x628] ss:$20 sps:$4 sm:$0xff]  }
 0x349   : > { %5609 = vmatmul.mubr.bf16.gmra.mrb[68].mxu1 %v8453_v8  ;;  %7535 = vmatmul.mubr.msk.bf16.gmra.mrb[124].mxu0 %vm789_vm0, %v8457_v45 }
 0x34a   : > { %5616 = vmatprep.mubr.bf16.mxu1 %v8458_v52  ;;  %7538 = vmatprep.mubr.msk.bf16.mxu0 %vm789_vm0, %v8460_v63 }
 0x34c   : > { %v5402_v16 = vpop.f32.mrb[220].mxu1  ;;  %v10525_v40 = vpop.f32.mrb[20].mxu0 }
 0x34d   : > { %11296 = vst [vmem:[#allocation26_spill] sm:$0xff] %v10525_v40  ;;  %v10535_v9 = vadd.f32 %v5402_v16, %v4858_v59  ;;  %v5404_v8 = vpop.f32.mrb[221].mxu1  ;;  %v5011_v45 = vpop.f32.mrb[21].mxu0  ;;  %v4866_v59 = vadd.f32 %v10051_v35, %v10057_v23  ;;  %v8468_v23 = vld [vmem:[%s11267_s3 + $0x764] ss:$20 sps:$4 sm:$0xff]  }
 0x34e   : > { %v5405_v52 = vpop.f32.mrb[222].mxu1  ;;  %v10543_v63 = vpop.f32.mrb[22].mxu0  ;;  %v4869_v45 = vadd.f32 %v10051_v35, %v10075_v44  ;;  %v8470_v44 = vld [vmem:[%s11267_s3 + $0x6a0] ss:$20 sps:$4 sm:$0xff]  }
 0x34f   : > { %11297 = vst [vmem:[#allocation27_spill] sm:$0xff] %v10543_v63  ;;  %v10545_v34 = vadd.f32 %v5405_v52, %v4861_v36  ;;  %v5014_v40 = vpop.f32.mrb[23].mxu0  ;;  %v5407_v47 = vpop.f32.mrb[223].mxu1 }
 0x350   : > { %v8466_v40 = vld [vmem:[%s11267_s3 + $0x738] ss:$20 sps:$4 sm:$0xff]  }
 0x351   : > { %5617 = vmatmul.mubr.bf16.gmra.mrb[72].mxu1 %v8461_v51  ;;  %7539 = vmatmul.mubr.msk.bf16.gmra.mrb[128].mxu0 %vm789_vm0, %v8462_v32  ;;  %v8467_v47 = vld [vmem:[%s11267_s3 + $0x678] ss:$20 sps:$4 sm:$0xff]  }
 0x352   : > { %5624 = vmatprep.mubr.bf16.mxu1 %v8463_v2  ;;  %7542 = vmatprep.mubr.msk.bf16.mxu0 %vm789_vm0, %v8465_v13 }
 0x354   : > { %v10551_v16 = vpop.f32.mrb[24].mxu0  ;;  %v5410_v8 = vpop.f32.mrb[224].mxu1 }
 0x355   : > { %11298 = vst [vmem:[#allocation28_spill] sm:$0xff] %v10551_v16  ;;  %v5019_v36 = vpop.f32.mrb[25].mxu0  ;;  %v10561_v51 = vadd.f32 %v5410_v8, %v4866_v59  ;;  %v5412_v32 = vpop.f32.mrb[225].mxu1  ;;  %v4874_v59 = vadd.f32 %v10051_v35, %v10083_v58  ;;  %v8473_v58 = vld [vmem:[%s11267_s3 + $0x78c] ss:$20 sps:$4 sm:$0xff]  }
 0x356   : > { %v10569_v2 = vpop.f32.mrb[26].mxu0  ;;  %v5413_v13 = vpop.f32.mrb[226].mxu1  ;;  %v4877_v32 = vadd.f32 %v10051_v35, %v10101_v18  ;;  %v8475_v18 = vld [vmem:[%s11267_s3 + $0x6f0] ss:$20 sps:$4 sm:$0xff]  }
 0x357   : > { %11299 = vst [vmem:[#allocation29_spill] sm:$0xff] %v10569_v2  ;;  %v5022_v52 = vpop.f32.mrb[27].mxu0  ;;  %v10571_v16 = vadd.f32 %v5413_v13, %v4869_v45  ;;  %v5415_v63 = vpop.f32.mrb[227].mxu1  ;;  %v8471_v45 = vld [vmem:[%s11267_s3 + $0x760] ss:$20 sps:$4 sm:$0xff]  }
 0x358   : > { %v8472_v63 = vld [vmem:[%s11267_s3 + $0x6c8] ss:$20 sps:$4 sm:$0xff]  }
 0x359   : > { %5625 = vmatmul.mubr.bf16.gmra.mrb[76].mxu1 %v8466_v40  ;;  %7543 = vmatmul.mubr.msk.bf16.gmra.mrb[132].mxu0 %vm789_vm0, %v8467_v47 }
 0x35a   : > { %5632 = vmatprep.mubr.bf16.mxu1 %v8468_v23  ;;  %7546 = vmatprep.mubr.msk.bf16.mxu0 %vm789_vm0, %v8470_v44 }
 0x35c   : > { %v10577_v8 = vpop.f32.mrb[28].mxu0  ;;  %v5418_v36 = vpop.f32.mrb[228].mxu1 }
 0x35d   : > { %11300 = vst [vmem:[#allocation30_spill] sm:$0xff] %v10577_v8  ;;  %v5027_v40 = vpop.f32.mrb[29].mxu0  ;;  %v10587_v47 = vadd.f32 %v5418_v36, %v4874_v59  ;;  %v5420_v23 = vpop.f32.mrb[229].mxu1  ;;  %v4882_v59 = vadd.f32 %v10051_v35, %v10109_v38  ;;  %v8478_v38 = vld [vmem:[%s11267_s3 + $0x7b4] ss:$20 sps:$4 sm:$0xff]  }
 0x35e   : > { %v10595_v44 = vpop.f32.mrb[30].mxu0  ;;  %v5421_v13 = vpop.f32.mrb[230].mxu1  ;;  %v4885_v23 = vadd.f32 %v10051_v35, %v10127_v60  ;;  %v8480_v60 = vld [vmem:[%s11267_s3 + $0x740] ss:$20 sps:$4 sm:$0xff]  }
 0x35f   : > { %11301 = vst [vmem:[#allocation31_spill] sm:$0xff] %v10595_v44  ;;  %v5030_v52 = vpop.f32.mrb[31].mxu0  ;;  %v10597_v8 = vadd.f32 %v5421_v13, %v4877_v32  ;;  %v5423_v2 = vpop.f32.mrb[231].mxu1  ;;  %v8476_v32 = vld [vmem:[%s11267_s3 + $0x788] ss:$20 sps:$4 sm:$0xff]  }
 0x360   : > { %v8477_v2 = vld [vmem:[%s11267_s3 + $0x718] ss:$20 sps:$4 sm:$0xff]  }
 0x361   : > { %5633 = vmatmul.mubr.bf16.gmra.mrb[80].mxu1 %v8471_v45  ;;  %7547 = vmatmul.mubr.msk.bf16.gmra.mrb[136].mxu0 %vm789_vm0, %v8472_v63 }
 0x362   : > { %5640 = vmatprep.mubr.bf16.mxu1 %v8473_v58  ;;  %7550 = vmatprep.mubr.msk.bf16.mxu0 %vm789_vm0, %v8475_v18 }
 0x364   : > { %v10603_v36 = vpop.f32.mrb[32].mxu0  ;;  %v5426_v40 = vpop.f32.mrb[232].mxu1 }
 0x365   : > { %11302 = vst [vmem:[#allocation32_spill] sm:$0xff] %v10603_v36  ;;  %v5035_v45 = vpop.f32.mrb[33].mxu0  ;;  %v10613_v63 = vadd.f32 %v5426_v40, %v4882_v59  ;;  %v5428_v58 = vpop.f32.mrb[233].mxu1  ;;  %v4890_v59 = vadd.f32 %v10051_v35, %v10135_v17  ;;  %v8483_v17 = vld [vmem:[%s11267_s3 + $0x7dc] ss:$20 sps:$4 sm:$0xff]  }
 0x366   : > { %v10621_v18 = vpop.f32.mrb[34].mxu0  ;;  %v5429_v13 = vpop.f32.mrb[234].mxu1  ;;  %v4893_v58 = vadd.f32 %v10051_v35, %v10153_v43  ;;  %v8485_v43 = vld [vmem:[%s11267_s3 + $0x790] ss:$20 sps:$4 sm:$0xff]  }
 0x367   : > { %11303 = vst [vmem:[#allocation33_spill] sm:$0xff] %v10621_v18  ;;  %v5038_v52 = vpop.f32.mrb[35].mxu0  ;;  %v10623_v36 = vadd.f32 %v5429_v13, %v4885_v23  ;;  %v5431_v44 = vpop.f32.mrb[235].mxu1  ;;  %v8481_v23 = vld [vmem:[%s11267_s3 + $0x7b0] ss:$20 sps:$4 sm:$0xff]  }
 0x368   : > { %v8482_v44 = vld [vmem:[%s11267_s3 + $0x768] ss:$20 sps:$4 sm:$0xff]  }
 0x369   : > { %5641 = vmatmul.mubr.bf16.gmra.mrb[84].mxu1 %v8476_v32  ;;  %7551 = vmatmul.mubr.msk.bf16.gmra.mrb[140].mxu0 %vm789_vm0, %v8477_v2 }
 0x36a   : > { %5648 = vmatprep.mubr.bf16.mxu1 %v8478_v38  ;;  %7554 = vmatprep.mubr.msk.bf16.mxu0 %vm789_vm0, %v8480_v60 }
 0x36c   : > { %v10629_v40 = vpop.f32.mrb[36].mxu0  ;;  %v5434_v45 = vpop.f32.mrb[236].mxu1 }
 0x36d   : > { %11304 = vst [vmem:[#allocation34_spill] sm:$0xff] %v10629_v40  ;;  %v5043_v32 = vpop.f32.mrb[37].mxu0  ;;  %v10639_v2 = vadd.f32 %v5434_v45, %v4890_v59  ;;  %v5436_v38 = vpop.f32.mrb[237].mxu1  ;;  %v4898_v59 = vadd.f32 %v10051_v35, %v10161_v57  ;;  %v8488_v57 = vld [vmem:[%s11267_s3 + $0x804] ss:$20 sps:$4 sm:$0xff]  }
 0x36e   : > { %v10647_v60 = vpop.f32.mrb[38].mxu0  ;;  %v5437_v13 = vpop.f32.mrb[238].mxu1  ;;  %v4901_v38 = vadd.f32 %v10051_v35, %v10179_v33  ;;  %v8490_v33 = vld [vmem:[%s11267_s3 + $0x7e0] ss:$20 sps:$4 sm:$0xff]  }
 0x36f   : > { %11305 = vst [vmem:[#allocation35_spill] sm:$0xff] %v10647_v60  ;;  %v5046_v52 = vpop.f32.mrb[39].mxu0  ;;  %v10649_v40 = vadd.f32 %v5437_v13, %v4893_v58  ;;  %v5439_v18 = vpop.f32.mrb[239].mxu1  ;;  %v8486_v58 = vld [vmem:[%s11267_s3 + $0x7d8] ss:$20 sps:$4 sm:$0xff]  }
 0x370   : > { %v8487_v18 = vld [vmem:[%s11267_s3 + $0x7b8] ss:$20 sps:$4 sm:$0xff]  }
 0x371   : > { %5649 = vmatmul.mubr.bf16.gmra.mrb[88].mxu1 %v8481_v23  ;;  %7555 = vmatmul.mubr.msk.bf16.gmra.mrb[144].mxu0 %vm789_vm0, %v8482_v44 }
 0x372   : > { %5656 = vmatprep.mubr.bf16.mxu1 %v8483_v17  ;;  %7558 = vmatprep.mubr.msk.bf16.mxu0 %vm789_vm0, %v8485_v43 }
 0x374   : > { %v10655_v45 = vpop.f32.mrb[40].mxu0  ;;  %v5442_v32 = vpop.f32.mrb[240].mxu1 }
 0x375   : > { %11306 = vst [vmem:[#allocation36_spill] sm:$0xff] %v10655_v45  ;;  %v5051_v23 = vpop.f32.mrb[41].mxu0  ;;  %v10665_v44 = vadd.f32 %v5442_v32, %v4898_v59  ;;  %v5444_v17 = vpop.f32.mrb[241].mxu1  ;;  %v4906_v59 = vadd.f32 %v10051_v35, %v10187_v21  ;;  %v8493_v21 = vld [vmem:[%s11267_s3 + $0x82c] ss:$20 sps:$4 sm:$0xff]  }
 0x376   : > { %v10673_v43 = vpop.f32.mrb[42].mxu0  ;;  %v5445_v13 = vpop.f32.mrb[242].mxu1  ;;  %v4909_v17 = vadd.f32 %v10051_v35, %v10205_v29  ;;  %v8496_v29 = vld [vmem:[%s11267_s3 + $0x830] ss:$20 sps:$4 sm:$0xff]  }
 0x377   : > { %11307 = vst [vmem:[#allocation37_spill] sm:$0xff] %v10673_v43  ;;  %v5054_v52 = vpop.f32.mrb[43].mxu0  ;;  %v10675_v45 = vadd.f32 %v5445_v13, %v4901_v38  ;;  %v5447_v60 = vpop.f32.mrb[243].mxu1  ;;  %v8491_v38 = vld [vmem:[%s11267_s3 + $0x800] ss:$20 sps:$4 sm:$0xff]  }
 0x378   : > { %v8492_v60 = vld [vmem:[%s11267_s3 + $0x808] ss:$20 sps:$4 sm:$0xff]  }
 0x379   : > { %5657 = vmatmul.mubr.bf16.gmra.mrb[92].mxu1 %v8486_v58  ;;  %7559 = vmatmul.mubr.msk.bf16.gmra.mrb[148].mxu0 %vm789_vm0, %v8487_v18 }
 0x37a   : > { %5664 = vmatprep.mubr.bf16.mxu1 %v8488_v57  ;;  %7562 = vmatprep.mubr.msk.bf16.mxu0 %vm789_vm0, %v8490_v33 }
 0x37c   : > { %v10681_v32 = vpop.f32.mrb[44].mxu0  ;;  %v5450_v23 = vpop.f32.mrb[244].mxu1 }
 0x37d   : > { %11308 = vst [vmem:[#allocation38_spill] sm:$0xff] %v10681_v32  ;;  %v5059_v58 = vpop.f32.mrb[45].mxu0  ;;  %v10691_v18 = vadd.f32 %v5450_v23, %v4906_v59  ;;  %v5452_v57 = vpop.f32.mrb[245].mxu1  ;;  %v4914_v59 = vadd.f32 %v10051_v35, %v10213_v56 }
 0x37e   : > { %v10693_v33 = vpop.f32.mrb[46].mxu0  ;;  %v5453_v13 = vpop.f32.mrb[246].mxu1  ;;  %v4917_v57 = vadd.f32 %v10051_v35, %v10231_v41  ;;  %v8504_v35 = vld [vmem:[%s11267_s3 + $0x880] ss:$20 sps:$4 sm:$0xff]  }
 0x37f   : > { %11309 = vst [vmem:[#allocation39_spill] sm:$0xff] %v10693_v33  ;;  %v5062_v52 = vpop.f32.mrb[47].mxu0  ;;  %v10701_v32 = vadd.f32 %v5453_v13, %v4909_v17  ;;  %v5455_v43 = vpop.f32.mrb[247].mxu1  ;;  %v8497_v17 = vld [vmem:[%s11267_s3 + $0x858] ss:$20 sps:$4 sm:$0xff]  }
 0x380   : > { %v8495_v43 = vld [vmem:[%s11267_s3 + $0x828] ss:$20 sps:$4 sm:$0xff]   ;;  %v10734_v52 = vld [vmem:[%s11269_s5] ss:$0 sm:$0xff] }
 0x381   : > { %5665 = vmatmul.mubr.bf16.gmra.mrb[96].mxu1 %v8491_v38  ;;  %7563 = vmatmul.mubr.msk.bf16.gmra.mrb[152].mxu0 %vm789_vm0, %v8492_v60 }
 0x382   : > { %5672 = vmatprep.mubr.bf16.mxu1 %v8493_v21  ;;  %7566 = vmatprep.mubr.msk.bf16.mxu0 %vm789_vm0, %v8496_v29  ;;  %v8498_v21 = vld [vmem:[%s11267_s3 + $0x854] ss:$20 sps:$4 sm:$0xff]  }
 0x384   : > { %v10707_v23 = vpop.f32.mrb[48].mxu0  ;;  %v5458_v58 = vpop.f32.mrb[248].mxu1 }
 0x385   : > { %11310 = vst [vmem:[#allocation40_spill] sm:$0xff] %v10707_v23  ;;  %v5067_v33 = vpop.f32.mrb[49].mxu0  ;;  %v10717_v38 = vadd.f32 %v5458_v58, %v4914_v59  ;;  %v5460_v60 = vpop.f32.mrb[249].mxu1  ;;  %v4922_v59 = vadd.f32 %v10734_v52, %v10239_v48  ;;  %v8500_v48 = vld [vmem:[%s11267_s3 + $0x850] ss:$20 sps:$4 sm:$0xff]  }
 0x386   : > { %v10719_v56 = vpop.f32.mrb[50].mxu0  ;;  %v5461_v41 = vpop.f32.mrb[250].mxu1 }
 0x387   : > { %11311 = vst [vmem:[#allocation41_spill] sm:$0xff] %v10719_v56  ;;  %v5070_v33 = vpop.f32.mrb[51].mxu0  ;;  %v10727_v29 = vadd.f32 %v5461_v41, %v4917_v57  ;;  %v5463_v13 = vpop.f32.mrb[251].mxu1 }
 0x388   : > { %v8512_v13 = vld [vmem:[%s11267_s3 + $0x8d0] ss:$20 sps:$4 sm:$0xff]  }
 0x389   : > { %5673 = vmatmul.mubr.bf16.gmra.mrb[100].mxu1 %v8495_v43  ;;  %7567 = vmatmul.mubr.msk.bf16.gmra.mrb[156].mxu0 %vm789_vm0, %v8497_v17  ;;  %v4925_v43 = vadd.f32 %v10734_v52, %v10257_v46 }
 0x38a   : > { %5680 = vmatprep.mubr.bf16.mxu1 %v8498_v21  ;;  %7570 = vmatprep.mubr.msk.bf16.mxu0 %vm789_vm0, %v8504_v35  ;;  %v8505_v21 = vld [vmem:[%s11267_s3 + $0x8a8] ss:$20 sps:$4 sm:$0xff]  }
 0x38c   : > { %v7464_v58 = vpop.f32.mrb[52].mxu0  ;;  %v5466_v57 = vpop.f32.mrb[252].mxu1 }
 0x38d   : > { %v5812_v17 = vadd.f32 %v7464_v58, %v10091_v3  ;;  %v5803_v60 = vpop.f32.mrb[53].mxu0  ;;  %v10754_v35 = vadd.f32 %v5466_v57, %v4922_v59  ;;  %v5468_v41 = vpop.f32.mrb[253].mxu1  ;;  %v8501_v3 = vld [vmem:[%s11267_s3 + $0x87c] ss:$20 sps:$4 sm:$0xff]  }
 0x38e   : > { %v5804_v33 = vadd.f32 %v5803_v60, %v10065_v31  ;;  %v7465_v46 = vpop.f32.mrb[54].mxu0  ;;  %v5469_v58 = vpop.f32.mrb[254].mxu1 }
 0x38f   : > { %6316 = vst [vmem:[%s10743_s9 + $0x10] sm:$0xff] %v5812_v17  ;;  %v5815_v56 = vadd.f32 %v7465_v46, %v10103_v22  ;;  %v5806_v23 = vpop.f32.mrb[55].mxu0  ;;  %v10765_v59 = vadd.f32 %v5469_v58, %v4925_v43  ;;  %v5471_v57 = vpop.f32.mrb[255].mxu1  ;;  %v4930_v17 = vadd.f32 %v10734_v52, %v10265_v15  ;;  %v4933_v43 = vadd.f32 %v10734_v52, %v10283_v14  ;;  %v8520_v46 = vld [vmem:[%s11267_s3 + $0x920] ss:$20 sps:$4 sm:$0xff]  }
 0x390   : > { %6314 = vst [vmem:[%s10743_s9] sm:$0xff] %v5804_v33  ;;  %v5807_v31 = vadd.f32 %v5806_v23, %v10077_v50  ;;  %v8503_v23 = vld [vmem:[%s11267_s3 + $0x878] ss:$20 sps:$4 sm:$0xff]  }
 0x391   : > { %6317 = vst [vmem:[%s10743_s9 + $0x18] sm:$0xff] %v5815_v56  ;;  %5681 = vmatmul.mubr.bf16.gmra.mrb[104].mxu1 %v8500_v48  ;;  %7571 = vmatmul.mubr.msk.bf16.gmra.mrb[160].mxu0 %vm789_vm0, %v8505_v21  ;;  %v8513_v56 = vld [vmem:[%s11267_s3 + $0x8f8] ss:$20 sps:$4 sm:$0xff]  }
 0x392   : > { %6315 = vst [vmem:[%s10743_s9 + $0x8] sm:$0xff] %v5807_v31  ;;  %5688 = vmatprep.mubr.bf16.mxu1 %v8501_v3  ;;  %7574 = vmatprep.mubr.msk.bf16.mxu0 %vm789_vm0, %v8512_v13  ;;  %v4938_v31 = vadd.f32 %v10734_v52, %v10291_v39  ;;  %v8521_v39 = vld [vmem:[%s11267_s3 + $0x948] ss:$20 sps:$4 sm:$0xff]  }
 0x394   : > { %v7468_v22 = vpop.f32.mrb[56].mxu0  ;;  %v5474_v60 = vpop.f32.mrb[0].mxu1 }
 0x395   : > { %v5828_v41 = vadd.f32 %v7468_v22, %v10143_v25  ;;  %v5819_v50 = vpop.f32.mrb[57].mxu0  ;;  %v10784_v48 = vadd.f32 %v5474_v60, %v4930_v17  ;;  %v5476_v15 = vpop.f32.mrb[1].mxu1  ;;  %v8506_v25 = vld [vmem:[%s11267_s3 + $0x8a4] ss:$20 sps:$4 sm:$0xff]   ;;  %v4941_v22 = vadd.f32 %v10734_v52, %v10309_v11 }
 0x396   : > { %v5820_v21 = vadd.f32 %v5819_v50, %v10117_v42  ;;  %v7469_v14 = vpop.f32.mrb[58].mxu0  ;;  %v5477_v33 = vpop.f32.mrb[2].mxu1  ;;  %v8528_v15 = vld [vmem:[%s11267_s3 + $0x970] ss:$20 sps:$4 sm:$0xff]  }
 0x397   : > { %6320 = vst [vmem:[%s10743_s9 + $0x30] sm:$0xff] %v5828_v41  ;;  %v5831_v3 = vadd.f32 %v7469_v14, %v10155_v53  ;;  %v5822_v13 = vpop.f32.mrb[59].mxu0  ;;  %v10795_v58 = vadd.f32 %v5477_v33, %v4933_v43  ;;  %v5479_v57 = vpop.f32.mrb[3].mxu1  ;;  %v8508_v43 = vld [vmem:[%s11267_s3 + $0x8a0] ss:$20 sps:$4 sm:$0xff]  }
 0x398   : > { %6318 = vst [vmem:[%s10743_s9 + $0x20] sm:$0xff] %v5820_v21  ;;  %v5823_v42 = vadd.f32 %v5822_v13, %v10129_v1  ;;  %v4949_v13 = vadd.f32 %v10734_v52, %v10335_v12  ;;  %v11312_v57 = vld [vmem:[#allocation4_spill] sm:$0xff] }
 0x399   : > { %6321 = vst [vmem:[%s10743_s9 + $0x38] sm:$0xff] %v5831_v3  ;;  %5689 = vmatmul.mubr.bf16.gmra.mrb[108].mxu1 %v8503_v23  ;;  %7575 = vmatmul.mubr.msk.bf16.gmra.mrb[164].mxu0 %vm789_vm0, %v8513_v56 }
 0x39a   : > { %6319 = vst [vmem:[%s10743_s9 + $0x28] sm:$0xff] %v5823_v42  ;;  %5696 = vmatprep.mubr.bf16.mxu1 %v8506_v25  ;;  %7578 = vmatprep.mubr.msk.bf16.mxu0 %vm789_vm0, %v8520_v46  ;;  %v4946_v46 = vadd.f32 %v10734_v52, %v10317_v54  ;;  %v8529_v54 = vld [vmem:[%s11267_s3 + $0x998] ss:$20 sps:$4 sm:$0xff]  }
 0x39c   : > { %v7472_v53 = vpop.f32.mrb[60].mxu0  ;;  %v5482_v17 = vpop.f32.mrb[4].mxu1 }
 0x39d   : > { %v5844_v60 = vadd.f32 %v7472_v53, %v10195_v4  ;;  %v5835_v1 = vpop.f32.mrb[61].mxu0  ;;  %v10811_v41 = vadd.f32 %v5482_v17, %v4938_v31  ;;  %v5484_v50 = vpop.f32.mrb[5].mxu1  ;;  %v8509_v4 = vld [vmem:[%s11267_s3 + $0x8cc] ss:$20 sps:$4 sm:$0xff]   ;;  %v8511_v31 = vld [vmem:[%s11267_s3 + $0x8c8] ss:$20 sps:$4 sm:$0xff]  }
 0x39e   : > { %v5836_v23 = vadd.f32 %v5835_v1, %v10169_v28  ;;  %v7473_v11 = vpop.f32.mrb[62].mxu0  ;;  %v5485_v56 = vpop.f32.mrb[6].mxu1  ;;  %v8514_v1 = vld [vmem:[%s11267_s3 + $0x8f4] ss:$20 sps:$4 sm:$0xff]  }
 0x39f   : > { %6324 = vst [vmem:[%s10743_s9 + $0x50] sm:$0xff] %v5844_v60  ;;  %v5847_v21 = vadd.f32 %v7473_v11, %v10207_v19  ;;  %v5838_v14 = vpop.f32.mrb[63].mxu0  ;;  %v10825_v25 = vadd.f32 %v5485_v56, %v4941_v22  ;;  %v5487_v33 = vpop.f32.mrb[7].mxu1  ;;  %v11313_v22 = vld [vmem:[#allocation2_spill] sm:$0xff] }
 0x3a0   : > { %6322 = vst [vmem:[%s10743_s9 + $0x40] sm:$0xff] %v5836_v23  ;;  %v5839_v28 = vadd.f32 %v5838_v14, %v10181_v30  ;;  %v8536_v50 = vld [vmem:[%s11267_s3 + $0x9c0] ss:$20 sps:$4 sm:$0xff]   ;;  %v4954_v14 = vadd.f32 %v10734_v52, %v10343_v62  ;;  %v8537_v62 = vld [vmem:[%s11267_s3 + $0x9e8] ss:$20 sps:$4 sm:$0xff]  }
 0x3a1   : > { %6325 = vst [vmem:[%s10743_s9 + $0x58] sm:$0xff] %v5847_v21  ;;  %5697 = vmatmul.mubr.bf16.gmra.mrb[112].mxu1 %v8508_v43  ;;  %7579 = vmatmul.mubr.msk.bf16.gmra.mrb[168].mxu0 %vm789_vm0, %v8521_v39  ;;  %v11314_v39 = vld [vmem:[#allocation5_spill] sm:$0xff] }
 0x3a2   : > { %6323 = vst [vmem:[%s10743_s9 + $0x48] sm:$0xff] %v5839_v28  ;;  %5704 = vmatprep.mubr.bf16.mxu1 %v8509_v4  ;;  %7582 = vmatprep.mubr.msk.bf16.mxu0 %vm789_vm0, %v8528_v15  ;;  %v11315_v15 = vld [vmem:[#allocation3_spill] sm:$0xff] }
 0x3a4   : > { %v7476_v19 = vpop.f32.mrb[64].mxu0  ;;  %v5490_v3 = vpop.f32.mrb[8].mxu1 }
 0x3a5   : > { %v5860_v42 = vadd.f32 %v7476_v19, %v11312_v57  ;;  %v5851_v30 = vpop.f32.mrb[65].mxu0  ;;  %v10841_v53 = vadd.f32 %v5490_v3, %v4946_v46  ;;  %v5492_v17 = vpop.f32.mrb[9].mxu1  ;;  %v4957_v46 = vadd.f32 %v10734_v52, %v10361_v55  ;;  %v11316_v19 = vld [vmem:[#allocation8_spill] sm:$0xff] }
 0x3a6   : > { %v5852_v60 = vadd.f32 %v5851_v30, %v11313_v22  ;;  %v7477_v12 = vpop.f32.mrb[66].mxu0  ;;  %v5493_v43 = vpop.f32.mrb[10].mxu1  ;;  %v8516_v57 = vld [vmem:[%s11267_s3 + $0x8f0] ss:$20 sps:$4 sm:$0xff]  }
 0x3a7   : > { %6328 = vst [vmem:[%s10743_s9 + $0x70] sm:$0xff] %v5860_v42  ;;  %v5863_v23 = vadd.f32 %v7477_v12, %v11314_v39  ;;  %v5854_v11 = vpop.f32.mrb[67].mxu0  ;;  %v10855_v4 = vadd.f32 %v5493_v43, %v4949_v13  ;;  %v5495_v56 = vpop.f32.mrb[11].mxu1  ;;  %v11319_v39 = vld [vmem:[#allocation7_spill] sm:$0xff] }
 0x3a8   : > { %6326 = vst [vmem:[%s10743_s9 + $0x60] sm:$0xff] %v5852_v60  ;;  %v5855_v21 = vadd.f32 %v5854_v11, %v11315_v15  ;;  %v11318_v60 = vld [vmem:[#allocation9_spill] sm:$0xff]  ;;  %v4962_v11 = vadd.f32 %v10734_v52, %v10369_v6 }
 0x3a9   : > { %6329 = vst [vmem:[%s10743_s9 + $0x78] sm:$0xff] %v5863_v23  ;;  %5705 = vmatmul.mubr.bf16.gmra.mrb[116].mxu1 %v8511_v31  ;;  %7583 = vmatmul.mubr.msk.bf16.gmra.mrb[172].mxu0 %vm789_vm0, %v8529_v54  ;;  %v11317_v31 = vld [vmem:[#allocation6_spill] sm:$0xff]  ;;  %v8517_v54 = vld [vmem:[%s11267_s3 + $0x91c] ss:$20 sps:$4 sm:$0xff]  }
 0x3aa   : > { %6327 = vst [vmem:[%s10743_s9 + $0x68] sm:$0xff] %v5855_v21  ;;  %5712 = vmatprep.mubr.bf16.mxu1 %v8514_v1  ;;  %7586 = vmatprep.mubr.msk.bf16.mxu0 %vm789_vm0, %v8536_v50  ;;  %v4965_v21 = vadd.f32 %v10734_v52, %v10387_v0 }
 0x3ac   : > { %v7480_v33 = vpop.f32.mrb[68].mxu0  ;;  %v5498_v28 = vpop.f32.mrb[12].mxu1 }
 0x3ad   : > { %v5876_v3 = vadd.f32 %v7480_v33, %v11316_v19  ;;  %v5867_v13 = vpop.f32.mrb[69].mxu0  ;;  %v10871_v42 = vadd.f32 %v5498_v28, %v4954_v14  ;;  %v5500_v30 = vpop.f32.mrb[13].mxu1  ;;  %v11320_v14 = vld [vmem:[#allocation12_spill] sm:$0xff] }
 0x3ae   : > { %v5868_v17 = vadd.f32 %v5867_v13, %v11317_v31  ;;  %v7481_v55 = vpop.f32.mrb[70].mxu0  ;;  %v5501_v22 = vpop.f32.mrb[14].mxu1  ;;  %v11321_v13 = vld [vmem:[#allocation10_spill] sm:$0xff] }
 0x3af   : > { %6332 = vst [vmem:[%s10743_s9 + $0x90] sm:$0xff] %v5876_v3  ;;  %v5879_v12 = vadd.f32 %v7481_v55, %v11318_v60  ;;  %v5870_v1 = vpop.f32.mrb[71].mxu0  ;;  %v10882_v43 = vadd.f32 %v5501_v22, %v4957_v46  ;;  %v5503_v50 = vpop.f32.mrb[15].mxu1  ;;  %v8519_v46 = vld [vmem:[%s11267_s3 + $0x918] ss:$20 sps:$4 sm:$0xff]  }
 0x3b0   : > { %6330 = vst [vmem:[%s10743_s9 + $0x80] sm:$0xff] %v5868_v17  ;;  %v5871_v23 = vadd.f32 %v5870_v1, %v11319_v39  ;;  %v8522_v30 = vld [vmem:[%s11267_s3 + $0x944] ss:$20 sps:$4 sm:$0xff]   ;;  %v11323_v22 = vld [vmem:[#allocation11_spill] sm:$0xff] }
 0x3b1   : > { %6333 = vst [vmem:[%s10743_s9 + $0x98] sm:$0xff] %v5879_v12  ;;  %5713 = vmatmul.mubr.bf16.gmra.mrb[120].mxu1 %v8516_v57  ;;  %7587 = vmatmul.mubr.msk.bf16.gmra.mrb[176].mxu0 %vm789_vm0, %v8537_v62  ;;  %v11322_v62 = vld [vmem:[#allocation13_spill] sm:$0xff]  ;;  %v11324_v12 = vld [vmem:[#allocation16_spill] sm:$0xff] }
 0x3b2   : > { %6331 = vst [vmem:[%s10743_s9 + $0x88] sm:$0xff] %v5871_v23  ;;  %5720 = vmatprep.mubr.bf16.mxu1 %v8517_v54  ;;  %v4970_v1 = vadd.f32 %v10734_v52, %v11324_v12  ;;  %v4973_v23 = vadd.f32 %v10734_v52, %v10413_v49 }
 0x3b4   : > { %v7484_v56 = vpop.f32.mrb[72].mxu0  ;;  %v5506_v15 = vpop.f32.mrb[16].mxu1 }
 0x3b5   : > { %v5892_v33 = vadd.f32 %v7484_v56, %v11320_v14  ;;  %v5883_v28 = vpop.f32.mrb[73].mxu0  ;;  %v10897_v19 = vadd.f32 %v5506_v15, %v4962_v11  ;;  %v5508_v3 = vpop.f32.mrb[17].mxu1  ;;  %v8524_v15 = vld [vmem:[%s11267_s3 + $0x940] ss:$20 sps:$4 sm:$0xff]  }
 0x3b6   : > { %v5884_v6 = vadd.f32 %v5883_v28, %v11321_v13  ;;  %v7485_v57 = vpop.f32.mrb[74].mxu0  ;;  %v5509_v0 = vpop.f32.mrb[18].mxu1  ;;  %v8525_v3 = vld [vmem:[%s11267_s3 + $0x96c] ss:$20 sps:$4 sm:$0xff]  }
 0x3b7   : > { %6336 = vst [vmem:[%s10743_s9 + $0xb0] sm:$0xff] %v5892_v33  ;;  %v5895_v31 = vadd.f32 %v7485_v57, %v11322_v62  ;;  %v5886_v17 = vpop.f32.mrb[75].mxu0  ;;  %v10905_v55 = vadd.f32 %v5509_v0, %v4965_v21  ;;  %v5511_v54 = vpop.f32.mrb[19].mxu1  ;;  %v11325_v33 = vld [vmem:[#allocation14_spill] sm:$0xff]  ;;  %v11327_v0 = vld [vmem:[#allocation15_spill] sm:$0xff] }
 0x3b8   : > { %6334 = vst [vmem:[%s10743_s9 + $0xa0] sm:$0xff] %v5884_v6  ;;  %v5887_v60 = vadd.f32 %v5886_v17, %v11323_v22 }
 0x3b9   : > { %6337 = vst [vmem:[%s10743_s9 + $0xb8] sm:$0xff] %v5895_v31  ;;  %5721 = vmatmul.mubr.bf16.gmra.mrb[124].mxu1 %v8519_v46  ;;  %v11328_v31 = vld [vmem:[#allocation18_spill] sm:$0xff] }
 0x3ba   : > { %6335 = vst [vmem:[%s10743_s9 + $0xa8] sm:$0xff] %v5887_v60  ;;  %5728 = vmatprep.mubr.bf16.mxu1 %v8522_v30  ;;  %v4978_v17 = vadd.f32 %v10734_v52, %v11328_v31  ;;  %v4981_v60 = vadd.f32 %v10734_v52, %v10439_v5 }
 0x3bc   : > { %v7488_v50 = vpop.f32.mrb[76].mxu0  ;;  %v5514_v39 = vpop.f32.mrb[20].mxu1 }
 0x3bd   : > { %v5908_v11 = vadd.f32 %v7488_v50, %v10405_v27  ;;  %v5899_v56 = vpop.f32.mrb[77].mxu0  ;;  %v10919_v21 = vadd.f32 %v5514_v39, %v4970_v1  ;;  %v5516_v14 = vpop.f32.mrb[21].mxu1  ;;  %v11326_v27 = vld [vmem:[#allocation17_spill] sm:$0xff] }
 0x3be   : > { %v5900_v28 = vadd.f32 %v5899_v56, %v11325_v33  ;;  %v7489_v46 = vpop.f32.mrb[78].mxu0  ;;  %v5517_v49 = vpop.f32.mrb[22].mxu1  ;;  %v8527_v50 = vld [vmem:[%s11267_s3 + $0x968] ss:$20 sps:$4 sm:$0xff]  }
 0x3bf   : > { %6340 = vst [vmem:[%s10743_s9 + $0xd0] sm:$0xff] %v5908_v11  ;;  %v5911_v13 = vadd.f32 %v7489_v46, %v11326_v27  ;;  %v5902_v6 = vpop.f32.mrb[79].mxu0  ;;  %v10927_v57 = vadd.f32 %v5517_v49, %v4973_v23  ;;  %v5519_v30 = vpop.f32.mrb[23].mxu1  ;;  %v11329_v46 = vld [vmem:[#allocation19_spill] sm:$0xff] }
 0x3c0   : > { %6338 = vst [vmem:[%s10743_s9 + $0xc0] sm:$0xff] %v5900_v28  ;;  %v5903_v62 = vadd.f32 %v5902_v6, %v11327_v0  ;;  %v11331_v6 = vld [vmem:[#allocation21_spill] sm:$0xff] }
 0x3c1   : > { %6341 = vst [vmem:[%s10743_s9 + $0xd8] sm:$0xff] %v5911_v13  ;;  %5729 = vmatmul.mubr.bf16.gmra.mrb[128].mxu1 %v8524_v15  ;;  %v8530_v15 = vld [vmem:[%s11267_s3 + $0x994] ss:$20 sps:$4 sm:$0xff]  }
 0x3c2   : > { %6339 = vst [vmem:[%s10743_s9 + $0xc8] sm:$0xff] %v5903_v62  ;;  %5736 = vmatprep.mubr.bf16.mxu1 %v8525_v3  ;;  %v8532_v62 = vld [vmem:[%s11267_s3 + $0x990] ss:$20 sps:$4 sm:$0xff]  }
 0x3c4   : > { %v7492_v54 = vpop.f32.mrb[80].mxu0  ;;  %v5522_v22 = vpop.f32.mrb[24].mxu1 }
 0x3c5   : > { %v5924_v12 = vadd.f32 %v7492_v54, %v10457_v24  ;;  %v5915_v1 = vpop.f32.mrb[81].mxu0  ;;  %v10941_v39 = vadd.f32 %v5522_v22, %v4978_v17  ;;  %v5524_v23 = vpop.f32.mrb[25].mxu1 }
 0x3c6   : > { %v5916_v11 = vadd.f32 %v5915_v1, %v10431_v26  ;;  %v7493_v56 = vpop.f32.mrb[82].mxu0  ;;  %v5525_v5 = vpop.f32.mrb[26].mxu1  ;;  %v11330_v26 = vld [vmem:[#allocation20_spill] sm:$0xff] }
 0x3c7   : > { %6344 = vst [vmem:[%s10743_s9 + $0xf0] sm:$0xff] %v5924_v12  ;;  %v5927_v24 = vadd.f32 %v7493_v56, %v10467_v61  ;;  %v5918_v14 = vpop.f32.mrb[83].mxu0  ;;  %v10949_v33 = vadd.f32 %v5525_v5, %v4981_v60  ;;  %v5527_v28 = vpop.f32.mrb[27].mxu1  ;;  %v4986_v49 = vadd.f32 %v10734_v52, %v11330_v26  ;;  %v4989_v61 = vadd.f32 %v10734_v52, %v11331_v6  ;;  %v8533_v60 = vld [vmem:[%s11267_s3 + $0x9bc] ss:$20 sps:$4 sm:$0xff]  }
 0x3c8   : > { %6342 = vst [vmem:[%s10743_s9 + $0xe0] sm:$0xff] %v5916_v11  ;;  %v5919_v3 = vadd.f32 %v5918_v14, %v11329_v46 }
 0x3c9   : > { %6345 = vst [vmem:[%s10743_s9 + $0xf8] sm:$0xff] %v5927_v24  ;;  %5737 = vmatmul.mubr.bf16.gmra.mrb[132].mxu1 %v8527_v50  ;;  %v11333_v24 = vld [vmem:[#allocation23_spill] sm:$0xff] }
 0x3ca   : > { %6343 = vst [vmem:[%s10743_s9 + $0xe8] sm:$0xff] %v5919_v3  ;;  %5744 = vmatprep.mubr.bf16.mxu1 %v8530_v15 }
 0x3cc   : > { %v7496_v27 = vpop.f32.mrb[84].mxu0  ;;  %v5530_v13 = vpop.f32.mrb[28].mxu1 }
 0x3cd   : > { %v5940_v30 = vadd.f32 %v7496_v27, %v10509_v37  ;;  %v5931_v0 = vpop.f32.mrb[85].mxu0  ;;  %v10963_v31 = vadd.f32 %v5530_v13, %v4986_v49  ;;  %v5532_v17 = vpop.f32.mrb[29].mxu1  ;;  %v8538_v27 = vld [vmem:[%s11267_s3 + $0x9e4] ss:$20 sps:$4 sm:$0xff]  }
 0x3ce   : > { %v5932_v54 = vadd.f32 %v5931_v0, %v10483_v7  ;;  %v7497_v22 = vpop.f32.mrb[86].mxu0  ;;  %v5533_v12 = vpop.f32.mrb[30].mxu1  ;;  %v11332_v7 = vld [vmem:[#allocation22_spill] sm:$0xff] }
 0x3cf   : > { %6348 = vst [vmem:[%s10743_s9 + $0x110] sm:$0xff] %v5940_v30  ;;  %v5943_v37 = vadd.f32 %v7497_v22, %v10519_v20  ;;  %v5934_v1 = vpop.f32.mrb[87].mxu0  ;;  %v10971_v50 = vadd.f32 %v5533_v12, %v4989_v61  ;;  %v5535_v23 = vpop.f32.mrb[31].mxu1  ;;  %v4994_v56 = vadd.f32 %v10734_v52, %v11332_v7  ;;  %v4997_v20 = vadd.f32 %v10734_v52, %v11333_v24  ;;  %v11335_v22 = vld [vmem:[#allocation25_spill] sm:$0xff] }
 0x3d0   : > { %6346 = vst [vmem:[%s10743_s9 + $0x100] sm:$0xff] %v5932_v54  ;;  %v5935_v11 = vadd.f32 %v5934_v1, %v10493_v10  ;;  %v8535_v10 = vld [vmem:[%s11267_s3 + $0x9b8] ss:$20 sps:$4 sm:$0xff]  }
 0x3d1   : > { %6349 = vst [vmem:[%s10743_s9 + $0x118] sm:$0xff] %v5943_v37  ;;  %5745 = vmatmul.mubr.bf16.gmra.mrb[136].mxu1 %v8532_v62 }
 0x3d2   : > { %6347 = vst [vmem:[%s10743_s9 + $0x108] sm:$0xff] %v5935_v11  ;;  %5752 = vmatprep.mubr.bf16.mxu1 %v8533_v60 }
 0x3d4   : > { %v7500_v15 = vpop.f32.mrb[88].mxu0  ;;  %v5538_v5 = vpop.f32.mrb[32].mxu1 }
 0x3d5   : > { %v5956_v14 = vadd.f32 %v7500_v15, %v10561_v51  ;;  %v5947_v28 = vpop.f32.mrb[89].mxu0  ;;  %v10985_v46 = vadd.f32 %v5538_v5, %v4994_v56  ;;  %v5540_v3 = vpop.f32.mrb[33].mxu1 }
 0x3d6   : > { %v5948_v26 = vadd.f32 %v5947_v28, %v10535_v9  ;;  %v7501_v49 = vpop.f32.mrb[90].mxu0  ;;  %v5541_v13 = vpop.f32.mrb[34].mxu1  ;;  %v11334_v9 = vld [vmem:[#allocation24_spill] sm:$0xff] }
 0x3d7   : > { %6352 = vst [vmem:[%s10743_s9 + $0x130] sm:$0xff] %v5956_v14  ;;  %v5959_v51 = vadd.f32 %v7501_v49, %v10571_v16  ;;  %v5950_v6 = vpop.f32.mrb[91].mxu0  ;;  %v10993_v61 = vadd.f32 %v5541_v13, %v4997_v20  ;;  %v5543_v30 = vpop.f32.mrb[35].mxu1  ;;  %v5002_v62 = vadd.f32 %v10734_v52, %v11334_v9  ;;  %v5005_v16 = vadd.f32 %v10734_v52, %v11335_v22  ;;  %v11336_v20 = vld [vmem:[#allocation26_spill] sm:$0xff]  ;;  %v11339_v22 = vld [vmem:[#allocation29_spill] sm:$0xff] }
 0x3d8   : > { %6350 = vst [vmem:[%s10743_s9 + $0x120] sm:$0xff] %v5948_v26  ;;  %v5951_v0 = vadd.f32 %v5950_v6, %v10545_v34  ;;  %v8540_v34 = vld [vmem:[%s11267_s3 + $0x9e0] ss:$20 sps:$4 sm:$0xff]   ;;  %v5010_v14 = vadd.f32 %v10734_v52, %v11336_v20 }
 0x3d9   : > { %6353 = vst [vmem:[%s10743_s9 + $0x138] sm:$0xff] %v5959_v51  ;;  %5753 = vmatmul.mubr.bf16.gmra.mrb[140].mxu1 %v8535_v10  ;;  %v11337_v10 = vld [vmem:[#allocation27_spill] sm:$0xff] }
 0x3da   : > { %6351 = vst [vmem:[%s10743_s9 + $0x128] sm:$0xff] %v5951_v0  ;;  %5760 = vmatprep.mubr.bf16.mxu1 %v8538_v27 }
 0x3dc   : > { %v7504_v17 = vpop.f32.mrb[92].mxu0  ;;  %v5546_v54 = vpop.f32.mrb[36].mxu1 }
 0x3dd   : > { %v5972_v60 = vadd.f32 %v7504_v17, %v10613_v63  ;;  %v5963_v12 = vpop.f32.mrb[93].mxu0  ;;  %v11007_v37 = vadd.f32 %v5546_v54, %v5002_v62  ;;  %v5548_v1 = vpop.f32.mrb[37].mxu1 }
 0x3de   : > { %v5964_v23 = vadd.f32 %v5963_v12, %v10587_v47  ;;  %v7505_v11 = vpop.f32.mrb[94].mxu0  ;;  %v5549_v7 = vpop.f32.mrb[38].mxu1 }
 0x3df   : > { %6356 = vst [vmem:[%s10743_s9 + $0x150] sm:$0xff] %v5972_v60  ;;  %v5975_v56 = vadd.f32 %v7505_v11, %v10623_v36  ;;  %v5966_v15 = vpop.f32.mrb[95].mxu0  ;;  %v11012_v5 = vadd.f32 %v5549_v7, %v5005_v16  ;;  %v5551_v63 = vpop.f32.mrb[39].mxu1  ;;  %v5013_v36 = vadd.f32 %v10734_v52, %v11337_v10 }
 0x3e0   : > { %6354 = vst [vmem:[%s10743_s9 + $0x140] sm:$0xff] %v5964_v23  ;;  %v5967_v24 = vadd.f32 %v5966_v15, %v10597_v8 }
 0x3e1   : > { %6357 = vst [vmem:[%s10743_s9 + $0x158] sm:$0xff] %v5975_v56  ;;  %5761 = vmatmul.mubr.bf16.gmra.mrb[144].mxu1 %v8540_v34 }
 0x3e2   : > { %6355 = vst [vmem:[%s10743_s9 + $0x148] sm:$0xff] %v5967_v24 }
 0x3e4   : > { %v7508_v47 = vpop.f32.mrb[96].mxu0  ;;  %v5554_v28 = vpop.f32.mrb[40].mxu1 }
 0x3e5   : > { %v5988_v3 = vadd.f32 %v7508_v47, %v10665_v44  ;;  %v5979_v26 = vpop.f32.mrb[97].mxu0  ;;  %v11023_v49 = vadd.f32 %v5554_v28, %v5010_v14  ;;  %v5556_v8 = vpop.f32.mrb[41].mxu1  ;;  %v11338_v44 = vld [vmem:[#allocation28_spill] sm:$0xff]  ;;  %v11341_v14 = vld [vmem:[#allocation31_spill] sm:$0xff] }
 0x3e6   : > { %v5980_v27 = vadd.f32 %v5979_v26, %v10639_v2  ;;  %v7509_v13 = vpop.f32.mrb[98].mxu0  ;;  %v5557_v51 = vpop.f32.mrb[42].mxu1  ;;  %v5018_v17 = vadd.f32 %v10734_v52, %v11338_v44 }
 0x3e7   : > { %6360 = vst [vmem:[%s10743_s9 + $0x170] sm:$0xff] %v5988_v3  ;;  %v5991_v6 = vadd.f32 %v7509_v13, %v10675_v45  ;;  %v5982_v30 = vpop.f32.mrb[99].mxu0  ;;  %v11028_v0 = vadd.f32 %v5557_v51, %v5013_v36  ;;  %v5559_v9 = vpop.f32.mrb[43].mxu1  ;;  %v5021_v45 = vadd.f32 %v10734_v52, %v11339_v22 }
 0x3e8   : > { %6358 = vst [vmem:[%s10743_s9 + $0x160] sm:$0xff] %v5980_v27  ;;  %v5983_v62 = vadd.f32 %v5982_v30, %v10649_v40 }
 0x3e9   : > { %6361 = vst [vmem:[%s10743_s9 + $0x178] sm:$0xff] %v5991_v6 }
 0x3ea   : > { %6359 = vst [vmem:[%s10743_s9 + $0x168] sm:$0xff] %v5983_v62  ;;  %v11343_v62 = vld [vmem:[#allocation33_spill] sm:$0xff] }
 0x3ec   : > { %v7512_v2 = vpop.f32.mrb[100].mxu0  ;;  %v5562_v54 = vpop.f32.mrb[44].mxu1 }
 0x3ed   : > { %v6004_v16 = vadd.f32 %v7512_v2, %v10717_v38  ;;  %v5995_v60 = vpop.f32.mrb[101].mxu0  ;;  %v11039_v12 = vadd.f32 %v5562_v54, %v5018_v17  ;;  %v5564_v34 = vpop.f32.mrb[45].mxu1  ;;  %v11340_v38 = vld [vmem:[#allocation30_spill] sm:$0xff] }
 0x3ee   : > { %v5996_v40 = vadd.f32 %v5995_v60, %v10691_v18  ;;  %v7513_v1 = vpop.f32.mrb[102].mxu0  ;;  %v5565_v23 = vpop.f32.mrb[46].mxu1  ;;  %v5026_v24 = vadd.f32 %v10734_v52, %v11340_v38 }
 0x3ef   : > { %6364 = vst [vmem:[%s10743_s9 + $0x190] sm:$0xff] %v6004_v16  ;;  %v6007_v11 = vadd.f32 %v7513_v1, %v10727_v29  ;;  %v5998_v7 = vpop.f32.mrb[103].mxu0  ;;  %v11044_v56 = vadd.f32 %v5565_v23, %v5021_v45  ;;  %v5567_v15 = vpop.f32.mrb[47].mxu1  ;;  %v5029_v29 = vadd.f32 %v10734_v52, %v11341_v14 }
 0x3f0   : > { %6362 = vst [vmem:[%s10743_s9 + $0x180] sm:$0xff] %v5996_v40  ;;  %v5999_v63 = vadd.f32 %v5998_v7, %v10701_v32  ;;  %v11345_v7 = vld [vmem:[#allocation35_spill] sm:$0xff] }
 0x3f1   : > { %6365 = vst [vmem:[%s10743_s9 + $0x198] sm:$0xff] %v6007_v11 }
 0x3f2   : > { %6363 = vst [vmem:[%s10743_s9 + $0x188] sm:$0xff] %v5999_v63 }
 0x3f4   : > { %v7516_v18 = vpop.f32.mrb[104].mxu0  ;;  %v5570_v20 = vpop.f32.mrb[48].mxu1 }
 0x3f5   : > { %v6020_v47 = vadd.f32 %v7516_v18, %v10784_v48  ;;  %v6011_v28 = vpop.f32.mrb[105].mxu0  ;;  %v11055_v10 = vadd.f32 %v5570_v20, %v5026_v24  ;;  %v5572_v36 = vpop.f32.mrb[49].mxu1  ;;  %v11342_v48 = vld [vmem:[#allocation32_spill] sm:$0xff] }
 0x3f6   : > { %v6012_v32 = vadd.f32 %v6011_v28, %v10754_v35  ;;  %v7517_v3 = vpop.f32.mrb[106].mxu0  ;;  %v5573_v26 = vpop.f32.mrb[50].mxu1  ;;  %v5034_v30 = vadd.f32 %v10734_v52, %v11342_v48 }
 0x3f7   : > { %6368 = vst [vmem:[%s10743_s9 + $0x1b0] sm:$0xff] %v6020_v47  ;;  %v6023_v8 = vadd.f32 %v7517_v3, %v10795_v58  ;;  %v6014_v27 = vpop.f32.mrb[107].mxu0  ;;  %v11060_v13 = vadd.f32 %v5573_v26, %v5029_v29  ;;  %v5575_v51 = vpop.f32.mrb[51].mxu1  ;;  %v5037_v58 = vadd.f32 %v10734_v52, %v11343_v62  ;;  %v11347_v26 = vld [vmem:[#allocation37_spill] sm:$0xff] }
 0x3f8   : > { %6366 = vst [vmem:[%s10743_s9 + $0x1a0] sm:$0xff] %v6012_v32  ;;  %v6015_v6 = vadd.f32 %v6014_v27, %v10765_v59 }
 0x3f9   : > { %6369 = vst [vmem:[%s10743_s9 + $0x1b8] sm:$0xff] %v6023_v8 }
 0x3fa   : > { %6367 = vst [vmem:[%s10743_s9 + $0x1a8] sm:$0xff] %v6015_v6 }
 0x3fc   : > { %v7520_v35 = vpop.f32.mrb[108].mxu0  ;;  %v5578_v9 = vpop.f32.mrb[52].mxu1 }
 0x3fd   : > { %v6036_v44 = vadd.f32 %v7520_v35, %v10841_v53  ;;  %v6027_v17 = vpop.f32.mrb[109].mxu0  ;;  %v11071_v2 = vadd.f32 %v5578_v9, %v5034_v30  ;;  %v5580_v54 = vpop.f32.mrb[53].mxu1  ;;  %v11344_v53 = vld [vmem:[#allocation34_spill] sm:$0xff] }
 0x3fe   : > { %v6028_v59 = vadd.f32 %v6027_v17, %v10811_v41  ;;  %v7521_v22 = vpop.f32.mrb[110].mxu0  ;;  %v5581_v45 = vpop.f32.mrb[54].mxu1  ;;  %v5042_v23 = vadd.f32 %v10734_v52, %v11344_v53 }
 0x3ff   : > { %6372 = vst [vmem:[%s10743_s9 + $0x1d0] sm:$0xff] %v6036_v44  ;;  %v6039_v16 = vadd.f32 %v7521_v22, %v10855_v4  ;;  %v6030_v60 = vpop.f32.mrb[111].mxu0  ;;  %v11076_v34 = vadd.f32 %v5581_v45, %v5037_v58  ;;  %v5583_v40 = vpop.f32.mrb[55].mxu1  ;;  %v5045_v4 = vadd.f32 %v10734_v52, %v11345_v7 }
 0x400   : > { %6370 = vst [vmem:[%s10743_s9 + $0x1c0] sm:$0xff] %v6028_v59  ;;  %v6031_v1 = vadd.f32 %v6030_v60, %v10825_v25  ;;  %v11349_v59 = vld [vmem:[#allocation39_spill] sm:$0xff] }
 0x401   : > { %6373 = vst [vmem:[%s10743_s9 + $0x1d8] sm:$0xff] %v6039_v16 }
 0x402   : > { %6371 = vst [vmem:[%s10743_s9 + $0x1c8] sm:$0xff] %v6031_v1 }
 0x404   : > { %v7524_v41 = vpop.f32.mrb[112].mxu0  ;;  %v5586_v11 = vpop.f32.mrb[56].mxu1 }
 0x405   : > { %v6052_v15 = vadd.f32 %v7524_v41, %v10897_v19  ;;  %v6043_v63 = vpop.f32.mrb[113].mxu0  ;;  %v11087_v38 = vadd.f32 %v5586_v11, %v5042_v23  ;;  %v5588_v24 = vpop.f32.mrb[57].mxu1  ;;  %v11346_v19 = vld [vmem:[#allocation36_spill] sm:$0xff] }
 0x406   : > { %v6044_v25 = vadd.f32 %v6043_v63, %v10871_v42  ;;  %v7525_v18 = vpop.f32.mrb[114].mxu0  ;;  %v5589_v20 = vpop.f32.mrb[58].mxu1  ;;  %v5050_v32 = vadd.f32 %v10734_v52, %v11346_v19  ;;  %v11351_v63 = vld [vmem:[#allocation41_spill] sm:$0xff] }
 0x407   : > { %6376 = vst [vmem:[%s10743_s9 + $0x1f0] sm:$0xff] %v6052_v15  ;;  %v6055_v14 = vadd.f32 %v7525_v18, %v10905_v55  ;;  %v6046_v29 = vpop.f32.mrb[115].mxu0  ;;  %v11092_v47 = vadd.f32 %v5589_v20, %v5045_v4  ;;  %v5591_v28 = vpop.f32.mrb[59].mxu1  ;;  %v5053_v55 = vadd.f32 %v10734_v52, %v11347_v26 }
 0x408   : > { %6374 = vst [vmem:[%s10743_s9 + $0x1e0] sm:$0xff] %v6044_v25  ;;  %v6047_v36 = vadd.f32 %v6046_v29, %v10882_v43 }
 0x409   : > { %6377 = vst [vmem:[%s10743_s9 + $0x1f8] sm:$0xff] %v6055_v14 }
 0x40a   : > { %6375 = vst [vmem:[%s10743_s9 + $0x1e8] sm:$0xff] %v6047_v36 }
 0x40c   : > { %v7528_v42 = vpop.f32.mrb[116].mxu0  ;;  %v5594_v3 = vpop.f32.mrb[60].mxu1 }
 0x40d   : > { %v6068_v8 = vadd.f32 %v7528_v42, %v10941_v39  ;;  %v6059_v27 = vpop.f32.mrb[117].mxu0  ;;  %v11103_v51 = vadd.f32 %v5594_v3, %v5050_v32  ;;  %v5596_v6 = vpop.f32.mrb[61].mxu1  ;;  %v11348_v39 = vld [vmem:[#allocation38_spill] sm:$0xff] }
 0x40e   : > { %v6060_v43 = vadd.f32 %v6059_v27, %v10919_v21  ;;  %v7529_v48 = vpop.f32.mrb[118].mxu0  ;;  %v5597_v30 = vpop.f32.mrb[62].mxu1  ;;  %v5058_v17 = vadd.f32 %v10734_v52, %v11348_v39 }
 0x40f   : > { %6380 = vst [vmem:[%s10743_s9 + $0x210] sm:$0xff] %v6068_v8  ;;  %v6071_v35 = vadd.f32 %v7529_v48, %v10949_v33  ;;  %v6062_v9 = vpop.f32.mrb[119].mxu0  ;;  %v11108_v62 = vadd.f32 %v5597_v30, %v5053_v55  ;;  %v5599_v58 = vpop.f32.mrb[63].mxu1  ;;  %v5061_v33 = vadd.f32 %v10734_v52, %v11349_v59 }
 0x410   : > { %6378 = vst [vmem:[%s10743_s9 + $0x200] sm:$0xff] %v6060_v43  ;;  %v6063_v44 = vadd.f32 %v6062_v9, %v10927_v57 }
 0x411   : > { %6381 = vst [vmem:[%s10743_s9 + $0x218] sm:$0xff] %v6071_v35 }
 0x412   : > { %6379 = vst [vmem:[%s10743_s9 + $0x208] sm:$0xff] %v6063_v44 }
 0x414   : > { %v7532_v21 = vpop.f32.mrb[120].mxu0  ;;  %v5602_v54 = vpop.f32.mrb[64].mxu1 }
 0x415   : > { %v6084_v22 = vadd.f32 %v7532_v21, %v10985_v46  ;;  %v6075_v45 = vpop.f32.mrb[121].mxu0  ;;  %v11119_v16 = vadd.f32 %v5602_v54, %v5058_v17  ;;  %v5604_v60 = vpop.f32.mrb[65].mxu1  ;;  %v11350_v46 = vld [vmem:[#allocation40_spill] sm:$0xff] }
 0x416   : > { %v6076_v57 = vadd.f32 %v6075_v45, %v10963_v31  ;;  %v7533_v40 = vpop.f32.mrb[122].mxu0  ;;  %v5605_v1 = vpop.f32.mrb[66].mxu1  ;;  %v5066_v4 = vadd.f32 %v10734_v52, %v11350_v46 }
 0x417   : > { %6384 = vst [vmem:[%s10743_s9 + $0x230] sm:$0xff] %v6084_v22  ;;  %v6087_v53 = vadd.f32 %v7533_v40, %v10993_v61  ;;  %v6078_v23 = vpop.f32.mrb[123].mxu0  ;;  %v11124_v41 = vadd.f32 %v5605_v1, %v5061_v33  ;;  %v5607_v11 = vpop.f32.mrb[67].mxu1  ;;  %v5069_v61 = vadd.f32 %v10734_v52, %v11351_v63 }
 0x418   : > { %6382 = vst [vmem:[%s10743_s9 + $0x220] sm:$0xff] %v6076_v57  ;;  %v6079_v7 = vadd.f32 %v6078_v23, %v10971_v50 }
 0x419   : > { %6385 = vst [vmem:[%s10743_s9 + $0x238] sm:$0xff] %v6087_v53 }
 0x41a   : > { %6383 = vst [vmem:[%s10743_s9 + $0x228] sm:$0xff] %v6079_v7 }
 0x41c   : > { %v7536_v31 = vpop.f32.mrb[124].mxu0  ;;  %v5610_v15 = vpop.f32.mrb[68].mxu1 }
 0x41d   : > { %v6100_v24 = vadd.f32 %v7536_v31, %v11023_v49  ;;  %v6091_v25 = vpop.f32.mrb[125].mxu0  ;;  %v11135_v18 = vadd.f32 %v5610_v15, %v5066_v4  ;;  %v5612_v20 = vpop.f32.mrb[69].mxu1 }
 0x41e   : > { %v6092_v50 = vadd.f32 %v6091_v25, %v11007_v37  ;;  %v7537_v14 = vpop.f32.mrb[126].mxu0  ;;  %v5613_v29 = vpop.f32.mrb[70].mxu1 }
 0x41f   : > { %6388 = vst [vmem:[%s10743_s9 + $0x250] sm:$0xff] %v6100_v24  ;;  %v6103_v28 = vadd.f32 %v7537_v14, %v11028_v0  ;;  %v6094_v36 = vpop.f32.mrb[127].mxu0  ;;  %v11140_v19 = vadd.f32 %v5613_v29, %v5069_v61  ;;  %v5615_v32 = vpop.f32.mrb[71].mxu1 }
 0x420   : > { %6386 = vst [vmem:[%s10743_s9 + $0x240] sm:$0xff] %v6092_v50  ;;  %v6095_v49 = vadd.f32 %v6094_v36, %v11012_v5 }
 0x421   : > { %6389 = vst [vmem:[%s10743_s9 + $0x258] sm:$0xff] %v6103_v28  ;;  %v11184_v28 = vld [vmem:[%s11269_s5] ss:$0 sm:$0xff] }
 0x422   : > { %6387 = vst [vmem:[%s10743_s9 + $0x248] sm:$0xff] %v6095_v49 }
 0x424   : > { %v5618_v42 = vpop.f32.mrb[72].mxu1  ;;  %v7540_v37 = vpop.f32.mrb[128].mxu0 }
 0x425   : > { %v6116_v3 = vadd.f32 %v7540_v37, %v11055_v10  ;;  %v5620_v26 = vpop.f32.mrb[73].mxu1  ;;  %v6107_v55 = vpop.f32.mrb[129].mxu0 }
 0x426   : > { %v6108_v0 = vadd.f32 %v6107_v55, %v11039_v12  ;;  %v5621_v8 = vpop.f32.mrb[74].mxu1  ;;  %v7541_v27 = vpop.f32.mrb[130].mxu0 }
 0x427   : > { %6392 = vst [vmem:[%s10743_s9 + $0x270] sm:$0xff] %v6116_v3  ;;  %v6119_v6 = vadd.f32 %v7541_v27, %v11060_v13  ;;  %v5623_v43 = vpop.f32.mrb[75].mxu1  ;;  %v6110_v5 = vpop.f32.mrb[131].mxu0  ;;  %v7803_v53 = vadd.f32 %v10734_v52, %v5621_v8 }
 0x428   : > { %6390 = vst [vmem:[%s10743_s9 + $0x260] sm:$0xff] %v6108_v0  ;;  %v6111_v48 = vadd.f32 %v6110_v5, %v11044_v56 }
 0x429   : > { %6393 = vst [vmem:[%s10743_s9 + $0x278] sm:$0xff] %v6119_v6 }
 0x42a   : > { %6391 = vst [vmem:[%s10743_s9 + $0x268] sm:$0xff] %v6111_v48 }
 0x42c   : > { %v5626_v10 = vpop.f32.mrb[76].mxu1  ;;  %v7544_v30 = vpop.f32.mrb[132].mxu0 }
 0x42d   : > { %v6132_v12 = vadd.f32 %v7544_v30, %v11087_v38  ;;  %v5628_v35 = vpop.f32.mrb[77].mxu1  ;;  %v6123_v9 = vpop.f32.mrb[133].mxu0  ;;  %v7804_v24 = vadd.f32 %v10734_v52, %v5626_v10 }
 0x42e   : > { %v6124_v58 = vadd.f32 %v6123_v9, %v11071_v2  ;;  %v5629_v44 = vpop.f32.mrb[78].mxu1  ;;  %v7545_v13 = vpop.f32.mrb[134].mxu0 }
 0x42f   : > { %6396 = vst [vmem:[%s10743_s9 + $0x290] sm:$0xff] %v6132_v12  ;;  %v6135_v39 = vadd.f32 %v7545_v13, %v11092_v47  ;;  %v5631_v17 = vpop.f32.mrb[79].mxu1  ;;  %v6126_v56 = vpop.f32.mrb[135].mxu0  ;;  %v7805_v36 = vadd.f32 %v11184_v28, %v5629_v44 }
 0x430   : > { %6394 = vst [vmem:[%s10743_s9 + $0x280] sm:$0xff] %v6124_v58  ;;  %v6127_v21 = vadd.f32 %v6126_v56, %v11076_v34 }
 0x431   : > { %6397 = vst [vmem:[%s10743_s9 + $0x298] sm:$0xff] %v6135_v39 }
 0x432   : > { %6395 = vst [vmem:[%s10743_s9 + $0x288] sm:$0xff] %v6127_v21 }
 0x434   : > { %v5634_v38 = vpop.f32.mrb[80].mxu1  ;;  %v7548_v54 = vpop.f32.mrb[136].mxu0 }
 0x435   : > { %v6148_v2 = vadd.f32 %v7548_v54, %v11119_v16  ;;  %v5636_v59 = vpop.f32.mrb[81].mxu1  ;;  %v6139_v33 = vpop.f32.mrb[137].mxu0  ;;  %v7802_v16 = vadd.f32 %v10734_v52, %v5618_v42  ;;  %v7806_v61 = vadd.f32 %v10734_v52, %v5634_v38 }
 0x436   : > { %v6140_v22 = vadd.f32 %v6139_v33, %v11103_v51  ;;  %v5637_v45 = vpop.f32.mrb[82].mxu1  ;;  %v7549_v47 = vpop.f32.mrb[138].mxu0 }
 0x437   : > { %6400 = vst [vmem:[%s10743_s9 + $0x2b0] sm:$0xff] %v6148_v2  ;;  %v6151_v60 = vadd.f32 %v7549_v47, %v11124_v41  ;;  %v5639_v57 = vpop.f32.mrb[83].mxu1  ;;  %v6142_v34 = vpop.f32.mrb[139].mxu0 }
 0x438   : > { %6398 = vst [vmem:[%s10743_s9 + $0x2a0] sm:$0xff] %v6140_v22  ;;  %v6143_v40 = vadd.f32 %v6142_v34, %v11108_v62 }
 0x439   : > { %6401 = vst [vmem:[%s10743_s9 + $0x2b8] sm:$0xff] %v6151_v60 }
 0x43a   : > { %6399 = vst [vmem:[%s10743_s9 + $0x2a8] sm:$0xff] %v6143_v40 }
 0x43c   : > { %v5642_v1 = vpop.f32.mrb[84].mxu1  ;;  %v7552_v51 = vpop.f32.mrb[140].mxu0 }
 0x43d   : > { %v6164_v23 = vadd.f32 %v7802_v16, %v7552_v51  ;;  %v5644_v11 = vpop.f32.mrb[85].mxu1  ;;  %v6155_v41 = vpop.f32.mrb[141].mxu0  ;;  %v7808_v55 = vadd.f32 %v11184_v28, %v5642_v1 }
 0x43e   : > { %v6156_v7 = vadd.f32 %v6155_v41, %v11135_v18  ;;  %v5645_v46 = vpop.f32.mrb[86].mxu1  ;;  %v7553_v4 = vpop.f32.mrb[142].mxu0  ;;  %v7807_v18 = vadd.f32 %v10734_v52, %v5637_v45 }
 0x43f   : > { %6404 = vst [vmem:[%s10743_s9 + $0x2d0] sm:$0xff] %v6164_v23  ;;  %v6167_v62 = vadd.f32 %v7803_v53, %v7553_v4  ;;  %v5647_v31 = vpop.f32.mrb[87].mxu1  ;;  %v6158_v15 = vpop.f32.mrb[143].mxu0  ;;  %v7809_v48 = vadd.f32 %v11184_v28, %v5645_v46 }
 0x440   : > { %6402 = vst [vmem:[%s10743_s9 + $0x2c0] sm:$0xff] %v6156_v7  ;;  %v6159_v63 = vadd.f32 %v6158_v15, %v11140_v19 }
 0x441   : > { %6405 = vst [vmem:[%s10743_s9 + $0x2d8] sm:$0xff] %v6167_v62 }
 0x442   : > { %6403 = vst [vmem:[%s10743_s9 + $0x2c8] sm:$0xff] %v6159_v63 }
 0x444   : > { %v5650_v25 = vpop.f32.mrb[88].mxu1  ;;  %v7556_v20 = vpop.f32.mrb[144].mxu0 }
 0x445   : > { %v6180_v50 = vadd.f32 %v7806_v61, %v7556_v20  ;;  %v5652_v14 = vpop.f32.mrb[89].mxu1  ;;  %v6171_v29 = vpop.f32.mrb[145].mxu0  ;;  %v7810_v26 = vadd.f32 %v11184_v28, %v5650_v25 }
 0x446   : > { %v6172_v19 = vadd.f32 %v7804_v24, %v6171_v29  ;;  %v5653_v32 = vpop.f32.mrb[90].mxu1  ;;  %v7557_v49 = vpop.f32.mrb[146].mxu0 }
 0x447   : > { %6408 = vst [vmem:[%s10743_s9 + $0x2f0] sm:$0xff] %v6180_v50  ;;  %v6183_v42 = vadd.f32 %v7807_v18, %v7557_v49  ;;  %v5655_v37 = vpop.f32.mrb[91].mxu1  ;;  %v6174_v3 = vpop.f32.mrb[147].mxu0  ;;  %v7811_v27 = vadd.f32 %v11184_v28, %v5653_v32 }
 0x448   : > { %6406 = vst [vmem:[%s10743_s9 + $0x2e0] sm:$0xff] %v6172_v19  ;;  %v6175_v52 = vadd.f32 %v7805_v36, %v6174_v3 }
 0x449   : > { %6409 = vst [vmem:[%s10743_s9 + $0x2f8] sm:$0xff] %v6183_v42 }
 0x44a   : > { %6407 = vst [vmem:[%s10743_s9 + $0x2e8] sm:$0xff] %v6175_v52 }
 0x44c   : > { %v5658_v0 = vpop.f32.mrb[92].mxu1  ;;  %v7560_v8 = vpop.f32.mrb[148].mxu0 }
 0x44d   : > { %v6196_v6 = vadd.f32 %v7810_v26, %v7560_v8  ;;  %v5660_v43 = vpop.f32.mrb[93].mxu1  ;;  %v6187_v5 = vpop.f32.mrb[149].mxu0  ;;  %v7812_v13 = vadd.f32 %v11184_v28, %v5658_v0 }
 0x44e   : > { %v6188_v10 = vadd.f32 %v7808_v55, %v6187_v5  ;;  %v5661_v30 = vpop.f32.mrb[94].mxu1  ;;  %v7561_v12 = vpop.f32.mrb[150].mxu0 }
 0x44f   : > { %6412 = vst [vmem:[%s10743_s9 + $0x310] sm:$0xff] %v6196_v6  ;;  %v6199_v35 = vadd.f32 %v7811_v27, %v7561_v12  ;;  %v5663_v9 = vpop.f32.mrb[95].mxu1  ;;  %v6190_v58 = vpop.f32.mrb[151].mxu0  ;;  %v7813_v54 = vadd.f32 %v11184_v28, %v5661_v30 }
 0x450   : > { %6410 = vst [vmem:[%s10743_s9 + $0x300] sm:$0xff] %v6188_v10  ;;  %v6191_v44 = vadd.f32 %v7809_v48, %v6190_v58 }
 0x451   : > { %6413 = vst [vmem:[%s10743_s9 + $0x318] sm:$0xff] %v6199_v35 }
 0x452   : > { %6411 = vst [vmem:[%s10743_s9 + $0x308] sm:$0xff] %v6191_v44 }
 0x454   : > { %v5666_v39 = vpop.f32.mrb[96].mxu1  ;;  %v7564_v17 = vpop.f32.mrb[152].mxu0 }
 0x455   : > { %v7814_v56 = vadd.f32 %v11184_v28, %v5666_v39  ;;  %v5668_v21 = vpop.f32.mrb[97].mxu1  ;;  %v6203_v38 = vpop.f32.mrb[153].mxu0 }
 0x456   : > { %v6204_v2 = vadd.f32 %v7812_v13, %v6203_v38  ;;  %v5669_v59 = vpop.f32.mrb[98].mxu1  ;;  %v7565_v33 = vpop.f32.mrb[154].mxu0 }
 0x457   : > { %v6212_v22 = vadd.f32 %v7814_v56, %v7564_v17  ;;  %v7815_v45 = vadd.f32 %v11184_v28, %v5669_v59  ;;  %v5671_v47 = vpop.f32.mrb[99].mxu1  ;;  %v6206_v60 = vpop.f32.mrb[155].mxu0 }
 0x458   : > { %6414 = vst [vmem:[%s10743_s9 + $0x320] sm:$0xff] %v6204_v2  ;;  %v6207_v57 = vadd.f32 %v7813_v54, %v6206_v60 }
 0x459   : > { %6416 = vst [vmem:[%s10743_s9 + $0x330] sm:$0xff] %v6212_v22  ;;  %v6215_v34 = vadd.f32 %v7815_v45, %v7565_v33 }
 0x45a   : > { %6415 = vst [vmem:[%s10743_s9 + $0x328] sm:$0xff] %v6207_v57 }
 0x45b   : > { %6417 = vst [vmem:[%s10743_s9 + $0x338] sm:$0xff] %v6215_v34 }
 0x45c   : > { %v5674_v40 = vpop.f32.mrb[100].mxu1  ;;  %v7568_v16 = vpop.f32.mrb[156].mxu0 }
 0x45d   : > { %v7816_v1 = vadd.f32 %v11184_v28, %v5674_v40  ;;  %v5676_v51 = vpop.f32.mrb[101].mxu1  ;;  %v6219_v53 = vpop.f32.mrb[157].mxu0 }
 0x45e   : > { %v5677_v23 = vpop.f32.mrb[102].mxu1  ;;  %v7569_v11 = vpop.f32.mrb[158].mxu0 }
 0x45f   : > { %v7817_v41 = vadd.f32 %v11184_v28, %v5677_v23  ;;  %v6220_v7 = vadd.f32 %v7816_v1, %v6219_v53  ;;  %v5679_v46 = vpop.f32.mrb[103].mxu1  ;;  %v6222_v4 = vpop.f32.mrb[159].mxu0 }
 0x461   : > { %6418 = vst [vmem:[%s10743_s9 + $0x340] sm:$0xff] %v6220_v7  ;;  %v6223_v62 = vadd.f32 %v7817_v41, %v6222_v4 }
 0x463   : > { %6419 = vst [vmem:[%s10743_s9 + $0x348] sm:$0xff] %v6223_v62 }
 0x464   : > { %v5682_v31 = vpop.f32.mrb[104].mxu1  ;;  %v7572_v15 = vpop.f32.mrb[160].mxu0 }
 0x465   : > { %v7818_v63 = vadd.f32 %v11184_v28, %v5682_v31  ;;  %v5684_v61 = vpop.f32.mrb[105].mxu1  ;;  %v6235_v24 = vpop.f32.mrb[161].mxu0 }
 0x466   : > { %v5685_v25 = vpop.f32.mrb[106].mxu1  ;;  %v7573_v20 = vpop.f32.mrb[162].mxu0 }
 0x467   : > { %v6228_v18 = vadd.f32 %v7818_v63, %v7568_v16  ;;  %v7819_v50 = vadd.f32 %v11184_v28, %v5685_v25  ;;  %v5687_v14 = vpop.f32.mrb[107].mxu1  ;;  %v6238_v29 = vpop.f32.mrb[163].mxu0 }
 0x469   : > { %6420 = vst [vmem:[%s10743_s9 + $0x350] sm:$0xff] %v6228_v18  ;;  %v6231_v36 = vadd.f32 %v7819_v50, %v7569_v11 }
 0x46b   : > { %6421 = vst [vmem:[%s10743_s9 + $0x358] sm:$0xff] %v6231_v36 }
 0x46c   : > { %v5690_v19 = vpop.f32.mrb[108].mxu1  ;;  %v7576_v32 = vpop.f32.mrb[164].mxu0 }
 0x46d   : > { %v7820_v49 = vadd.f32 %v11184_v28, %v5690_v19  ;;  %v5692_v42 = vpop.f32.mrb[109].mxu1  ;;  %v6251_v37 = vpop.f32.mrb[165].mxu0 }
 0x46e   : > { %v5693_v3 = vpop.f32.mrb[110].mxu1  ;;  %v7577_v52 = vpop.f32.mrb[166].mxu0 }
 0x46f   : > { %v7821_v26 = vadd.f32 %v11184_v28, %v5693_v3  ;;  %v6236_v55 = vadd.f32 %v7820_v49, %v6235_v24  ;;  %v5695_v0 = vpop.f32.mrb[111].mxu1  ;;  %v6254_v8 = vpop.f32.mrb[167].mxu0 }
 0x471   : > { %6422 = vst [vmem:[%s10743_s9 + $0x360] sm:$0xff] %v6236_v55  ;;  %v6239_v27 = vadd.f32 %v7821_v26, %v6238_v29 }
 0x473   : > { %6423 = vst [vmem:[%s10743_s9 + $0x368] sm:$0xff] %v6239_v27 }
 0x474   : > { %v5698_v6 = vpop.f32.mrb[112].mxu1  ;;  %v7580_v43 = vpop.f32.mrb[168].mxu0 }
 0x475   : > { %v7822_v5 = vadd.f32 %v11184_v28, %v5698_v6  ;;  %v5700_v48 = vpop.f32.mrb[113].mxu1  ;;  %v6267_v10 = vpop.f32.mrb[169].mxu0 }
 0x476   : > { %v5701_v30 = vpop.f32.mrb[114].mxu1  ;;  %v7581_v12 = vpop.f32.mrb[170].mxu0 }
 0x477   : > { %v6244_v35 = vadd.f32 %v7822_v5, %v7572_v15  ;;  %v7823_v9 = vadd.f32 %v11184_v28, %v5701_v30  ;;  %v5703_v58 = vpop.f32.mrb[115].mxu1  ;;  %v6270_v44 = vpop.f32.mrb[171].mxu0 }
 0x479   : > { %6424 = vst [vmem:[%s10743_s9 + $0x370] sm:$0xff] %v6244_v35  ;;  %v6247_v13 = vadd.f32 %v7823_v9, %v7573_v20 }
 0x47b   : > { %6425 = vst [vmem:[%s10743_s9 + $0x378] sm:$0xff] %v6247_v13 }
 0x47c   : > { %v5706_v39 = vpop.f32.mrb[116].mxu1  ;;  %v7584_v17 = vpop.f32.mrb[172].mxu0 }
 0x47d   : > { %v7824_v56 = vadd.f32 %v11184_v28, %v5706_v39  ;;  %v5708_v21 = vpop.f32.mrb[117].mxu1  ;;  %v6283_v38 = vpop.f32.mrb[173].mxu0 }
 0x47e   : > { %v5709_v54 = vpop.f32.mrb[118].mxu1  ;;  %v7585_v2 = vpop.f32.mrb[174].mxu0 }
 0x47f   : > { %v7825_v59 = vadd.f32 %v11184_v28, %v5709_v54  ;;  %v6252_v33 = vadd.f32 %v7824_v56, %v6251_v37  ;;  %v5711_v22 = vpop.f32.mrb[119].mxu1  ;;  %v6286_v45 = vpop.f32.mrb[175].mxu0 }
 0x481   : > { %6426 = vst [vmem:[%s10743_s9 + $0x380] sm:$0xff] %v6252_v33  ;;  %v6255_v47 = vadd.f32 %v7825_v59, %v6254_v8 }
 0x483   : > { %6427 = vst [vmem:[%s10743_s9 + $0x388] sm:$0xff] %v6255_v47 }
 0x484   : > { %v5714_v60 = vpop.f32.mrb[120].mxu1  ;;  %v11227_v57 = vpop.f32.mrb[176].mxu0 }
 0x485   : > { %v7826_v34 = vadd.f32 %v11184_v28, %v5714_v60  ;;  %v5716_v40 = vpop.f32.mrb[121].mxu1  ;;  %v6299_v16 = vpop.f32.mrb[177].mxu0 }
 0x486   : > { %v5717_v1 = vpop.f32.mrb[122].mxu1  ;;  %v11230_v51 = vpop.f32.mrb[178].mxu0 }
 0x487   : > { %v6260_v53 = vadd.f32 %v7826_v34, %v7576_v32  ;;  %v7827_v23 = vadd.f32 %v11184_v28, %v5717_v1  ;;  %v5719_v11 = vpop.f32.mrb[123].mxu1  ;;  %v6302_v41 = vpop.f32.mrb[179].mxu0 }
 0x489   : > { %6428 = vst [vmem:[%s10743_s9 + $0x390] sm:$0xff] %v6260_v53  ;;  %v6263_v7 = vadd.f32 %v7827_v23, %v7577_v52 }
 0x48b   : > { %6429 = vst [vmem:[%s10743_s9 + $0x398] sm:$0xff] %v6263_v7 }
 0x48c   : > { %v5722_v46 = vpop.f32.mrb[124].mxu1 }
 0x48d   : > { %v7828_v4 = vadd.f32 %v11184_v28, %v5722_v46  ;;  %v5724_v62 = vpop.f32.mrb[125].mxu1 }
 0x48e   : > { %v5725_v31 = vpop.f32.mrb[126].mxu1 }
 0x48f   : > { %v7829_v15 = vadd.f32 %v11184_v28, %v5725_v31  ;;  %v6268_v63 = vadd.f32 %v7828_v4, %v6267_v10  ;;  %v5727_v61 = vpop.f32.mrb[127].mxu1 }
 0x491   : > { %6430 = vst [vmem:[%s10743_s9 + $0x3a0] sm:$0xff] %v6268_v63  ;;  %v6271_v24 = vadd.f32 %v7829_v15, %v6270_v44 }
 0x493   : > { %6431 = vst [vmem:[%s10743_s9 + $0x3a8] sm:$0xff] %v6271_v24 }
 0x494   : > { %v5730_v25 = vpop.f32.mrb[128].mxu1 }
 0x495   : > { %v7830_v20 = vadd.f32 %v11184_v28, %v5730_v25  ;;  %v5732_v18 = vpop.f32.mrb[129].mxu1 }
 0x496   : > { %v5733_v50 = vpop.f32.mrb[130].mxu1 }
 0x497   : > { %v6276_v14 = vadd.f32 %v7830_v20, %v7580_v43  ;;  %v7831_v29 = vadd.f32 %v11184_v28, %v5733_v50  ;;  %v5735_v36 = vpop.f32.mrb[131].mxu1 }
 0x499   : > { %6432 = vst [vmem:[%s10743_s9 + $0x3b0] sm:$0xff] %v6276_v14  ;;  %v6279_v19 = vadd.f32 %v7831_v29, %v7581_v12 }
 0x49b   : > { %6433 = vst [vmem:[%s10743_s9 + $0x3b8] sm:$0xff] %v6279_v19 }
 0x49c   : > { %v5738_v32 = vpop.f32.mrb[132].mxu1 }
 0x49d   : > { %v7832_v49 = vadd.f32 %v11184_v28, %v5738_v32  ;;  %v5740_v42 = vpop.f32.mrb[133].mxu1 }
 0x49e   : > { %v5741_v37 = vpop.f32.mrb[134].mxu1 }
 0x49f   : > { %v7833_v3 = vadd.f32 %v11184_v28, %v5741_v37  ;;  %v6284_v52 = vadd.f32 %v7832_v49, %v6283_v38  ;;  %v5743_v26 = vpop.f32.mrb[135].mxu1 }
 0x4a1   : > { %6434 = vst [vmem:[%s10743_s9 + $0x3c0] sm:$0xff] %v6284_v52  ;;  %v6287_v55 = vadd.f32 %v7833_v3, %v6286_v45 }
 0x4a3   : > { %6435 = vst [vmem:[%s10743_s9 + $0x3c8] sm:$0xff] %v6287_v55 }
 0x4a4   : > { %v5746_v0 = vpop.f32.mrb[136].mxu1 }
 0x4a5   : > { %v7834_v8 = vadd.f32 %v11184_v28, %v5746_v0  ;;  %v5748_v27 = vpop.f32.mrb[137].mxu1 }
 0x4a6   : > { %v5749_v6 = vpop.f32.mrb[138].mxu1 }
 0x4a7   : > { %v6292_v43 = vadd.f32 %v7834_v8, %v7584_v17  ;;  %v7835_v5 = vadd.f32 %v11184_v28, %v5749_v6  ;;  %v5751_v48 = vpop.f32.mrb[139].mxu1 }
 0x4a9   : > { %6436 = vst [vmem:[%s10743_s9 + $0x3d0] sm:$0xff] %v6292_v43  ;;  %v6295_v10 = vadd.f32 %v7835_v5, %v7585_v2 }
 0x4ab   : > { %6437 = vst [vmem:[%s10743_s9 + $0x3d8] sm:$0xff] %v6295_v10 }
 0x4ac   : > { %v5754_v30 = vpop.f32.mrb[140].mxu1 }
 0x4ad   : > { %v7836_v12 = vadd.f32 %v11184_v28, %v5754_v30  ;;  %v5756_v35 = vpop.f32.mrb[141].mxu1 }
 0x4ae   : > { %v5757_v9 = vpop.f32.mrb[142].mxu1 }
 0x4af   : > { %v7837_v58 = vadd.f32 %v11184_v28, %v5757_v9  ;;  %v6300_v44 = vadd.f32 %v7836_v12, %v6299_v16  ;;  %v5759_v13 = vpop.f32.mrb[143].mxu1 }
 0x4b1   : > { %6438 = vst [vmem:[%s10743_s9 + $0x3e0] sm:$0xff] %v6300_v44  ;;  %v6303_v39 = vadd.f32 %v7837_v58, %v6302_v41 }
 0x4b3   : > { %6439 = vst [vmem:[%s10743_s9 + $0x3e8] sm:$0xff] %v6303_v39 }
 0x4b4   : > { %v5762_v17 = vpop.f32.mrb[144].mxu1 }
 0x4b5   : > { %v7838_v56 = vadd.f32 %v11184_v28, %v5762_v17  ;;  %v5764_v21 = vpop.f32.mrb[145].mxu1 }
 0x4b6   : > { %v5765_v38 = vpop.f32.mrb[146].mxu1 }
 0x4b7   : > { %v6308_v54 = vadd.f32 %v7838_v56, %v11227_v57  ;;  %v7839_v2 = vadd.f32 %v11184_v28, %v5765_v38  ;;  %v5767_v59 = vpop.f32.mrb[147].mxu1 }
 0x4b9   : > { %6440 = vst [vmem:[%s10743_s9 + $0x3f0] sm:$0xff] %v6308_v54  ;;  %v6311_v33 = vadd.f32 %v7839_v2, %v11230_v51 }
 0x4bb   : > { %6441 = vst [vmem:[%s10743_s9 + $0x3f8] sm:$0xff] %v6311_v33 }
 0x4bc PF: > { %s18_s24 = sadd.s32 1, %s8549_s24  }
 0x4bd   : > { %p15_p4 = scmp.ge.s32.totalorder %s18_s24, 4  }
 0x4bf   :  { %17 = sbr.rel (!%p15_p4) target bundleno = 1 (0x1), region = 89 }

</bundles_post_ra>
